<compile_context>
chip_gen: v5e
topology: v5e:2x2
jax: 0.10.0
libtpu: 0.0.40
codegen_flags: <defaults>
</compile_context>

<pallas_src>
import jax
import jax.numpy as jnp
from jax.experimental import pallas as pl
from jax.experimental.pallas import tpu as pltpu


def _sigmoid(x):
    # Exact sigmoid with a single EUP transcendental: sigmoid(x) = 0.5*tanh(x/2)+0.5.
    return 0.5 * jnp.tanh(0.5 * x) + 0.5


def mlp_kernel(x_ref,
               w1_ref, b1_ref,
               w2_ref, b2_ref,
               w3_ref, b3_ref,
               w4_ref, b4_ref,
               w5_ref, b5_ref,
               o_ref):
    def linear_t(h, w_ref, b_ref):
        # y = h @ W^T + b with torch-layout W = [out, in]; bf16 MXU inputs, f32 acc.
        y = jax.lax.dot_general(h.astype(w_ref.dtype), w_ref[...],
                                (((1,), (1,)), ((), ())),
                                preferred_element_type=jnp.float32)
        return y + b_ref[...]

    h = _sigmoid(linear_t(x_ref[...], w1_ref, b1_ref))   # [tm, H]
    h = _sigmoid(linear_t(h, w2_ref, b2_ref))
    h = _sigmoid(linear_t(h, w3_ref, b3_ref))
    h = _sigmoid(linear_t(h, w4_ref, b4_ref))
    # Final layer emitted lane-dense as (1, tm): out[o, b] = sum_k w5[o, k] * h[b, k].
    out = jax.lax.dot_general(w5_ref[...], h.astype(w5_ref.dtype),
                              (((1,), (1,)), ((), ())),
                              preferred_element_type=jnp.float32) + b5_ref[...]
    o_ref[...] = out.astype(o_ref.dtype)


def _tensorcores_per_chip():
    """v7x exposes 2 TensorCores per chip; earlier generations 1."""
    try:
        kind = jax.devices()[0].device_kind.lower()
    except Exception:
        return 1
    return 2 if ("v7" in kind or "7x" in kind) else 1


def _pick_tm(B, K, n_tc, vmem_budget_bytes=24 << 20):
    """One batch tile per TensorCore; halve if the double-buffered f32 x block
    would exceed the scoped-VMEM budget (guard for scaled-up sizes / v7x 64 MiB)."""
    def fits(t):
        return 2 * t * K * 4 <= vmem_budget_bytes
    tm = B // n_tc if (n_tc > 1 and B % n_tc == 0 and (B // n_tc) % 8 == 0) else B
    while tm > 8 and ((B % tm) != 0 or not fits(tm)):
        tm //= 2
    return max(tm, 1)


def mlp_forward(x, params):
    """x: [B, F] float32. params: list of (W [out,in] bf16, b [1,out] f32) per layer."""
    B, K = x.shape
    (w1, b1), (w2, b2), (w3, b3), (w4, b4), (w5, b5) = params

    n_tc = _tensorcores_per_chip()
    tm = _pick_tm(B, K, n_tc)
    grid = (B // tm,)

    vmem_full = pl.BlockSpec(memory_space=pltpu.MemorySpace.VMEM)

    out = pl.pallas_call(
        mlp_kernel,
        out_shape=jax.ShapeDtypeStruct((1, B), jnp.float32),
        grid_spec=pltpu.PrefetchScalarGridSpec(
            num_scalar_prefetch=0,
            grid=grid,
            in_specs=[
                pl.BlockSpec((tm, K), lambda i: (i, 0)),   # x tile (f32, cast in-kernel)
                vmem_full, vmem_full,    # w1 [H,K] bf16 (lane-dense), b1
                vmem_full, vmem_full,    # w2, b2
                vmem_full, vmem_full,    # w3, b3
                vmem_full, vmem_full,    # w4, b4
                vmem_full, vmem_full,    # w5 [1,H], b5 [1,1]
            ],
            out_specs=pl.BlockSpec((1, tm), lambda i: (0, i)),  # lane-dense (1, B)
        ),
        compiler_params=pltpu.CompilerParams(
            dimension_semantics=("parallel",),
        ),
    )(x, w1, b1, w2, b2, w3, b3, w4, b4, w5, b5)
    # Present the conventional [B, 1] result (same element order, trivial reshape).
    return out.reshape(B, 1)


def init_params(key, num_features):
    """torch.nn.Linear-style init (U[-1/sqrt(fan_in), +]); weights stored ONCE as
    bf16 in torch layout [out, in], biases kept f32."""
    hidden = int(num_features / 100)
    dims = [(num_features, hidden), (hidden, hidden), (hidden, hidden),
            (hidden, hidden), (hidden, 1)]
    params = []
    for fan_in, fan_out in dims:
        key, kw, kb = jax.random.split(key, 3)
        bound = 1.0 / (fan_in ** 0.5)
        w = jax.random.uniform(kw, (fan_out, fan_in), jnp.float32, -bound, bound)
        b = jax.random.uniform(kb, (1, fan_out), jnp.float32, -bound, bound)
        params.append((w.astype(jnp.bfloat16), b))
    return params


def _reference(x, params):
    """Pure-JAX reference with the same bf16 matmul inputs / f32 accumulation."""
    h = x
    n = len(params)
    for li, (w, b) in enumerate(params):
        y = jax.lax.dot_general(h.astype(jnp.bfloat16), w,
                                (((1,), (1,)), ((), ())),
                                preferred_element_type=jnp.float32) + b
        h = jax.nn.sigmoid(y) if li < n - 1 else y
    return h


if __name__ == "__main__":
    key = jax.random.PRNGKey(0)
    num_features = 3200          # -> hidden_feature = 32
    batch = 256

    kx, kp = jax.random.split(key)
    x = jax.random.normal(kx, (batch, num_features), jnp.float32)
    params = init_params(kp, num_features)

    out = mlp_forward(x, params)
    jax.block_until_ready(out)
    assert out.shape == (batch, 1) and out.dtype == jnp.float32

    ref = _reference(x, params)
    assert jnp.allclose(out, ref, atol=2e-2, rtol=2e-2), (
        "max abs err = %f" % float(jnp.max(jnp.abs(out - ref))))

    print("KERNEL_OK")
</pallas_src>

<mosaic_0001>
module attributes {stable_mosaic.version = 11 : i64} {
  func.func @mlp_kernel(%arg0: i32, %arg1: memref<256x3200xf32, #tpu.memory_space<vmem>>, %arg2: memref<32x3200xbf16, #tpu.memory_space<vmem>>, %arg3: memref<1x32xf32, #tpu.memory_space<vmem>>, %arg4: memref<32x32xbf16, #tpu.memory_space<vmem>>, %arg5: memref<1x32xf32, #tpu.memory_space<vmem>>, %arg6: memref<32x32xbf16, #tpu.memory_space<vmem>>, %arg7: memref<1x32xf32, #tpu.memory_space<vmem>>, %arg8: memref<32x32xbf16, #tpu.memory_space<vmem>>, %arg9: memref<1x32xf32, #tpu.memory_space<vmem>>, %arg10: memref<1x32xbf16, #tpu.memory_space<vmem>>, %arg11: memref<1x1xf32, #tpu.memory_space<vmem>>, %arg12: memref<1x256xf32, #tpu.memory_space<vmem>>) attributes {dimension_semantics = [#tpu.dimension_semantics<parallel>], iteration_bounds = array<i64: 1>, scalar_prefetch = 0 : i64, scratch_operands = 0 : i64, tpu.core_type = #tpu.core_type<tc>, window_params = [{transform_indices = @transform_0, window_bounds = array<i64: 256, 3200>}, {pipeline_mode = #tpu.pipeline_mode<synchronous>, transform_indices = @transform_1, window_bounds = array<i64: 32, 3200>}, {pipeline_mode = #tpu.pipeline_mode<synchronous>, transform_indices = @transform_2, window_bounds = array<i64: 1, 32>}, {pipeline_mode = #tpu.pipeline_mode<synchronous>, transform_indices = @transform_3, window_bounds = array<i64: 32, 32>}, {pipeline_mode = #tpu.pipeline_mode<synchronous>, transform_indices = @transform_4, window_bounds = array<i64: 1, 32>}, {pipeline_mode = #tpu.pipeline_mode<synchronous>, transform_indices = @transform_5, window_bounds = array<i64: 32, 32>}, {pipeline_mode = #tpu.pipeline_mode<synchronous>, transform_indices = @transform_6, window_bounds = array<i64: 1, 32>}, {pipeline_mode = #tpu.pipeline_mode<synchronous>, transform_indices = @transform_7, window_bounds = array<i64: 32, 32>}, {pipeline_mode = #tpu.pipeline_mode<synchronous>, transform_indices = @transform_8, window_bounds = array<i64: 1, 32>}, {pipeline_mode = #tpu.pipeline_mode<synchronous>, transform_indices = @transform_9, window_bounds = array<i64: 1, 32>}, {pipeline_mode = #tpu.pipeline_mode<synchronous>, transform_indices = @transform_10, window_bounds = array<i64: 1, 1>}, {transform_indices = @transform_11, window_bounds = array<i64: 1, 256>}]} {
    %c0 = arith.constant 0 : index
    %c0_0 = arith.constant 0 : index
    %0 = vector.load %arg1[%c0, %c0_0] : memref<256x3200xf32, #tpu.memory_space<vmem>>, vector<256x3200xf32>
    %1 = arith.truncf %0 : vector<256x3200xf32> to vector<256x3200xbf16>
    %c0_1 = arith.constant 0 : index
    %c0_2 = arith.constant 0 : index
    %2 = vector.load %arg2[%c0_1, %c0_2] : memref<32x3200xbf16, #tpu.memory_space<vmem>>, vector<32x3200xbf16>
    %cst = arith.constant dense<0.000000e+00> : vector<256x32xf32>
    %3 = tpu.matmul %1, %2, %cst {dimension_numbers = #tpu.dot_dimension_numbers<[1], [1], [0], [0], [0, 0, 1, 0], [], []>} : vector<256x3200xbf16>, vector<32x3200xbf16>, vector<256x32xf32> -> vector<256x32xf32>
    %c0_3 = arith.constant 0 : index
    %c0_4 = arith.constant 0 : index
    %4 = vector.load %arg3[%c0_3, %c0_4] : memref<1x32xf32, #tpu.memory_space<vmem>>, vector<1x32xf32>
    %5 = vector.broadcast %4 : vector<1x32xf32> to vector<256x32xf32>
    %6 = arith.addf %3, %5 : vector<256x32xf32>
    %cst_5 = arith.constant 5.000000e-01 : f32
    %7 = vector.broadcast %cst_5 : f32 to vector<256x32xf32>
    %8 = arith.mulf %7, %6 : vector<256x32xf32>
    %9 = math.tanh %8 : vector<256x32xf32>
    %cst_6 = arith.constant 5.000000e-01 : f32
    %10 = vector.broadcast %cst_6 : f32 to vector<256x32xf32>
    %11 = arith.mulf %10, %9 : vector<256x32xf32>
    %cst_7 = arith.constant 5.000000e-01 : f32
    %12 = vector.broadcast %cst_7 : f32 to vector<256x32xf32>
    %13 = arith.addf %11, %12 : vector<256x32xf32>
    %14 = arith.truncf %13 : vector<256x32xf32> to vector<256x32xbf16>
    %c0_8 = arith.constant 0 : index
    %c0_9 = arith.constant 0 : index
    %15 = vector.load %arg4[%c0_8, %c0_9] : memref<32x32xbf16, #tpu.memory_space<vmem>>, vector<32x32xbf16>
    %cst_10 = arith.constant dense<0.000000e+00> : vector<256x32xf32>
    %16 = tpu.matmul %14, %15, %cst_10 {dimension_numbers = #tpu.dot_dimension_numbers<[1], [1], [0], [0], [0, 0, 1, 0], [], []>} : vector<256x32xbf16>, vector<32x32xbf16>, vector<256x32xf32> -> vector<256x32xf32>
    %c0_11 = arith.constant 0 : index
    %c0_12 = arith.constant 0 : index
    %17 = vector.load %arg5[%c0_11, %c0_12] : memref<1x32xf32, #tpu.memory_space<vmem>>, vector<1x32xf32>
    %18 = vector.broadcast %17 : vector<1x32xf32> to vector<256x32xf32>
    %19 = arith.addf %16, %18 : vector<256x32xf32>
    %cst_13 = arith.constant 5.000000e-01 : f32
    %20 = vector.broadcast %cst_13 : f32 to vector<256x32xf32>
    %21 = arith.mulf %20, %19 : vector<256x32xf32>
    %22 = math.tanh %21 : vector<256x32xf32>
    %cst_14 = arith.constant 5.000000e-01 : f32
    %23 = vector.broadcast %cst_14 : f32 to vector<256x32xf32>
    %24 = arith.mulf %23, %22 : vector<256x32xf32>
    %cst_15 = arith.constant 5.000000e-01 : f32
    %25 = vector.broadcast %cst_15 : f32 to vector<256x32xf32>
    %26 = arith.addf %24, %25 : vector<256x32xf32>
    %27 = arith.truncf %26 : vector<256x32xf32> to vector<256x32xbf16>
    %c0_16 = arith.constant 0 : index
    %c0_17 = arith.constant 0 : index
    %28 = vector.load %arg6[%c0_16, %c0_17] : memref<32x32xbf16, #tpu.memory_space<vmem>>, vector<32x32xbf16>
    %cst_18 = arith.constant dense<0.000000e+00> : vector<256x32xf32>
    %29 = tpu.matmul %27, %28, %cst_18 {dimension_numbers = #tpu.dot_dimension_numbers<[1], [1], [0], [0], [0, 0, 1, 0], [], []>} : vector<256x32xbf16>, vector<32x32xbf16>, vector<256x32xf32> -> vector<256x32xf32>
    %c0_19 = arith.constant 0 : index
    %c0_20 = arith.constant 0 : index
    %30 = vector.load %arg7[%c0_19, %c0_20] : memref<1x32xf32, #tpu.memory_space<vmem>>, vector<1x32xf32>
    %31 = vector.broadcast %30 : vector<1x32xf32> to vector<256x32xf32>
    %32 = arith.addf %29, %31 : vector<256x32xf32>
    %cst_21 = arith.constant 5.000000e-01 : f32
    %33 = vector.broadcast %cst_21 : f32 to vector<256x32xf32>
    %34 = arith.mulf %33, %32 : vector<256x32xf32>
    %35 = math.tanh %34 : vector<256x32xf32>
    %cst_22 = arith.constant 5.000000e-01 : f32
    %36 = vector.broadcast %cst_22 : f32 to vector<256x32xf32>
    %37 = arith.mulf %36, %35 : vector<256x32xf32>
    %cst_23 = arith.constant 5.000000e-01 : f32
    %38 = vector.broadcast %cst_23 : f32 to vector<256x32xf32>
    %39 = arith.addf %37, %38 : vector<256x32xf32>
    %40 = arith.truncf %39 : vector<256x32xf32> to vector<256x32xbf16>
    %c0_24 = arith.constant 0 : index
    %c0_25 = arith.constant 0 : index
    %41 = vector.load %arg8[%c0_24, %c0_25] : memref<32x32xbf16, #tpu.memory_space<vmem>>, vector<32x32xbf16>
    %cst_26 = arith.constant dense<0.000000e+00> : vector<256x32xf32>
    %42 = tpu.matmul %40, %41, %cst_26 {dimension_numbers = #tpu.dot_dimension_numbers<[1], [1], [0], [0], [0, 0, 1, 0], [], []>} : vector<256x32xbf16>, vector<32x32xbf16>, vector<256x32xf32> -> vector<256x32xf32>
    %c0_27 = arith.constant 0 : index
    %c0_28 = arith.constant 0 : index
    %43 = vector.load %arg9[%c0_27, %c0_28] : memref<1x32xf32, #tpu.memory_space<vmem>>, vector<1x32xf32>
    %44 = vector.broadcast %43 : vector<1x32xf32> to vector<256x32xf32>
    %45 = arith.addf %42, %44 : vector<256x32xf32>
    %cst_29 = arith.constant 5.000000e-01 : f32
    %46 = vector.broadcast %cst_29 : f32 to vector<256x32xf32>
    %47 = arith.mulf %46, %45 : vector<256x32xf32>
    %48 = math.tanh %47 : vector<256x32xf32>
    %cst_30 = arith.constant 5.000000e-01 : f32
    %49 = vector.broadcast %cst_30 : f32 to vector<256x32xf32>
    %50 = arith.mulf %49, %48 : vector<256x32xf32>
    %cst_31 = arith.constant 5.000000e-01 : f32
    %51 = vector.broadcast %cst_31 : f32 to vector<256x32xf32>
    %52 = arith.addf %50, %51 : vector<256x32xf32>
    %c0_32 = arith.constant 0 : index
    %c0_33 = arith.constant 0 : index
    %53 = vector.load %arg10[%c0_32, %c0_33] : memref<1x32xbf16, #tpu.memory_space<vmem>>, vector<1x32xbf16>
    %54 = arith.truncf %52 : vector<256x32xf32> to vector<256x32xbf16>
    %cst_34 = arith.constant dense<0.000000e+00> : vector<1x256xf32>
    %55 = tpu.matmul %53, %54, %cst_34 {dimension_numbers = #tpu.dot_dimension_numbers<[1], [1], [0], [0], [0, 0, 1, 0], [], []>} : vector<1x32xbf16>, vector<256x32xbf16>, vector<1x256xf32> -> vector<1x256xf32>
    %c0_35 = arith.constant 0 : index
    %c0_36 = arith.constant 0 : index
    %56 = vector.load %arg11[%c0_35, %c0_36] : memref<1x1xf32, #tpu.memory_space<vmem>>, vector<1x1xf32>
    %57 = vector.broadcast %56 : vector<1x1xf32> to vector<1x256xf32>
    %58 = arith.addf %55, %57 : vector<1x256xf32>
    %c0_37 = arith.constant 0 : index
    %c0_38 = arith.constant 0 : index
    %59 = vector.load %arg12[%c0_37, %c0_38] : memref<1x256xf32, #tpu.memory_space<vmem>>, vector<1x256xf32>
    tpu.vector_store %arg12[%c0_37, %c0_38], %58 {strides = array<i32>} : memref<1x256xf32, #tpu.memory_space<vmem>>, vector<1x256xf32>,
    return
  }
  func.func @transform_0(%arg0: i32) -> (i32, i32) {
    %c0_i32 = arith.constant 0 : i32
    %c0_i32_0 = arith.constant 0 : i32
    return %arg0, %c0_i32 : i32, i32
  }
  func.func @transform_1(%arg0: i32) -> (i32, i32) {
    %c0_i32 = arith.constant 0 : i32
    %c0_i32_0 = arith.constant 0 : i32
    %c0_i32_1 = arith.constant 0 : i32
    return %c0_i32, %c0_i32_0 : i32, i32
  }
  func.func @transform_2(%arg0: i32) -> (i32, i32) {
    %c0_i32 = arith.constant 0 : i32
    %c0_i32_0 = arith.constant 0 : i32
    %c0_i32_1 = arith.constant 0 : i32
    return %c0_i32, %c0_i32_0 : i32, i32
  }
  func.func @transform_3(%arg0: i32) -> (i32, i32) {
    %c0_i32 = arith.constant 0 : i32
    %c0_i32_0 = arith.constant 0 : i32
    %c0_i32_1 = arith.constant 0 : i32
    return %c0_i32, %c0_i32_0 : i32, i32
  }
  func.func @transform_4(%arg0: i32) -> (i32, i32) {
    %c0_i32 = arith.constant 0 : i32
    %c0_i32_0 = arith.constant 0 : i32
    %c0_i32_1 = arith.constant 0 : i32
    return %c0_i32, %c0_i32_0 : i32, i32
  }
  func.func @transform_5(%arg0: i32) -> (i32, i32) {
    %c0_i32 = arith.constant 0 : i32
    %c0_i32_0 = arith.constant 0 : i32
    %c0_i32_1 = arith.constant 0 : i32
    return %c0_i32, %c0_i32_0 : i32, i32
  }
  func.func @transform_6(%arg0: i32) -> (i32, i32) {
    %c0_i32 = arith.constant 0 : i32
    %c0_i32_0 = arith.constant 0 : i32
    %c0_i32_1 = arith.constant 0 : i32
    return %c0_i32, %c0_i32_0 : i32, i32
  }
  func.func @transform_7(%arg0: i32) -> (i32, i32) {
    %c0_i32 = arith.constant 0 : i32
    %c0_i32_0 = arith.constant 0 : i32
    %c0_i32_1 = arith.constant 0 : i32
    return %c0_i32, %c0_i32_0 : i32, i32
  }
  func.func @transform_8(%arg0: i32) -> (i32, i32) {
    %c0_i32 = arith.constant 0 : i32
    %c0_i32_0 = arith.constant 0 : i32
    %c0_i32_1 = arith.constant 0 : i32
    return %c0_i32, %c0_i32_0 : i32, i32
  }
  func.func @transform_9(%arg0: i32) -> (i32, i32) {
    %c0_i32 = arith.constant 0 : i32
    %c0_i32_0 = arith.constant 0 : i32
    %c0_i32_1 = arith.constant 0 : i32
    return %c0_i32, %c0_i32_0 : i32, i32
  }
  func.func @transform_10(%arg0: i32) -> (i32, i32) {
    %c0_i32 = arith.constant 0 : i32
    %c0_i32_0 = arith.constant 0 : i32
    %c0_i32_1 = arith.constant 0 : i32
    return %c0_i32, %c0_i32_0 : i32, i32
  }
  func.func @transform_11(%arg0: i32) -> (i32, i32) {
    %c0_i32 = arith.constant 0 : i32
    %c0_i32_0 = arith.constant 0 : i32
    return %c0_i32, %arg0 : i32, i32
  }
}

</mosaic_0001>

<bundles_post_ra>
// kernel: tpu_custom_call.1
= control target key start
LH: loop header
LB: loop body
LE: loop exit
PB: predicated region body
PF: predicated region fallthrough
CT: control target
= control target key end

     0   :  { %s7048_s0 = inlined_call_operand.hbm [shape: f32[256,3200], index: 0, kind: input, shape index: {}]   ;;  %s7049_s1 = inlined_call_operand.hbm [shape: bf16[32,3200], index: 1, kind: input, shape index: {}]   ;;  %s7050_s2 = inlined_call_operand.hbm [shape: f32[1,32], index: 2, kind: input, shape index: {}]   ;;  %s7051_s3 = inlined_call_operand.hbm [shape: bf16[32,32], index: 3, kind: input, shape index: {}]   ;;  %s7052_s4 = inlined_call_operand.hbm [shape: f32[1,32], index: 4, kind: input, shape index: {}]   ;;  %s7053_s5 = inlined_call_operand.hbm [shape: bf16[32,32], index: 5, kind: input, shape index: {}]   ;;  %s7054_s6 = inlined_call_operand.hbm [shape: f32[1,32], index: 6, kind: input, shape index: {}]   ;;  %s7055_s7 = inlined_call_operand.hbm [shape: bf16[32,32], index: 7, kind: input, shape index: {}]   ;;  %s7056_s8 = inlined_call_operand.hbm [shape: f32[1,32], index: 8, kind: input, shape index: {}]   ;;  %s7057_s9 = inlined_call_operand.hbm [shape: bf16[1,32], index: 9, kind: input, shape index: {}]   ;;  %s7058_s10 = inlined_call_operand.<no memory space> [shape: f32[1,1], index: 10, kind: input, shape index: {}]   ;;  %s7059_s11 = inlined_call_operand.hbm [shape: f32[1,256], index: 11, kind: output, shape index: {}]  }
   0x1   :  { %v16_v0 = vstv %s7058_s10 }
   0x2   :  { %17 = vst [vmem:[#allocation2] sm:$0x1] %v16_v0 }
   0x3   :  { %18 = vsyncpa [#allocation4], 0 }
   0x4   :  { %19 = vsyncpa [#allocation7], 0 }
   0x5   :  { %20 = vsyncpa [#allocation10], 0 }
   0x6   :  { %21 = vsyncpa [#allocation13], 0 }
   0x7   :  { %22 = vsyncpa [#allocation16], 0 }
   0x8   :  { %23 = vsyncpa [#allocation19], 0  ;;  %s42_s21 = sshll.u32 %s7049_s1, 4  ;;  %s43_s21 = int_to_ptr.hbm [resolvable:$true] %s42_s21 }
   0x9   :  { %24 = vsyncpa [#allocation5], 0  ;;  %s5987_s22 = smov [#allocation6]   ;;  %s66_s10 = sshll.u32 %s7051_s3, 4  ;;  %s67_s10 = int_to_ptr.hbm [resolvable:$true] %s66_s10 }
   0xa   :  { %s44_s23 = sshll.u32 %s5987_s22, 4  ;;  %s5988_s26 = smov 1600   ;;  %s45_s23 = int_to_ptr.vmem [resolvable:$true] %s44_s23 }
   0xb   :  { %s5989_s27 = smov 100   ;;  %s5990_s28 = smov [#allocation9]  }
   0xc   :  { %50 = dma.hbm_to_vmem [thread:$0]  %s43_s21, 6400, %s45_s23, [#allocation7], %s5988_s26, %s5988_s26, %s5989_s27  }
   0xd   :  { %s68_s29 = sshll.u32 %s5990_s28, 4  ;;  %s5991_s30 = smov 64   ;;  %s69_s29 = int_to_ptr.vmem [resolvable:$true] %s68_s29 }
   0xe   :  { %s5992_s12 = smov 4   ;;  %s90_s14 = sshll.u32 %s7053_s5, 4  ;;  %s91_s14 = int_to_ptr.hbm [resolvable:$true] %s90_s14 }
   0xf   :  { %74 = dma.hbm_to_vmem [thread:$0]  %s67_s10, 256, %s69_s29, [#allocation10], %s5991_s30, %s5991_s30, %s5992_s12  }
  0x10   :  { %s5993_s15 = smov [#allocation12]   ;;  %s114_s18 = sshll.u32 %s7055_s7, 4  ;;  %s115_s18 = int_to_ptr.hbm [resolvable:$true] %s114_s18 }
  0x11   :  { %s92_s16 = sshll.u32 %s5993_s15, 4  ;;  %s5994_s19 = smov [#allocation15]   ;;  %s93_s16 = int_to_ptr.vmem [resolvable:$true] %s92_s16 }
  0x12   :  { %98 = dma.hbm_to_vmem [thread:$0]  %s91_s14, 256, %s93_s16, [#allocation13], %s5991_s30, %s5991_s30, %s5992_s12  }
  0x13   :  { %s116_s20 = sshll.u32 %s5994_s19, 4  ;;  %s29_s23 = sshll.u32 %s7048_s0, 4  ;;  %s117_s20 = int_to_ptr.vmem [resolvable:$true] %s116_s20  ;;  %s30_s23 = int_to_ptr.hbm [resolvable:$true] %s29_s23 }
  0x14   :  { %122 = dma.hbm_to_vmem [thread:$0]  %s115_s18, 256, %s117_s20, [#allocation16], %s5991_s30, %s5991_s30, %s5992_s12  }
  0x15   :  { %s5995_s5 = smov [#allocation3]   ;;  %s56_s26 = sshll.u32 %s7050_s2, 4  ;;  %s57_s26 = int_to_ptr.hbm [resolvable:$true] %s56_s26 }
  0x16   :  { %s31_s24 = sshll.u32 %s5995_s5, 4  ;;  %s5996_s27 = smov 3200   ;;  %s32_s24 = int_to_ptr.vmem [resolvable:$true] %s31_s24 }
  0x17   :  { %s5997_s7 = smov 200   ;;  %s5998_s28 = smov [#allocation8]  }
  0x18   :  { %37 = dma.hbm_to_vmem [thread:$0]  %s30_s23, 102400, %s32_s24, [#allocation4], %s5996_s27, %s5996_s27, %s5997_s7  }
  0x19   :  { %s58_s29 = sshll.u32 %s5998_s28, 4  ;;  %s80_s0 = sshll.u32 %s7052_s4, 4  ;;  %s59_s29 = int_to_ptr.vmem [resolvable:$true] %s58_s29  ;;  %s81_s0 = int_to_ptr.hbm [resolvable:$true] %s80_s0 }
  0x1a   :  { %61 = dma.hbm_to_vmem [thread:$0]  %s57_s26, 16, %s59_s29, [#allocation7]  }
  0x1b   :  { %s104_s14 = sshll.u32 %s7054_s6, 4  ;;  %s5999_s15 = smov [#allocation11]   ;;  %s105_s14 = int_to_ptr.hbm [resolvable:$true] %s104_s14 }
  0x1c   :  { %s82_s16 = sshll.u32 %s5999_s15, 4  ;;  %s6000_s2 = smov [#allocation14]   ;;  %s83_s16 = int_to_ptr.vmem [resolvable:$true] %s82_s16 }
  0x1d   :  { %85 = dma.hbm_to_vmem [thread:$0]  %s81_s0, 16, %s83_s16, [#allocation10]  }
  0x1e   :  { %s106_s17 = sshll.u32 %s6000_s2, 4  ;;  %s128_s19 = sshll.u32 %s7056_s8, 4  ;;  %s107_s17 = int_to_ptr.vmem [resolvable:$true] %s106_s17  ;;  %s129_s19 = int_to_ptr.hbm [resolvable:$true] %s128_s19 }
  0x1f   :  { %109 = dma.hbm_to_vmem [thread:$0]  %s105_s14, 16, %s107_s17, [#allocation13]  }
  0x20   :  { %s139_s21 = sshll.u32 %s7057_s9, 4  ;;  %s6001_s22 = smov [#allocation17]   ;;  %s140_s21 = int_to_ptr.hbm [resolvable:$true] %s139_s21 }
  0x21   :  { %s130_s6 = sshll.u32 %s6001_s22, 4  ;;  %s6002_s23 = smov [#allocation18]   ;;  %s131_s6 = int_to_ptr.vmem [resolvable:$true] %s130_s6 }
  0x22   :  { %133 = dma.hbm_to_vmem [thread:$0]  %s129_s19, 16, %s131_s6, [#allocation16]  }
  0x23   :  { %s141_s5 = sshll.u32 %s6002_s23, 4  ;;  %s142_s5 = int_to_ptr.vmem [resolvable:$true] %s141_s5 }
  0x24   :  { %144 = dma.hbm_to_vmem [thread:$0]  %s140_s21, 16, %s142_s5, [#allocation19]  }
  0x25   :  { %5973 = dma.done.wait [#allocation4], 102400  }
  0x26   :  { %5974 = vsyncadd [#allocation4], 4294864896 }
  0x27   :  { %5975 = dma.done.wait [#allocation7], 6416  }
  0x28   :  { %5976 = vsyncadd [#allocation7], 4294960880 }
  0x29   :  { %5977 = dma.done.wait [#allocation10], 272  }
  0x2a   :  { %5978 = vsyncadd [#allocation10], 4294967024 }
  0x2b   :  { %5979 = dma.done.wait [#allocation13], 272  }
  0x2c   :  { %5980 = vsyncadd [#allocation13], 4294967024 }
  0x2d   :  { %5981 = dma.done.wait [#allocation16], 272  }
  0x2e   :  { %5982 = vsyncadd [#allocation16], 4294967024 }
  0x2f   :  { %5983 = dma.done.wait [#allocation19], 16  }
  0x30   :  { %5984 = vsyncadd [#allocation19], 4294967280  ;;  %v5201_v1 = vld [vmem:[#allocation6 + $0xc8] sm:$0xf]  ;;  %v5410_v2 = vld [vmem:[#allocation6 + $0x128] sm:$0xf0] }
  0x31   :  { %v5209_v3 = vld [vmem:[#allocation6 + $0xd0] sm:$0xf]  ;;  %v5202_v4 = vor.u32 %v5410_v2, %v5201_v1  ;;  %v5411_v5 = vld [vmem:[#allocation6 + $0x130] sm:$0xf0]  ;;  %v5398_v6 = vld [vmem:[#allocation6 + $0xcc] sm:$0xf] }
  0x32   :  { %v5203_v7 = vld [vmem:[#allocation6 + $0x12c] sm:$0xf0]  ;;  %v5210_v8 = vor.u32 %v5411_v5, %v5209_v3  ;;  %v5399_v10 = vld [vmem:[#allocation6 + $0xd4] sm:$0xf]  ;;  %v5211_v11 = vld [vmem:[#allocation6 + $0x134] sm:$0xf0] }
  0x33   :  { %v5206_v9 = vor.u32 %v5398_v6, %v5203_v7  ;;  %1702 = vmatpush.bf16.xpose.msra.mxu0 %v5202_v4  ;;  %v5214_v12 = vor.u32 %v5399_v10, %v5211_v11  ;;  %v5101_v13 = vld [vmem:[#allocation6] sm:$0xf]  ;;  %v5385_v14 = vld [vmem:[#allocation6 + $0x60] sm:$0xf0]  ;;  %v5109_v15 = vld [vmem:[#allocation6 + $0x8] sm:$0xf] }
  0x34   :  { %1880 = vmatpush.bf16.xpose.msra.mxu2 %v5210_v8  ;;  %v5386_v16 = vld [vmem:[#allocation6 + $0x68] sm:$0xf0]  ;;  %v5373_v17 = vld [vmem:[#allocation6 + $0x4] sm:$0xf]  ;;  %v5103_v18 = vld [vmem:[#allocation6 + $0x64] sm:$0xf0]  ;;  %v5102_v21 = vor.u32 %v5385_v14, %v5101_v13 }
  0x35   :  { %1791 = vmatpush.bf16.xpose.msra.mxu1 %v5206_v9  ;;  %1969 = vmatpush.bf16.xpose.msra.mxu3 %v5214_v12  ;;  %v5374_v19 = vld [vmem:[#allocation6 + $0xc] sm:$0xf]  ;;  %v5111_v20 = vld [vmem:[#allocation6 + $0x6c] sm:$0xf0]  ;;  %v5110_v22 = vor.u32 %v5386_v16, %v5109_v15  ;;  %v5106_v23 = vor.u32 %v5373_v17, %v5103_v18  ;;  %v188_v25 = vld [vmem:[#allocation3] sm:$0xff]  ;;  %vm4083_vm0 = vcmask 261120  }
  0x36   :  { %v5114_v24 = vor.u32 %v5374_v19, %v5111_v20  ;;  %v213_v26 = vld [vmem:[#allocation3 + $0xc8] sm:$0xff]  ;;  %v190_v27 = vld [vmem:[#allocation3 + $0x10] sm:$0xff]  ;;  %v215_v28 = vld [vmem:[#allocation3 + $0xd8] sm:$0xff]  ;;  %s6004_s8 = smov [#allocation20]   ;;  %s5084_s10 = sshll.u32 %s7059_s11, 4  ;;  %vm5069_vm1 = vcmask 1040384   ;;  %s5085_s10 = int_to_ptr.hbm [resolvable:$true] %s5084_s10 }
  0x37   :  { %v189_v29 = vld [vmem:[#allocation3 + $0x8] sm:$0xff]  ;;  %v214_v30 = vld [vmem:[#allocation3 + $0xd0] sm:$0xff]  ;;  %v191_v31 = vld [vmem:[#allocation3 + $0x18] sm:$0xff]  ;;  %v988_v33 = vpack.c.bf16 %v213_v26, %v188_v25  ;;  %v990_v34 = vpack.c.bf16 %v215_v28, %v190_v27  ;;  %s5082_s9 = sshll.u32 %s6004_s8, 4  ;;  %s5083_s9 = int_to_ptr.vmem [resolvable:$true] %s5082_s9 }
  0x38   :  { %v216_v32 = vld [vmem:[#allocation3 + $0xe0] sm:$0xff]  ;;  %v989_v35 = vpack.c.bf16 %v214_v30, %v189_v29  ;;  %v238_v37 = vld [vmem:[#allocation3 + $0x190] sm:$0xff]  ;;  %v263_v38 = vld [vmem:[#allocation3 + $0x258] sm:$0xff] }
  0x39   :  { %v991_v36 = vpack.c.bf16 %v216_v32, %v191_v31  ;;  %v240_v39 = vld [vmem:[#allocation3 + $0x1a0] sm:$0xff]  ;;  %v265_v40 = vld [vmem:[#allocation3 + $0x268] sm:$0xff]  ;;  %v239_v41 = vld [vmem:[#allocation3 + $0x198] sm:$0xff]  ;;  %v1013_v45 = vpack.c.bf16 %v263_v38, %v238_v37 }
  0x3a   :  { %v264_v42 = vld [vmem:[#allocation3 + $0x260] sm:$0xff]  ;;  %v241_v43 = vld [vmem:[#allocation3 + $0x1a8] sm:$0xff]  ;;  %v266_v44 = vld [vmem:[#allocation3 + $0x270] sm:$0xff]  ;;  %v1015_v46 = vpack.c.bf16 %v265_v40, %v240_v39 }
  0x3b   :  { %1703 = vmatpush.bf16.xpose.msra.mxu0 %v5102_v21  ;;  %v1014_v47 = vpack.c.bf16 %v264_v42, %v239_v41  ;;  %v1016_v48 = vpack.c.bf16 %v266_v44, %v241_v43  ;;  %v288_v49 = vld [vmem:[#allocation3 + $0x320] sm:$0xff]  ;;  %v313_v50 = vld [vmem:[#allocation3 + $0x3e8] sm:$0xff]  ;;  %v290_v51 = vld [vmem:[#allocation3 + $0x330] sm:$0xff] }
  0x3c   :  { %1881 = vmatpush.bf16.xpose.msra.mxu2 %v5110_v22  ;;  %v315_v52 = vld [vmem:[#allocation3 + $0x3f8] sm:$0xff]  ;;  %v289_v53 = vld [vmem:[#allocation3 + $0x328] sm:$0xff]  ;;  %v314_v54 = vld [vmem:[#allocation3 + $0x3f0] sm:$0xff]  ;;  %v1038_v57 = vpack.c.bf16 %v313_v50, %v288_v49 }
  0x3d   :  { %1792 = vmatpush.bf16.xpose.msra.mxu1 %v5106_v23  ;;  %1970 = vmatpush.bf16.xpose.msra.mxu3 %v5114_v24  ;;  %v291_v55 = vld [vmem:[#allocation3 + $0x338] sm:$0xff]  ;;  %v316_v56 = vld [vmem:[#allocation3 + $0x400] sm:$0xff]  ;;  %v1040_v58 = vpack.c.bf16 %v315_v52, %v290_v51  ;;  %v1039_v59 = vpack.c.bf16 %v314_v54, %v289_v53  ;;  %v338_v61 = vld [vmem:[#allocation3 + $0x4b0] sm:$0xff] }
  0x3e   :  { %v1041_v60 = vpack.c.bf16 %v316_v56, %v291_v55  ;;  %v363_v62 = vld [vmem:[#allocation3 + $0x578] sm:$0xff]  ;;  %v340_v63 = vld [vmem:[#allocation3 + $0x4c0] sm:$0xff]  ;;  %v365_v0 = vld [vmem:[#allocation3 + $0x588] sm:$0xff] }
  0x3f   :  { %v339_v1 = vld [vmem:[#allocation3 + $0x4b8] sm:$0xff]  ;;  %v364_v2 = vld [vmem:[#allocation3 + $0x580] sm:$0xff]  ;;  %v341_v3 = vld [vmem:[#allocation3 + $0x4c8] sm:$0xff]  ;;  %v1063_v5 = vpack.c.bf16 %v363_v62, %v338_v61  ;;  %v1065_v6 = vpack.c.bf16 %v365_v0, %v340_v63 }
  0x40   :  { %v366_v4 = vld [vmem:[#allocation3 + $0x590] sm:$0xff]  ;;  %v1064_v7 = vpack.c.bf16 %v364_v2, %v339_v1  ;;  %v388_v9 = vld [vmem:[#allocation3 + $0x640] sm:$0xff]  ;;  %v413_v10 = vld [vmem:[#allocation3 + $0x708] sm:$0xff] }
  0x41   :  { %v1066_v8 = vpack.c.bf16 %v366_v4, %v341_v3  ;;  %v390_v11 = vld [vmem:[#allocation3 + $0x650] sm:$0xff]  ;;  %v415_v12 = vld [vmem:[#allocation3 + $0x718] sm:$0xff]  ;;  %v389_v13 = vld [vmem:[#allocation3 + $0x648] sm:$0xff]  ;;  %v1088_v17 = vpack.c.bf16 %v413_v10, %v388_v9 }
  0x42   :  { %1704 = vmatmul.bf16.vlgmr.msra.gmra.mxu0 %v988_v33  ;;  %v414_v14 = vld [vmem:[#allocation3 + $0x710] sm:$0xff]  ;;  %v391_v15 = vld [vmem:[#allocation3 + $0x658] sm:$0xff]  ;;  %v416_v16 = vld [vmem:[#allocation3 + $0x720] sm:$0xff]  ;;  %v1090_v18 = vpack.c.bf16 %v415_v12, %v390_v11 }
  0x43   :  { %1882 = vmatmul.bf16.vlgmr.msra.gmra.mxu2 %v990_v34  ;;  %v1089_v19 = vpack.c.bf16 %v414_v14, %v389_v13  ;;  %v1091_v20 = vpack.c.bf16 %v416_v16, %v391_v15  ;;  %v438_v21 = vld [vmem:[#allocation3 + $0x7d0] sm:$0xff]  ;;  %v463_v22 = vld [vmem:[#allocation3 + $0x898] sm:$0xff]  ;;  %v440_v23 = vld [vmem:[#allocation3 + $0x7e0] sm:$0xff] }
  0x44   :  { %1793 = vmatmul.bf16.vlgmr.msra.gmra.mxu1 %v989_v35  ;;  %1971 = vmatmul.bf16.vlgmr.msra.gmra.mxu3 %v991_v36  ;;  %v465_v24 = vld [vmem:[#allocation3 + $0x8a8] sm:$0xff]  ;;  %v439_v25 = vld [vmem:[#allocation3 + $0x7d8] sm:$0xff]  ;;  %v464_v26 = vld [vmem:[#allocation3 + $0x8a0] sm:$0xff]  ;;  %v1113_v29 = vpack.c.bf16 %v463_v22, %v438_v21 }
  0x45   :  { %v441_v27 = vld [vmem:[#allocation3 + $0x7e8] sm:$0xff]  ;;  %v466_v28 = vld [vmem:[#allocation3 + $0x8b0] sm:$0xff]  ;;  %v1115_v30 = vpack.c.bf16 %v465_v24, %v440_v23  ;;  %v1114_v31 = vpack.c.bf16 %v464_v26, %v439_v25  ;;  %v488_v33 = vld [vmem:[#allocation3 + $0x960] sm:$0xff] }
  0x46   :  { %v1116_v32 = vpack.c.bf16 %v466_v28, %v441_v27  ;;  %v513_v34 = vld [vmem:[#allocation3 + $0xa28] sm:$0xff]  ;;  %v490_v35 = vld [vmem:[#allocation3 + $0x970] sm:$0xff]  ;;  %v515_v36 = vld [vmem:[#allocation3 + $0xa38] sm:$0xff] }
  0x47   :  { %v489_v37 = vld [vmem:[#allocation3 + $0x968] sm:$0xff]  ;;  %v514_v38 = vld [vmem:[#allocation3 + $0xa30] sm:$0xff]  ;;  %v491_v39 = vld [vmem:[#allocation3 + $0x978] sm:$0xff]  ;;  %v1138_v41 = vpack.c.bf16 %v513_v34, %v488_v33  ;;  %v1140_v42 = vpack.c.bf16 %v515_v36, %v490_v35 }
  0x48   :  { %v516_v40 = vld [vmem:[#allocation3 + $0xa40] sm:$0xff]  ;;  %v1139_v43 = vpack.c.bf16 %v514_v38, %v489_v37  ;;  %v539_v49 = vld [vmem:[#allocation3 + $0xaf8] sm:$0xff]  ;;  %v541_v51 = vld [vmem:[#allocation3 + $0xb08] sm:$0xff] }
  0x49   :  { %v1141_v44 = vpack.c.bf16 %v516_v40, %v491_v39  ;;  %v564_v50 = vld [vmem:[#allocation3 + $0xbc0] sm:$0xff]  ;;  %v566_v52 = vld [vmem:[#allocation3 + $0xbd0] sm:$0xff]  ;;  %v615_v61 = vld [vmem:[#allocation3 + $0xd58] sm:$0xff] }
  0x4a   :  { %v1164_v55 = vpack.c.bf16 %v564_v50, %v539_v49  ;;  %v1166_v56 = vpack.c.bf16 %v566_v52, %v541_v51  ;;  %v589_v62 = vld [vmem:[#allocation3 + $0xc88] sm:$0xff]  ;;  %v614_v63 = vld [vmem:[#allocation3 + $0xd50] sm:$0xff]  ;;  %v591_v0 = vld [vmem:[#allocation3 + $0xc98] sm:$0xff] }
  0x4b   :  { %v616_v1 = vld [vmem:[#allocation3 + $0xd60] sm:$0xff]  ;;  %v665_v21 = vld [vmem:[#allocation3 + $0xee8] sm:$0xff]  ;;  %v639_v22 = vld [vmem:[#allocation3 + $0xe18] sm:$0xff] }
  0x4c   :  { %v664_v23 = vld [vmem:[#allocation3 + $0xee0] sm:$0xff]  ;;  %v641_v24 = vld [vmem:[#allocation3 + $0xe28] sm:$0xff]  ;;  %v666_v25 = vld [vmem:[#allocation3 + $0xef0] sm:$0xff] }
  0x4d   :  { %v1216_v35 = vpack.c.bf16 %v666_v25, %v641_v24  ;;  %v715_v49 = vld [vmem:[#allocation3 + $0x1078] sm:$0xff]  ;;  %v689_v50 = vld [vmem:[#allocation3 + $0xfa8] sm:$0xff]  ;;  %v714_v51 = vld [vmem:[#allocation3 + $0x1070] sm:$0xff] }
  0x4e   :  { %v691_v52 = vld [vmem:[#allocation3 + $0xfb8] sm:$0xff] }
  0x52   :  { %1709 = vmatmul.bf16.gmra.mxu0 %v1013_v45  ;;  %v538_v45 = vld [vmem:[#allocation3 + $0xaf0] sm:$0xff] }
  0x53   :  { %1887 = vmatmul.bf16.gmra.mxu2 %v1015_v46  ;;  %v563_v46 = vld [vmem:[#allocation3 + $0xbb8] sm:$0xff] }
  0x54   :  { %1798 = vmatmul.bf16.gmra.mxu1 %v1014_v47  ;;  %1976 = vmatmul.bf16.gmra.mxu3 %v1016_v48  ;;  %v540_v47 = vld [vmem:[#allocation3 + $0xb00] sm:$0xff]  ;;  %v565_v48 = vld [vmem:[#allocation3 + $0xbc8] sm:$0xff]  ;;  %v1163_v53 = vpack.c.bf16 %v563_v46, %v538_v45 }
  0x55   :  { %v1165_v54 = vpack.c.bf16 %v565_v48, %v540_v47  ;;  %v688_v46 = vld [vmem:[#allocation3 + $0xfa0] sm:$0xff]  ;;  %v713_v47 = vld [vmem:[#allocation3 + $0x1068] sm:$0xff]  ;;  %v690_v48 = vld [vmem:[#allocation3 + $0xfb0] sm:$0xff] }
  0x62   :  { %1714 = vmatmul.bf16.gmra.mxu0 %v1038_v57  ;;  %v6098_v57 = vld [vmem:[#allocation8] ss:$0 sm:$0xff] }
  0x63   :  { %1892 = vmatmul.bf16.gmra.mxu2 %v1040_v58  ;;  %v588_v58 = vld [vmem:[#allocation3 + $0xc80] sm:$0xff] }
  0x64   :  { %1803 = vmatmul.bf16.gmra.mxu1 %v1039_v59  ;;  %1981 = vmatmul.bf16.gmra.mxu3 %v1041_v60  ;;  %v613_v59 = vld [vmem:[#allocation3 + $0xd48] sm:$0xff]  ;;  %v590_v60 = vld [vmem:[#allocation3 + $0xc90] sm:$0xff] }
  0x65   :  { %v1188_v2 = vpack.c.bf16 %v613_v59, %v588_v58  ;;  %v1190_v4 = vpack.c.bf16 %v615_v61, %v590_v60  ;;  %v1240_v60 = vpack.c.bf16 %v715_v49, %v690_v48  ;;  %v1239_v61 = vpack.c.bf16 %v714_v51, %v689_v50  ;;  %v815_v48 = vld [vmem:[#allocation3 + $0x1398] sm:$0xff]  ;;  %v789_v49 = vld [vmem:[#allocation3 + $0x12c8] sm:$0xff]  ;;  %v814_v50 = vld [vmem:[#allocation3 + $0x1390] sm:$0xff] }
  0x66   :  { %v791_v51 = vld [vmem:[#allocation3 + $0x12d8] sm:$0xff] }
  0x72   :  { %1719 = vmatmul.bf16.gmra.mxu0 %v1063_v5  ;;  %v1189_v5 = vpack.c.bf16 %v614_v63, %v589_v62 }
  0x73   :  { %1897 = vmatmul.bf16.gmra.mxu2 %v1065_v6 }
  0x74   :  { %1808 = vmatmul.bf16.gmra.mxu1 %v1064_v7  ;;  %1986 = vmatmul.bf16.gmra.mxu3 %v1066_v8  ;;  %v1191_v8 = vpack.c.bf16 %v616_v1, %v591_v0 }
  0x82   :  { %1724 = vmatmul.bf16.gmra.mxu0 %v1088_v17 }
  0x83   :  { %1902 = vmatmul.bf16.gmra.mxu2 %v1090_v18  ;;  %v638_v18 = vld [vmem:[#allocation3 + $0xe10] sm:$0xff] }
  0x84   :  { %1813 = vmatmul.bf16.gmra.mxu1 %v1089_v19  ;;  %1991 = vmatmul.bf16.gmra.mxu3 %v1091_v20  ;;  %v663_v19 = vld [vmem:[#allocation3 + $0xed8] sm:$0xff]  ;;  %v640_v20 = vld [vmem:[#allocation3 + $0xe20] sm:$0xff] }
  0x85   :  { %v1213_v27 = vpack.c.bf16 %v663_v19, %v638_v18  ;;  %v765_v18 = vld [vmem:[#allocation3 + $0x1208] sm:$0xff]  ;;  %v739_v19 = vld [vmem:[#allocation3 + $0x1138] sm:$0xff] }
  0x92   :  { %1729 = vmatmul.bf16.gmra.mxu0 %v1113_v29 }
  0x93   :  { %1907 = vmatmul.bf16.gmra.mxu2 %v1115_v30 }
  0x94   :  { %1818 = vmatmul.bf16.gmra.mxu1 %v1114_v31  ;;  %1996 = vmatmul.bf16.gmra.mxu3 %v1116_v32  ;;  %v1215_v31 = vpack.c.bf16 %v665_v21, %v640_v20  ;;  %v1214_v32 = vpack.c.bf16 %v664_v23, %v639_v22  ;;  %v764_v20 = vld [vmem:[#allocation3 + $0x1200] sm:$0xff]  ;;  %v741_v21 = vld [vmem:[#allocation3 + $0x1148] sm:$0xff]  ;;  %v766_v22 = vld [vmem:[#allocation3 + $0x1210] sm:$0xff] }
  0xa2   :  { %1734 = vmatmul.bf16.gmra.mxu0 %v1138_v41 }
  0xa3   :  { %1912 = vmatmul.bf16.gmra.mxu2 %v1140_v42 }
  0xa4   :  { %1823 = vmatmul.bf16.gmra.mxu1 %v1139_v43  ;;  %2001 = vmatmul.bf16.gmra.mxu3 %v1141_v44 }
  0xb2   :  { %1739 = vmatmul.bf16.gmra.mxu0 %v1163_v53  ;;  %v716_v53 = vld [vmem:[#allocation3 + $0x1080] sm:$0xff] }
  0xb3   :  { %1917 = vmatmul.bf16.gmra.mxu2 %v1165_v54  ;;  %v1241_v0 = vpack.c.bf16 %v716_v53, %v691_v52  ;;  %v816_v52 = vld [vmem:[#allocation3 + $0x13a0] sm:$0xff] }
  0xb4   :  { %1828 = vmatmul.bf16.gmra.mxu1 %v1164_v55  ;;  %2006 = vmatmul.bf16.gmra.mxu3 %v1166_v56  ;;  %v1238_v55 = vpack.c.bf16 %v713_v47, %v688_v46  ;;  %v813_v46 = vld [vmem:[#allocation3 + $0x1388] sm:$0xff]  ;;  %v790_v47 = vld [vmem:[#allocation3 + $0x12d0] sm:$0xff] }
  0xbf   :  { %v1705_v3 = vpop.f32.mrf.mxu0 }
  0xc0   :  { %v1706_v6 = vadd.f32 %v6098_v57, %v1705_v3  ;;  %v5217_v3 = vld [vmem:[#allocation6 + $0xd8] sm:$0xf] }
  0xc1   :  { %v1794_v7 = vpop.f32.mrf.mxu1 }
  0xc2   :  { %v1795_v9 = vadd.f32 %v1794_v7, %v1706_v6  ;;  %1744 = vmatmul.bf16.gmra.mxu0 %v1188_v2 }
  0xc3   :  { %1922 = vmatmul.bf16.gmra.mxu2 %v1190_v4  ;;  %v5412_v4 = vld [vmem:[#allocation6 + $0x138] sm:$0xf0] }
  0xc4   :  { %1833 = vmatmul.bf16.gmra.mxu1 %v1189_v5  ;;  %2011 = vmatmul.bf16.gmra.mxu3 %v1191_v8  ;;  %v5218_v5 = vor.u32 %v5412_v4, %v5217_v3 }
  0xc6   :  { %v1883_v10 = vpop.f32.mrf.mxu2  ;;  %2058 = vmatpush.bf16.xpose.msrb.mxu0 %v5218_v5 }
  0xc7   :  { %v1884_v11 = vadd.f32 %v1883_v10, %v1795_v9  ;;  %v1707_v12 = vpop.f32.mrf.mxu0  ;;  %v1972_v13 = vpop.f32.mrf.mxu3 }
  0xc8   :  { %v1708_v14 = vadd.f32 %v6098_v57, %v1707_v12 }
  0xc9   :  { %v1796_v15 = vpop.f32.mrf.mxu1  ;;  %v6102_v16 = vadd.f32 %v1972_v13, %v1884_v11 }
  0xca   :  { %v1797_v17 = vadd.f32 %v1796_v15, %v1708_v14  ;;  %v738_v14 = vld [vmem:[#allocation3 + $0x1130] sm:$0xff]  ;;  %v763_v15 = vld [vmem:[#allocation3 + $0x11f8] sm:$0xff] }
  0xcb   :  { %v1263_v24 = vpack.c.bf16 %v763_v15, %v738_v14  ;;  %v840_v14 = vld [vmem:[#allocation3 + $0x1460] sm:$0xff]  ;;  %v865_v15 = vld [vmem:[#allocation3 + $0x1528] sm:$0xff] }
  0xce   :  { %v1885_v26 = vpop.f32.mrf.mxu2 }
  0xcf   :  { %v1886_v28 = vadd.f32 %v1885_v26, %v1797_v17  ;;  %v1710_v29 = vpop.f32.mrf.mxu0  ;;  %v1974_v30 = vpop.f32.mrf.mxu3  ;;  %v740_v17 = vld [vmem:[#allocation3 + $0x1140] sm:$0xff] }
  0xd0   :  { %v1711_v33 = vadd.f32 %v6098_v57, %v1710_v29  ;;  %v1264_v29 = vpack.c.bf16 %v764_v20, %v739_v19  ;;  %v841_v19 = vld [vmem:[#allocation3 + $0x1468] sm:$0xff]  ;;  %v866_v20 = vld [vmem:[#allocation3 + $0x1530] sm:$0xff] }
  0xd1   :  { %v1799_v34 = vpop.f32.mrf.mxu1  ;;  %v6105_v36 = vadd.f32 %v1974_v30, %v1886_v28  ;;  %v1265_v28 = vpack.c.bf16 %v765_v18, %v740_v17  ;;  %v839_v17 = vld [vmem:[#allocation3 + $0x1458] sm:$0xff]  ;;  %v864_v18 = vld [vmem:[#allocation3 + $0x1520] sm:$0xff] }
  0xd2   :  { %v1800_v37 = vadd.f32 %v1799_v34, %v1711_v33  ;;  %1749 = vmatmul.bf16.gmra.mxu0 %v1213_v27 }
  0xd3   :  { %1927 = vmatmul.bf16.gmra.mxu2 %v1215_v31 }
  0xd4   :  { %1838 = vmatmul.bf16.gmra.mxu1 %v1214_v32  ;;  %2016 = vmatmul.bf16.gmra.mxu3 %v1216_v35  ;;  %v1266_v32 = vpack.c.bf16 %v766_v22, %v741_v21 }
  0xd6   :  { %v1888_v38 = vpop.f32.mrf.mxu2 }
  0xd7   :  { %v1889_v39 = vadd.f32 %v1888_v38, %v1800_v37  ;;  %v1712_v40 = vpop.f32.mrf.mxu0  ;;  %v1977_v41 = vpop.f32.mrf.mxu3 }
  0xd8   :  { %v1713_v42 = vadd.f32 %v6098_v57, %v1712_v40 }
  0xd9   :  { %v1801_v43 = vpop.f32.mrf.mxu1  ;;  %v6108_v44 = vadd.f32 %v1977_v41, %v1889_v39 }
  0xda   :  { %v1802_v45 = vadd.f32 %v1801_v43, %v1713_v42 }
  0xde   :  { %v1890_v54 = vpop.f32.mrf.mxu2 }
  0xdf   :  { %v1891_v56 = vadd.f32 %v1890_v54, %v1802_v45  ;;  %v1715_v58 = vpop.f32.mrf.mxu0  ;;  %v1979_v59 = vpop.f32.mrf.mxu3  ;;  %v788_v45 = vld [vmem:[#allocation3 + $0x12c0] sm:$0xff] }
  0xe0   :  { %v1716_v62 = vadd.f32 %v6098_v57, %v1715_v58  ;;  %v1288_v54 = vpack.c.bf16 %v813_v46, %v788_v45 }
  0xe1   :  { %v1804_v63 = vpop.f32.mrf.mxu1  ;;  %v6111_v1 = vadd.f32 %v1979_v59, %v1891_v56  ;;  %v1290_v59 = vpack.c.bf16 %v815_v48, %v790_v47 }
  0xe2   :  { %v1805_v2 = vadd.f32 %v1804_v63, %v1716_v62  ;;  %1754 = vmatmul.bf16.gmra.mxu0 %v1238_v55  ;;  %v1291_v63 = vpack.c.bf16 %v816_v52, %v791_v51 }
  0xe3   :  { %1932 = vmatmul.bf16.gmra.mxu2 %v1240_v60  ;;  %v1289_v60 = vpack.c.bf16 %v814_v50, %v789_v49 }
  0xe4   :  { %1843 = vmatmul.bf16.gmra.mxu1 %v1239_v61  ;;  %2021 = vmatmul.bf16.gmra.mxu3 %v1241_v0 }
  0xe6   :  { %v1893_v6 = vpop.f32.mrf.mxu2 }
  0xe7   :  { %v1894_v7 = vadd.f32 %v1893_v6, %v1805_v2  ;;  %v1717_v8 = vpop.f32.mrf.mxu0  ;;  %v1982_v9 = vpop.f32.mrf.mxu3 }
  0xe8   :  { %v1718_v10 = vadd.f32 %v6098_v57, %v1717_v8 }
  0xe9   :  { %v1806_v11 = vpop.f32.mrf.mxu1  ;;  %v6114_v12 = vadd.f32 %v1982_v9, %v1894_v7 }
  0xea   :  { %v1807_v13 = vadd.f32 %v1806_v11, %v1718_v10  ;;  %v838_v11 = vld [vmem:[#allocation3 + $0x1450] sm:$0xff] }
  0xee   :  { %v1895_v23 = vpop.f32.mrf.mxu2 }
  0xef   :  { %v1896_v25 = vadd.f32 %v1895_v23, %v1807_v13  ;;  %v1720_v26 = vpop.f32.mrf.mxu0  ;;  %v1984_v27 = vpop.f32.mrf.mxu3  ;;  %v863_v13 = vld [vmem:[#allocation3 + $0x1518] sm:$0xff] }
  0xf0   :  { %v1721_v30 = vadd.f32 %v6098_v57, %v1720_v26  ;;  %v1313_v22 = vpack.c.bf16 %v863_v13, %v838_v11  ;;  %v1315_v26 = vpack.c.bf16 %v865_v15, %v840_v14  ;;  %v891_v11 = vld [vmem:[#allocation3 + $0x15f8] sm:$0xff]  ;;  %v916_v13 = vld [vmem:[#allocation3 + $0x16c0] sm:$0xff] }
  0xf1   :  { %v1809_v31 = vpop.f32.mrf.mxu1  ;;  %v6117_v33 = vadd.f32 %v1984_v27, %v1896_v25  ;;  %v1314_v27 = vpack.c.bf16 %v864_v18, %v839_v17 }
  0xf2   :  { %v1810_v34 = vadd.f32 %v1809_v31, %v1721_v30  ;;  %1759 = vmatmul.bf16.gmra.mxu0 %v1263_v24  ;;  %v1316_v30 = vpack.c.bf16 %v866_v20, %v841_v19 }
  0xf3   :  { %1937 = vmatmul.bf16.gmra.mxu2 %v1265_v28 }
  0xf4   :  { %1848 = vmatmul.bf16.gmra.mxu1 %v1264_v29  ;;  %2026 = vmatmul.bf16.gmra.mxu3 %v1266_v32  ;;  %v5225_v32 = vld [vmem:[#allocation6 + $0xe0] sm:$0xf] }
  0xf6   :  { %v1898_v35 = vpop.f32.mrf.mxu2 }
  0xf7   :  { %v1899_v37 = vadd.f32 %v1898_v35, %v1810_v34  ;;  %v1722_v38 = vpop.f32.mrf.mxu0  ;;  %v1987_v39 = vpop.f32.mrf.mxu3  ;;  %v5413_v34 = vld [vmem:[#allocation6 + $0x140] sm:$0xf0] }
  0xf8   :  { %v1723_v40 = vadd.f32 %v6098_v57, %v1722_v38  ;;  %v5400_v38 = vld [vmem:[#allocation6 + $0xdc] sm:$0xf] }
  0xf9   :  { %v1811_v41 = vpop.f32.mrf.mxu1  ;;  %v6120_v42 = vadd.f32 %v1987_v39, %v1899_v37  ;;  %v5226_v37 = vor.u32 %v5413_v34, %v5225_v32  ;;  %v5219_v39 = vld [vmem:[#allocation6 + $0x13c] sm:$0xf0] }
  0xfa   :  { %v1812_v43 = vadd.f32 %v1811_v41, %v1723_v40  ;;  %v5222_v40 = vor.u32 %v5400_v38, %v5219_v39  ;;  %v5401_v41 = vld [vmem:[#allocation6 + $0xe4] sm:$0xf]  ;;  %v938_v39 = vld [vmem:[#allocation3 + $0x1770] sm:$0xff] }
  0xfb   :  { %2236 = vmatpush.bf16.xpose.msrb.mxu2 %v5226_v37 }
  0xfc   :  { %2147 = vmatpush.bf16.xpose.msrb.mxu1 %v5222_v40  ;;  %v963_v40 = vld [vmem:[#allocation3 + $0x1838] sm:$0xff] }
  0xfe   :  { %v1900_v53 = vpop.f32.mrf.mxu2 }
  0xff   :  { %v1901_v55 = vadd.f32 %v1900_v53, %v1812_v43  ;;  %v1725_v56 = vpop.f32.mrf.mxu0  ;;  %v1989_v58 = vpop.f32.mrf.mxu3  ;;  %v5227_v43 = vld [vmem:[#allocation6 + $0x144] sm:$0xf0]  ;;  %v888_v53 = vld [vmem:[#allocation3 + $0x15e0] sm:$0xff] }
 0x100   :  { %v1726_v61 = vadd.f32 %v6098_v57, %v1725_v56  ;;  %v5230_v45 = vor.u32 %v5401_v41, %v5227_v43  ;;  %v5387_v56 = vld [vmem:[#allocation6 + $0x70] sm:$0xf0]  ;;  %v940_v41 = vld [vmem:[#allocation3 + $0x1780] sm:$0xff]  ;;  %v965_v43 = vld [vmem:[#allocation3 + $0x1848] sm:$0xff] }
 0x101   :  { %v1814_v62 = vpop.f32.mrf.mxu1  ;;  %v6123_v0 = vadd.f32 %v1989_v58, %v1901_v55  ;;  %v5117_v55 = vld [vmem:[#allocation6 + $0x10] sm:$0xf]  ;;  %v5125_v58 = vld [vmem:[#allocation6 + $0x18] sm:$0xf] }
 0x102   :  { %v1815_v2 = vadd.f32 %v1814_v62, %v1726_v61  ;;  %1764 = vmatmul.bf16.gmra.mxu0 %v1288_v54  ;;  %2325 = vmatpush.bf16.xpose.msrb.mxu3 %v5230_v45  ;;  %v913_v54 = vld [vmem:[#allocation3 + $0x16a8] sm:$0xff]  ;;  %v915_v61 = vld [vmem:[#allocation3 + $0x16b8] sm:$0xff]  ;;  %v5118_v62 = vor.u32 %v5387_v56, %v5117_v55  ;;  %v1365_v55 = vpack.c.bf16 %v965_v43, %v940_v41 }
 0x103   :  { %1942 = vmatmul.bf16.gmra.mxu2 %v1290_v59  ;;  %v1338_v17 = vpack.c.bf16 %v913_v54, %v888_v53  ;;  %v939_v45 = vld [vmem:[#allocation3 + $0x1778] sm:$0xff] }
 0x104   :  { %1853 = vmatmul.bf16.gmra.mxu1 %v1289_v60  ;;  %2031 = vmatmul.bf16.gmra.mxu3 %v1291_v63  ;;  %v890_v60 = vld [vmem:[#allocation3 + $0x15f0] sm:$0xff]  ;;  %v5388_v63 = vld [vmem:[#allocation6 + $0x78] sm:$0xf0] }
 0x105   :  { %2059 = vmatpush.bf16.xpose.msrb.mxu0 %v5118_v62 }
 0x106   :  { %v1903_v3 = vpop.f32.mrf.mxu2 }
 0x107   :  { %v1904_v4 = vadd.f32 %v1903_v3, %v1815_v2  ;;  %v1727_v5 = vpop.f32.mrf.mxu0  ;;  %v1992_v6 = vpop.f32.mrf.mxu3  ;;  %v5126_v2 = vor.u32 %v5388_v63, %v5125_v58  ;;  %v5375_v3 = vld [vmem:[#allocation6 + $0x14] sm:$0xf] }
 0x108   :  { %v1728_v7 = vadd.f32 %v6098_v57, %v1727_v5  ;;  %v5376_v5 = vld [vmem:[#allocation6 + $0x1c] sm:$0xf] }
 0x109   :  { %v1816_v8 = vpop.f32.mrf.mxu1  ;;  %v6126_v9 = vadd.f32 %v1992_v6, %v1904_v4  ;;  %v5119_v4 = vld [vmem:[#allocation6 + $0x74] sm:$0xf0]  ;;  %v889_v6 = vld [vmem:[#allocation3 + $0x15e8] sm:$0xff]  ;;  %2237 = vmatpush.bf16.xpose.msrb.mxu2 %v5126_v2 }
 0x10a   :  { %v1817_v10 = vadd.f32 %v1816_v8, %v1728_v7  ;;  %v914_v7 = vld [vmem:[#allocation3 + $0x16b0] sm:$0xff]  ;;  %v5122_v8 = vor.u32 %v5375_v3, %v5119_v4 }
 0x10c   :  { %2148 = vmatpush.bf16.xpose.msrb.mxu1 %v5122_v8 }
 0x10e   :  { %v1905_v21 = vpop.f32.mrf.mxu2 }
 0x10f   :  { %v1906_v23 = vadd.f32 %v1905_v21, %v1817_v10  ;;  %v1730_v24 = vpop.f32.mrf.mxu0  ;;  %v1994_v25 = vpop.f32.mrf.mxu3  ;;  %v5127_v10 = vld [vmem:[#allocation6 + $0x7c] sm:$0xf0]  ;;  %v1340_v21 = vpack.c.bf16 %v915_v61, %v890_v60 }
 0x110   :  { %v1731_v28 = vadd.f32 %v6098_v57, %v1730_v24  ;;  %v5130_v14 = vor.u32 %v5376_v5, %v5127_v10  ;;  %v192_v10 = vld [vmem:[#allocation3 + $0x20] sm:$0xff] }
 0x111   :  { %v1819_v29 = vpop.f32.mrf.mxu1  ;;  %v6129_v31 = vadd.f32 %v1994_v25, %v1906_v23  ;;  %v1341_v25 = vpack.c.bf16 %v916_v13, %v891_v11  ;;  %v217_v11 = vld [vmem:[#allocation3 + $0xe8] sm:$0xff]  ;;  %v194_v13 = vld [vmem:[#allocation3 + $0x30] sm:$0xff] }
 0x112   :  { %v1820_v35 = vadd.f32 %v1819_v29, %v1731_v28  ;;  %1769 = vmatmul.bf16.gmra.mxu0 %v1313_v22  ;;  %v1339_v22 = vpack.c.bf16 %v914_v7, %v889_v6  ;;  %2326 = vmatpush.bf16.xpose.msrb.mxu3 %v5130_v14  ;;  %v219_v14 = vld [vmem:[#allocation3 + $0xf8] sm:$0xff] }
 0x113   :  { %1947 = vmatmul.bf16.gmra.mxu2 %v1315_v26 }
 0x114   :  { %1858 = vmatmul.bf16.gmra.mxu1 %v1314_v27  ;;  %2036 = vmatmul.bf16.gmra.mxu3 %v1316_v30 }
 0x116   :  { %v1908_v46 = vpop.f32.mrf.mxu2 }
 0x117   :  { %v1909_v47 = vadd.f32 %v1908_v46, %v1820_v35  ;;  %v1732_v48 = vpop.f32.mrf.mxu0  ;;  %v1997_v49 = vpop.f32.mrf.mxu3  ;;  %v964_v46 = vld [vmem:[#allocation3 + $0x1840] sm:$0xff] }
 0x118   :  { %v1733_v50 = vadd.f32 %v6098_v57, %v1732_v48  ;;  %v966_v48 = vld [vmem:[#allocation3 + $0x1850] sm:$0xff]  ;;  %v1364_v56 = vpack.c.bf16 %v964_v46, %v939_v45 }
 0x119   :  { %v1821_v51 = vpop.f32.mrf.mxu1  ;;  %v6132_v52 = vadd.f32 %v1997_v49, %v1909_v47  ;;  %v941_v47 = vld [vmem:[#allocation3 + $0x1788] sm:$0xff] }
 0x11a   :  { %v1822_v59 = vadd.f32 %v1821_v51, %v1733_v50  ;;  %v1363_v50 = vpack.c.bf16 %v963_v40, %v938_v39  ;;  %v1366_v60 = vpack.c.bf16 %v966_v48, %v941_v47  ;;  %v242_v47 = vld [vmem:[#allocation3 + $0x1b0] sm:$0xff]  ;;  %v267_v48 = vld [vmem:[#allocation3 + $0x278] sm:$0xff] }
 0x11e   :  { %v1910_v15 = vpop.f32.mrf.mxu2 }
 0x11f   :  { %v1911_v18 = vadd.f32 %v1910_v15, %v1822_v59  ;;  %v1735_v19 = vpop.f32.mrf.mxu0  ;;  %v1999_v20 = vpop.f32.mrf.mxu3  ;;  %v193_v15 = vld [vmem:[#allocation3 + $0x28] sm:$0xff] }
 0x120   :  { %v1736_v23 = vadd.f32 %v6098_v57, %v1735_v19  ;;  %v220_v19 = vld [vmem:[#allocation3 + $0x100] sm:$0xff] }
 0x121   :  { %v1824_v24 = vpop.f32.mrf.mxu1  ;;  %v6135_v26 = vadd.f32 %v1999_v20, %v1911_v18  ;;  %v195_v18 = vld [vmem:[#allocation3 + $0x38] sm:$0xff] }
 0x122   :  { %v1825_v27 = vadd.f32 %v1824_v24, %v1736_v23  ;;  %1774 = vmatmul.bf16.gmra.mxu0 %v1338_v17  ;;  %v218_v17 = vld [vmem:[#allocation3 + $0xf0] sm:$0xff] }
 0x123   :  { %1952 = vmatmul.bf16.gmra.mxu2 %v1340_v21  ;;  %v992_v21 = vpack.c.bf16 %v217_v11, %v192_v10 }
 0x124   :  { %1863 = vmatmul.bf16.gmra.mxu1 %v1339_v22  ;;  %2041 = vmatmul.bf16.gmra.mxu3 %v1341_v25  ;;  %v994_v25 = vpack.c.bf16 %v219_v14, %v194_v13 }
 0x126   :  { %v1913_v28 = vpop.f32.mrf.mxu2 }
 0x127   :  { %v1914_v29 = vadd.f32 %v1913_v28, %v1825_v27  ;;  %v1737_v30 = vpop.f32.mrf.mxu0  ;;  %v2002_v32 = vpop.f32.mrf.mxu3  ;;  %v993_v27 = vpack.c.bf16 %v218_v17, %v193_v15 }
 0x128   :  { %v1738_v34 = vadd.f32 %v6098_v57, %v1737_v30  ;;  %v995_v30 = vpack.c.bf16 %v220_v19, %v195_v18 }
 0x129   :  { %v1826_v35 = vpop.f32.mrf.mxu1  ;;  %v6138_v37 = vadd.f32 %v2002_v32, %v1914_v29 }
 0x12a   :  { %v1827_v38 = vadd.f32 %v1826_v35, %v1738_v34 }
 0x12e   :  { %v1915_v49 = vpop.f32.mrf.mxu2 }
 0x12f   :  { %v1916_v51 = vadd.f32 %v1915_v49, %v1827_v38  ;;  %v1740_v53 = vpop.f32.mrf.mxu0  ;;  %v2004_v54 = vpop.f32.mrf.mxu3  ;;  %v244_v49 = vld [vmem:[#allocation3 + $0x1c0] sm:$0xff] }
 0x130   :  { %v1741_v58 = vadd.f32 %v6098_v57, %v1740_v53  ;;  %v268_v53 = vld [vmem:[#allocation3 + $0x280] sm:$0xff] }
 0x131   :  { %v1829_v59 = vpop.f32.mrf.mxu1  ;;  %v6141_v61 = vadd.f32 %v2004_v54, %v1916_v51  ;;  %v243_v51 = vld [vmem:[#allocation3 + $0x1b8] sm:$0xff]  ;;  %v245_v54 = vld [vmem:[#allocation3 + $0x1c8] sm:$0xff] }
 0x132   :  { %v1830_v62 = vadd.f32 %v1829_v59, %v1741_v58  ;;  %1779 = vmatmul.bf16.gmra.mxu0 %v1363_v50  ;;  %v269_v50 = vld [vmem:[#allocation3 + $0x288] sm:$0xff]  ;;  %v1017_v58 = vpack.c.bf16 %v267_v48, %v242_v47 }
 0x133   :  { %1957 = vmatmul.bf16.gmra.mxu2 %v1365_v55  ;;  %v270_v55 = vld [vmem:[#allocation3 + $0x290] sm:$0xff] }
 0x134   :  { %1868 = vmatmul.bf16.gmra.mxu1 %v1364_v56  ;;  %2046 = vmatmul.bf16.gmra.mxu3 %v1366_v60 }
 0x136   :  { %v1918_v63 = vpop.f32.mrf.mxu2 }
 0x137   :  { %v1919_v2 = vadd.f32 %v1918_v63, %v1830_v62  ;;  %v1742_v3 = vpop.f32.mrf.mxu0  ;;  %v2007_v4 = vpop.f32.mrf.mxu3  ;;  %v1019_v63 = vpack.c.bf16 %v269_v50, %v244_v49 }
 0x138   :  { %v1743_v5 = vadd.f32 %v6098_v57, %v1742_v3 }
 0x139   :  { %v1831_v6 = vpop.f32.mrf.mxu1  ;;  %v6144_v7 = vadd.f32 %v2007_v4, %v1919_v2  ;;  %v1018_v2 = vpack.c.bf16 %v268_v53, %v243_v51 }
 0x13a   :  { %v1832_v8 = vadd.f32 %v1831_v6, %v1743_v5  ;;  %v1020_v5 = vpack.c.bf16 %v270_v55, %v245_v54 }
 0x13e   :  { %v1920_v20 = vpop.f32.mrf.mxu2 }
 0x13f   :  { %v1921_v22 = vadd.f32 %v1920_v20, %v1832_v8  ;;  %v1745_v23 = vpop.f32.mrf.mxu0  ;;  %v2009_v24 = vpop.f32.mrf.mxu3  ;;  %v292_v20 = vld [vmem:[#allocation3 + $0x340] sm:$0xff] }
 0x140   :  { %v1746_v28 = vadd.f32 %v6098_v57, %v1745_v23  ;;  %v319_v23 = vld [vmem:[#allocation3 + $0x418] sm:$0xff] }
 0x141   :  { %v1834_v29 = vpop.f32.mrf.mxu1  ;;  %v6147_v32 = vadd.f32 %v2009_v24, %v1921_v22  ;;  %v294_v22 = vld [vmem:[#allocation3 + $0x350] sm:$0xff]  ;;  %v293_v24 = vld [vmem:[#allocation3 + $0x348] sm:$0xff] }
 0x142   :  { %v1835_v34 = vadd.f32 %v1834_v29, %v1746_v28  ;;  %2060 = vmatmul.bf16.vlgmr.msrb.gmra.mxu0 %v992_v21  ;;  %v317_v21 = vld [vmem:[#allocation3 + $0x408] sm:$0xff]  ;;  %v320_v28 = vld [vmem:[#allocation3 + $0x420] sm:$0xff] }
 0x143   :  { %2238 = vmatmul.bf16.vlgmr.msrb.gmra.mxu2 %v994_v25  ;;  %v318_v25 = vld [vmem:[#allocation3 + $0x410] sm:$0xff] }
 0x144   :  { %2149 = vmatmul.bf16.vlgmr.msrb.gmra.mxu1 %v993_v27  ;;  %2327 = vmatmul.bf16.vlgmr.msrb.gmra.mxu3 %v995_v30  ;;  %v295_v27 = vld [vmem:[#allocation3 + $0x358] sm:$0xff]  ;;  %v1042_v30 = vpack.c.bf16 %v317_v21, %v292_v20 }
 0x146   :  { %v1923_v35 = vpop.f32.mrf.mxu2 }
 0x147   :  { %v1924_v38 = vadd.f32 %v1923_v35, %v1835_v34  ;;  %v1747_v39 = vpop.f32.mrf.mxu0  ;;  %v2012_v40 = vpop.f32.mrf.mxu3 }
 0x148   :  { %v1748_v41 = vadd.f32 %v6098_v57, %v1747_v39  ;;  %v1044_v39 = vpack.c.bf16 %v319_v23, %v294_v22 }
 0x149   :  { %v1836_v43 = vpop.f32.mrf.mxu1  ;;  %v6150_v45 = vadd.f32 %v2012_v40, %v1924_v38  ;;  %v1043_v40 = vpack.c.bf16 %v318_v25, %v293_v24 }
 0x14a   :  { %v1837_v46 = vadd.f32 %v1836_v43, %v1748_v41 }
 0x14e   :  { %v1925_v56 = vpop.f32.mrf.mxu2 }
 0x14f   :  { %v1926_v59 = vadd.f32 %v1925_v56, %v1837_v46  ;;  %v1750_v60 = vpop.f32.mrf.mxu0  ;;  %v2014_v62 = vpop.f32.mrf.mxu3  ;;  %v1045_v46 = vpack.c.bf16 %v320_v28, %v295_v27 }
 0x150   :  { %v1751_v3 = vadd.f32 %v6098_v57, %v1750_v60  ;;  %v367_v60 = vld [vmem:[#allocation3 + $0x598] sm:$0xff] }
 0x151   :  { %v1839_v4 = vpop.f32.mrf.mxu1  ;;  %v6153_v6 = vadd.f32 %v2014_v62, %v1926_v59  ;;  %v342_v59 = vld [vmem:[#allocation3 + $0x4d0] sm:$0xff]  ;;  %v344_v62 = vld [vmem:[#allocation3 + $0x4e0] sm:$0xff] }
 0x152   :  { %v1840_v8 = vadd.f32 %v1839_v4, %v1751_v3  ;;  %2065 = vmatmul.bf16.gmra.mxu0 %v1017_v58  ;;  %v368_v3 = vld [vmem:[#allocation3 + $0x5a0] sm:$0xff]  ;;  %v345_v4 = vld [vmem:[#allocation3 + $0x4e8] sm:$0xff] }
 0x153   :  { %2243 = vmatmul.bf16.gmra.mxu2 %v1019_v63  ;;  %v369_v63 = vld [vmem:[#allocation3 + $0x5a8] sm:$0xff] }
 0x154   :  { %2154 = vmatmul.bf16.gmra.mxu1 %v1018_v2  ;;  %2332 = vmatmul.bf16.gmra.mxu3 %v1020_v5  ;;  %v343_v2 = vld [vmem:[#allocation3 + $0x4d8] sm:$0xff]  ;;  %v370_v5 = vld [vmem:[#allocation3 + $0x5b0] sm:$0xff] }
 0x155   :  { %v1070_v21 = vpack.c.bf16 %v370_v5, %v345_v4 }
 0x156   :  { %v1928_v10 = vpop.f32.mrf.mxu2 }
 0x157   :  { %v1929_v11 = vadd.f32 %v1928_v10, %v1840_v8  ;;  %v1752_v13 = vpop.f32.mrf.mxu0  ;;  %v2017_v14 = vpop.f32.mrf.mxu3  ;;  %v1067_v10 = vpack.c.bf16 %v367_v60, %v342_v59 }
 0x158   :  { %v1753_v15 = vadd.f32 %v6098_v57, %v1752_v13 }
 0x159   :  { %v1841_v17 = vpop.f32.mrf.mxu1  ;;  %v6156_v18 = vadd.f32 %v2017_v14, %v1929_v11 }
 0x15a   :  { %v1842_v19 = vadd.f32 %v1841_v17, %v1753_v15  ;;  %v1069_v15 = vpack.c.bf16 %v369_v63, %v344_v62  ;;  %v1068_v17 = vpack.c.bf16 %v368_v3, %v343_v2 }
 0x15e   :  { %v1930_v29 = vpop.f32.mrf.mxu2 }
 0x15f   :  { %v1931_v34 = vadd.f32 %v1930_v29, %v1842_v19  ;;  %v1755_v35 = vpop.f32.mrf.mxu0  ;;  %v2019_v38 = vpop.f32.mrf.mxu3 }
 0x160   :  { %v1756_v41 = vadd.f32 %v6098_v57, %v1755_v35 }
 0x161   :  { %v1844_v43 = vpop.f32.mrf.mxu1  ;;  %v6159_v47 = vadd.f32 %v2019_v38, %v1931_v34  ;;  %v392_v38 = vld [vmem:[#allocation3 + $0x660] sm:$0xff] }
 0x162   :  { %v1845_v48 = vadd.f32 %v1844_v43, %v1756_v41  ;;  %2070 = vmatmul.bf16.gmra.mxu0 %v1042_v30  ;;  %v419_v41 = vld [vmem:[#allocation3 + $0x738] sm:$0xff]  ;;  %v393_v43 = vld [vmem:[#allocation3 + $0x668] sm:$0xff] }
 0x163   :  { %2248 = vmatmul.bf16.gmra.mxu2 %v1044_v39  ;;  %v417_v39 = vld [vmem:[#allocation3 + $0x728] sm:$0xff] }
 0x164   :  { %2159 = vmatmul.bf16.gmra.mxu1 %v1043_v40  ;;  %2337 = vmatmul.bf16.gmra.mxu3 %v1045_v46  ;;  %v394_v40 = vld [vmem:[#allocation3 + $0x670] sm:$0xff] }
 0x165   :  { %v418_v46 = vld [vmem:[#allocation3 + $0x730] sm:$0xff] }
 0x166   :  { %v1933_v49 = vpop.f32.mrf.mxu2  ;;  %v1093_v59 = vpack.c.bf16 %v418_v46, %v393_v43 }
 0x167   :  { %v1934_v50 = vadd.f32 %v1933_v49, %v1845_v48  ;;  %v1757_v51 = vpop.f32.mrf.mxu0  ;;  %v2022_v53 = vpop.f32.mrf.mxu3  ;;  %v395_v48 = vld [vmem:[#allocation3 + $0x678] sm:$0xff]  ;;  %v420_v49 = vld [vmem:[#allocation3 + $0x740] sm:$0xff] }
 0x168   :  { %v1758_v54 = vadd.f32 %v6098_v57, %v1757_v51  ;;  %v1092_v51 = vpack.c.bf16 %v417_v39, %v392_v38  ;;  %v1095_v63 = vpack.c.bf16 %v420_v49, %v395_v48 }
 0x169   :  { %v1846_v55 = vpop.f32.mrf.mxu1  ;;  %v6162_v56 = vadd.f32 %v2022_v53, %v1934_v50 }
 0x16a   :  { %v1847_v58 = vadd.f32 %v1846_v55, %v1758_v54 }
 0x16e   :  { %v1935_v8 = vpop.f32.mrf.mxu2 }
 0x16f   :  { %v1936_v11 = vadd.f32 %v1935_v8, %v1847_v58  ;;  %v1760_v13 = vpop.f32.mrf.mxu0  ;;  %v2024_v14 = vpop.f32.mrf.mxu3  ;;  %v1094_v58 = vpack.c.bf16 %v419_v41, %v394_v40 }
 0x170   :  { %v1761_v19 = vadd.f32 %v6098_v57, %v1760_v13 }
 0x171   :  { %v1849_v20 = vpop.f32.mrf.mxu1  ;;  %v6165_v22 = vadd.f32 %v2024_v14, %v1936_v11 }
 0x172   :  { %v1850_v23 = vadd.f32 %v1849_v20, %v1761_v19  ;;  %2075 = vmatmul.bf16.gmra.mxu0 %v1067_v10  ;;  %v467_v19 = vld [vmem:[#allocation3 + $0x8b8] sm:$0xff]  ;;  %v444_v20 = vld [vmem:[#allocation3 + $0x800] sm:$0xff] }
 0x173   :  { %2253 = vmatmul.bf16.gmra.mxu2 %v1069_v15 }
 0x174   :  { %2164 = vmatmul.bf16.gmra.mxu1 %v1068_v17  ;;  %2342 = vmatmul.bf16.gmra.mxu3 %v1070_v21  ;;  %v442_v17 = vld [vmem:[#allocation3 + $0x7f0] sm:$0xff]  ;;  %v469_v21 = vld [vmem:[#allocation3 + $0x8c8] sm:$0xff] }
 0x175   :  { %v1119_v39 = vpack.c.bf16 %v469_v21, %v444_v20 }
 0x176   :  { %v1938_v24 = vpop.f32.mrf.mxu2 }
 0x177   :  { %v1939_v25 = vadd.f32 %v1938_v24, %v1850_v23  ;;  %v1762_v27 = vpop.f32.mrf.mxu0  ;;  %v2027_v28 = vpop.f32.mrf.mxu3  ;;  %v443_v23 = vld [vmem:[#allocation3 + $0x7f8] sm:$0xff]  ;;  %v468_v24 = vld [vmem:[#allocation3 + $0x8c0] sm:$0xff] }
 0x178   :  { %v1763_v29 = vadd.f32 %v6098_v57, %v1762_v27  ;;  %v470_v27 = vld [vmem:[#allocation3 + $0x8d0] sm:$0xff]  ;;  %v1118_v40 = vpack.c.bf16 %v468_v24, %v443_v23 }
 0x179   :  { %v1851_v30 = vpop.f32.mrf.mxu1  ;;  %v6168_v34 = vadd.f32 %v2027_v28, %v1939_v25  ;;  %v445_v25 = vld [vmem:[#allocation3 + $0x808] sm:$0xff] }
 0x17a   :  { %v1852_v35 = vadd.f32 %v1851_v30, %v1763_v29  ;;  %v1117_v29 = vpack.c.bf16 %v467_v19, %v442_v17  ;;  %v1120_v46 = vpack.c.bf16 %v470_v27, %v445_v25 }
 0x17e   :  { %v1940_v50 = vpop.f32.mrf.mxu2 }
 0x17f   :  { %v1941_v53 = vadd.f32 %v1940_v50, %v1852_v35  ;;  %v1765_v54 = vpop.f32.mrf.mxu0  ;;  %v2029_v55 = vpop.f32.mrf.mxu3 }
 0x180   :  { %v1766_v60 = vadd.f32 %v6098_v57, %v1765_v54 }
 0x181   :  { %v1854_v62 = vpop.f32.mrf.mxu1  ;;  %v6171_v2 = vadd.f32 %v2029_v55, %v1941_v53 }
 0x182   :  { %v1855_v3 = vadd.f32 %v1854_v62, %v1766_v60  ;;  %2080 = vmatmul.bf16.gmra.mxu0 %v1092_v51  ;;  %v492_v62 = vld [vmem:[#allocation3 + $0x980] sm:$0xff] }
 0x183   :  { %2258 = vmatmul.bf16.gmra.mxu2 %v1094_v58 }
 0x184   :  { %2169 = vmatmul.bf16.gmra.mxu1 %v1093_v59  ;;  %2347 = vmatmul.bf16.gmra.mxu3 %v1095_v63  ;;  %v517_v63 = vld [vmem:[#allocation3 + $0xa48] sm:$0xff] }
 0x186   :  { %v1943_v4 = vpop.f32.mrf.mxu2 }
 0x187   :  { %v1944_v5 = vadd.f32 %v1943_v4, %v1855_v3  ;;  %v1767_v8 = vpop.f32.mrf.mxu0  ;;  %v2032_v10 = vpop.f32.mrf.mxu3  ;;  %v494_v3 = vld [vmem:[#allocation3 + $0x990] sm:$0xff]  ;;  %v519_v4 = vld [vmem:[#allocation3 + $0xa58] sm:$0xff] }
 0x188   :  { %v1768_v11 = vadd.f32 %v6098_v57, %v1767_v8  ;;  %v518_v8 = vld [vmem:[#allocation3 + $0xa50] sm:$0xff]  ;;  %v1144_v21 = vpack.c.bf16 %v519_v4, %v494_v3 }
 0x189   :  { %v1856_v13 = vpop.f32.mrf.mxu1  ;;  %v6174_v14 = vadd.f32 %v2032_v10, %v1944_v5  ;;  %v493_v5 = vld [vmem:[#allocation3 + $0x988] sm:$0xff]  ;;  %v495_v10 = vld [vmem:[#allocation3 + $0x998] sm:$0xff] }
 0x18a   :  { %v1857_v15 = vadd.f32 %v1856_v13, %v1768_v11  ;;  %v520_v11 = vld [vmem:[#allocation3 + $0xa60] sm:$0xff]  ;;  %v1143_v23 = vpack.c.bf16 %v518_v8, %v493_v5 }
 0x18b   :  { %v1145_v27 = vpack.c.bf16 %v520_v11, %v495_v10 }
 0x18e   :  { %v1945_v28 = vpop.f32.mrf.mxu2 }
 0x18f   :  { %v1946_v30 = vadd.f32 %v1945_v28, %v1857_v15  ;;  %v1770_v35 = vpop.f32.mrf.mxu0  ;;  %v2034_v38 = vpop.f32.mrf.mxu3  ;;  %v1142_v15 = vpack.c.bf16 %v517_v63, %v492_v62 }
 0x190   :  { %v1771_v41 = vadd.f32 %v6098_v57, %v1770_v35 }
 0x191   :  { %v1859_v43 = vpop.f32.mrf.mxu1  ;;  %v6177_v48 = vadd.f32 %v2034_v38, %v1946_v30 }
 0x192   :  { %v1860_v49 = vadd.f32 %v1859_v43, %v1771_v41  ;;  %2085 = vmatmul.bf16.gmra.mxu0 %v1117_v29 }
 0x193   :  { %2263 = vmatmul.bf16.gmra.mxu2 %v1119_v39 }
 0x194   :  { %2174 = vmatmul.bf16.gmra.mxu1 %v1118_v40  ;;  %2352 = vmatmul.bf16.gmra.mxu3 %v1120_v46 }
 0x196   :  { %v1948_v50 = vpop.f32.mrf.mxu2 }
 0x197   :  { %v1949_v51 = vadd.f32 %v1948_v50, %v1860_v49  ;;  %v1772_v53 = vpop.f32.mrf.mxu0  ;;  %v2037_v54 = vpop.f32.mrf.mxu3  ;;  %v542_v49 = vld [vmem:[#allocation3 + $0xb10] sm:$0xff]  ;;  %v567_v50 = vld [vmem:[#allocation3 + $0xbd8] sm:$0xff] }
 0x198   :  { %v1773_v55 = vadd.f32 %v6098_v57, %v1772_v53  ;;  %v569_v53 = vld [vmem:[#allocation3 + $0xbe8] sm:$0xff]  ;;  %v1167_v63 = vpack.c.bf16 %v567_v50, %v542_v49  ;;  %v595_v49 = vld [vmem:[#allocation3 + $0xcb8] sm:$0xff]  ;;  %v620_v50 = vld [vmem:[#allocation3 + $0xd80] sm:$0xff] }
 0x199   :  { %v1861_v58 = vpop.f32.mrf.mxu1  ;;  %v6180_v59 = vadd.f32 %v2037_v54, %v1949_v51  ;;  %v544_v51 = vld [vmem:[#allocation3 + $0xb20] sm:$0xff]  ;;  %v543_v54 = vld [vmem:[#allocation3 + $0xb18] sm:$0xff] }
 0x19a   :  { %v1862_v60 = vadd.f32 %v1861_v58, %v1773_v55  ;;  %v568_v55 = vld [vmem:[#allocation3 + $0xbe0] sm:$0xff]  ;;  %v545_v58 = vld [vmem:[#allocation3 + $0xb28] sm:$0xff]  ;;  %v1169_v8 = vpack.c.bf16 %v569_v53, %v544_v51 }
 0x19b   :  { %v1168_v10 = vpack.c.bf16 %v568_v55, %v543_v54 }
 0x19e   :  { %v1950_v13 = vpop.f32.mrf.mxu2 }
 0x19f   :  { %v1951_v17 = vadd.f32 %v1950_v13, %v1862_v60  ;;  %v1775_v19 = vpop.f32.mrf.mxu0  ;;  %v2039_v20 = vpop.f32.mrf.mxu3  ;;  %v570_v60 = vld [vmem:[#allocation3 + $0xbf0] sm:$0xff] }
 0x1a0   :  { %v1776_v24 = vadd.f32 %v6098_v57, %v1775_v19 }
 0x1a1   :  { %v1864_v25 = vpop.f32.mrf.mxu1  ;;  %v6183_v28 = vadd.f32 %v2039_v20, %v1951_v17 }
 0x1a2   :  { %v1865_v29 = vadd.f32 %v1864_v25, %v1776_v24  ;;  %2090 = vmatmul.bf16.gmra.mxu0 %v1142_v15  ;;  %v1170_v15 = vpack.c.bf16 %v570_v60, %v545_v58 }
 0x1a3   :  { %2268 = vmatmul.bf16.gmra.mxu2 %v1144_v21 }
 0x1a4   :  { %2179 = vmatmul.bf16.gmra.mxu1 %v1143_v23  ;;  %2357 = vmatmul.bf16.gmra.mxu3 %v1145_v27 }
 0x1a6   :  { %v1953_v30 = vpop.f32.mrf.mxu2 }
 0x1a7   :  { %v1954_v35 = vadd.f32 %v1953_v30, %v1865_v29  ;;  %v1777_v38 = vpop.f32.mrf.mxu0  ;;  %v2042_v39 = vpop.f32.mrf.mxu3 }
 0x1a8   :  { %v1778_v40 = vadd.f32 %v6098_v57, %v1777_v38  ;;  %v5708_v57 = vld [vmem:[#allocation8] ss:$0 sm:$0xff]  ;;  %v617_v38 = vld [vmem:[#allocation3 + $0xd68] sm:$0xff] }
 0x1a9   :  { %v1866_v41 = vpop.f32.mrf.mxu1  ;;  %v6186_v43 = vadd.f32 %v2042_v39, %v1954_v35  ;;  %v592_v35 = vld [vmem:[#allocation3 + $0xca0] sm:$0xff]  ;;  %v594_v39 = vld [vmem:[#allocation3 + $0xcb0] sm:$0xff] }
 0x1aa   :  { %v1867_v46 = vadd.f32 %v1866_v41, %v1778_v40  ;;  %v619_v40 = vld [vmem:[#allocation3 + $0xd78] sm:$0xff]  ;;  %v593_v41 = vld [vmem:[#allocation3 + $0xca8] sm:$0xff]  ;;  %v1192_v53 = vpack.c.bf16 %v617_v38, %v592_v35  ;;  %v670_v38 = vld [vmem:[#allocation3 + $0xf10] sm:$0xff] }
 0x1ab   :  { %v1194_v60 = vpack.c.bf16 %v619_v40, %v594_v39  ;;  %v645_v35 = vld [vmem:[#allocation3 + $0xe48] sm:$0xff] }
 0x1ae   :  { %v1955_v62 = vpop.f32.mrf.mxu2 }
 0x1af   :  { %v1956_v3 = vadd.f32 %v1955_v62, %v1867_v46  ;;  %v1780_v4 = vpop.f32.mrf.mxu0  ;;  %v2044_v5 = vpop.f32.mrf.mxu3  ;;  %v618_v46 = vld [vmem:[#allocation3 + $0xd70] sm:$0xff] }
 0x1b0   :  { %v1781_v11 = vadd.f32 %v5708_v57, %v1780_v4  ;;  %v1193_v62 = vpack.c.bf16 %v618_v46, %v593_v41  ;;  %v1195_v4 = vpack.c.bf16 %v620_v50, %v595_v49 }
 0x1b1   :  { %v1869_v13 = vpop.f32.mrf.mxu1  ;;  %v6188_v17 = vadd.f32 %v2044_v5, %v1956_v3 }
 0x1b2   :  { %v1870_v19 = vadd.f32 %v1869_v13, %v1781_v11  ;;  %2095 = vmatmul.bf16.gmra.mxu0 %v1167_v63 }
 0x1b3   :  { %2273 = vmatmul.bf16.gmra.mxu2 %v1169_v8 }
 0x1b4   :  { %2184 = vmatmul.bf16.gmra.mxu1 %v1168_v10  ;;  %2362 = vmatmul.bf16.gmra.mxu3 %v1170_v15 }
 0x1b6   :  { %v1958_v20 = vpop.f32.mrf.mxu2 }
 0x1b7   :  { %v1959_v21 = vadd.f32 %v1958_v20, %v1870_v19  ;;  %v1782_v23 = vpop.f32.mrf.mxu0  ;;  %v2047_v24 = vpop.f32.mrf.mxu3 }
 0x1b8   :  { %v1783_v25 = vadd.f32 %v5708_v57, %v1782_v23  ;;  %v667_v23 = vld [vmem:[#allocation3 + $0xef8] sm:$0xff] }
 0x1b9   :  { %v1871_v27 = vpop.f32.mrf.mxu1  ;;  %v6190_v29 = vadd.f32 %v2047_v24, %v1959_v21  ;;  %v644_v24 = vld [vmem:[#allocation3 + $0xe40] sm:$0xff] }
 0x1ba   :  { %v1872_v30 = vadd.f32 %v1871_v27, %v1783_v25  ;;  %v669_v25 = vld [vmem:[#allocation3 + $0xf08] sm:$0xff]  ;;  %v643_v27 = vld [vmem:[#allocation3 + $0xe38] sm:$0xff] }
 0x1bb   :  { %v1219_v50 = vpack.c.bf16 %v669_v25, %v644_v24 }
 0x1be   :  { %v1960_v51 = vpop.f32.mrf.mxu2 }
 0x1bf   :  { %v1961_v54 = vadd.f32 %v1960_v51, %v1872_v30  ;;  %v2049_v55 = vpop.f32.mrf.mxu3  ;;  %v2061_v58 = vpop.f32.mrf.mxu0  ;;  %v668_v30 = vld [vmem:[#allocation3 + $0xf00] sm:$0xff] }
 0x1c0   :  { %v2062_v63 = vadd.f32 %v2061_v58, %v6102_v16  ;;  %v642_v16 = vld [vmem:[#allocation3 + $0xe30] sm:$0xff]  ;;  %v1218_v51 = vpack.c.bf16 %v668_v30, %v643_v27 }
 0x1c1   :  { %v2150_v3 = vpop.f32.mrf.mxu1  ;;  %v6193_v5 = vadd.f32 %v2049_v55, %v1961_v54  ;;  %v1217_v40 = vpack.c.bf16 %v667_v23, %v642_v16  ;;  %v1220_v54 = vpack.c.bf16 %v670_v38, %v645_v35  ;;  %v695_v16 = vld [vmem:[#allocation3 + $0xfd8] sm:$0xff]  ;;  %v720_v23 = vld [vmem:[#allocation3 + $0x10a0] sm:$0xff] }
 0x1c2   :  { %v2151_v8 = vadd.f32 %v2150_v3, %v2062_v63  ;;  %2100 = vmatmul.bf16.gmra.mxu0 %v1192_v53 }
 0x1c3   :  { %2278 = vmatmul.bf16.gmra.mxu2 %v1194_v60 }
 0x1c4   :  { %2189 = vmatmul.bf16.gmra.mxu1 %v1193_v62  ;;  %2367 = vmatmul.bf16.gmra.mxu3 %v1195_v4 }
 0x1c6   :  { %v2239_v10 = vpop.f32.mrf.mxu2 }
 0x1c7   :  { %v2240_v57 = vadd.f32 %v2239_v10, %v2151_v8  ;;  %v2063_v11 = vpop.f32.mrf.mxu0  ;;  %v2328_v13 = vpop.f32.mrf.mxu3 }
 0x1c8   :  { %v2064_v15 = vadd.f32 %v2063_v11, %v6105_v36  ;;  %v717_v11 = vld [vmem:[#allocation3 + $0x1088] sm:$0xff] }
 0x1c9   :  { %v2152_v19 = vpop.f32.mrf.mxu1  ;;  %v6196_v20 = vadd.f32 %v2328_v13, %v2240_v57  ;;  %v694_v13 = vld [vmem:[#allocation3 + $0xfd0] sm:$0xff] }
 0x1ca   :  { %v2153_v21 = vadd.f32 %v2152_v19, %v2064_v15  ;;  %v719_v15 = vld [vmem:[#allocation3 + $0x1098] sm:$0xff]  ;;  %v693_v19 = vld [vmem:[#allocation3 + $0xfc8] sm:$0xff] }
 0x1cb   :  { %v1244_v38 = vpack.c.bf16 %v719_v15, %v694_v13  ;;  %v768_v13 = vld [vmem:[#allocation3 + $0x1220] sm:$0xff]  ;;  %v745_v15 = vld [vmem:[#allocation3 + $0x1168] sm:$0xff] }
 0x1ce   :  { %v2241_v39 = vpop.f32.mrf.mxu2 }
 0x1cf   :  { %v2242_v41 = vadd.f32 %v2241_v39, %v2153_v21  ;;  %v2066_v46 = vpop.f32.mrf.mxu0  ;;  %v2330_v49 = vpop.f32.mrf.mxu3  ;;  %v718_v21 = vld [vmem:[#allocation3 + $0x1090] sm:$0xff] }
 0x1d0   :  { %v2067_v36 = vadd.f32 %v2066_v46, %v6108_v44  ;;  %v692_v44 = vld [vmem:[#allocation3 + $0xfc0] sm:$0xff]  ;;  %v1243_v39 = vpack.c.bf16 %v718_v21, %v693_v19  ;;  %v770_v19 = vld [vmem:[#allocation3 + $0x1230] sm:$0xff] }
 0x1d1   :  { %v2155_v53 = vpop.f32.mrf.mxu1  ;;  %v6199_v55 = vadd.f32 %v2330_v49, %v2242_v41  ;;  %v1242_v25 = vpack.c.bf16 %v717_v11, %v692_v44  ;;  %v1245_v41 = vpack.c.bf16 %v720_v23, %v695_v16  ;;  %v769_v44 = vld [vmem:[#allocation3 + $0x1228] sm:$0xff]  ;;  %v743_v11 = vld [vmem:[#allocation3 + $0x1158] sm:$0xff] }
 0x1d2   :  { %v2156_v58 = vadd.f32 %v2155_v53, %v2067_v36  ;;  %2105 = vmatmul.bf16.gmra.mxu0 %v1217_v40 }
 0x1d3   :  { %2283 = vmatmul.bf16.gmra.mxu2 %v1219_v50  ;;  %v5233_v50 = vld [vmem:[#allocation6 + $0xe8] sm:$0xf] }
 0x1d4   :  { %2194 = vmatmul.bf16.gmra.mxu1 %v1218_v51  ;;  %2372 = vmatmul.bf16.gmra.mxu3 %v1220_v54  ;;  %v5414_v51 = vld [vmem:[#allocation6 + $0x148] sm:$0xf0] }
 0x1d5   :  { %v5234_v36 = vor.u32 %v5414_v51, %v5233_v50 }
 0x1d6   :  { %v2244_v60 = vpop.f32.mrf.mxu2 }
 0x1d7   :  { %v2245_v62 = vadd.f32 %v2244_v60, %v2156_v58  ;;  %v2068_v63 = vpop.f32.mrf.mxu0  ;;  %v2333_v3 = vpop.f32.mrf.mxu3  ;;  %2414 = vmatpush.bf16.xpose.msra.mxu0 %v5234_v36 }
 0x1d8   :  { %v2069_v4 = vadd.f32 %v2068_v63, %v6111_v1 }
 0x1d9   :  { %v2157_v8 = vpop.f32.mrf.mxu1  ;;  %v6202_v10 = vadd.f32 %v2333_v3, %v2245_v62 }
 0x1da   :  { %v2158_v57 = vadd.f32 %v2157_v8, %v2069_v4  ;;  %v742_v4 = vld [vmem:[#allocation3 + $0x1150] sm:$0xff]  ;;  %v767_v8 = vld [vmem:[#allocation3 + $0x1218] sm:$0xff] }
 0x1db   :  { %v1267_v16 = vpack.c.bf16 %v767_v8, %v742_v4  ;;  %v795_v4 = vld [vmem:[#allocation3 + $0x12f8] sm:$0xff]  ;;  %v820_v8 = vld [vmem:[#allocation3 + $0x13c0] sm:$0xff] }
 0x1de   :  { %v2246_v24 = vpop.f32.mrf.mxu2 }
 0x1df   :  { %v2247_v27 = vadd.f32 %v2246_v24, %v2158_v57  ;;  %v2071_v30 = vpop.f32.mrf.mxu0  ;;  %v2335_v35 = vpop.f32.mrf.mxu3  ;;  %v744_v57 = vld [vmem:[#allocation3 + $0x1160] sm:$0xff] }
 0x1e0   :  { %v2072_v1 = vadd.f32 %v2071_v30, %v6114_v12  ;;  %v1268_v30 = vpack.c.bf16 %v768_v13, %v743_v11 }
 0x1e1   :  { %v2160_v40 = vpop.f32.mrf.mxu1  ;;  %v6205_v46 = vadd.f32 %v2335_v35, %v2247_v27  ;;  %v1269_v27 = vpack.c.bf16 %v769_v44, %v744_v57 }
 0x1e2   :  { %v2161_v49 = vadd.f32 %v2160_v40, %v2072_v1  ;;  %2110 = vmatmul.bf16.gmra.mxu0 %v1242_v25 }
 0x1e3   :  { %2288 = vmatmul.bf16.gmra.mxu2 %v1244_v38  ;;  %v1270_v38 = vpack.c.bf16 %v770_v19, %v745_v15 }
 0x1e4   :  { %2199 = vmatmul.bf16.gmra.mxu1 %v1243_v39  ;;  %2377 = vmatmul.bf16.gmra.mxu3 %v1245_v41 }
 0x1e6   :  { %v2249_v53 = vpop.f32.mrf.mxu2 }
 0x1e7   :  { %v2250_v54 = vadd.f32 %v2249_v53, %v2161_v49  ;;  %v2073_v58 = vpop.f32.mrf.mxu0  ;;  %v2338_v60 = vpop.f32.mrf.mxu3 }
 0x1e8   :  { %v2074_v62 = vadd.f32 %v2073_v58, %v6117_v33  ;;  %v817_v58 = vld [vmem:[#allocation3 + $0x13a8] sm:$0xff] }
 0x1e9   :  { %v2162_v12 = vpop.f32.mrf.mxu1  ;;  %v6208_v63 = vadd.f32 %v2338_v60, %v2250_v54  ;;  %v794_v60 = vld [vmem:[#allocation3 + $0x12f0] sm:$0xff] }
 0x1ea   :  { %v2163_v3 = vadd.f32 %v2162_v12, %v2074_v62  ;;  %v819_v62 = vld [vmem:[#allocation3 + $0x13b8] sm:$0xff]  ;;  %v793_v12 = vld [vmem:[#allocation3 + $0x12e8] sm:$0xff] }
 0x1eb   :  { %v1294_v19 = vpack.c.bf16 %v819_v62, %v794_v60 }
 0x1ee   :  { %v2251_v21 = vpop.f32.mrf.mxu2 }
 0x1ef   :  { %v2252_v23 = vadd.f32 %v2251_v21, %v2163_v3  ;;  %v2076_v24 = vpop.f32.mrf.mxu0  ;;  %v2340_v25 = vpop.f32.mrf.mxu3  ;;  %v818_v3 = vld [vmem:[#allocation3 + $0x13b0] sm:$0xff] }
 0x1f0   :  { %v2077_v33 = vadd.f32 %v2076_v24, %v6120_v42  ;;  %v792_v42 = vld [vmem:[#allocation3 + $0x12e0] sm:$0xff]  ;;  %v1293_v21 = vpack.c.bf16 %v818_v3, %v793_v12 }
 0x1f1   :  { %v2165_v35 = vpop.f32.mrf.mxu1  ;;  %v6211_v39 = vadd.f32 %v2340_v25, %v2252_v23  ;;  %v1292_v44 = vpack.c.bf16 %v817_v58, %v792_v42  ;;  %v1295_v23 = vpack.c.bf16 %v820_v8, %v795_v4  ;;  %v845_v42 = vld [vmem:[#allocation3 + $0x1488] sm:$0xff]  ;;  %v870_v58 = vld [vmem:[#allocation3 + $0x1550] sm:$0xff] }
 0x1f2   :  { %v2166_v1 = vadd.f32 %v2165_v35, %v2077_v33  ;;  %2115 = vmatmul.bf16.gmra.mxu0 %v1267_v16 }
 0x1f3   :  { %2293 = vmatmul.bf16.gmra.mxu2 %v1269_v27 }
 0x1f4   :  { %2204 = vmatmul.bf16.gmra.mxu1 %v1268_v30  ;;  %2382 = vmatmul.bf16.gmra.mxu3 %v1270_v38 }
 0x1f6   :  { %v2254_v40 = vpop.f32.mrf.mxu2 }
 0x1f7   :  { %v2255_v41 = vadd.f32 %v2254_v40, %v2166_v1  ;;  %v2078_v49 = vpop.f32.mrf.mxu0  ;;  %v2343_v50 = vpop.f32.mrf.mxu3 }
 0x1f8   :  { %v2079_v51 = vadd.f32 %v2078_v49, %v6123_v0  ;;  %v867_v49 = vld [vmem:[#allocation3 + $0x1538] sm:$0xff] }
 0x1f9   :  { %v2167_v36 = vpop.f32.mrf.mxu1  ;;  %v6214_v53 = vadd.f32 %v2343_v50, %v2255_v41  ;;  %v844_v50 = vld [vmem:[#allocation3 + $0x1480] sm:$0xff] }
 0x1fa   :  { %v2168_v54 = vadd.f32 %v2167_v36, %v2079_v51  ;;  %v869_v51 = vld [vmem:[#allocation3 + $0x1548] sm:$0xff]  ;;  %v843_v36 = vld [vmem:[#allocation3 + $0x1478] sm:$0xff] }
 0x1fb   :  { %v1319_v8 = vpack.c.bf16 %v869_v51, %v844_v50  ;;  %v892_v50 = vld [vmem:[#allocation3 + $0x1600] sm:$0xff]  ;;  %v917_v51 = vld [vmem:[#allocation3 + $0x16c8] sm:$0xff] }
 0x1fe   :  { %v2256_v57 = vpop.f32.mrf.mxu2 }
 0x1ff   :  { %v2257_v11 = vadd.f32 %v2256_v57, %v2168_v54  ;;  %v2081_v13 = vpop.f32.mrf.mxu0  ;;  %v2345_v15 = vpop.f32.mrf.mxu3  ;;  %v868_v54 = vld [vmem:[#allocation3 + $0x1540] sm:$0xff] }
 0x200   :  { %v2082_v0 = vadd.f32 %v2081_v13, %v6126_v9  ;;  %v842_v9 = vld [vmem:[#allocation3 + $0x1470] sm:$0xff]  ;;  %v1318_v57 = vpack.c.bf16 %v868_v54, %v843_v36  ;;  %v5133_v36 = vld [vmem:[#allocation6 + $0x20] sm:$0xf]  ;;  %v5389_v54 = vld [vmem:[#allocation6 + $0x80] sm:$0xf0] }
 0x201   :  { %v2170_v16 = vpop.f32.mrf.mxu1  ;;  %v6217_v24 = vadd.f32 %v2345_v15, %v2257_v11  ;;  %v1317_v62 = vpack.c.bf16 %v867_v49, %v842_v9  ;;  %v1320_v11 = vpack.c.bf16 %v870_v58, %v845_v42  ;;  %v5241_v15 = vld [vmem:[#allocation6 + $0xf0] sm:$0xf]  ;;  %v5141_v42 = vld [vmem:[#allocation6 + $0x28] sm:$0xf] }
 0x202   :  { %v2171_v25 = vadd.f32 %v2170_v16, %v2082_v0  ;;  %2120 = vmatmul.bf16.gmra.mxu0 %v1292_v44  ;;  %v5402_v16 = vld [vmem:[#allocation6 + $0xec] sm:$0xf] }
 0x203   :  { %2298 = vmatmul.bf16.gmra.mxu2 %v1294_v19  ;;  %v5415_v19 = vld [vmem:[#allocation6 + $0x150] sm:$0xf0] }
 0x204   :  { %2209 = vmatmul.bf16.gmra.mxu1 %v1293_v21  ;;  %2387 = vmatmul.bf16.gmra.mxu3 %v1295_v23  ;;  %v5242_v0 = vor.u32 %v5415_v19, %v5241_v15  ;;  %v5235_v23 = vld [vmem:[#allocation6 + $0x14c] sm:$0xf0]  ;;  %v895_v19 = vld [vmem:[#allocation3 + $0x1618] sm:$0xff] }
 0x205   :  { %v5143_v15 = vld [vmem:[#allocation6 + $0x8c] sm:$0xf0] }
 0x206   :  { %v2259_v27 = vpop.f32.mrf.mxu2  ;;  %2592 = vmatpush.bf16.xpose.msra.mxu2 %v5242_v0 }
 0x207   :  { %v2260_v30 = vadd.f32 %v2259_v27, %v2171_v25  ;;  %v2083_v33 = vpop.f32.mrf.mxu0  ;;  %v2348_v35 = vpop.f32.mrf.mxu3  ;;  %v5238_v25 = vor.u32 %v5402_v16, %v5235_v23  ;;  %v5403_v27 = vld [vmem:[#allocation6 + $0xf4] sm:$0xf]  ;;  %v1342_v23 = vpack.c.bf16 %v917_v51, %v892_v50 }
 0x208   :  { %v2084_v38 = vadd.f32 %v2083_v33, %v6129_v31 }
 0x209   :  { %v2172_v1 = vpop.f32.mrf.mxu1  ;;  %v6220_v40 = vadd.f32 %v2348_v35, %v2260_v30  ;;  %v5243_v30 = vld [vmem:[#allocation6 + $0x154] sm:$0xf0]  ;;  %2503 = vmatpush.bf16.xpose.msra.mxu1 %v5238_v25 }
 0x20a   :  { %v2173_v41 = vadd.f32 %v2172_v1, %v2084_v38  ;;  %v5246_v33 = vor.u32 %v5403_v27, %v5243_v30 }
 0x20c   :  { %2681 = vmatpush.bf16.xpose.msra.mxu3 %v5246_v33 }
 0x20e   :  { %v2261_v60 = vpop.f32.mrf.mxu2 }
 0x20f   :  { %v2262_v12 = vadd.f32 %v2261_v60, %v2173_v41  ;;  %v2086_v3 = vpop.f32.mrf.mxu0  ;;  %v2350_v4 = vpop.f32.mrf.mxu3  ;;  %v894_v60 = vld [vmem:[#allocation3 + $0x1610] sm:$0xff] }
 0x210   :  { %v2087_v31 = vadd.f32 %v2086_v3, %v6132_v52  ;;  %v5390_v3 = vld [vmem:[#allocation6 + $0x88] sm:$0xf0] }
 0x211   :  { %v2175_v44 = vpop.f32.mrf.mxu1  ;;  %v6223_v13 = vadd.f32 %v2350_v4, %v2262_v12  ;;  %v5134_v12 = vor.u32 %v5389_v54, %v5133_v36  ;;  %v5142_v4 = vor.u32 %v5390_v3, %v5141_v42  ;;  %v944_v3 = vld [vmem:[#allocation3 + $0x17a0] sm:$0xff] }
 0x212   :  { %v2176_v21 = vadd.f32 %v2175_v44, %v2087_v31  ;;  %2125 = vmatmul.bf16.gmra.mxu0 %v1317_v62  ;;  %v919_v62 = vld [vmem:[#allocation3 + $0x16d8] sm:$0xff]  ;;  %v5378_v31 = vld [vmem:[#allocation6 + $0x2c] sm:$0xf] }
 0x213   :  { %2303 = vmatmul.bf16.gmra.mxu2 %v1319_v8  ;;  %v5377_v8 = vld [vmem:[#allocation6 + $0x24] sm:$0xf]  ;;  %v893_v44 = vld [vmem:[#allocation3 + $0x1608] sm:$0xff]  ;;  %2415 = vmatpush.bf16.xpose.msra.mxu0 %v5134_v12  ;;  %v5146_v0 = vor.u32 %v5378_v31, %v5143_v15  ;;  %v1344_v33 = vpack.c.bf16 %v919_v62, %v894_v60  ;;  %v967_v12 = vld [vmem:[#allocation3 + $0x1858] sm:$0xff] }
 0x214   :  { %2214 = vmatmul.bf16.gmra.mxu1 %v1318_v57  ;;  %2392 = vmatmul.bf16.gmra.mxu3 %v1320_v11  ;;  %v5135_v57 = vld [vmem:[#allocation6 + $0x84] sm:$0xf0]  ;;  %v918_v11 = vld [vmem:[#allocation3 + $0x16d0] sm:$0xff] }
 0x215   :  { %2593 = vmatpush.bf16.xpose.msra.mxu2 %v5142_v4  ;;  %2682 = vmatpush.bf16.xpose.msra.mxu3 %v5146_v0  ;;  %v969_v4 = vld [vmem:[#allocation3 + $0x1868] sm:$0xff] }
 0x216   :  { %v2264_v52 = vpop.f32.mrf.mxu2  ;;  %v945_v31 = vld [vmem:[#allocation3 + $0x17a8] sm:$0xff]  ;;  %v1369_v0 = vpack.c.bf16 %v969_v4, %v944_v3 }
 0x217   :  { %v2265_v35 = vadd.f32 %v2264_v52, %v2176_v21  ;;  %v2088_v38 = vpop.f32.mrf.mxu0  ;;  %v2353_v1 = vpop.f32.mrf.mxu3  ;;  %v920_v21 = vld [vmem:[#allocation3 + $0x16e0] sm:$0xff]  ;;  %v1343_v52 = vpack.c.bf16 %v918_v11, %v893_v44  ;;  %v970_v44 = vld [vmem:[#allocation3 + $0x1870] sm:$0xff] }
 0x218   :  { %v2089_v41 = vadd.f32 %v2088_v38, %v6135_v26  ;;  %v5138_v26 = vor.u32 %v5377_v8, %v5135_v57  ;;  %v943_v8 = vld [vmem:[#allocation3 + $0x1798] sm:$0xff]  ;;  %v968_v57 = vld [vmem:[#allocation3 + $0x1860] sm:$0xff] }
 0x219   :  { %v2177_v9 = vpop.f32.mrf.mxu1  ;;  %v6226_v49 = vadd.f32 %v2353_v1, %v2265_v35  ;;  %v1345_v1 = vpack.c.bf16 %v920_v21, %v895_v19 }
 0x21a   :  { %v2178_v58 = vadd.f32 %v2177_v9, %v2089_v41  ;;  %2504 = vmatpush.bf16.xpose.msra.mxu1 %v5138_v26 }
 0x21e   :  { %v2266_v16 = vpop.f32.mrf.mxu2 }
 0x21f   :  { %v2267_v25 = vadd.f32 %v2266_v16, %v2178_v58  ;;  %v2091_v27 = vpop.f32.mrf.mxu0  ;;  %v2355_v30 = vpop.f32.mrf.mxu3  ;;  %v1368_v16 = vpack.c.bf16 %v968_v57, %v943_v8 }
 0x220   :  { %v2092_v35 = vadd.f32 %v2091_v27, %v6138_v37  ;;  %v942_v37 = vld [vmem:[#allocation3 + $0x1790] sm:$0xff] }
 0x221   :  { %v2180_v38 = vpop.f32.mrf.mxu1  ;;  %v6229_v41 = vadd.f32 %v2355_v30, %v2267_v25  ;;  %v1367_v26 = vpack.c.bf16 %v967_v12, %v942_v37  ;;  %v1370_v25 = vpack.c.bf16 %v970_v44, %v945_v31  ;;  %v199_v37 = vld [vmem:[#allocation3 + $0x58] sm:$0xff]  ;;  %v224_v12 = vld [vmem:[#allocation3 + $0x120] sm:$0xff] }
 0x222   :  { %v2181_v9 = vadd.f32 %v2180_v38, %v2092_v35  ;;  %2130 = vmatmul.bf16.gmra.mxu0 %v1342_v23 }
 0x223   :  { %2308 = vmatmul.bf16.gmra.mxu2 %v1344_v33 }
 0x224   :  { %2219 = vmatmul.bf16.gmra.mxu1 %v1343_v52  ;;  %2397 = vmatmul.bf16.gmra.mxu3 %v1345_v1 }
 0x226   :  { %v2269_v36 = vpop.f32.mrf.mxu2 }
 0x227   :  { %v2270_v50 = vadd.f32 %v2269_v36, %v2181_v9  ;;  %v2093_v51 = vpop.f32.mrf.mxu0  ;;  %v2358_v54 = vpop.f32.mrf.mxu3 }
 0x228   :  { %v2094_v42 = vadd.f32 %v2093_v51, %v6141_v61  ;;  %v221_v51 = vld [vmem:[#allocation3 + $0x108] sm:$0xff] }
 0x229   :  { %v2182_v58 = vpop.f32.mrf.mxu1  ;;  %v6232_v60 = vadd.f32 %v2358_v54, %v2270_v50  ;;  %v198_v54 = vld [vmem:[#allocation3 + $0x50] sm:$0xff] }
 0x22a   :  { %v2183_v62 = vadd.f32 %v2182_v58, %v2094_v42  ;;  %v223_v42 = vld [vmem:[#allocation3 + $0x118] sm:$0xff]  ;;  %v197_v58 = vld [vmem:[#allocation3 + $0x48] sm:$0xff] }
 0x22b   :  { %v998_v44 = vpack.c.bf16 %v223_v42, %v198_v54 }
 0x22e   :  { %v2271_v11 = vpop.f32.mrf.mxu2 }
 0x22f   :  { %v2272_v15 = vadd.f32 %v2271_v11, %v2183_v62  ;;  %v2096_v19 = vpop.f32.mrf.mxu0  ;;  %v2360_v21 = vpop.f32.mrf.mxu3  ;;  %v222_v62 = vld [vmem:[#allocation3 + $0x110] sm:$0xff] }
 0x230   :  { %v2097_v61 = vadd.f32 %v2096_v19, %v6144_v7  ;;  %v196_v7 = vld [vmem:[#allocation3 + $0x40] sm:$0xff]  ;;  %v997_v11 = vpack.c.bf16 %v222_v62, %v197_v58 }
 0x231   :  { %v2185_v23 = vpop.f32.mrf.mxu1  ;;  %v6235_v27 = vadd.f32 %v2360_v21, %v2272_v15  ;;  %v996_v4 = vpack.c.bf16 %v221_v51, %v196_v7  ;;  %v999_v15 = vpack.c.bf16 %v224_v12, %v199_v37  ;;  %v249_v7 = vld [vmem:[#allocation3 + $0x1e8] sm:$0xff]  ;;  %v274_v51 = vld [vmem:[#allocation3 + $0x2b0] sm:$0xff] }
 0x232   :  { %v2186_v30 = vadd.f32 %v2185_v23, %v2097_v61  ;;  %2135 = vmatmul.bf16.gmra.mxu0 %v1367_v26 }
 0x233   :  { %2313 = vmatmul.bf16.gmra.mxu2 %v1369_v0 }
 0x234   :  { %2224 = vmatmul.bf16.gmra.mxu1 %v1368_v16  ;;  %2402 = vmatmul.bf16.gmra.mxu3 %v1370_v25 }
 0x236   :  { %v2274_v33 = vpop.f32.mrf.mxu2 }
 0x237   :  { %v2275_v52 = vadd.f32 %v2274_v33, %v2186_v30  ;;  %v2098_v35 = vpop.f32.mrf.mxu0  ;;  %v2363_v38 = vpop.f32.mrf.mxu3 }
 0x238   :  { %v2099_v1 = vadd.f32 %v2098_v35, %v6147_v32  ;;  %v271_v35 = vld [vmem:[#allocation3 + $0x298] sm:$0xff] }
 0x239   :  { %v2187_v9 = vpop.f32.mrf.mxu1  ;;  %v6238_v36 = vadd.f32 %v2363_v38, %v2275_v52  ;;  %v248_v38 = vld [vmem:[#allocation3 + $0x1e0] sm:$0xff] }
 0x23a   :  { %v2188_v50 = vadd.f32 %v2187_v9, %v2099_v1  ;;  %v273_v1 = vld [vmem:[#allocation3 + $0x2a8] sm:$0xff]  ;;  %v247_v9 = vld [vmem:[#allocation3 + $0x1d8] sm:$0xff] }
 0x23b   :  { %v1023_v12 = vpack.c.bf16 %v273_v1, %v248_v38 }
 0x23e   :  { %v2276_v3 = vpop.f32.mrf.mxu2 }
 0x23f   :  { %v2277_v8 = vadd.f32 %v2276_v3, %v2188_v50  ;;  %v2101_v57 = vpop.f32.mrf.mxu0  ;;  %v2365_v31 = vpop.f32.mrf.mxu3  ;;  %v272_v50 = vld [vmem:[#allocation3 + $0x2a0] sm:$0xff] }
 0x240   :  { %v2102_v32 = vadd.f32 %v2101_v57, %v6150_v45  ;;  %v246_v45 = vld [vmem:[#allocation3 + $0x1d0] sm:$0xff]  ;;  %v1022_v3 = vpack.c.bf16 %v272_v50, %v247_v9 }
 0x241   :  { %v2190_v26 = vpop.f32.mrf.mxu1  ;;  %v6241_v19 = vadd.f32 %v2365_v31, %v2277_v8  ;;  %v1021_v42 = vpack.c.bf16 %v271_v35, %v246_v45  ;;  %v1024_v8 = vpack.c.bf16 %v274_v51, %v249_v7  ;;  %v299_v45 = vld [vmem:[#allocation3 + $0x378] sm:$0xff]  ;;  %v324_v35 = vld [vmem:[#allocation3 + $0x440] sm:$0xff] }
 0x242   :  { %v2191_v21 = vadd.f32 %v2190_v26, %v2102_v32  ;;  %2416 = vmatmul.bf16.vlgmr.msra.gmra.mxu0 %v996_v4 }
 0x243   :  { %2594 = vmatmul.bf16.vlgmr.msra.gmra.mxu2 %v998_v44 }
 0x244   :  { %2505 = vmatmul.bf16.vlgmr.msra.gmra.mxu1 %v997_v11  ;;  %2683 = vmatmul.bf16.vlgmr.msra.gmra.mxu3 %v999_v15 }
 0x246   :  { %v2279_v0 = vpop.f32.mrf.mxu2 }
 0x247   :  { %v2280_v16 = vadd.f32 %v2279_v0, %v2191_v21  ;;  %v2103_v61 = vpop.f32.mrf.mxu0  ;;  %v2368_v23 = vpop.f32.mrf.mxu3 }
 0x248   :  { %v2104_v25 = vadd.f32 %v2103_v61, %v6153_v6  ;;  %v321_v61 = vld [vmem:[#allocation3 + $0x428] sm:$0xff] }
 0x249   :  { %v2192_v30 = vpop.f32.mrf.mxu1  ;;  %v6244_v33 = vadd.f32 %v2368_v23, %v2280_v16  ;;  %v298_v23 = vld [vmem:[#allocation3 + $0x370] sm:$0xff] }
 0x24a   :  { %v2193_v52 = vadd.f32 %v2192_v30, %v2104_v25  ;;  %v323_v25 = vld [vmem:[#allocation3 + $0x438] sm:$0xff]  ;;  %v297_v30 = vld [vmem:[#allocation3 + $0x368] sm:$0xff] }
 0x24b   :  { %v1048_v51 = vpack.c.bf16 %v323_v25, %v298_v23 }
 0x24e   :  { %v2281_v54 = vpop.f32.mrf.mxu2 }
 0x24f   :  { %v2282_v58 = vadd.f32 %v2281_v54, %v2193_v52  ;;  %v2106_v62 = vpop.f32.mrf.mxu0  ;;  %v2370_v37 = vpop.f32.mrf.mxu3  ;;  %v322_v52 = vld [vmem:[#allocation3 + $0x430] sm:$0xff] }
 0x250   :  { %v2107_v6 = vadd.f32 %v2106_v62, %v6156_v18  ;;  %v296_v18 = vld [vmem:[#allocation3 + $0x360] sm:$0xff]  ;;  %v1047_v54 = vpack.c.bf16 %v322_v52, %v297_v30 }
 0x251   :  { %v2195_v4 = vpop.f32.mrf.mxu1  ;;  %v6247_v57 = vadd.f32 %v2370_v37, %v2282_v58  ;;  %v1046_v1 = vpack.c.bf16 %v321_v61, %v296_v18  ;;  %v1049_v58 = vpack.c.bf16 %v324_v35, %v299_v45  ;;  %v349_v18 = vld [vmem:[#allocation3 + $0x508] sm:$0xff]  ;;  %v374_v61 = vld [vmem:[#allocation3 + $0x5d0] sm:$0xff] }
 0x252   :  { %v2196_v31 = vadd.f32 %v2195_v4, %v2107_v6  ;;  %2421 = vmatmul.bf16.gmra.mxu0 %v1021_v42 }
 0x253   :  { %2599 = vmatmul.bf16.gmra.mxu2 %v1023_v12 }
 0x254   :  { %2510 = vmatmul.bf16.gmra.mxu1 %v1022_v3  ;;  %2688 = vmatmul.bf16.gmra.mxu3 %v1024_v8 }
 0x256   :  { %v2284_v44 = vpop.f32.mrf.mxu2 }
 0x257   :  { %v2285_v11 = vadd.f32 %v2284_v44, %v2196_v31  ;;  %v2108_v32 = vpop.f32.mrf.mxu0  ;;  %v2373_v26 = vpop.f32.mrf.mxu3 }
 0x258   :  { %v2109_v15 = vadd.f32 %v2108_v32, %v6159_v47  ;;  %v371_v32 = vld [vmem:[#allocation3 + $0x5b8] sm:$0xff] }
 0x259   :  { %v2197_v21 = vpop.f32.mrf.mxu1  ;;  %v6250_v0 = vadd.f32 %v2373_v26, %v2285_v11  ;;  %v348_v26 = vld [vmem:[#allocation3 + $0x500] sm:$0xff] }
 0x25a   :  { %v2198_v16 = vadd.f32 %v2197_v21, %v2109_v15  ;;  %v373_v15 = vld [vmem:[#allocation3 + $0x5c8] sm:$0xff]  ;;  %v347_v21 = vld [vmem:[#allocation3 + $0x4f8] sm:$0xff] }
 0x25b   :  { %v1073_v35 = vpack.c.bf16 %v373_v15, %v348_v26 }
 0x25e   :  { %v2286_v38 = vpop.f32.mrf.mxu2 }
 0x25f   :  { %v2287_v9 = vadd.f32 %v2286_v38, %v2198_v16  ;;  %v2111_v50 = vpop.f32.mrf.mxu0  ;;  %v2375_v7 = vpop.f32.mrf.mxu3  ;;  %v372_v16 = vld [vmem:[#allocation3 + $0x5c0] sm:$0xff] }
 0x260   :  { %v2112_v47 = vadd.f32 %v2111_v50, %v6162_v56  ;;  %v346_v56 = vld [vmem:[#allocation3 + $0x4f0] sm:$0xff]  ;;  %v1072_v38 = vpack.c.bf16 %v372_v16, %v347_v21 }
 0x261   :  { %v2200_v42 = vpop.f32.mrf.mxu1  ;;  %v6253_v62 = vadd.f32 %v2375_v7, %v2287_v9  ;;  %v1071_v25 = vpack.c.bf16 %v371_v32, %v346_v56  ;;  %v1074_v9 = vpack.c.bf16 %v374_v61, %v349_v18  ;;  %v399_v56 = vld [vmem:[#allocation3 + $0x698] sm:$0xff]  ;;  %v424_v32 = vld [vmem:[#allocation3 + $0x760] sm:$0xff] }
 0x262   :  { %v2201_v37 = vadd.f32 %v2200_v42, %v2112_v47  ;;  %2426 = vmatmul.bf16.gmra.mxu0 %v1046_v1 }
 0x263   :  { %2604 = vmatmul.bf16.gmra.mxu2 %v1048_v51 }
 0x264   :  { %2515 = vmatmul.bf16.gmra.mxu1 %v1047_v54  ;;  %2693 = vmatmul.bf16.gmra.mxu3 %v1049_v58 }
 0x266   :  { %v2289_v12 = vpop.f32.mrf.mxu2 }
 0x267   :  { %v2290_v3 = vadd.f32 %v2289_v12, %v2201_v37  ;;  %v2113_v6 = vpop.f32.mrf.mxu0  ;;  %v2378_v4 = vpop.f32.mrf.mxu3 }
 0x268   :  { %v2114_v8 = vadd.f32 %v2113_v6, %v6165_v22  ;;  %v421_v6 = vld [vmem:[#allocation3 + $0x748] sm:$0xff] }
 0x269   :  { %v2202_v31 = vpop.f32.mrf.mxu1  ;;  %v6256_v44 = vadd.f32 %v2378_v4, %v2290_v3  ;;  %v398_v4 = vld [vmem:[#allocation3 + $0x690] sm:$0xff] }
 0x26a   :  { %v2203_v11 = vadd.f32 %v2202_v31, %v2114_v8  ;;  %v423_v8 = vld [vmem:[#allocation3 + $0x758] sm:$0xff]  ;;  %v397_v31 = vld [vmem:[#allocation3 + $0x688] sm:$0xff] }
 0x26b   :  { %v1098_v61 = vpack.c.bf16 %v423_v8, %v398_v4 }
 0x26e   :  { %v2291_v23 = vpop.f32.mrf.mxu2 }
 0x26f   :  { %v2292_v30 = vadd.f32 %v2291_v23, %v2203_v11  ;;  %v2116_v52 = vpop.f32.mrf.mxu0  ;;  %v2380_v45 = vpop.f32.mrf.mxu3  ;;  %v422_v11 = vld [vmem:[#allocation3 + $0x750] sm:$0xff] }
 0x270   :  { %v2117_v22 = vadd.f32 %v2116_v52, %v6168_v34  ;;  %v396_v34 = vld [vmem:[#allocation3 + $0x680] sm:$0xff]  ;;  %v1097_v23 = vpack.c.bf16 %v422_v11, %v397_v31 }
 0x271   :  { %v2205_v1 = vpop.f32.mrf.mxu1  ;;  %v6259_v50 = vadd.f32 %v2380_v45, %v2292_v30  ;;  %v1096_v15 = vpack.c.bf16 %v421_v6, %v396_v34  ;;  %v1099_v30 = vpack.c.bf16 %v424_v32, %v399_v56  ;;  %v449_v34 = vld [vmem:[#allocation3 + $0x828] sm:$0xff]  ;;  %v474_v6 = vld [vmem:[#allocation3 + $0x8f0] sm:$0xff] }
 0x272   :  { %v2206_v7 = vadd.f32 %v2205_v1, %v2117_v22  ;;  %2431 = vmatmul.bf16.gmra.mxu0 %v1071_v25 }
 0x273   :  { %2609 = vmatmul.bf16.gmra.mxu2 %v1073_v35 }
 0x274   :  { %2520 = vmatmul.bf16.gmra.mxu1 %v1072_v38  ;;  %2698 = vmatmul.bf16.gmra.mxu3 %v1074_v9 }
 0x276   :  { %v2294_v51 = vpop.f32.mrf.mxu2 }
 0x277   :  { %v2295_v54 = vadd.f32 %v2294_v51, %v2206_v7  ;;  %v2118_v47 = vpop.f32.mrf.mxu0  ;;  %v2383_v42 = vpop.f32.mrf.mxu3 }
 0x278   :  { %v2119_v58 = vadd.f32 %v2118_v47, %v6171_v2  ;;  %v471_v47 = vld [vmem:[#allocation3 + $0x8d8] sm:$0xff] }
 0x279   :  { %v2207_v37 = vpop.f32.mrf.mxu1  ;;  %v6262_v12 = vadd.f32 %v2383_v42, %v2295_v54  ;;  %v448_v42 = vld [vmem:[#allocation3 + $0x820] sm:$0xff] }
 0x27a   :  { %v2208_v3 = vadd.f32 %v2207_v37, %v2119_v58  ;;  %v473_v58 = vld [vmem:[#allocation3 + $0x8e8] sm:$0xff]  ;;  %v447_v37 = vld [vmem:[#allocation3 + $0x818] sm:$0xff] }
 0x27b   :  { %v1123_v32 = vpack.c.bf16 %v473_v58, %v448_v42 }
 0x27e   :  { %v2296_v26 = vpop.f32.mrf.mxu2 }
 0x27f   :  { %v2297_v21 = vadd.f32 %v2296_v26, %v2208_v3  ;;  %v2121_v16 = vpop.f32.mrf.mxu0  ;;  %v2385_v18 = vpop.f32.mrf.mxu3  ;;  %v472_v3 = vld [vmem:[#allocation3 + $0x8e0] sm:$0xff] }
 0x280   :  { %v2122_v2 = vadd.f32 %v2121_v16, %v6174_v14  ;;  %v446_v14 = vld [vmem:[#allocation3 + $0x810] sm:$0xff]  ;;  %v1122_v26 = vpack.c.bf16 %v472_v3, %v447_v37 }
 0x281   :  { %v2210_v25 = vpop.f32.mrf.mxu1  ;;  %v6265_v52 = vadd.f32 %v2385_v18, %v2297_v21  ;;  %v1121_v8 = vpack.c.bf16 %v471_v47, %v446_v14  ;;  %v1124_v21 = vpack.c.bf16 %v474_v6, %v449_v34  ;;  %v499_v14 = vld [vmem:[#allocation3 + $0x9b8] sm:$0xff]  ;;  %v524_v47 = vld [vmem:[#allocation3 + $0xa80] sm:$0xff] }
 0x282   :  { %v2211_v45 = vadd.f32 %v2210_v25, %v2122_v2  ;;  %2436 = vmatmul.bf16.gmra.mxu0 %v1096_v15 }
 0x283   :  { %2614 = vmatmul.bf16.gmra.mxu2 %v1098_v61 }
 0x284   :  { %2525 = vmatmul.bf16.gmra.mxu1 %v1097_v23  ;;  %2703 = vmatmul.bf16.gmra.mxu3 %v1099_v30 }
 0x286   :  { %v2299_v35 = vpop.f32.mrf.mxu2 }
 0x287   :  { %v2300_v38 = vadd.f32 %v2299_v35, %v2211_v45  ;;  %v2123_v22 = vpop.f32.mrf.mxu0  ;;  %v2388_v1 = vpop.f32.mrf.mxu3 }
 0x288   :  { %v2124_v9 = vadd.f32 %v2123_v22, %v6177_v48  ;;  %v521_v22 = vld [vmem:[#allocation3 + $0xa68] sm:$0xff] }
 0x289   :  { %v2212_v7 = vpop.f32.mrf.mxu1  ;;  %v6268_v51 = vadd.f32 %v2388_v1, %v2300_v38  ;;  %v498_v1 = vld [vmem:[#allocation3 + $0x9b0] sm:$0xff] }
 0x28a   :  { %v2213_v54 = vadd.f32 %v2212_v7, %v2124_v9  ;;  %v523_v9 = vld [vmem:[#allocation3 + $0xa78] sm:$0xff]  ;;  %v497_v7 = vld [vmem:[#allocation3 + $0x9a8] sm:$0xff] }
 0x28b   :  { %v1148_v6 = vpack.c.bf16 %v523_v9, %v498_v1 }
 0x28e   :  { %v2301_v4 = vpop.f32.mrf.mxu2 }
 0x28f   :  { %v2302_v31 = vadd.f32 %v2301_v4, %v2213_v54  ;;  %v2126_v11 = vpop.f32.mrf.mxu0  ;;  %v2390_v56 = vpop.f32.mrf.mxu3  ;;  %v522_v54 = vld [vmem:[#allocation3 + $0xa70] sm:$0xff] }
 0x290   :  { %v2127_v48 = vadd.f32 %v2126_v11, %v6180_v59  ;;  %v496_v59 = vld [vmem:[#allocation3 + $0x9a0] sm:$0xff]  ;;  %v1147_v4 = vpack.c.bf16 %v522_v54, %v497_v7 }
 0x291   :  { %v2215_v15 = vpop.f32.mrf.mxu1  ;;  %v6271_v16 = vadd.f32 %v2390_v56, %v2302_v31  ;;  %v1146_v58 = vpack.c.bf16 %v521_v22, %v496_v59  ;;  %v1149_v31 = vpack.c.bf16 %v524_v47, %v499_v14  ;;  %v549_v59 = vld [vmem:[#allocation3 + $0xb48] sm:$0xff]  ;;  %v574_v22 = vld [vmem:[#allocation3 + $0xc10] sm:$0xff] }
 0x292   :  { %v2216_v18 = vadd.f32 %v2215_v15, %v2127_v48  ;;  %2441 = vmatmul.bf16.gmra.mxu0 %v1121_v8 }
 0x293   :  { %2619 = vmatmul.bf16.gmra.mxu2 %v1123_v32 }
 0x294   :  { %2530 = vmatmul.bf16.gmra.mxu1 %v1122_v26  ;;  %2708 = vmatmul.bf16.gmra.mxu3 %v1124_v21 }
 0x296   :  { %v2304_v61 = vpop.f32.mrf.mxu2 }
 0x297   :  { %v2305_v23 = vadd.f32 %v2304_v61, %v2216_v18  ;;  %v2128_v2 = vpop.f32.mrf.mxu0  ;;  %v2393_v25 = vpop.f32.mrf.mxu3 }
 0x298   :  { %v2129_v30 = vadd.f32 %v2128_v2, %v6183_v28  ;;  %v571_v2 = vld [vmem:[#allocation3 + $0xbf8] sm:$0xff] }
 0x299   :  { %v2217_v45 = vpop.f32.mrf.mxu1  ;;  %v6274_v35 = vadd.f32 %v2393_v25, %v2305_v23  ;;  %v548_v25 = vld [vmem:[#allocation3 + $0xb40] sm:$0xff] }
 0x29a   :  { %v2218_v38 = vadd.f32 %v2217_v45, %v2129_v30  ;;  %v573_v30 = vld [vmem:[#allocation3 + $0xc08] sm:$0xff]  ;;  %v547_v45 = vld [vmem:[#allocation3 + $0xb38] sm:$0xff] }
 0x29b   :  { %v1173_v47 = vpack.c.bf16 %v573_v30, %v548_v25 }
 0x29e   :  { %v2306_v42 = vpop.f32.mrf.mxu2 }
 0x29f   :  { %v2307_v37 = vadd.f32 %v2306_v42, %v2218_v38  ;;  %v2131_v3 = vpop.f32.mrf.mxu0  ;;  %v2395_v34 = vpop.f32.mrf.mxu3  ;;  %v572_v38 = vld [vmem:[#allocation3 + $0xc00] sm:$0xff] }
 0x2a0   :  { %v2132_v28 = vadd.f32 %v2131_v3, %v6186_v43  ;;  %v546_v43 = vld [vmem:[#allocation3 + $0xb30] sm:$0xff]  ;;  %v1172_v42 = vpack.c.bf16 %v572_v38, %v547_v45 }
 0x2a1   :  { %v2220_v8 = vpop.f32.mrf.mxu1  ;;  %v6277_v11 = vadd.f32 %v2395_v34, %v2307_v37  ;;  %v1171_v9 = vpack.c.bf16 %v571_v2, %v546_v43  ;;  %v1174_v37 = vpack.c.bf16 %v574_v22, %v549_v59  ;;  %v599_v43 = vld [vmem:[#allocation3 + $0xcd8] sm:$0xff]  ;;  %v624_v2 = vld [vmem:[#allocation3 + $0xda0] sm:$0xff] }
 0x2a2   :  { %v2221_v56 = vadd.f32 %v2220_v8, %v2132_v28  ;;  %2446 = vmatmul.bf16.gmra.mxu0 %v1146_v58 }
 0x2a3   :  { %2624 = vmatmul.bf16.gmra.mxu2 %v1148_v6 }
 0x2a4   :  { %2535 = vmatmul.bf16.gmra.mxu1 %v1147_v4  ;;  %2713 = vmatmul.bf16.gmra.mxu3 %v1149_v31 }
 0x2a6   :  { %v2309_v32 = vpop.f32.mrf.mxu2 }
 0x2a7   :  { %v2310_v26 = vadd.f32 %v2309_v32, %v2221_v56  ;;  %v2133_v48 = vpop.f32.mrf.mxu0  ;;  %v2398_v15 = vpop.f32.mrf.mxu3 }
 0x2a8   :  { %v2134_v21 = vadd.f32 %v2133_v48, %v6188_v17  ;;  %v621_v48 = vld [vmem:[#allocation3 + $0xd88] sm:$0xff] }
 0x2a9   :  { %v2222_v18 = vpop.f32.mrf.mxu1  ;;  %v6280_v61 = vadd.f32 %v2398_v15, %v2310_v26  ;;  %v598_v15 = vld [vmem:[#allocation3 + $0xcd0] sm:$0xff] }
 0x2aa   :  { %v2223_v23 = vadd.f32 %v2222_v18, %v2134_v21  ;;  %v623_v21 = vld [vmem:[#allocation3 + $0xd98] sm:$0xff]  ;;  %v597_v18 = vld [vmem:[#allocation3 + $0xcc8] sm:$0xff] }
 0x2ab   :  { %v1198_v22 = vpack.c.bf16 %v623_v21, %v598_v15 }
 0x2ae   :  { %v2311_v1 = vpop.f32.mrf.mxu2 }
 0x2af   :  { %v2312_v7 = vadd.f32 %v2311_v1, %v2223_v23  ;;  %v2136_v54 = vpop.f32.mrf.mxu0  ;;  %v2400_v14 = vpop.f32.mrf.mxu3  ;;  %v622_v23 = vld [vmem:[#allocation3 + $0xd90] sm:$0xff] }
 0x2b0   :  { %v2137_v17 = vadd.f32 %v2136_v54, %v6190_v29  ;;  %v596_v29 = vld [vmem:[#allocation3 + $0xcc0] sm:$0xff]  ;;  %v1197_v1 = vpack.c.bf16 %v622_v23, %v597_v18 }
 0x2b1   :  { %v2225_v58 = vpop.f32.mrf.mxu1  ;;  %v6283_v3 = vadd.f32 %v2400_v14, %v2312_v7  ;;  %v1196_v30 = vpack.c.bf16 %v621_v48, %v596_v29  ;;  %v1199_v7 = vpack.c.bf16 %v624_v2, %v599_v43  ;;  %v649_v29 = vld [vmem:[#allocation3 + $0xe68] sm:$0xff]  ;;  %v674_v48 = vld [vmem:[#allocation3 + $0xf30] sm:$0xff] }
 0x2b2   :  { %v2226_v34 = vadd.f32 %v2225_v58, %v2137_v17  ;;  %2451 = vmatmul.bf16.gmra.mxu0 %v1171_v9 }
 0x2b3   :  { %2629 = vmatmul.bf16.gmra.mxu2 %v1173_v47 }
 0x2b4   :  { %2540 = vmatmul.bf16.gmra.mxu1 %v1172_v42  ;;  %2718 = vmatmul.bf16.gmra.mxu3 %v1174_v37 }
 0x2b6   :  { %v2314_v6 = vpop.f32.mrf.mxu2 }
 0x2b7   :  { %v2315_v4 = vadd.f32 %v2314_v6, %v2226_v34  ;;  %v2138_v28 = vpop.f32.mrf.mxu0  ;;  %v2403_v8 = vpop.f32.mrf.mxu3 }
 0x2b8   :  { %v2139_v31 = vadd.f32 %v2138_v28, %v6193_v5  ;;  %v671_v28 = vld [vmem:[#allocation3 + $0xf18] sm:$0xff] }
 0x2b9   :  { %v2227_v56 = vpop.f32.mrf.mxu1  ;;  %v6286_v32 = vadd.f32 %v2403_v8, %v2315_v4  ;;  %v648_v8 = vld [vmem:[#allocation3 + $0xe60] sm:$0xff] }
 0x2ba   :  { %v2228_v26 = vadd.f32 %v2227_v56, %v2139_v31  ;;  %v673_v31 = vld [vmem:[#allocation3 + $0xf28] sm:$0xff]  ;;  %v647_v56 = vld [vmem:[#allocation3 + $0xe58] sm:$0xff] }
 0x2bb   :  { %v1223_v2 = vpack.c.bf16 %v673_v31, %v648_v8 }
 0x2be   :  { %v2316_v25 = vpop.f32.mrf.mxu2 }
 0x2bf   :  { %v2317_v45 = vadd.f32 %v2316_v25, %v2228_v26  ;;  %v2405_v38 = vpop.f32.mrf.mxu3  ;;  %v2417_v59 = vpop.f32.mrf.mxu0  ;;  %v672_v26 = vld [vmem:[#allocation3 + $0xf20] sm:$0xff] }
 0x2c0   :  { %v2418_v5 = vadd.f32 %v2417_v59, %v6196_v20  ;;  %v646_v20 = vld [vmem:[#allocation3 + $0xe50] sm:$0xff]  ;;  %v1222_v25 = vpack.c.bf16 %v672_v26, %v647_v56 }
 0x2c1   :  { %v2506_v9 = vpop.f32.mrf.mxu1  ;;  %v6289_v54 = vadd.f32 %v2405_v38, %v2317_v45  ;;  %v1221_v21 = vpack.c.bf16 %v671_v28, %v646_v20  ;;  %v1224_v45 = vpack.c.bf16 %v674_v48, %v649_v29  ;;  %v699_v20 = vld [vmem:[#allocation3 + $0xff8] sm:$0xff]  ;;  %v724_v28 = vld [vmem:[#allocation3 + $0x10c0] sm:$0xff] }
 0x2c2   :  { %v2507_v14 = vadd.f32 %v2506_v9, %v2418_v5  ;;  %2456 = vmatmul.bf16.gmra.mxu0 %v1196_v30 }
 0x2c3   :  { %2634 = vmatmul.bf16.gmra.mxu2 %v1198_v22 }
 0x2c4   :  { %2545 = vmatmul.bf16.gmra.mxu1 %v1197_v1  ;;  %2723 = vmatmul.bf16.gmra.mxu3 %v1199_v7 }
 0x2c6   :  { %v2595_v47 = vpop.f32.mrf.mxu2 }
 0x2c7   :  { %v2596_v42 = vadd.f32 %v2595_v47, %v2507_v14  ;;  %v2419_v17 = vpop.f32.mrf.mxu0  ;;  %v2684_v58 = vpop.f32.mrf.mxu3 }
 0x2c8   :  { %v2420_v37 = vadd.f32 %v2419_v17, %v6199_v55  ;;  %v721_v17 = vld [vmem:[#allocation3 + $0x10a8] sm:$0xff] }
 0x2c9   :  { %v2508_v34 = vpop.f32.mrf.mxu1  ;;  %v6292_v6 = vadd.f32 %v2684_v58, %v2596_v42  ;;  %v698_v58 = vld [vmem:[#allocation3 + $0xff0] sm:$0xff] }
 0x2ca   :  { %v2509_v4 = vadd.f32 %v2508_v34, %v2420_v37  ;;  %v723_v37 = vld [vmem:[#allocation3 + $0x10b8] sm:$0xff]  ;;  %v697_v34 = vld [vmem:[#allocation3 + $0xfe8] sm:$0xff] }
 0x2cb   :  { %v1248_v48 = vpack.c.bf16 %v723_v37, %v698_v58  ;;  %v772_v58 = vld [vmem:[#allocation3 + $0x1240] sm:$0xff]  ;;  %v749_v37 = vld [vmem:[#allocation3 + $0x1188] sm:$0xff] }
 0x2ce   :  { %v2597_v15 = vpop.f32.mrf.mxu2 }
 0x2cf   :  { %v2598_v18 = vadd.f32 %v2597_v15, %v2509_v4  ;;  %v2422_v23 = vpop.f32.mrf.mxu0  ;;  %v2686_v43 = vpop.f32.mrf.mxu3  ;;  %v722_v4 = vld [vmem:[#allocation3 + $0x10b0] sm:$0xff] }
 0x2d0   :  { %v2423_v55 = vadd.f32 %v2422_v23, %v6202_v10  ;;  %v696_v10 = vld [vmem:[#allocation3 + $0xfe0] sm:$0xff]  ;;  %v1247_v15 = vpack.c.bf16 %v722_v4, %v697_v34  ;;  %v774_v34 = vld [vmem:[#allocation3 + $0x1250] sm:$0xff] }
 0x2d1   :  { %v2511_v30 = vpop.f32.mrf.mxu1  ;;  %v6295_v38 = vadd.f32 %v2686_v43, %v2598_v18  ;;  %v1246_v31 = vpack.c.bf16 %v721_v17, %v696_v10  ;;  %v1249_v18 = vpack.c.bf16 %v724_v28, %v699_v20  ;;  %v773_v10 = vld [vmem:[#allocation3 + $0x1248] sm:$0xff]  ;;  %v747_v17 = vld [vmem:[#allocation3 + $0x1178] sm:$0xff] }
 0x2d2   :  { %v2512_v59 = vadd.f32 %v2511_v30, %v2423_v55  ;;  %2461 = vmatmul.bf16.gmra.mxu0 %v1221_v21 }
 0x2d3   :  { %2639 = vmatmul.bf16.gmra.mxu2 %v1223_v2  ;;  %v5249_v2 = vld [vmem:[#allocation6 + $0xf8] sm:$0xf] }
 0x2d4   :  { %2550 = vmatmul.bf16.gmra.mxu1 %v1222_v25  ;;  %2728 = vmatmul.bf16.gmra.mxu3 %v1224_v45  ;;  %v5416_v25 = vld [vmem:[#allocation6 + $0x158] sm:$0xf0] }
 0x2d5   :  { %v5250_v55 = vor.u32 %v5416_v25, %v5249_v2 }
 0x2d6   :  { %v2600_v22 = vpop.f32.mrf.mxu2 }
 0x2d7   :  { %v2601_v1 = vadd.f32 %v2600_v22, %v2512_v59  ;;  %v2424_v5 = vpop.f32.mrf.mxu0  ;;  %v2689_v9 = vpop.f32.mrf.mxu3  ;;  %2770 = vmatpush.bf16.xpose.msrb.mxu0 %v5250_v55 }
 0x2d8   :  { %v2425_v7 = vadd.f32 %v2424_v5, %v6205_v46 }
 0x2d9   :  { %v2513_v14 = vpop.f32.mrf.mxu1  ;;  %v6298_v47 = vadd.f32 %v2689_v9, %v2601_v1 }
 0x2da   :  { %v2514_v42 = vadd.f32 %v2513_v14, %v2425_v7  ;;  %v746_v7 = vld [vmem:[#allocation3 + $0x1170] sm:$0xff]  ;;  %v771_v14 = vld [vmem:[#allocation3 + $0x1238] sm:$0xff] }
 0x2db   :  { %v1271_v20 = vpack.c.bf16 %v771_v14, %v746_v7  ;;  %v799_v7 = vld [vmem:[#allocation3 + $0x1318] sm:$0xff]  ;;  %v824_v14 = vld [vmem:[#allocation3 + $0x13e0] sm:$0xff] }
 0x2de   :  { %v2602_v8 = vpop.f32.mrf.mxu2 }
 0x2df   :  { %v2603_v56 = vadd.f32 %v2602_v8, %v2514_v42  ;;  %v2427_v26 = vpop.f32.mrf.mxu0  ;;  %v2691_v29 = vpop.f32.mrf.mxu3  ;;  %v748_v42 = vld [vmem:[#allocation3 + $0x1180] sm:$0xff] }
 0x2e0   :  { %v2428_v46 = vadd.f32 %v2427_v26, %v6208_v63  ;;  %v1272_v26 = vpack.c.bf16 %v772_v58, %v747_v17 }
 0x2e1   :  { %v2516_v21 = vpop.f32.mrf.mxu1  ;;  %v6301_v23 = vadd.f32 %v2691_v29, %v2603_v56  ;;  %v1273_v56 = vpack.c.bf16 %v773_v10, %v748_v42 }
 0x2e2   :  { %v2517_v43 = vadd.f32 %v2516_v21, %v2428_v46  ;;  %2466 = vmatmul.bf16.gmra.mxu0 %v1246_v31 }
 0x2e3   :  { %2644 = vmatmul.bf16.gmra.mxu2 %v1248_v48  ;;  %v1274_v48 = vpack.c.bf16 %v774_v34, %v749_v37 }
 0x2e4   :  { %2555 = vmatmul.bf16.gmra.mxu1 %v1247_v15  ;;  %2733 = vmatmul.bf16.gmra.mxu3 %v1249_v18 }
 0x2e6   :  { %v2605_v30 = vpop.f32.mrf.mxu2 }
 0x2e7   :  { %v2606_v45 = vadd.f32 %v2605_v30, %v2517_v43  ;;  %v2429_v59 = vpop.f32.mrf.mxu0  ;;  %v2694_v22 = vpop.f32.mrf.mxu3 }
 0x2e8   :  { %v2430_v1 = vadd.f32 %v2429_v59, %v6211_v39  ;;  %v821_v59 = vld [vmem:[#allocation3 + $0x13c8] sm:$0xff] }
 0x2e9   :  { %v2518_v63 = vpop.f32.mrf.mxu1  ;;  %v6304_v5 = vadd.f32 %v2694_v22, %v2606_v45  ;;  %v798_v22 = vld [vmem:[#allocation3 + $0x1310] sm:$0xff] }
 0x2ea   :  { %v2519_v9 = vadd.f32 %v2518_v63, %v2430_v1  ;;  %v823_v1 = vld [vmem:[#allocation3 + $0x13d8] sm:$0xff]  ;;  %v797_v63 = vld [vmem:[#allocation3 + $0x1308] sm:$0xff] }
 0x2eb   :  { %v1298_v34 = vpack.c.bf16 %v823_v1, %v798_v22 }
 0x2ee   :  { %v2607_v4 = vpop.f32.mrf.mxu2 }
 0x2ef   :  { %v2608_v28 = vadd.f32 %v2607_v4, %v2519_v9  ;;  %v2432_v8 = vpop.f32.mrf.mxu0  ;;  %v2696_v31 = vpop.f32.mrf.mxu3  ;;  %v822_v9 = vld [vmem:[#allocation3 + $0x13d0] sm:$0xff] }
 0x2f0   :  { %v2433_v39 = vadd.f32 %v2432_v8, %v6214_v53  ;;  %v796_v53 = vld [vmem:[#allocation3 + $0x1300] sm:$0xff]  ;;  %v1297_v4 = vpack.c.bf16 %v822_v9, %v797_v63 }
 0x2f1   :  { %v2521_v29 = vpop.f32.mrf.mxu1  ;;  %v6307_v15 = vadd.f32 %v2696_v31, %v2608_v28  ;;  %v1296_v10 = vpack.c.bf16 %v821_v59, %v796_v53  ;;  %v1299_v28 = vpack.c.bf16 %v824_v14, %v799_v7  ;;  %v849_v53 = vld [vmem:[#allocation3 + $0x14a8] sm:$0xff]  ;;  %v874_v59 = vld [vmem:[#allocation3 + $0x1570] sm:$0xff] }
 0x2f2   :  { %v2522_v46 = vadd.f32 %v2521_v29, %v2433_v39  ;;  %2471 = vmatmul.bf16.gmra.mxu0 %v1271_v20 }
 0x2f3   :  { %2649 = vmatmul.bf16.gmra.mxu2 %v1273_v56 }
 0x2f4   :  { %2560 = vmatmul.bf16.gmra.mxu1 %v1272_v26  ;;  %2738 = vmatmul.bf16.gmra.mxu3 %v1274_v48 }
 0x2f6   :  { %v2610_v21 = vpop.f32.mrf.mxu2 }
 0x2f7   :  { %v2611_v18 = vadd.f32 %v2610_v21, %v2522_v46  ;;  %v2434_v43 = vpop.f32.mrf.mxu0  ;;  %v2699_v2 = vpop.f32.mrf.mxu3 }
 0x2f8   :  { %v2435_v25 = vadd.f32 %v2434_v43, %v6217_v24  ;;  %v871_v43 = vld [vmem:[#allocation3 + $0x1558] sm:$0xff] }
 0x2f9   :  { %v2523_v55 = vpop.f32.mrf.mxu1  ;;  %v6310_v30 = vadd.f32 %v2699_v2, %v2611_v18  ;;  %v848_v2 = vld [vmem:[#allocation3 + $0x14a0] sm:$0xff] }
 0x2fa   :  { %v2524_v45 = vadd.f32 %v2523_v55, %v2435_v25  ;;  %v873_v25 = vld [vmem:[#allocation3 + $0x1568] sm:$0xff]  ;;  %v847_v55 = vld [vmem:[#allocation3 + $0x1498] sm:$0xff] }
 0x2fb   :  { %v1323_v14 = vpack.c.bf16 %v873_v25, %v848_v2  ;;  %v896_v2 = vld [vmem:[#allocation3 + $0x1620] sm:$0xff]  ;;  %v921_v25 = vld [vmem:[#allocation3 + $0x16e8] sm:$0xff] }
 0x2fe   :  { %v2612_v42 = vpop.f32.mrf.mxu2 }
 0x2ff   :  { %v2613_v17 = vadd.f32 %v2612_v42, %v2524_v45  ;;  %v2437_v58 = vpop.f32.mrf.mxu0  ;;  %v2701_v37 = vpop.f32.mrf.mxu3  ;;  %v872_v45 = vld [vmem:[#allocation3 + $0x1560] sm:$0xff] }
 0x300   :  { %v2438_v24 = vadd.f32 %v2437_v58, %v6220_v40  ;;  %v846_v40 = vld [vmem:[#allocation3 + $0x1490] sm:$0xff]  ;;  %v1322_v42 = vpack.c.bf16 %v872_v45, %v847_v55 }
 0x301   :  { %v2526_v20 = vpop.f32.mrf.mxu1  ;;  %v6313_v8 = vadd.f32 %v2701_v37, %v2613_v17  ;;  %v1321_v1 = vpack.c.bf16 %v871_v43, %v846_v40  ;;  %v1324_v17 = vpack.c.bf16 %v874_v59, %v849_v53  ;;  %v5257_v37 = vld [vmem:[#allocation6 + $0x100] sm:$0xf]  ;;  %v5149_v55 = vld [vmem:[#allocation6 + $0x30] sm:$0xf]  ;;  %v5391_v45 = vld [vmem:[#allocation6 + $0x90] sm:$0xf0] }
 0x302   :  { %v2527_v31 = vadd.f32 %v2526_v20, %v2438_v24  ;;  %2476 = vmatmul.bf16.gmra.mxu0 %v1296_v10  ;;  %v5404_v20 = vld [vmem:[#allocation6 + $0xfc] sm:$0xf]  ;;  %v5157_v53 = vld [vmem:[#allocation6 + $0x38] sm:$0xf] }
 0x303   :  { %2654 = vmatmul.bf16.gmra.mxu2 %v1298_v34  ;;  %v5417_v34 = vld [vmem:[#allocation6 + $0x160] sm:$0xf0] }
 0x304   :  { %2565 = vmatmul.bf16.gmra.mxu1 %v1297_v4  ;;  %2743 = vmatmul.bf16.gmra.mxu3 %v1299_v28  ;;  %v5258_v24 = vor.u32 %v5417_v34, %v5257_v37  ;;  %v5251_v28 = vld [vmem:[#allocation6 + $0x15c] sm:$0xf0]  ;;  %v899_v34 = vld [vmem:[#allocation3 + $0x1638] sm:$0xff] }
 0x305   :  { %v5159_v37 = vld [vmem:[#allocation6 + $0x9c] sm:$0xf0] }
 0x306   :  { %v2615_v56 = vpop.f32.mrf.mxu2  ;;  %2948 = vmatpush.bf16.xpose.msrb.mxu2 %v5258_v24 }
 0x307   :  { %v2616_v26 = vadd.f32 %v2615_v56, %v2527_v31  ;;  %v2439_v39 = vpop.f32.mrf.mxu0  ;;  %v2704_v29 = vpop.f32.mrf.mxu3  ;;  %v5254_v31 = vor.u32 %v5404_v20, %v5251_v28  ;;  %v5405_v56 = vld [vmem:[#allocation6 + $0x104] sm:$0xf]  ;;  %v1346_v28 = vpack.c.bf16 %v921_v25, %v896_v2 }
 0x308   :  { %v2440_v48 = vadd.f32 %v2439_v39, %v6223_v13 }
 0x309   :  { %v2528_v46 = vpop.f32.mrf.mxu1  ;;  %v6316_v21 = vadd.f32 %v2704_v29, %v2616_v26  ;;  %v5259_v26 = vld [vmem:[#allocation6 + $0x164] sm:$0xf0]  ;;  %2859 = vmatpush.bf16.xpose.msrb.mxu1 %v5254_v31 }
 0x30a   :  { %v2529_v18 = vadd.f32 %v2528_v46, %v2440_v48  ;;  %v5262_v39 = vor.u32 %v5405_v56, %v5259_v26 }
 0x30c   :  { %3037 = vmatpush.bf16.xpose.msrb.mxu3 %v5262_v39 }
 0x30e   :  { %v2617_v22 = vpop.f32.mrf.mxu2 }
 0x30f   :  { %v2618_v63 = vadd.f32 %v2617_v22, %v2529_v18  ;;  %v2442_v9 = vpop.f32.mrf.mxu0  ;;  %v2706_v7 = vpop.f32.mrf.mxu3  ;;  %v898_v22 = vld [vmem:[#allocation3 + $0x1630] sm:$0xff] }
 0x310   :  { %v2443_v13 = vadd.f32 %v2442_v9, %v6226_v49  ;;  %v5392_v9 = vld [vmem:[#allocation6 + $0x98] sm:$0xf0] }
 0x311   :  { %v2531_v10 = vpop.f32.mrf.mxu1  ;;  %v6319_v58 = vadd.f32 %v2706_v7, %v2618_v63  ;;  %v5150_v63 = vor.u32 %v5391_v45, %v5149_v55  ;;  %v5158_v7 = vor.u32 %v5392_v9, %v5157_v53  ;;  %v948_v9 = vld [vmem:[#allocation3 + $0x17c0] sm:$0xff] }
 0x312   :  { %v2532_v4 = vadd.f32 %v2531_v10, %v2443_v13  ;;  %2481 = vmatmul.bf16.gmra.mxu0 %v1321_v1  ;;  %v923_v1 = vld [vmem:[#allocation3 + $0x16f8] sm:$0xff]  ;;  %v897_v10 = vld [vmem:[#allocation3 + $0x1628] sm:$0xff] }
 0x313   :  { %2659 = vmatmul.bf16.gmra.mxu2 %v1323_v14  ;;  %v5379_v14 = vld [vmem:[#allocation6 + $0x34] sm:$0xf]  ;;  %v5380_v13 = vld [vmem:[#allocation6 + $0x3c] sm:$0xf]  ;;  %2771 = vmatpush.bf16.xpose.msrb.mxu0 %v5150_v63  ;;  %v1348_v39 = vpack.c.bf16 %v923_v1, %v898_v22 }
 0x314   :  { %2570 = vmatmul.bf16.gmra.mxu1 %v1322_v42  ;;  %2748 = vmatmul.bf16.gmra.mxu3 %v1324_v17  ;;  %v5151_v42 = vld [vmem:[#allocation6 + $0x94] sm:$0xf0]  ;;  %v922_v17 = vld [vmem:[#allocation3 + $0x16f0] sm:$0xff]  ;;  %v5162_v24 = vor.u32 %v5380_v13, %v5159_v37  ;;  %v949_v13 = vld [vmem:[#allocation3 + $0x17c8] sm:$0xff] }
 0x315   :  { %2949 = vmatpush.bf16.xpose.msrb.mxu2 %v5158_v7  ;;  %v971_v63 = vld [vmem:[#allocation3 + $0x1878] sm:$0xff]  ;;  %v973_v7 = vld [vmem:[#allocation3 + $0x1888] sm:$0xff] }
 0x316   :  { %v2620_v49 = vpop.f32.mrf.mxu2  ;;  %3038 = vmatpush.bf16.xpose.msrb.mxu3 %v5162_v24  ;;  %v1373_v24 = vpack.c.bf16 %v973_v7, %v948_v9 }
 0x317   :  { %v2621_v29 = vadd.f32 %v2620_v49, %v2532_v4  ;;  %v2444_v48 = vpop.f32.mrf.mxu0  ;;  %v2709_v46 = vpop.f32.mrf.mxu3  ;;  %v924_v4 = vld [vmem:[#allocation3 + $0x1700] sm:$0xff]  ;;  %v1347_v49 = vpack.c.bf16 %v922_v17, %v897_v10  ;;  %v974_v10 = vld [vmem:[#allocation3 + $0x1890] sm:$0xff] }
 0x318   :  { %v2445_v18 = vadd.f32 %v2444_v48, %v6229_v41  ;;  %v5154_v41 = vor.u32 %v5379_v14, %v5151_v42  ;;  %v947_v14 = vld [vmem:[#allocation3 + $0x17b8] sm:$0xff]  ;;  %v972_v42 = vld [vmem:[#allocation3 + $0x1880] sm:$0xff] }
 0x319   :  { %v2533_v40 = vpop.f32.mrf.mxu1  ;;  %v6322_v43 = vadd.f32 %v2709_v46, %v2621_v29  ;;  %v1349_v46 = vpack.c.bf16 %v924_v4, %v899_v34 }
 0x31a   :  { %v2534_v59 = vadd.f32 %v2533_v40, %v2445_v18  ;;  %2860 = vmatpush.bf16.xpose.msrb.mxu1 %v5154_v41 }
 0x31e   :  { %v2622_v20 = vpop.f32.mrf.mxu2 }
 0x31f   :  { %v2623_v31 = vadd.f32 %v2622_v20, %v2534_v59  ;;  %v2447_v56 = vpop.f32.mrf.mxu0  ;;  %v2711_v26 = vpop.f32.mrf.mxu3  ;;  %v1372_v20 = vpack.c.bf16 %v972_v42, %v947_v14 }
 0x320   :  { %v2448_v29 = vadd.f32 %v2447_v56, %v6232_v60  ;;  %v946_v60 = vld [vmem:[#allocation3 + $0x17b0] sm:$0xff] }
 0x321   :  { %v2536_v48 = vpop.f32.mrf.mxu1  ;;  %v6325_v18 = vadd.f32 %v2711_v26, %v2623_v31  ;;  %v1371_v41 = vpack.c.bf16 %v971_v63, %v946_v60  ;;  %v1374_v31 = vpack.c.bf16 %v974_v10, %v949_v13  ;;  %v203_v60 = vld [vmem:[#allocation3 + $0x78] sm:$0xff]  ;;  %v228_v63 = vld [vmem:[#allocation3 + $0x140] sm:$0xff] }
 0x322   :  { %v2537_v40 = vadd.f32 %v2536_v48, %v2448_v29  ;;  %2486 = vmatmul.bf16.gmra.mxu0 %v1346_v28 }
 0x323   :  { %2664 = vmatmul.bf16.gmra.mxu2 %v1348_v39 }
 0x324   :  { %2575 = vmatmul.bf16.gmra.mxu1 %v1347_v49  ;;  %2753 = vmatmul.bf16.gmra.mxu3 %v1349_v46 }
 0x326   :  { %v2625_v55 = vpop.f32.mrf.mxu2 }
 0x327   :  { %v2626_v2 = vadd.f32 %v2625_v55, %v2537_v40  ;;  %v2449_v25 = vpop.f32.mrf.mxu0  ;;  %v2714_v45 = vpop.f32.mrf.mxu3 }
 0x328   :  { %v2450_v53 = vadd.f32 %v2449_v25, %v6235_v27  ;;  %v225_v25 = vld [vmem:[#allocation3 + $0x128] sm:$0xff] }
 0x329   :  { %v2538_v59 = vpop.f32.mrf.mxu1  ;;  %v6328_v22 = vadd.f32 %v2714_v45, %v2626_v2  ;;  %v202_v45 = vld [vmem:[#allocation3 + $0x70] sm:$0xff] }
 0x32a   :  { %v2539_v1 = vadd.f32 %v2538_v59, %v2450_v53  ;;  %v227_v53 = vld [vmem:[#allocation3 + $0x138] sm:$0xff]  ;;  %v201_v59 = vld [vmem:[#allocation3 + $0x68] sm:$0xff] }
 0x32b   :  { %v1002_v10 = vpack.c.bf16 %v227_v53, %v202_v45 }
 0x32e   :  { %v2627_v17 = vpop.f32.mrf.mxu2 }
 0x32f   :  { %v2628_v37 = vadd.f32 %v2627_v17, %v2539_v1  ;;  %v2452_v34 = vpop.f32.mrf.mxu0  ;;  %v2716_v4 = vpop.f32.mrf.mxu3  ;;  %v226_v1 = vld [vmem:[#allocation3 + $0x130] sm:$0xff] }
 0x330   :  { %v2453_v27 = vadd.f32 %v2452_v34, %v6238_v36  ;;  %v200_v36 = vld [vmem:[#allocation3 + $0x60] sm:$0xff]  ;;  %v1001_v17 = vpack.c.bf16 %v226_v1, %v201_v59 }
 0x331   :  { %v2541_v28 = vpop.f32.mrf.mxu1  ;;  %v6331_v56 = vadd.f32 %v2716_v4, %v2628_v37  ;;  %v1000_v7 = vpack.c.bf16 %v225_v25, %v200_v36  ;;  %v1003_v37 = vpack.c.bf16 %v228_v63, %v203_v60  ;;  %v253_v36 = vld [vmem:[#allocation3 + $0x208] sm:$0xff]  ;;  %v278_v25 = vld [vmem:[#allocation3 + $0x2d0] sm:$0xff] }
 0x332   :  { %v2542_v26 = vadd.f32 %v2541_v28, %v2453_v27  ;;  %2491 = vmatmul.bf16.gmra.mxu0 %v1371_v41 }
 0x333   :  { %2669 = vmatmul.bf16.gmra.mxu2 %v1373_v24 }
 0x334   :  { %2580 = vmatmul.bf16.gmra.mxu1 %v1372_v20  ;;  %2758 = vmatmul.bf16.gmra.mxu3 %v1374_v31 }
 0x336   :  { %v2630_v39 = vpop.f32.mrf.mxu2 }
 0x337   :  { %v2631_v49 = vadd.f32 %v2630_v39, %v2542_v26  ;;  %v2454_v29 = vpop.f32.mrf.mxu0  ;;  %v2719_v48 = vpop.f32.mrf.mxu3 }
 0x338   :  { %v2455_v46 = vadd.f32 %v2454_v29, %v6241_v19  ;;  %v275_v29 = vld [vmem:[#allocation3 + $0x2b8] sm:$0xff] }
 0x339   :  { %v2543_v40 = vpop.f32.mrf.mxu1  ;;  %v6334_v55 = vadd.f32 %v2719_v48, %v2631_v49  ;;  %v252_v48 = vld [vmem:[#allocation3 + $0x200] sm:$0xff] }
 0x33a   :  { %v2544_v2 = vadd.f32 %v2543_v40, %v2455_v46  ;;  %v277_v46 = vld [vmem:[#allocation3 + $0x2c8] sm:$0xff]  ;;  %v251_v40 = vld [vmem:[#allocation3 + $0x1f8] sm:$0xff] }
 0x33b   :  { %v1027_v63 = vpack.c.bf16 %v277_v46, %v252_v48 }
 0x33e   :  { %v2632_v9 = vpop.f32.mrf.mxu2 }
 0x33f   :  { %v2633_v14 = vadd.f32 %v2632_v9, %v2544_v2  ;;  %v2457_v42 = vpop.f32.mrf.mxu0  ;;  %v2721_v13 = vpop.f32.mrf.mxu3  ;;  %v276_v2 = vld [vmem:[#allocation3 + $0x2c0] sm:$0xff] }
 0x340   :  { %v2458_v19 = vadd.f32 %v2457_v42, %v6244_v33  ;;  %v250_v33 = vld [vmem:[#allocation3 + $0x1f0] sm:$0xff]  ;;  %v1026_v9 = vpack.c.bf16 %v276_v2, %v251_v40 }
 0x341   :  { %v2546_v41 = vpop.f32.mrf.mxu1  ;;  %v6337_v34 = vadd.f32 %v2721_v13, %v2633_v14  ;;  %v1025_v53 = vpack.c.bf16 %v275_v29, %v250_v33  ;;  %v1028_v14 = vpack.c.bf16 %v278_v25, %v253_v36  ;;  %v303_v33 = vld [vmem:[#allocation3 + $0x398] sm:$0xff]  ;;  %v328_v29 = vld [vmem:[#allocation3 + $0x460] sm:$0xff] }
 0x342   :  { %v2547_v4 = vadd.f32 %v2546_v41, %v2458_v19  ;;  %2772 = vmatmul.bf16.vlgmr.msrb.gmra.mxu0 %v1000_v7 }
 0x343   :  { %2950 = vmatmul.bf16.vlgmr.msrb.gmra.mxu2 %v1002_v10 }
 0x344   :  { %2861 = vmatmul.bf16.vlgmr.msrb.gmra.mxu1 %v1001_v17  ;;  %3039 = vmatmul.bf16.vlgmr.msrb.gmra.mxu3 %v1003_v37 }
 0x346   :  { %v2635_v24 = vpop.f32.mrf.mxu2 }
 0x347   :  { %v2636_v20 = vadd.f32 %v2635_v24, %v2547_v4  ;;  %v2459_v27 = vpop.f32.mrf.mxu0  ;;  %v2724_v28 = vpop.f32.mrf.mxu3 }
 0x348   :  { %v2460_v31 = vadd.f32 %v2459_v27, %v6247_v57  ;;  %v325_v27 = vld [vmem:[#allocation3 + $0x448] sm:$0xff] }
 0x349   :  { %v2548_v26 = vpop.f32.mrf.mxu1  ;;  %v6340_v39 = vadd.f32 %v2724_v28, %v2636_v20  ;;  %v302_v28 = vld [vmem:[#allocation3 + $0x390] sm:$0xff] }
 0x34a   :  { %v2549_v49 = vadd.f32 %v2548_v26, %v2460_v31  ;;  %v327_v31 = vld [vmem:[#allocation3 + $0x458] sm:$0xff]  ;;  %v301_v26 = vld [vmem:[#allocation3 + $0x388] sm:$0xff] }
 0x34b   :  { %v1052_v25 = vpack.c.bf16 %v327_v31, %v302_v28 }
 0x34e   :  { %v2637_v45 = vpop.f32.mrf.mxu2 }
 0x34f   :  { %v2638_v59 = vadd.f32 %v2637_v45, %v2549_v49  ;;  %v2462_v1 = vpop.f32.mrf.mxu0  ;;  %v2726_v60 = vpop.f32.mrf.mxu3  ;;  %v326_v49 = vld [vmem:[#allocation3 + $0x450] sm:$0xff] }
 0x350   :  { %v2463_v57 = vadd.f32 %v2462_v1, %v6250_v0  ;;  %v300_v0 = vld [vmem:[#allocation3 + $0x380] sm:$0xff]  ;;  %v1051_v45 = vpack.c.bf16 %v326_v49, %v301_v26 }
 0x351   :  { %v2551_v7 = vpop.f32.mrf.mxu1  ;;  %v6343_v42 = vadd.f32 %v2726_v60, %v2638_v59  ;;  %v1050_v46 = vpack.c.bf16 %v325_v27, %v300_v0  ;;  %v1053_v59 = vpack.c.bf16 %v328_v29, %v303_v33  ;;  %v353_v0 = vld [vmem:[#allocation3 + $0x528] sm:$0xff]  ;;  %v378_v27 = vld [vmem:[#allocation3 + $0x5f0] sm:$0xff] }
 0x352   :  { %v2552_v13 = vadd.f32 %v2551_v7, %v2463_v57  ;;  %2777 = vmatmul.bf16.gmra.mxu0 %v1025_v53 }
 0x353   :  { %2955 = vmatmul.bf16.gmra.mxu2 %v1027_v63 }
 0x354   :  { %2866 = vmatmul.bf16.gmra.mxu1 %v1026_v9  ;;  %3044 = vmatmul.bf16.gmra.mxu3 %v1028_v14 }
 0x356   :  { %v2640_v10 = vpop.f32.mrf.mxu2 }
 0x357   :  { %v2641_v17 = vadd.f32 %v2640_v10, %v2552_v13  ;;  %v2464_v19 = vpop.f32.mrf.mxu0  ;;  %v2729_v41 = vpop.f32.mrf.mxu3 }
 0x358   :  { %v2465_v37 = vadd.f32 %v2464_v19, %v6253_v62  ;;  %v375_v19 = vld [vmem:[#allocation3 + $0x5d8] sm:$0xff] }
 0x359   :  { %v2553_v4 = vpop.f32.mrf.mxu1  ;;  %v6346_v24 = vadd.f32 %v2729_v41, %v2641_v17  ;;  %v352_v41 = vld [vmem:[#allocation3 + $0x520] sm:$0xff] }
 0x35a   :  { %v2554_v20 = vadd.f32 %v2553_v4, %v2465_v37  ;;  %v377_v37 = vld [vmem:[#allocation3 + $0x5e8] sm:$0xff]  ;;  %v351_v4 = vld [vmem:[#allocation3 + $0x518] sm:$0xff] }
 0x35b   :  { %v1077_v29 = vpack.c.bf16 %v377_v37, %v352_v41 }
 0x35e   :  { %v2642_v48 = vpop.f32.mrf.mxu2 }
 0x35f   :  { %v2643_v40 = vadd.f32 %v2642_v48, %v2554_v20  ;;  %v2467_v2 = vpop.f32.mrf.mxu0  ;;  %v2731_v36 = vpop.f32.mrf.mxu3  ;;  %v376_v20 = vld [vmem:[#allocation3 + $0x5e0] sm:$0xff] }
 0x360   :  { %v2468_v62 = vadd.f32 %v2467_v2, %v6256_v44  ;;  %v350_v44 = vld [vmem:[#allocation3 + $0x510] sm:$0xff]  ;;  %v1076_v48 = vpack.c.bf16 %v376_v20, %v351_v4 }
 0x361   :  { %v2556_v53 = vpop.f32.mrf.mxu1  ;;  %v6349_v1 = vadd.f32 %v2731_v36, %v2643_v40  ;;  %v1075_v31 = vpack.c.bf16 %v375_v19, %v350_v44  ;;  %v1078_v40 = vpack.c.bf16 %v378_v27, %v353_v0  ;;  %v403_v44 = vld [vmem:[#allocation3 + $0x6b8] sm:$0xff]  ;;  %v428_v19 = vld [vmem:[#allocation3 + $0x780] sm:$0xff] }
 0x362   :  { %v2557_v60 = vadd.f32 %v2556_v53, %v2468_v62  ;;  %2782 = vmatmul.bf16.gmra.mxu0 %v1050_v46 }
 0x363   :  { %2960 = vmatmul.bf16.gmra.mxu2 %v1052_v25 }
 0x364   :  { %2871 = vmatmul.bf16.gmra.mxu1 %v1051_v45  ;;  %3049 = vmatmul.bf16.gmra.mxu3 %v1053_v59 }
 0x366   :  { %v2645_v63 = vpop.f32.mrf.mxu2 }
 0x367   :  { %v2646_v9 = vadd.f32 %v2645_v63, %v2557_v60  ;;  %v2469_v57 = vpop.f32.mrf.mxu0  ;;  %v2734_v7 = vpop.f32.mrf.mxu3 }
 0x368   :  { %v2470_v14 = vadd.f32 %v2469_v57, %v6259_v50  ;;  %v425_v57 = vld [vmem:[#allocation3 + $0x768] sm:$0xff] }
 0x369   :  { %v2558_v13 = vpop.f32.mrf.mxu1  ;;  %v6352_v10 = vadd.f32 %v2734_v7, %v2646_v9  ;;  %v402_v7 = vld [vmem:[#allocation3 + $0x6b0] sm:$0xff] }
 0x36a   :  { %v2559_v17 = vadd.f32 %v2558_v13, %v2470_v14  ;;  %v427_v14 = vld [vmem:[#allocation3 + $0x778] sm:$0xff]  ;;  %v401_v13 = vld [vmem:[#allocation3 + $0x6a8] sm:$0xff] }
 0x36b   :  { %v1102_v27 = vpack.c.bf16 %v427_v14, %v402_v7 }
 0x36e   :  { %v2647_v28 = vpop.f32.mrf.mxu2 }
 0x36f   :  { %v2648_v26 = vadd.f32 %v2647_v28, %v2559_v17  ;;  %v2472_v49 = vpop.f32.mrf.mxu0  ;;  %v2736_v33 = vpop.f32.mrf.mxu3  ;;  %v426_v17 = vld [vmem:[#allocation3 + $0x770] sm:$0xff] }
 0x370   :  { %v2473_v50 = vadd.f32 %v2472_v49, %v6262_v12  ;;  %v400_v12 = vld [vmem:[#allocation3 + $0x6a0] sm:$0xff]  ;;  %v1101_v28 = vpack.c.bf16 %v426_v17, %v401_v13 }
 0x371   :  { %v2561_v46 = vpop.f32.mrf.mxu1  ;;  %v6355_v2 = vadd.f32 %v2736_v33, %v2648_v26  ;;  %v1100_v37 = vpack.c.bf16 %v425_v57, %v400_v12  ;;  %v1103_v26 = vpack.c.bf16 %v428_v19, %v403_v44  ;;  %v453_v12 = vld [vmem:[#allocation3 + $0x848] sm:$0xff]  ;;  %v478_v57 = vld [vmem:[#allocation3 + $0x910] sm:$0xff] }
 0x372   :  { %v2562_v36 = vadd.f32 %v2561_v46, %v2473_v50  ;;  %2787 = vmatmul.bf16.gmra.mxu0 %v1075_v31 }
 0x373   :  { %2965 = vmatmul.bf16.gmra.mxu2 %v1077_v29 }
 0x374   :  { %2876 = vmatmul.bf16.gmra.mxu1 %v1076_v48  ;;  %3054 = vmatmul.bf16.gmra.mxu3 %v1078_v40 }
 0x376   :  { %v2650_v25 = vpop.f32.mrf.mxu2 }
 0x377   :  { %v2651_v45 = vadd.f32 %v2650_v25, %v2562_v36  ;;  %v2474_v62 = vpop.f32.mrf.mxu0  ;;  %v2739_v53 = vpop.f32.mrf.mxu3 }
 0x378   :  { %v2475_v59 = vadd.f32 %v2474_v62, %v6265_v52  ;;  %v475_v62 = vld [vmem:[#allocation3 + $0x8f8] sm:$0xff] }
 0x379   :  { %v2563_v60 = vpop.f32.mrf.mxu1  ;;  %v6358_v63 = vadd.f32 %v2739_v53, %v2651_v45  ;;  %v452_v53 = vld [vmem:[#allocation3 + $0x840] sm:$0xff] }
 0x37a   :  { %v2564_v9 = vadd.f32 %v2563_v60, %v2475_v59  ;;  %v477_v59 = vld [vmem:[#allocation3 + $0x908] sm:$0xff]  ;;  %v451_v60 = vld [vmem:[#allocation3 + $0x838] sm:$0xff] }
 0x37b   :  { %v1127_v19 = vpack.c.bf16 %v477_v59, %v452_v53 }
 0x37e   :  { %v2652_v41 = vpop.f32.mrf.mxu2 }
 0x37f   :  { %v2653_v4 = vadd.f32 %v2652_v41, %v2564_v9  ;;  %v2477_v20 = vpop.f32.mrf.mxu0  ;;  %v2741_v0 = vpop.f32.mrf.mxu3  ;;  %v476_v9 = vld [vmem:[#allocation3 + $0x900] sm:$0xff] }
 0x380   :  { %v2478_v52 = vadd.f32 %v2477_v20, %v6268_v51  ;;  %v450_v51 = vld [vmem:[#allocation3 + $0x830] sm:$0xff]  ;;  %v1126_v41 = vpack.c.bf16 %v476_v9, %v451_v60 }
 0x381   :  { %v2566_v31 = vpop.f32.mrf.mxu1  ;;  %v6361_v49 = vadd.f32 %v2741_v0, %v2653_v4  ;;  %v1125_v14 = vpack.c.bf16 %v475_v62, %v450_v51  ;;  %v1128_v4 = vpack.c.bf16 %v478_v57, %v453_v12  ;;  %v503_v51 = vld [vmem:[#allocation3 + $0x9d8] sm:$0xff]  ;;  %v528_v62 = vld [vmem:[#allocation3 + $0xaa0] sm:$0xff] }
 0x382   :  { %v2567_v33 = vadd.f32 %v2566_v31, %v2478_v52  ;;  %2792 = vmatmul.bf16.gmra.mxu0 %v1100_v37 }
 0x383   :  { %2970 = vmatmul.bf16.gmra.mxu2 %v1102_v27 }
 0x384   :  { %2881 = vmatmul.bf16.gmra.mxu1 %v1101_v28  ;;  %3059 = vmatmul.bf16.gmra.mxu3 %v1103_v26 }
 0x386   :  { %v2655_v29 = vpop.f32.mrf.mxu2 }
 0x387   :  { %v2656_v48 = vadd.f32 %v2655_v29, %v2567_v33  ;;  %v2479_v50 = vpop.f32.mrf.mxu0  ;;  %v2744_v46 = vpop.f32.mrf.mxu3 }
 0x388   :  { %v2480_v40 = vadd.f32 %v2479_v50, %v6271_v16  ;;  %v525_v50 = vld [vmem:[#allocation3 + $0xa88] sm:$0xff] }
 0x389   :  { %v2568_v36 = vpop.f32.mrf.mxu1  ;;  %v6364_v25 = vadd.f32 %v2744_v46, %v2656_v48  ;;  %v502_v46 = vld [vmem:[#allocation3 + $0x9d0] sm:$0xff] }
 0x38a   :  { %v2569_v45 = vadd.f32 %v2568_v36, %v2480_v40  ;;  %v527_v40 = vld [vmem:[#allocation3 + $0xa98] sm:$0xff]  ;;  %v501_v36 = vld [vmem:[#allocation3 + $0x9c8] sm:$0xff] }
 0x38b   :  { %v1152_v57 = vpack.c.bf16 %v527_v40, %v502_v46 }
 0x38e   :  { %v2657_v7 = vpop.f32.mrf.mxu2 }
 0x38f   :  { %v2658_v13 = vadd.f32 %v2657_v7, %v2569_v45  ;;  %v2482_v17 = vpop.f32.mrf.mxu0  ;;  %v2746_v44 = vpop.f32.mrf.mxu3  ;;  %v526_v45 = vld [vmem:[#allocation3 + $0xa90] sm:$0xff] }
 0x390   :  { %v2483_v16 = vadd.f32 %v2482_v17, %v6274_v35  ;;  %v500_v35 = vld [vmem:[#allocation3 + $0x9c0] sm:$0xff]  ;;  %v1151_v7 = vpack.c.bf16 %v526_v45, %v501_v36 }
 0x391   :  { %v2571_v37 = vpop.f32.mrf.mxu1  ;;  %v6367_v20 = vadd.f32 %v2746_v44, %v2658_v13  ;;  %v1150_v59 = vpack.c.bf16 %v525_v50, %v500_v35  ;;  %v1153_v13 = vpack.c.bf16 %v528_v62, %v503_v51  ;;  %v553_v35 = vld [vmem:[#allocation3 + $0xb68] sm:$0xff]  ;;  %v578_v50 = vld [vmem:[#allocation3 + $0xc30] sm:$0xff] }
 0x392   :  { %v2572_v0 = vadd.f32 %v2571_v37, %v2483_v16  ;;  %2797 = vmatmul.bf16.gmra.mxu0 %v1125_v14 }
 0x393   :  { %2975 = vmatmul.bf16.gmra.mxu2 %v1127_v19 }
 0x394   :  { %2886 = vmatmul.bf16.gmra.mxu1 %v1126_v41  ;;  %3064 = vmatmul.bf16.gmra.mxu3 %v1128_v4 }
 0x396   :  { %v2660_v27 = vpop.f32.mrf.mxu2 }
 0x397   :  { %v2661_v28 = vadd.f32 %v2660_v27, %v2572_v0  ;;  %v2484_v52 = vpop.f32.mrf.mxu0  ;;  %v2749_v31 = vpop.f32.mrf.mxu3 }
 0x398   :  { %v2485_v26 = vadd.f32 %v2484_v52, %v6277_v11  ;;  %v575_v52 = vld [vmem:[#allocation3 + $0xc18] sm:$0xff] }
 0x399   :  { %v2573_v33 = vpop.f32.mrf.mxu1  ;;  %v6370_v29 = vadd.f32 %v2749_v31, %v2661_v28  ;;  %v552_v31 = vld [vmem:[#allocation3 + $0xb60] sm:$0xff] }
 0x39a   :  { %v2574_v48 = vadd.f32 %v2573_v33, %v2485_v26  ;;  %v577_v26 = vld [vmem:[#allocation3 + $0xc28] sm:$0xff]  ;;  %v551_v33 = vld [vmem:[#allocation3 + $0xb58] sm:$0xff] }
 0x39b   :  { %v1177_v62 = vpack.c.bf16 %v577_v26, %v552_v31 }
 0x39e   :  { %v2662_v53 = vpop.f32.mrf.mxu2 }
 0x39f   :  { %v2663_v60 = vadd.f32 %v2662_v53, %v2574_v48  ;;  %v2487_v9 = vpop.f32.mrf.mxu0  ;;  %v2751_v12 = vpop.f32.mrf.mxu3  ;;  %v576_v48 = vld [vmem:[#allocation3 + $0xc20] sm:$0xff] }
 0x3a0   :  { %v2488_v11 = vadd.f32 %v2487_v9, %v6280_v61  ;;  %v550_v61 = vld [vmem:[#allocation3 + $0xb50] sm:$0xff]  ;;  %v1176_v53 = vpack.c.bf16 %v576_v48, %v551_v33 }
 0x3a1   :  { %v2576_v14 = vpop.f32.mrf.mxu1  ;;  %v6373_v17 = vadd.f32 %v2751_v12, %v2663_v60  ;;  %v1175_v40 = vpack.c.bf16 %v575_v52, %v550_v61  ;;  %v1178_v60 = vpack.c.bf16 %v578_v50, %v553_v35  ;;  %v603_v61 = vld [vmem:[#allocation3 + $0xcf8] sm:$0xff]  ;;  %v628_v52 = vld [vmem:[#allocation3 + $0xdc0] sm:$0xff] }
 0x3a2   :  { %v2577_v44 = vadd.f32 %v2576_v14, %v2488_v11  ;;  %2802 = vmatmul.bf16.gmra.mxu0 %v1150_v59 }
 0x3a3   :  { %2980 = vmatmul.bf16.gmra.mxu2 %v1152_v57 }
 0x3a4   :  { %2891 = vmatmul.bf16.gmra.mxu1 %v1151_v7  ;;  %3069 = vmatmul.bf16.gmra.mxu3 %v1153_v13 }
 0x3a6   :  { %v2665_v19 = vpop.f32.mrf.mxu2 }
 0x3a7   :  { %v2666_v41 = vadd.f32 %v2665_v19, %v2577_v44  ;;  %v2489_v16 = vpop.f32.mrf.mxu0  ;;  %v2754_v37 = vpop.f32.mrf.mxu3 }
 0x3a8   :  { %v2490_v4 = vadd.f32 %v2489_v16, %v6283_v3  ;;  %v625_v16 = vld [vmem:[#allocation3 + $0xda8] sm:$0xff] }
 0x3a9   :  { %v2578_v0 = vpop.f32.mrf.mxu1  ;;  %v6376_v27 = vadd.f32 %v2754_v37, %v2666_v41  ;;  %v602_v37 = vld [vmem:[#allocation3 + $0xcf0] sm:$0xff] }
 0x3aa   :  { %v2579_v28 = vadd.f32 %v2578_v0, %v2490_v4  ;;  %v627_v4 = vld [vmem:[#allocation3 + $0xdb8] sm:$0xff]  ;;  %v601_v0 = vld [vmem:[#allocation3 + $0xce8] sm:$0xff] }
 0x3ab   :  { %v1202_v50 = vpack.c.bf16 %v627_v4, %v602_v37 }
 0x3ae   :  { %v2667_v46 = vpop.f32.mrf.mxu2 }
 0x3af   :  { %v2668_v36 = vadd.f32 %v2667_v46, %v2579_v28  ;;  %v2492_v45 = vpop.f32.mrf.mxu0  ;;  %v2756_v51 = vpop.f32.mrf.mxu3  ;;  %v626_v28 = vld [vmem:[#allocation3 + $0xdb0] sm:$0xff] }
 0x3b0   :  { %v2493_v3 = vadd.f32 %v2492_v45, %v6286_v32  ;;  %v600_v32 = vld [vmem:[#allocation3 + $0xce0] sm:$0xff]  ;;  %v1201_v46 = vpack.c.bf16 %v626_v28, %v601_v0 }
 0x3b1   :  { %v2581_v59 = vpop.f32.mrf.mxu1  ;;  %v6379_v9 = vadd.f32 %v2756_v51, %v2668_v36  ;;  %v1200_v26 = vpack.c.bf16 %v625_v16, %v600_v32  ;;  %v1203_v36 = vpack.c.bf16 %v628_v52, %v603_v61  ;;  %v653_v32 = vld [vmem:[#allocation3 + $0xe88] sm:$0xff]  ;;  %v678_v16 = vld [vmem:[#allocation3 + $0xf50] sm:$0xff] }
 0x3b2   :  { %v2582_v12 = vadd.f32 %v2581_v59, %v2493_v3  ;;  %2807 = vmatmul.bf16.gmra.mxu0 %v1175_v40 }
 0x3b3   :  { %2985 = vmatmul.bf16.gmra.mxu2 %v1177_v62 }
 0x3b4   :  { %2896 = vmatmul.bf16.gmra.mxu1 %v1176_v53  ;;  %3074 = vmatmul.bf16.gmra.mxu3 %v1178_v60 }
 0x3b6   :  { %v2670_v57 = vpop.f32.mrf.mxu2 }
 0x3b7   :  { %v2671_v7 = vadd.f32 %v2670_v57, %v2582_v12  ;;  %v2494_v11 = vpop.f32.mrf.mxu0  ;;  %v2759_v14 = vpop.f32.mrf.mxu3 }
 0x3b8   :  { %v2495_v13 = vadd.f32 %v2494_v11, %v6289_v54  ;;  %v675_v11 = vld [vmem:[#allocation3 + $0xf38] sm:$0xff] }
 0x3b9   :  { %v2583_v44 = vpop.f32.mrf.mxu1  ;;  %v6382_v19 = vadd.f32 %v2759_v14, %v2671_v7  ;;  %v652_v14 = vld [vmem:[#allocation3 + $0xe80] sm:$0xff] }
 0x3ba   :  { %v2584_v41 = vadd.f32 %v2583_v44, %v2495_v13  ;;  %v677_v13 = vld [vmem:[#allocation3 + $0xf48] sm:$0xff]  ;;  %v651_v44 = vld [vmem:[#allocation3 + $0xe78] sm:$0xff] }
 0x3bb   :  { %v1227_v52 = vpack.c.bf16 %v677_v13, %v652_v14 }
 0x3be   :  { %v2672_v31 = vpop.f32.mrf.mxu2 }
 0x3bf   :  { %v2673_v33 = vadd.f32 %v2672_v31, %v2584_v41  ;;  %v2761_v48 = vpop.f32.mrf.mxu3  ;;  %v2773_v35 = vpop.f32.mrf.mxu0  ;;  %v676_v41 = vld [vmem:[#allocation3 + $0xf40] sm:$0xff] }
 0x3c0   :  { %v2774_v54 = vadd.f32 %v2773_v35, %v6292_v6  ;;  %v650_v6 = vld [vmem:[#allocation3 + $0xe70] sm:$0xff]  ;;  %v1226_v31 = vpack.c.bf16 %v676_v41, %v651_v44 }
 0x3c1   :  { %v2862_v40 = vpop.f32.mrf.mxu1  ;;  %v6385_v45 = vadd.f32 %v2761_v48, %v2673_v33  ;;  %v1225_v4 = vpack.c.bf16 %v675_v11, %v650_v6  ;;  %v1228_v33 = vpack.c.bf16 %v678_v16, %v653_v32  ;;  %v703_v6 = vld [vmem:[#allocation3 + $0x1018] sm:$0xff]  ;;  %v728_v11 = vld [vmem:[#allocation3 + $0x10e0] sm:$0xff] }
 0x3c2   :  { %v2863_v51 = vadd.f32 %v2862_v40, %v2774_v54  ;;  %2812 = vmatmul.bf16.gmra.mxu0 %v1200_v26 }
 0x3c3   :  { %2990 = vmatmul.bf16.gmra.mxu2 %v1202_v50 }
 0x3c4   :  { %2901 = vmatmul.bf16.gmra.mxu1 %v1201_v46  ;;  %3079 = vmatmul.bf16.gmra.mxu3 %v1203_v36 }
 0x3c6   :  { %v2951_v62 = vpop.f32.mrf.mxu2 }
 0x3c7   :  { %v2952_v53 = vadd.f32 %v2951_v62, %v2863_v51  ;;  %v2775_v3 = vpop.f32.mrf.mxu0  ;;  %v3040_v59 = vpop.f32.mrf.mxu3 }
 0x3c8   :  { %v2776_v60 = vadd.f32 %v2775_v3, %v6295_v38  ;;  %v725_v3 = vld [vmem:[#allocation3 + $0x10c8] sm:$0xff] }
 0x3c9   :  { %v2864_v12 = vpop.f32.mrf.mxu1  ;;  %v6388_v57 = vadd.f32 %v3040_v59, %v2952_v53  ;;  %v702_v59 = vld [vmem:[#allocation3 + $0x1010] sm:$0xff] }
 0x3ca   :  { %v2865_v7 = vadd.f32 %v2864_v12, %v2776_v60  ;;  %v727_v60 = vld [vmem:[#allocation3 + $0x10d8] sm:$0xff]  ;;  %v701_v12 = vld [vmem:[#allocation3 + $0x1008] sm:$0xff] }
 0x3cb   :  { %v1252_v16 = vpack.c.bf16 %v727_v60, %v702_v59  ;;  %v776_v59 = vld [vmem:[#allocation3 + $0x1260] sm:$0xff]  ;;  %v753_v60 = vld [vmem:[#allocation3 + $0x11a8] sm:$0xff] }
 0x3ce   :  { %v2953_v37 = vpop.f32.mrf.mxu2 }
 0x3cf   :  { %v2954_v0 = vadd.f32 %v2953_v37, %v2865_v7  ;;  %v2778_v28 = vpop.f32.mrf.mxu0  ;;  %v3042_v61 = vpop.f32.mrf.mxu3  ;;  %v726_v7 = vld [vmem:[#allocation3 + $0x10d0] sm:$0xff] }
 0x3d0   :  { %v2779_v38 = vadd.f32 %v2778_v28, %v6298_v47  ;;  %v700_v47 = vld [vmem:[#allocation3 + $0x1000] sm:$0xff]  ;;  %v1251_v37 = vpack.c.bf16 %v726_v7, %v701_v12  ;;  %v778_v12 = vld [vmem:[#allocation3 + $0x1270] sm:$0xff] }
 0x3d1   :  { %v2867_v26 = vpop.f32.mrf.mxu1  ;;  %v6391_v48 = vadd.f32 %v3042_v61, %v2954_v0  ;;  %v1250_v13 = vpack.c.bf16 %v725_v3, %v700_v47  ;;  %v1253_v0 = vpack.c.bf16 %v728_v11, %v703_v6  ;;  %v777_v47 = vld [vmem:[#allocation3 + $0x1268] sm:$0xff]  ;;  %v751_v3 = vld [vmem:[#allocation3 + $0x1198] sm:$0xff] }
 0x3d2   :  { %v2868_v35 = vadd.f32 %v2867_v26, %v2779_v38  ;;  %2817 = vmatmul.bf16.gmra.mxu0 %v1225_v4 }
 0x3d3   :  { %2995 = vmatmul.bf16.gmra.mxu2 %v1227_v52  ;;  %v5265_v52 = vld [vmem:[#allocation6 + $0x108] sm:$0xf] }
 0x3d4   :  { %2906 = vmatmul.bf16.gmra.mxu1 %v1226_v31  ;;  %3084 = vmatmul.bf16.gmra.mxu3 %v1228_v33  ;;  %v5418_v31 = vld [vmem:[#allocation6 + $0x168] sm:$0xf0] }
 0x3d5   :  { %v5266_v38 = vor.u32 %v5418_v31, %v5265_v52 }
 0x3d6   :  { %v2956_v50 = vpop.f32.mrf.mxu2 }
 0x3d7   :  { %v2957_v46 = vadd.f32 %v2956_v50, %v2868_v35  ;;  %v2780_v54 = vpop.f32.mrf.mxu0  ;;  %v3045_v40 = vpop.f32.mrf.mxu3  ;;  %3126 = vmatpush.bf16.xpose.msra.mxu0 %v5266_v38 }
 0x3d8   :  { %v2781_v36 = vadd.f32 %v2780_v54, %v6301_v23 }
 0x3d9   :  { %v2869_v51 = vpop.f32.mrf.mxu1  ;;  %v6394_v62 = vadd.f32 %v3045_v40, %v2957_v46 }
 0x3da   :  { %v2870_v53 = vadd.f32 %v2869_v51, %v2781_v36  ;;  %v750_v36 = vld [vmem:[#allocation3 + $0x1190] sm:$0xff]  ;;  %v775_v51 = vld [vmem:[#allocation3 + $0x1258] sm:$0xff] }
 0x3db   :  { %v1275_v6 = vpack.c.bf16 %v775_v51, %v750_v36  ;;  %v803_v36 = vld [vmem:[#allocation3 + $0x1338] sm:$0xff]  ;;  %v828_v51 = vld [vmem:[#allocation3 + $0x1400] sm:$0xff] }
 0x3de   :  { %v2958_v14 = vpop.f32.mrf.mxu2 }
 0x3df   :  { %v2959_v44 = vadd.f32 %v2958_v14, %v2870_v53  ;;  %v2783_v41 = vpop.f32.mrf.mxu0  ;;  %v3047_v32 = vpop.f32.mrf.mxu3  ;;  %v752_v53 = vld [vmem:[#allocation3 + $0x11a0] sm:$0xff] }
 0x3e0   :  { %v2784_v23 = vadd.f32 %v2783_v41, %v6304_v5  ;;  %v1276_v41 = vpack.c.bf16 %v776_v59, %v751_v3 }
 0x3e1   :  { %v2872_v4 = vpop.f32.mrf.mxu1  ;;  %v6397_v28 = vadd.f32 %v3047_v32, %v2959_v44  ;;  %v1277_v44 = vpack.c.bf16 %v777_v47, %v752_v53 }
 0x3e2   :  { %v2873_v61 = vadd.f32 %v2872_v4, %v2784_v23  ;;  %2822 = vmatmul.bf16.gmra.mxu0 %v1250_v13 }
 0x3e3   :  { %3000 = vmatmul.bf16.gmra.mxu2 %v1252_v16  ;;  %v1278_v16 = vpack.c.bf16 %v778_v12, %v753_v60 }
 0x3e4   :  { %2911 = vmatmul.bf16.gmra.mxu1 %v1251_v37  ;;  %3089 = vmatmul.bf16.gmra.mxu3 %v1253_v0 }
 0x3e6   :  { %v2961_v26 = vpop.f32.mrf.mxu2 }
 0x3e7   :  { %v2962_v33 = vadd.f32 %v2961_v26, %v2873_v61  ;;  %v2785_v35 = vpop.f32.mrf.mxu0  ;;  %v3050_v50 = vpop.f32.mrf.mxu3 }
 0x3e8   :  { %v2786_v46 = vadd.f32 %v2785_v35, %v6307_v15  ;;  %v825_v35 = vld [vmem:[#allocation3 + $0x13e8] sm:$0xff] }
 0x3e9   :  { %v2874_v5 = vpop.f32.mrf.mxu1  ;;  %v6400_v54 = vadd.f32 %v3050_v50, %v2962_v33  ;;  %v802_v50 = vld [vmem:[#allocation3 + $0x1330] sm:$0xff] }
 0x3ea   :  { %v2875_v40 = vadd.f32 %v2874_v5, %v2786_v46  ;;  %v827_v46 = vld [vmem:[#allocation3 + $0x13f8] sm:$0xff]  ;;  %v801_v5 = vld [vmem:[#allocation3 + $0x1328] sm:$0xff] }
 0x3eb   :  { %v1302_v12 = vpack.c.bf16 %v827_v46, %v802_v50 }
 0x3ee   :  { %v2963_v7 = vpop.f32.mrf.mxu2 }
 0x3ef   :  { %v2964_v11 = vadd.f32 %v2963_v7, %v2875_v40  ;;  %v2788_v14 = vpop.f32.mrf.mxu0  ;;  %v3052_v13 = vpop.f32.mrf.mxu3  ;;  %v826_v40 = vld [vmem:[#allocation3 + $0x13f0] sm:$0xff] }
 0x3f0   :  { %v2789_v15 = vadd.f32 %v2788_v14, %v6310_v30  ;;  %v800_v30 = vld [vmem:[#allocation3 + $0x1320] sm:$0xff]  ;;  %v1301_v7 = vpack.c.bf16 %v826_v40, %v801_v5 }
 0x3f1   :  { %v2877_v32 = vpop.f32.mrf.mxu1  ;;  %v6403_v37 = vadd.f32 %v3052_v13, %v2964_v11  ;;  %v1300_v47 = vpack.c.bf16 %v825_v35, %v800_v30  ;;  %v1303_v11 = vpack.c.bf16 %v828_v51, %v803_v36  ;;  %v853_v30 = vld [vmem:[#allocation3 + $0x14c8] sm:$0xff]  ;;  %v878_v35 = vld [vmem:[#allocation3 + $0x1590] sm:$0xff] }
 0x3f2   :  { %v2878_v23 = vadd.f32 %v2877_v32, %v2789_v15  ;;  %2827 = vmatmul.bf16.gmra.mxu0 %v1275_v6 }
 0x3f3   :  { %3005 = vmatmul.bf16.gmra.mxu2 %v1277_v44 }
 0x3f4   :  { %2916 = vmatmul.bf16.gmra.mxu1 %v1276_v41  ;;  %3094 = vmatmul.bf16.gmra.mxu3 %v1278_v16 }
 0x3f6   :  { %v2966_v4 = vpop.f32.mrf.mxu2 }
 0x3f7   :  { %v2967_v0 = vadd.f32 %v2966_v4, %v2878_v23  ;;  %v2790_v61 = vpop.f32.mrf.mxu0  ;;  %v3055_v52 = vpop.f32.mrf.mxu3 }
 0x3f8   :  { %v2791_v31 = vadd.f32 %v2790_v61, %v6313_v8  ;;  %v875_v61 = vld [vmem:[#allocation3 + $0x1578] sm:$0xff] }
 0x3f9   :  { %v2879_v38 = vpop.f32.mrf.mxu1  ;;  %v6406_v26 = vadd.f32 %v3055_v52, %v2967_v0  ;;  %v852_v52 = vld [vmem:[#allocation3 + $0x14c0] sm:$0xff] }
 0x3fa   :  { %v2880_v33 = vadd.f32 %v2879_v38, %v2791_v31  ;;  %v877_v31 = vld [vmem:[#allocation3 + $0x1588] sm:$0xff]  ;;  %v851_v38 = vld [vmem:[#allocation3 + $0x14b8] sm:$0xff] }
 0x3fb   :  { %v1327_v51 = vpack.c.bf16 %v877_v31, %v852_v52  ;;  %v900_v52 = vld [vmem:[#allocation3 + $0x1640] sm:$0xff]  ;;  %v925_v31 = vld [vmem:[#allocation3 + $0x1708] sm:$0xff] }
 0x3fe   :  { %v2968_v53 = vpop.f32.mrf.mxu2 }
 0x3ff   :  { %v2969_v3 = vadd.f32 %v2968_v53, %v2880_v33  ;;  %v2793_v59 = vpop.f32.mrf.mxu0  ;;  %v3057_v60 = vpop.f32.mrf.mxu3  ;;  %v876_v33 = vld [vmem:[#allocation3 + $0x1580] sm:$0xff] }
 0x400   :  { %v2794_v8 = vadd.f32 %v2793_v59, %v6316_v21  ;;  %v850_v21 = vld [vmem:[#allocation3 + $0x14b0] sm:$0xff]  ;;  %v1326_v53 = vpack.c.bf16 %v876_v33, %v851_v38  ;;  %v5165_v38 = vld [vmem:[#allocation6 + $0x40] sm:$0xf]  ;;  %v5393_v33 = vld [vmem:[#allocation6 + $0xa0] sm:$0xf0] }
 0x401   :  { %v2882_v6 = vpop.f32.mrf.mxu1  ;;  %v6409_v14 = vadd.f32 %v3057_v60, %v2969_v3  ;;  %v1325_v46 = vpack.c.bf16 %v875_v61, %v850_v21  ;;  %v1328_v3 = vpack.c.bf16 %v878_v35, %v853_v30  ;;  %v5273_v60 = vld [vmem:[#allocation6 + $0x110] sm:$0xf]  ;;  %v5173_v30 = vld [vmem:[#allocation6 + $0x48] sm:$0xf] }
 0x402   :  { %v2883_v13 = vadd.f32 %v2882_v6, %v2794_v8  ;;  %2832 = vmatmul.bf16.gmra.mxu0 %v1300_v47  ;;  %v5406_v6 = vld [vmem:[#allocation6 + $0x10c] sm:$0xf] }
 0x403   :  { %3010 = vmatmul.bf16.gmra.mxu2 %v1302_v12  ;;  %v5419_v12 = vld [vmem:[#allocation6 + $0x170] sm:$0xf0] }
 0x404   :  { %2921 = vmatmul.bf16.gmra.mxu1 %v1301_v7  ;;  %3099 = vmatmul.bf16.gmra.mxu3 %v1303_v11  ;;  %v5274_v8 = vor.u32 %v5419_v12, %v5273_v60  ;;  %v5267_v11 = vld [vmem:[#allocation6 + $0x16c] sm:$0xf0]  ;;  %v903_v12 = vld [vmem:[#allocation3 + $0x1658] sm:$0xff] }
 0x405   :  { %v5175_v60 = vld [vmem:[#allocation6 + $0xac] sm:$0xf0] }
 0x406   :  { %v2971_v44 = vpop.f32.mrf.mxu2  ;;  %3304 = vmatpush.bf16.xpose.msra.mxu2 %v5274_v8 }
 0x407   :  { %v2972_v41 = vadd.f32 %v2971_v44, %v2883_v13  ;;  %v2795_v15 = vpop.f32.mrf.mxu0  ;;  %v3060_v32 = vpop.f32.mrf.mxu3  ;;  %v5270_v13 = vor.u32 %v5406_v6, %v5267_v11  ;;  %v5407_v44 = vld [vmem:[#allocation6 + $0x114] sm:$0xf]  ;;  %v1350_v11 = vpack.c.bf16 %v925_v31, %v900_v52 }
 0x408   :  { %v2796_v16 = vadd.f32 %v2795_v15, %v6319_v58 }
 0x409   :  { %v2884_v23 = vpop.f32.mrf.mxu1  ;;  %v6412_v4 = vadd.f32 %v3060_v32, %v2972_v41  ;;  %v5275_v41 = vld [vmem:[#allocation6 + $0x174] sm:$0xf0]  ;;  %3215 = vmatpush.bf16.xpose.msra.mxu1 %v5270_v13 }
 0x40a   :  { %v2885_v0 = vadd.f32 %v2884_v23, %v2796_v16  ;;  %v5278_v15 = vor.u32 %v5407_v44, %v5275_v41 }
 0x40c   :  { %3393 = vmatpush.bf16.xpose.msra.mxu3 %v5278_v15 }
 0x40e   :  { %v2973_v50 = vpop.f32.mrf.mxu2 }
 0x40f   :  { %v2974_v5 = vadd.f32 %v2973_v50, %v2885_v0  ;;  %v2798_v40 = vpop.f32.mrf.mxu0  ;;  %v3062_v36 = vpop.f32.mrf.mxu3  ;;  %v902_v50 = vld [vmem:[#allocation3 + $0x1650] sm:$0xff] }
 0x410   :  { %v2799_v58 = vadd.f32 %v2798_v40, %v6322_v43  ;;  %v5394_v40 = vld [vmem:[#allocation6 + $0xa8] sm:$0xf0] }
 0x411   :  { %v2887_v47 = vpop.f32.mrf.mxu1  ;;  %v6415_v59 = vadd.f32 %v3062_v36, %v2974_v5  ;;  %v5166_v5 = vor.u32 %v5393_v33, %v5165_v38  ;;  %v5174_v36 = vor.u32 %v5394_v40, %v5173_v30  ;;  %v952_v40 = vld [vmem:[#allocation3 + $0x17e0] sm:$0xff] }
 0x412   :  { %v2888_v7 = vadd.f32 %v2887_v47, %v2799_v58  ;;  %2837 = vmatmul.bf16.gmra.mxu0 %v1325_v46  ;;  %v927_v46 = vld [vmem:[#allocation3 + $0x1718] sm:$0xff]  ;;  %v5382_v58 = vld [vmem:[#allocation6 + $0x4c] sm:$0xf] }
 0x413   :  { %3015 = vmatmul.bf16.gmra.mxu2 %v1327_v51  ;;  %v5381_v51 = vld [vmem:[#allocation6 + $0x44] sm:$0xf]  ;;  %v901_v47 = vld [vmem:[#allocation3 + $0x1648] sm:$0xff]  ;;  %3127 = vmatpush.bf16.xpose.msra.mxu0 %v5166_v5  ;;  %v5178_v8 = vor.u32 %v5382_v58, %v5175_v60  ;;  %v1352_v15 = vpack.c.bf16 %v927_v46, %v902_v50  ;;  %v975_v5 = vld [vmem:[#allocation3 + $0x1898] sm:$0xff] }
 0x414   :  { %2926 = vmatmul.bf16.gmra.mxu1 %v1326_v53  ;;  %3104 = vmatmul.bf16.gmra.mxu3 %v1328_v3  ;;  %v5167_v53 = vld [vmem:[#allocation6 + $0xa4] sm:$0xf0]  ;;  %v926_v3 = vld [vmem:[#allocation3 + $0x1710] sm:$0xff] }
 0x415   :  { %3305 = vmatpush.bf16.xpose.msra.mxu2 %v5174_v36  ;;  %3394 = vmatpush.bf16.xpose.msra.mxu3 %v5178_v8  ;;  %v977_v36 = vld [vmem:[#allocation3 + $0x18a8] sm:$0xff] }
 0x416   :  { %v2976_v43 = vpop.f32.mrf.mxu2  ;;  %v953_v58 = vld [vmem:[#allocation3 + $0x17e8] sm:$0xff]  ;;  %v1377_v8 = vpack.c.bf16 %v977_v36, %v952_v40 }
 0x417   :  { %v2977_v32 = vadd.f32 %v2976_v43, %v2888_v7  ;;  %v2800_v16 = vpop.f32.mrf.mxu0  ;;  %v3065_v23 = vpop.f32.mrf.mxu3  ;;  %v928_v7 = vld [vmem:[#allocation3 + $0x1720] sm:$0xff]  ;;  %v1351_v43 = vpack.c.bf16 %v926_v3, %v901_v47  ;;  %v978_v47 = vld [vmem:[#allocation3 + $0x18b0] sm:$0xff] }
 0x418   :  { %v2801_v0 = vadd.f32 %v2800_v16, %v6325_v18  ;;  %v5170_v18 = vor.u32 %v5381_v51, %v5167_v53  ;;  %v951_v51 = vld [vmem:[#allocation3 + $0x17d8] sm:$0xff]  ;;  %v976_v53 = vld [vmem:[#allocation3 + $0x18a0] sm:$0xff] }
 0x419   :  { %v2889_v21 = vpop.f32.mrf.mxu1  ;;  %v6418_v61 = vadd.f32 %v3065_v23, %v2977_v32  ;;  %v1353_v23 = vpack.c.bf16 %v928_v7, %v903_v12 }
 0x41a   :  { %v2890_v35 = vadd.f32 %v2889_v21, %v2801_v0  ;;  %3216 = vmatpush.bf16.xpose.msra.mxu1 %v5170_v18 }
 0x41e   :  { %v2978_v6 = vpop.f32.mrf.mxu2 }
 0x41f   :  { %v2979_v13 = vadd.f32 %v2978_v6, %v2890_v35  ;;  %v2803_v44 = vpop.f32.mrf.mxu0  ;;  %v3067_v41 = vpop.f32.mrf.mxu3  ;;  %v1376_v6 = vpack.c.bf16 %v976_v53, %v951_v51 }
 0x420   :  { %v2804_v32 = vadd.f32 %v2803_v44, %v6328_v22  ;;  %v950_v22 = vld [vmem:[#allocation3 + $0x17d0] sm:$0xff] }
 0x421   :  { %v2892_v16 = vpop.f32.mrf.mxu1  ;;  %v6421_v0 = vadd.f32 %v3067_v41, %v2979_v13  ;;  %v1375_v18 = vpack.c.bf16 %v975_v5, %v950_v22  ;;  %v1378_v13 = vpack.c.bf16 %v978_v47, %v953_v58  ;;  %v207_v22 = vld [vmem:[#allocation3 + $0x98] sm:$0xff]  ;;  %v232_v5 = vld [vmem:[#allocation3 + $0x160] sm:$0xff] }
 0x422   :  { %v2893_v21 = vadd.f32 %v2892_v16, %v2804_v32  ;;  %2842 = vmatmul.bf16.gmra.mxu0 %v1350_v11 }
 0x423   :  { %3020 = vmatmul.bf16.gmra.mxu2 %v1352_v15 }
 0x424   :  { %2931 = vmatmul.bf16.gmra.mxu1 %v1351_v43  ;;  %3109 = vmatmul.bf16.gmra.mxu3 %v1353_v23 }
 0x426   :  { %v2981_v38 = vpop.f32.mrf.mxu2 }
 0x427   :  { %v2982_v52 = vadd.f32 %v2981_v38, %v2893_v21  ;;  %v2805_v31 = vpop.f32.mrf.mxu0  ;;  %v3070_v33 = vpop.f32.mrf.mxu3 }
 0x428   :  { %v2806_v30 = vadd.f32 %v2805_v31, %v6331_v56  ;;  %v229_v31 = vld [vmem:[#allocation3 + $0x148] sm:$0xff] }
 0x429   :  { %v2894_v35 = vpop.f32.mrf.mxu1  ;;  %v6424_v50 = vadd.f32 %v3070_v33, %v2982_v52  ;;  %v206_v33 = vld [vmem:[#allocation3 + $0x90] sm:$0xff] }
 0x42a   :  { %v2895_v46 = vadd.f32 %v2894_v35, %v2806_v30  ;;  %v231_v30 = vld [vmem:[#allocation3 + $0x158] sm:$0xff]  ;;  %v205_v35 = vld [vmem:[#allocation3 + $0x88] sm:$0xff] }
 0x42b   :  { %v1006_v47 = vpack.c.bf16 %v231_v30, %v206_v33 }
 0x42e   :  { %v2983_v3 = vpop.f32.mrf.mxu2 }
 0x42f   :  { %v2984_v60 = vadd.f32 %v2983_v3, %v2895_v46  ;;  %v2808_v12 = vpop.f32.mrf.mxu0  ;;  %v3072_v7 = vpop.f32.mrf.mxu3  ;;  %v230_v46 = vld [vmem:[#allocation3 + $0x150] sm:$0xff] }
 0x430   :  { %v2809_v56 = vadd.f32 %v2808_v12, %v6334_v55  ;;  %v204_v55 = vld [vmem:[#allocation3 + $0x80] sm:$0xff]  ;;  %v1005_v3 = vpack.c.bf16 %v230_v46, %v205_v35 }
 0x431   :  { %v2897_v11 = vpop.f32.mrf.mxu1  ;;  %v6427_v44 = vadd.f32 %v3072_v7, %v2984_v60  ;;  %v1004_v36 = vpack.c.bf16 %v229_v31, %v204_v55  ;;  %v1007_v60 = vpack.c.bf16 %v232_v5, %v207_v22  ;;  %v257_v55 = vld [vmem:[#allocation3 + $0x228] sm:$0xff]  ;;  %v282_v31 = vld [vmem:[#allocation3 + $0x2f0] sm:$0xff] }
 0x432   :  { %v2898_v41 = vadd.f32 %v2897_v11, %v2809_v56  ;;  %2847 = vmatmul.bf16.gmra.mxu0 %v1375_v18 }
 0x433   :  { %3025 = vmatmul.bf16.gmra.mxu2 %v1377_v8 }
 0x434   :  { %2936 = vmatmul.bf16.gmra.mxu1 %v1376_v6  ;;  %3114 = vmatmul.bf16.gmra.mxu3 %v1378_v13 }
 0x436   :  { %v2986_v15 = vpop.f32.mrf.mxu2 }
 0x437   :  { %v2987_v43 = vadd.f32 %v2986_v15, %v2898_v41  ;;  %v2810_v32 = vpop.f32.mrf.mxu0  ;;  %v3075_v16 = vpop.f32.mrf.mxu3 }
 0x438   :  { %v2811_v23 = vadd.f32 %v2810_v32, %v6337_v34  ;;  %v279_v32 = vld [vmem:[#allocation3 + $0x2d8] sm:$0xff] }
 0x439   :  { %v2899_v21 = vpop.f32.mrf.mxu1  ;;  %v6430_v38 = vadd.f32 %v3075_v16, %v2987_v43  ;;  %v256_v16 = vld [vmem:[#allocation3 + $0x220] sm:$0xff] }
 0x43a   :  { %v2900_v52 = vadd.f32 %v2899_v21, %v2811_v23  ;;  %v281_v23 = vld [vmem:[#allocation3 + $0x2e8] sm:$0xff]  ;;  %v255_v21 = vld [vmem:[#allocation3 + $0x218] sm:$0xff] }
 0x43b   :  { %v1031_v5 = vpack.c.bf16 %v281_v23, %v256_v16 }
 0x43e   :  { %v2988_v40 = vpop.f32.mrf.mxu2 }
 0x43f   :  { %v2989_v51 = vadd.f32 %v2988_v40, %v2900_v52  ;;  %v2813_v53 = vpop.f32.mrf.mxu0  ;;  %v3077_v58 = vpop.f32.mrf.mxu3  ;;  %v280_v52 = vld [vmem:[#allocation3 + $0x2e0] sm:$0xff] }
 0x440   :  { %v2814_v34 = vadd.f32 %v2813_v53, %v6340_v39  ;;  %v254_v39 = vld [vmem:[#allocation3 + $0x210] sm:$0xff]  ;;  %v1030_v40 = vpack.c.bf16 %v280_v52, %v255_v21 }
 0x441   :  { %v2902_v18 = vpop.f32.mrf.mxu1  ;;  %v6433_v12 = vadd.f32 %v3077_v58, %v2989_v51  ;;  %v1029_v30 = vpack.c.bf16 %v279_v32, %v254_v39  ;;  %v1032_v51 = vpack.c.bf16 %v282_v31, %v257_v55  ;;  %v307_v39 = vld [vmem:[#allocation3 + $0x3b8] sm:$0xff]  ;;  %v332_v32 = vld [vmem:[#allocation3 + $0x480] sm:$0xff] }
 0x442   :  { %v2903_v7 = vadd.f32 %v2902_v18, %v2814_v34  ;;  %3128 = vmatmul.bf16.vlgmr.msra.gmra.mxu0 %v1004_v36 }
 0x443   :  { %3306 = vmatmul.bf16.vlgmr.msra.gmra.mxu2 %v1006_v47 }
 0x444   :  { %3217 = vmatmul.bf16.vlgmr.msra.gmra.mxu1 %v1005_v3  ;;  %3395 = vmatmul.bf16.vlgmr.msra.gmra.mxu3 %v1007_v60 }
 0x446   :  { %v2991_v8 = vpop.f32.mrf.mxu2 }
 0x447   :  { %v2992_v6 = vadd.f32 %v2991_v8, %v2903_v7  ;;  %v2815_v56 = vpop.f32.mrf.mxu0  ;;  %v3080_v11 = vpop.f32.mrf.mxu3 }
 0x448   :  { %v2816_v13 = vadd.f32 %v2815_v56, %v6343_v42  ;;  %v329_v56 = vld [vmem:[#allocation3 + $0x468] sm:$0xff] }
 0x449   :  { %v2904_v41 = vpop.f32.mrf.mxu1  ;;  %v6436_v15 = vadd.f32 %v3080_v11, %v2992_v6  ;;  %v306_v11 = vld [vmem:[#allocation3 + $0x3b0] sm:$0xff] }
 0x44a   :  { %v2905_v43 = vadd.f32 %v2904_v41, %v2816_v13  ;;  %v331_v13 = vld [vmem:[#allocation3 + $0x478] sm:$0xff]  ;;  %v305_v41 = vld [vmem:[#allocation3 + $0x3a8] sm:$0xff] }
 0x44b   :  { %v1056_v31 = vpack.c.bf16 %v331_v13, %v306_v11 }
 0x44e   :  { %v2993_v33 = vpop.f32.mrf.mxu2 }
 0x44f   :  { %v2994_v35 = vadd.f32 %v2993_v33, %v2905_v43  ;;  %v2818_v46 = vpop.f32.mrf.mxu0  ;;  %v3082_v22 = vpop.f32.mrf.mxu3  ;;  %v330_v43 = vld [vmem:[#allocation3 + $0x470] sm:$0xff] }
 0x450   :  { %v2819_v42 = vadd.f32 %v2818_v46, %v6346_v24  ;;  %v304_v24 = vld [vmem:[#allocation3 + $0x3a0] sm:$0xff]  ;;  %v1055_v33 = vpack.c.bf16 %v330_v43, %v305_v41 }
 0x451   :  { %v2907_v36 = vpop.f32.mrf.mxu1  ;;  %v6439_v53 = vadd.f32 %v3082_v22, %v2994_v35  ;;  %v1054_v23 = vpack.c.bf16 %v329_v56, %v304_v24  ;;  %v1057_v35 = vpack.c.bf16 %v332_v32, %v307_v39  ;;  %v357_v24 = vld [vmem:[#allocation3 + $0x548] sm:$0xff]  ;;  %v382_v56 = vld [vmem:[#allocation3 + $0x610] sm:$0xff] }
 0x452   :  { %v2908_v58 = vadd.f32 %v2907_v36, %v2819_v42  ;;  %3133 = vmatmul.bf16.gmra.mxu0 %v1029_v30 }
 0x453   :  { %3311 = vmatmul.bf16.gmra.mxu2 %v1031_v5 }
 0x454   :  { %3222 = vmatmul.bf16.gmra.mxu1 %v1030_v40  ;;  %3400 = vmatmul.bf16.gmra.mxu3 %v1032_v51 }
 0x456   :  { %v2996_v47 = vpop.f32.mrf.mxu2 }
 0x457   :  { %v2997_v3 = vadd.f32 %v2996_v47, %v2908_v58  ;;  %v2820_v34 = vpop.f32.mrf.mxu0  ;;  %v3085_v18 = vpop.f32.mrf.mxu3 }
 0x458   :  { %v2821_v60 = vadd.f32 %v2820_v34, %v6349_v1  ;;  %v379_v34 = vld [vmem:[#allocation3 + $0x5f8] sm:$0xff] }
 0x459   :  { %v2909_v7 = vpop.f32.mrf.mxu1  ;;  %v6442_v8 = vadd.f32 %v3085_v18, %v2997_v3  ;;  %v356_v18 = vld [vmem:[#allocation3 + $0x540] sm:$0xff] }
 0x45a   :  { %v2910_v6 = vadd.f32 %v2909_v7, %v2821_v60  ;;  %v381_v60 = vld [vmem:[#allocation3 + $0x608] sm:$0xff]  ;;  %v355_v7 = vld [vmem:[#allocation3 + $0x538] sm:$0xff] }
 0x45b   :  { %v1081_v32 = vpack.c.bf16 %v381_v60, %v356_v18 }
 0x45e   :  { %v2998_v16 = vpop.f32.mrf.mxu2 }
 0x45f   :  { %v2999_v21 = vadd.f32 %v2998_v16, %v2910_v6  ;;  %v2823_v52 = vpop.f32.mrf.mxu0  ;;  %v3087_v55 = vpop.f32.mrf.mxu3  ;;  %v380_v6 = vld [vmem:[#allocation3 + $0x600] sm:$0xff] }
 0x460   :  { %v2824_v1 = vadd.f32 %v2823_v52, %v6352_v10  ;;  %v354_v10 = vld [vmem:[#allocation3 + $0x530] sm:$0xff]  ;;  %v1080_v16 = vpack.c.bf16 %v380_v6, %v355_v7 }
 0x461   :  { %v2912_v30 = vpop.f32.mrf.mxu1  ;;  %v6445_v46 = vadd.f32 %v3087_v55, %v2999_v21  ;;  %v1079_v13 = vpack.c.bf16 %v379_v34, %v354_v10  ;;  %v1082_v21 = vpack.c.bf16 %v382_v56, %v357_v24  ;;  %v407_v10 = vld [vmem:[#allocation3 + $0x6d8] sm:$0xff]  ;;  %v432_v34 = vld [vmem:[#allocation3 + $0x7a0] sm:$0xff] }
 0x462   :  { %v2913_v22 = vadd.f32 %v2912_v30, %v2824_v1  ;;  %3138 = vmatmul.bf16.gmra.mxu0 %v1054_v23 }
 0x463   :  { %3316 = vmatmul.bf16.gmra.mxu2 %v1056_v31 }
 0x464   :  { %3227 = vmatmul.bf16.gmra.mxu1 %v1055_v33  ;;  %3405 = vmatmul.bf16.gmra.mxu3 %v1057_v35 }
 0x466   :  { %v3001_v5 = vpop.f32.mrf.mxu2 }
 0x467   :  { %v3002_v40 = vadd.f32 %v3001_v5, %v2913_v22  ;;  %v2825_v42 = vpop.f32.mrf.mxu0  ;;  %v3090_v36 = vpop.f32.mrf.mxu3 }
 0x468   :  { %v2826_v51 = vadd.f32 %v2825_v42, %v6355_v2  ;;  %v429_v42 = vld [vmem:[#allocation3 + $0x788] sm:$0xff] }
 0x469   :  { %v2914_v58 = vpop.f32.mrf.mxu1  ;;  %v6448_v47 = vadd.f32 %v3090_v36, %v3002_v40  ;;  %v406_v36 = vld [vmem:[#allocation3 + $0x6d0] sm:$0xff] }
 0x46a   :  { %v2915_v3 = vadd.f32 %v2914_v58, %v2826_v51  ;;  %v431_v51 = vld [vmem:[#allocation3 + $0x798] sm:$0xff]  ;;  %v405_v58 = vld [vmem:[#allocation3 + $0x6c8] sm:$0xff] }
 0x46b   :  { %v1106_v56 = vpack.c.bf16 %v431_v51, %v406_v36 }
 0x46e   :  { %v3003_v11 = vpop.f32.mrf.mxu2 }
 0x46f   :  { %v3004_v41 = vadd.f32 %v3003_v11, %v2915_v3  ;;  %v2828_v43 = vpop.f32.mrf.mxu0  ;;  %v3092_v39 = vpop.f32.mrf.mxu3  ;;  %v430_v3 = vld [vmem:[#allocation3 + $0x790] sm:$0xff] }
 0x470   :  { %v2829_v2 = vadd.f32 %v2828_v43, %v6358_v63  ;;  %v404_v63 = vld [vmem:[#allocation3 + $0x6c0] sm:$0xff]  ;;  %v1105_v11 = vpack.c.bf16 %v430_v3, %v405_v58 }
 0x471   :  { %v2917_v23 = vpop.f32.mrf.mxu1  ;;  %v6451_v52 = vadd.f32 %v3092_v39, %v3004_v41  ;;  %v1104_v60 = vpack.c.bf16 %v429_v42, %v404_v63  ;;  %v1107_v41 = vpack.c.bf16 %v432_v34, %v407_v10  ;;  %v457_v63 = vld [vmem:[#allocation3 + $0x868] sm:$0xff]  ;;  %v482_v42 = vld [vmem:[#allocation3 + $0x930] sm:$0xff] }
 0x472   :  { %v2918_v55 = vadd.f32 %v2917_v23, %v2829_v2  ;;  %3143 = vmatmul.bf16.gmra.mxu0 %v1079_v13 }
 0x473   :  { %3321 = vmatmul.bf16.gmra.mxu2 %v1081_v32 }
 0x474   :  { %3232 = vmatmul.bf16.gmra.mxu1 %v1080_v16  ;;  %3410 = vmatmul.bf16.gmra.mxu3 %v1082_v21 }
 0x476   :  { %v3006_v31 = vpop.f32.mrf.mxu2 }
 0x477   :  { %v3007_v33 = vadd.f32 %v3006_v31, %v2918_v55  ;;  %v2830_v1 = vpop.f32.mrf.mxu0  ;;  %v3095_v30 = vpop.f32.mrf.mxu3 }
 0x478   :  { %v2831_v35 = vadd.f32 %v2830_v1, %v6361_v49  ;;  %v479_v1 = vld [vmem:[#allocation3 + $0x918] sm:$0xff] }
 0x479   :  { %v2919_v22 = vpop.f32.mrf.mxu1  ;;  %v6454_v5 = vadd.f32 %v3095_v30, %v3007_v33  ;;  %v456_v30 = vld [vmem:[#allocation3 + $0x860] sm:$0xff] }
 0x47a   :  { %v2920_v40 = vadd.f32 %v2919_v22, %v2831_v35  ;;  %v481_v35 = vld [vmem:[#allocation3 + $0x928] sm:$0xff]  ;;  %v455_v22 = vld [vmem:[#allocation3 + $0x858] sm:$0xff] }
 0x47b   :  { %v1131_v34 = vpack.c.bf16 %v481_v35, %v456_v30 }
 0x47e   :  { %v3008_v18 = vpop.f32.mrf.mxu2 }
 0x47f   :  { %v3009_v7 = vadd.f32 %v3008_v18, %v2920_v40  ;;  %v2833_v6 = vpop.f32.mrf.mxu0  ;;  %v3097_v24 = vpop.f32.mrf.mxu3  ;;  %v480_v40 = vld [vmem:[#allocation3 + $0x920] sm:$0xff] }
 0x480   :  { %v2834_v49 = vadd.f32 %v2833_v6, %v6364_v25  ;;  %v454_v25 = vld [vmem:[#allocation3 + $0x850] sm:$0xff]  ;;  %v1130_v18 = vpack.c.bf16 %v480_v40, %v455_v22 }
 0x481   :  { %v2922_v13 = vpop.f32.mrf.mxu1  ;;  %v6457_v43 = vadd.f32 %v3097_v24, %v3009_v7  ;;  %v1129_v51 = vpack.c.bf16 %v479_v1, %v454_v25  ;;  %v1132_v7 = vpack.c.bf16 %v482_v42, %v457_v63  ;;  %v507_v25 = vld [vmem:[#allocation3 + $0x9f8] sm:$0xff]  ;;  %v532_v1 = vld [vmem:[#allocation3 + $0xac0] sm:$0xff] }
 0x482   :  { %v2923_v39 = vadd.f32 %v2922_v13, %v2834_v49  ;;  %3148 = vmatmul.bf16.gmra.mxu0 %v1104_v60 }
 0x483   :  { %3326 = vmatmul.bf16.gmra.mxu2 %v1106_v56 }
 0x484   :  { %3237 = vmatmul.bf16.gmra.mxu1 %v1105_v11  ;;  %3415 = vmatmul.bf16.gmra.mxu3 %v1107_v41 }
 0x486   :  { %v3011_v32 = vpop.f32.mrf.mxu2 }
 0x487   :  { %v3012_v16 = vadd.f32 %v3011_v32, %v2923_v39  ;;  %v2835_v2 = vpop.f32.mrf.mxu0  ;;  %v3100_v23 = vpop.f32.mrf.mxu3 }
 0x488   :  { %v2836_v21 = vadd.f32 %v2835_v2, %v6367_v20  ;;  %v529_v2 = vld [vmem:[#allocation3 + $0xaa8] sm:$0xff] }
 0x489   :  { %v2924_v55 = vpop.f32.mrf.mxu1  ;;  %v6460_v31 = vadd.f32 %v3100_v23, %v3012_v16  ;;  %v506_v23 = vld [vmem:[#allocation3 + $0x9f0] sm:$0xff] }
 0x48a   :  { %v2925_v33 = vadd.f32 %v2924_v55, %v2836_v21  ;;  %v531_v21 = vld [vmem:[#allocation3 + $0xab8] sm:$0xff]  ;;  %v505_v55 = vld [vmem:[#allocation3 + $0x9e8] sm:$0xff] }
 0x48b   :  { %v1156_v42 = vpack.c.bf16 %v531_v21, %v506_v23 }
 0x48e   :  { %v3013_v36 = vpop.f32.mrf.mxu2 }
 0x48f   :  { %v3014_v58 = vadd.f32 %v3013_v36, %v2925_v33  ;;  %v2838_v3 = vpop.f32.mrf.mxu0  ;;  %v3102_v10 = vpop.f32.mrf.mxu3  ;;  %v530_v33 = vld [vmem:[#allocation3 + $0xab0] sm:$0xff] }
 0x490   :  { %v2839_v20 = vadd.f32 %v2838_v3, %v6370_v29  ;;  %v504_v29 = vld [vmem:[#allocation3 + $0x9e0] sm:$0xff]  ;;  %v1155_v36 = vpack.c.bf16 %v530_v33, %v505_v55 }
 0x491   :  { %v2927_v60 = vpop.f32.mrf.mxu1  ;;  %v6463_v6 = vadd.f32 %v3102_v10, %v3014_v58  ;;  %v1154_v35 = vpack.c.bf16 %v529_v2, %v504_v29  ;;  %v1157_v58 = vpack.c.bf16 %v532_v1, %v507_v25  ;;  %v557_v29 = vld [vmem:[#allocation3 + $0xb88] sm:$0xff]  ;;  %v582_v2 = vld [vmem:[#allocation3 + $0xc50] sm:$0xff] }
 0x492   :  { %v2928_v24 = vadd.f32 %v2927_v60, %v2839_v20  ;;  %3153 = vmatmul.bf16.gmra.mxu0 %v1129_v51 }
 0x493   :  { %3331 = vmatmul.bf16.gmra.mxu2 %v1131_v34 }
 0x494   :  { %3242 = vmatmul.bf16.gmra.mxu1 %v1130_v18  ;;  %3420 = vmatmul.bf16.gmra.mxu3 %v1132_v7 }
 0x496   :  { %v3016_v56 = vpop.f32.mrf.mxu2 }
 0x497   :  { %v3017_v11 = vadd.f32 %v3016_v56, %v2928_v24  ;;  %v2840_v49 = vpop.f32.mrf.mxu0  ;;  %v3105_v13 = vpop.f32.mrf.mxu3 }
 0x498   :  { %v2841_v41 = vadd.f32 %v2840_v49, %v6373_v17  ;;  %v579_v49 = vld [vmem:[#allocation3 + $0xc38] sm:$0xff] }
 0x499   :  { %v2929_v39 = vpop.f32.mrf.mxu1  ;;  %v6466_v32 = vadd.f32 %v3105_v13, %v3017_v11  ;;  %v556_v13 = vld [vmem:[#allocation3 + $0xb80] sm:$0xff] }
 0x49a   :  { %v2930_v16 = vadd.f32 %v2929_v39, %v2841_v41  ;;  %v581_v41 = vld [vmem:[#allocation3 + $0xc48] sm:$0xff]  ;;  %v555_v39 = vld [vmem:[#allocation3 + $0xb78] sm:$0xff] }
 0x49b   :  { %v1181_v1 = vpack.c.bf16 %v581_v41, %v556_v13 }
 0x49e   :  { %v3018_v30 = vpop.f32.mrf.mxu2 }
 0x49f   :  { %v3019_v22 = vadd.f32 %v3018_v30, %v2930_v16  ;;  %v2843_v40 = vpop.f32.mrf.mxu0  ;;  %v3107_v63 = vpop.f32.mrf.mxu3  ;;  %v580_v16 = vld [vmem:[#allocation3 + $0xc40] sm:$0xff] }
 0x4a0   :  { %v2844_v17 = vadd.f32 %v2843_v40, %v6376_v27  ;;  %v554_v27 = vld [vmem:[#allocation3 + $0xb70] sm:$0xff]  ;;  %v1180_v30 = vpack.c.bf16 %v580_v16, %v555_v39 }
 0x4a1   :  { %v2932_v51 = vpop.f32.mrf.mxu1  ;;  %v6469_v3 = vadd.f32 %v3107_v63, %v3019_v22  ;;  %v1179_v21 = vpack.c.bf16 %v579_v49, %v554_v27  ;;  %v1182_v22 = vpack.c.bf16 %v582_v2, %v557_v29  ;;  %v607_v27 = vld [vmem:[#allocation3 + $0xd18] sm:$0xff]  ;;  %v632_v49 = vld [vmem:[#allocation3 + $0xde0] sm:$0xff] }
 0x4a2   :  { %v2933_v10 = vadd.f32 %v2932_v51, %v2844_v17  ;;  %3158 = vmatmul.bf16.gmra.mxu0 %v1154_v35 }
 0x4a3   :  { %3336 = vmatmul.bf16.gmra.mxu2 %v1156_v42 }
 0x4a4   :  { %3247 = vmatmul.bf16.gmra.mxu1 %v1155_v36  ;;  %3425 = vmatmul.bf16.gmra.mxu3 %v1157_v58 }
 0x4a6   :  { %v3021_v34 = vpop.f32.mrf.mxu2 }
 0x4a7   :  { %v3022_v18 = vadd.f32 %v3021_v34, %v2933_v10  ;;  %v2845_v20 = vpop.f32.mrf.mxu0  ;;  %v3110_v60 = vpop.f32.mrf.mxu3 }
 0x4a8   :  { %v2846_v7 = vadd.f32 %v2845_v20, %v6379_v9  ;;  %v629_v20 = vld [vmem:[#allocation3 + $0xdc8] sm:$0xff] }
 0x4a9   :  { %v2934_v24 = vpop.f32.mrf.mxu1  ;;  %v6472_v56 = vadd.f32 %v3110_v60, %v3022_v18  ;;  %v606_v60 = vld [vmem:[#allocation3 + $0xd10] sm:$0xff] }
 0x4aa   :  { %v2935_v11 = vadd.f32 %v2934_v24, %v2846_v7  ;;  %v631_v7 = vld [vmem:[#allocation3 + $0xdd8] sm:$0xff]  ;;  %v605_v24 = vld [vmem:[#allocation3 + $0xd08] sm:$0xff] }
 0x4ab   :  { %v1206_v2 = vpack.c.bf16 %v631_v7, %v606_v60 }
 0x4ae   :  { %v3023_v23 = vpop.f32.mrf.mxu2 }
 0x4af   :  { %v3024_v55 = vadd.f32 %v3023_v23, %v2935_v11  ;;  %v2848_v33 = vpop.f32.mrf.mxu0  ;;  %v3112_v25 = vpop.f32.mrf.mxu3  ;;  %v630_v11 = vld [vmem:[#allocation3 + $0xdd0] sm:$0xff] }
 0x4b0   :  { %v2849_v9 = vadd.f32 %v2848_v33, %v6382_v19  ;;  %v604_v19 = vld [vmem:[#allocation3 + $0xd00] sm:$0xff]  ;;  %v1205_v23 = vpack.c.bf16 %v630_v11, %v605_v24 }
 0x4b1   :  { %v2937_v35 = vpop.f32.mrf.mxu1  ;;  %v6475_v40 = vadd.f32 %v3112_v25, %v3024_v55  ;;  %v1204_v41 = vpack.c.bf16 %v629_v20, %v604_v19  ;;  %v1207_v55 = vpack.c.bf16 %v632_v49, %v607_v27  ;;  %v657_v19 = vld [vmem:[#allocation3 + $0xea8] sm:$0xff]  ;;  %v682_v20 = vld [vmem:[#allocation3 + $0xf70] sm:$0xff] }
 0x4b2   :  { %v2938_v63 = vadd.f32 %v2937_v35, %v2849_v9  ;;  %3163 = vmatmul.bf16.gmra.mxu0 %v1179_v21 }
 0x4b3   :  { %3341 = vmatmul.bf16.gmra.mxu2 %v1181_v1 }
 0x4b4   :  { %3252 = vmatmul.bf16.gmra.mxu1 %v1180_v30  ;;  %3430 = vmatmul.bf16.gmra.mxu3 %v1182_v22 }
 0x4b6   :  { %v3026_v42 = vpop.f32.mrf.mxu2 }
 0x4b7   :  { %v3027_v36 = vadd.f32 %v3026_v42, %v2938_v63  ;;  %v2850_v17 = vpop.f32.mrf.mxu0  ;;  %v3115_v51 = vpop.f32.mrf.mxu3 }
 0x4b8   :  { %v2851_v58 = vadd.f32 %v2850_v17, %v6385_v45  ;;  %v679_v17 = vld [vmem:[#allocation3 + $0xf58] sm:$0xff] }
 0x4b9   :  { %v2939_v10 = vpop.f32.mrf.mxu1  ;;  %v6478_v34 = vadd.f32 %v3115_v51, %v3027_v36  ;;  %v656_v51 = vld [vmem:[#allocation3 + $0xea0] sm:$0xff] }
 0x4ba   :  { %v2940_v18 = vadd.f32 %v2939_v10, %v2851_v58  ;;  %v681_v58 = vld [vmem:[#allocation3 + $0xf68] sm:$0xff]  ;;  %v655_v10 = vld [vmem:[#allocation3 + $0xe98] sm:$0xff] }
 0x4bb   :  { %v1231_v49 = vpack.c.bf16 %v681_v58, %v656_v51 }
 0x4be   :  { %v3028_v13 = vpop.f32.mrf.mxu2 }
 0x4bf   :  { %v3029_v39 = vadd.f32 %v3028_v13, %v2940_v18  ;;  %v3117_v16 = vpop.f32.mrf.mxu3  ;;  %v3129_v29 = vpop.f32.mrf.mxu0  ;;  %v680_v18 = vld [vmem:[#allocation3 + $0xf60] sm:$0xff] }
 0x4c0   :  { %v3130_v45 = vadd.f32 %v3129_v29, %v6388_v57  ;;  %v654_v57 = vld [vmem:[#allocation3 + $0xe90] sm:$0xff]  ;;  %v1230_v13 = vpack.c.bf16 %v680_v18, %v655_v10 }
 0x4c1   :  { %v3218_v21 = vpop.f32.mrf.mxu1  ;;  %v6481_v33 = vadd.f32 %v3117_v16, %v3029_v39  ;;  %v1229_v7 = vpack.c.bf16 %v679_v17, %v654_v57  ;;  %v1232_v39 = vpack.c.bf16 %v682_v20, %v657_v19  ;;  %v707_v57 = vld [vmem:[#allocation3 + $0x1038] sm:$0xff]  ;;  %v732_v17 = vld [vmem:[#allocation3 + $0x1100] sm:$0xff] }
 0x4c2   :  { %v3219_v25 = vadd.f32 %v3218_v21, %v3130_v45  ;;  %3168 = vmatmul.bf16.gmra.mxu0 %v1204_v41 }
 0x4c3   :  { %3346 = vmatmul.bf16.gmra.mxu2 %v1206_v2 }
 0x4c4   :  { %3257 = vmatmul.bf16.gmra.mxu1 %v1205_v23  ;;  %3435 = vmatmul.bf16.gmra.mxu3 %v1207_v55 }
 0x4c6   :  { %v3307_v1 = vpop.f32.mrf.mxu2 }
 0x4c7   :  { %v3308_v30 = vadd.f32 %v3307_v1, %v3219_v25  ;;  %v3131_v9 = vpop.f32.mrf.mxu0  ;;  %v3396_v35 = vpop.f32.mrf.mxu3 }
 0x4c8   :  { %v3132_v22 = vadd.f32 %v3131_v9, %v6391_v48  ;;  %v729_v9 = vld [vmem:[#allocation3 + $0x10e8] sm:$0xff] }
 0x4c9   :  { %v3220_v63 = vpop.f32.mrf.mxu1  ;;  %v6484_v42 = vadd.f32 %v3396_v35, %v3308_v30  ;;  %v706_v35 = vld [vmem:[#allocation3 + $0x1030] sm:$0xff] }
 0x4ca   :  { %v3221_v36 = vadd.f32 %v3220_v63, %v3132_v22  ;;  %v731_v22 = vld [vmem:[#allocation3 + $0x10f8] sm:$0xff]  ;;  %v705_v63 = vld [vmem:[#allocation3 + $0x1028] sm:$0xff] }
 0x4cb   :  { %v1256_v20 = vpack.c.bf16 %v731_v22, %v706_v35  ;;  %v780_v35 = vld [vmem:[#allocation3 + $0x1280] sm:$0xff]  ;;  %v757_v22 = vld [vmem:[#allocation3 + $0x11c8] sm:$0xff] }
 0x4ce   :  { %v3309_v60 = vpop.f32.mrf.mxu2 }
 0x4cf   :  { %v3310_v24 = vadd.f32 %v3309_v60, %v3221_v36  ;;  %v3134_v11 = vpop.f32.mrf.mxu0  ;;  %v3398_v27 = vpop.f32.mrf.mxu3  ;;  %v730_v36 = vld [vmem:[#allocation3 + $0x10f0] sm:$0xff] }
 0x4d0   :  { %v3135_v48 = vadd.f32 %v3134_v11, %v6394_v62  ;;  %v704_v62 = vld [vmem:[#allocation3 + $0x1020] sm:$0xff]  ;;  %v1255_v60 = vpack.c.bf16 %v730_v36, %v705_v63  ;;  %v782_v63 = vld [vmem:[#allocation3 + $0x1290] sm:$0xff] }
 0x4d1   :  { %v3223_v41 = vpop.f32.mrf.mxu1  ;;  %v6487_v16 = vadd.f32 %v3398_v27, %v3310_v24  ;;  %v1254_v58 = vpack.c.bf16 %v729_v9, %v704_v62  ;;  %v1257_v24 = vpack.c.bf16 %v732_v17, %v707_v57  ;;  %v781_v62 = vld [vmem:[#allocation3 + $0x1288] sm:$0xff]  ;;  %v755_v9 = vld [vmem:[#allocation3 + $0x11b8] sm:$0xff] }
 0x4d2   :  { %v3224_v29 = vadd.f32 %v3223_v41, %v3135_v48  ;;  %3173 = vmatmul.bf16.gmra.mxu0 %v1229_v7 }
 0x4d3   :  { %3351 = vmatmul.bf16.gmra.mxu2 %v1231_v49  ;;  %v5281_v49 = vld [vmem:[#allocation6 + $0x118] sm:$0xf] }
 0x4d4   :  { %3262 = vmatmul.bf16.gmra.mxu1 %v1230_v13  ;;  %3440 = vmatmul.bf16.gmra.mxu3 %v1232_v39  ;;  %v5420_v13 = vld [vmem:[#allocation6 + $0x178] sm:$0xf0] }
 0x4d5   :  { %v5282_v48 = vor.u32 %v5420_v13, %v5281_v49 }
 0x4d6   :  { %v3312_v2 = vpop.f32.mrf.mxu2 }
 0x4d7   :  { %v3313_v23 = vadd.f32 %v3312_v2, %v3224_v29  ;;  %v3136_v45 = vpop.f32.mrf.mxu0  ;;  %v3401_v21 = vpop.f32.mrf.mxu3  ;;  %3482 = vmatpush.bf16.xpose.msrb.mxu0 %v5282_v48 }
 0x4d8   :  { %v3137_v55 = vadd.f32 %v3136_v45, %v6397_v28 }
 0x4d9   :  { %v3225_v25 = vpop.f32.mrf.mxu1  ;;  %v6490_v1 = vadd.f32 %v3401_v21, %v3313_v23 }
 0x4da   :  { %v3226_v30 = vadd.f32 %v3225_v25, %v3137_v55  ;;  %v754_v55 = vld [vmem:[#allocation3 + $0x11b0] sm:$0xff]  ;;  %v779_v25 = vld [vmem:[#allocation3 + $0x1278] sm:$0xff] }
 0x4db   :  { %v1279_v57 = vpack.c.bf16 %v779_v25, %v754_v55  ;;  %v807_v55 = vld [vmem:[#allocation3 + $0x1358] sm:$0xff]  ;;  %v832_v25 = vld [vmem:[#allocation3 + $0x1420] sm:$0xff] }
 0x4de   :  { %v3314_v51 = vpop.f32.mrf.mxu2 }
 0x4df   :  { %v3315_v10 = vadd.f32 %v3314_v51, %v3226_v30  ;;  %v3139_v18 = vpop.f32.mrf.mxu0  ;;  %v3403_v19 = vpop.f32.mrf.mxu3  ;;  %v756_v30 = vld [vmem:[#allocation3 + $0x11c0] sm:$0xff] }
 0x4e0   :  { %v3140_v28 = vadd.f32 %v3139_v18, %v6400_v54  ;;  %v1280_v18 = vpack.c.bf16 %v780_v35, %v755_v9 }
 0x4e1   :  { %v3228_v7 = vpop.f32.mrf.mxu1  ;;  %v6493_v11 = vadd.f32 %v3403_v19, %v3315_v10  ;;  %v1281_v10 = vpack.c.bf16 %v781_v62, %v756_v30 }
 0x4e2   :  { %v3229_v27 = vadd.f32 %v3228_v7, %v3140_v28  ;;  %3178 = vmatmul.bf16.gmra.mxu0 %v1254_v58 }
 0x4e3   :  { %3356 = vmatmul.bf16.gmra.mxu2 %v1256_v20  ;;  %v1282_v20 = vpack.c.bf16 %v782_v63, %v757_v22 }
 0x4e4   :  { %3267 = vmatmul.bf16.gmra.mxu1 %v1255_v60  ;;  %3445 = vmatmul.bf16.gmra.mxu3 %v1257_v24 }
 0x4e6   :  { %v3317_v41 = vpop.f32.mrf.mxu2 }
 0x4e7   :  { %v3318_v39 = vadd.f32 %v3317_v41, %v3229_v27  ;;  %v3141_v29 = vpop.f32.mrf.mxu0  ;;  %v3406_v2 = vpop.f32.mrf.mxu3 }
 0x4e8   :  { %v3142_v23 = vadd.f32 %v3141_v29, %v6403_v37  ;;  %v829_v29 = vld [vmem:[#allocation3 + $0x1408] sm:$0xff] }
 0x4e9   :  { %v3230_v54 = vpop.f32.mrf.mxu1  ;;  %v6496_v45 = vadd.f32 %v3406_v2, %v3318_v39  ;;  %v806_v2 = vld [vmem:[#allocation3 + $0x1350] sm:$0xff] }
 0x4ea   :  { %v3231_v21 = vadd.f32 %v3230_v54, %v3142_v23  ;;  %v831_v23 = vld [vmem:[#allocation3 + $0x1418] sm:$0xff]  ;;  %v805_v54 = vld [vmem:[#allocation3 + $0x1348] sm:$0xff] }
 0x4eb   :  { %v1306_v63 = vpack.c.bf16 %v831_v23, %v806_v2 }
 0x4ee   :  { %v3319_v36 = vpop.f32.mrf.mxu2 }
 0x4ef   :  { %v3320_v17 = vadd.f32 %v3319_v36, %v3231_v21  ;;  %v3144_v51 = vpop.f32.mrf.mxu0  ;;  %v3408_v58 = vpop.f32.mrf.mxu3  ;;  %v830_v21 = vld [vmem:[#allocation3 + $0x1410] sm:$0xff] }
 0x4f0   :  { %v3145_v37 = vadd.f32 %v3144_v51, %v6406_v26  ;;  %v804_v26 = vld [vmem:[#allocation3 + $0x1340] sm:$0xff]  ;;  %v1305_v36 = vpack.c.bf16 %v830_v21, %v805_v54 }
 0x4f1   :  { %v3233_v19 = vpop.f32.mrf.mxu1  ;;  %v6499_v60 = vadd.f32 %v3408_v58, %v3320_v17  ;;  %v1304_v62 = vpack.c.bf16 %v829_v29, %v804_v26  ;;  %v1307_v17 = vpack.c.bf16 %v832_v25, %v807_v55  ;;  %v857_v26 = vld [vmem:[#allocation3 + $0x14e8] sm:$0xff]  ;;  %v882_v29 = vld [vmem:[#allocation3 + $0x15b0] sm:$0xff] }
 0x4f2   :  { %v3234_v28 = vadd.f32 %v3233_v19, %v3145_v37  ;;  %3183 = vmatmul.bf16.gmra.mxu0 %v1279_v57 }
 0x4f3   :  { %3361 = vmatmul.bf16.gmra.mxu2 %v1281_v10 }
 0x4f4   :  { %3272 = vmatmul.bf16.gmra.mxu1 %v1280_v18  ;;  %3450 = vmatmul.bf16.gmra.mxu3 %v1282_v20 }
 0x4f6   :  { %v3322_v7 = vpop.f32.mrf.mxu2 }
 0x4f7   :  { %v3323_v24 = vadd.f32 %v3322_v7, %v3234_v28  ;;  %v3146_v27 = vpop.f32.mrf.mxu0  ;;  %v3411_v49 = vpop.f32.mrf.mxu3 }
 0x4f8   :  { %v3147_v13 = vadd.f32 %v3146_v27, %v6409_v14  ;;  %v879_v27 = vld [vmem:[#allocation3 + $0x1598] sm:$0xff] }
 0x4f9   :  { %v3235_v48 = vpop.f32.mrf.mxu1  ;;  %v6502_v41 = vadd.f32 %v3411_v49, %v3323_v24  ;;  %v856_v49 = vld [vmem:[#allocation3 + $0x14e0] sm:$0xff] }
 0x4fa   :  { %v3236_v39 = vadd.f32 %v3235_v48, %v3147_v13  ;;  %v881_v13 = vld [vmem:[#allocation3 + $0x15a8] sm:$0xff]  ;;  %v855_v48 = vld [vmem:[#allocation3 + $0x14d8] sm:$0xff] }
 0x4fb   :  { %v1331_v25 = vpack.c.bf16 %v881_v13, %v856_v49  ;;  %v904_v49 = vld [vmem:[#allocation3 + $0x1660] sm:$0xff]  ;;  %v929_v13 = vld [vmem:[#allocation3 + $0x1728] sm:$0xff] }
 0x4fe   :  { %v3324_v30 = vpop.f32.mrf.mxu2 }
 0x4ff   :  { %v3325_v9 = vadd.f32 %v3324_v30, %v3236_v39  ;;  %v3149_v35 = vpop.f32.mrf.mxu0  ;;  %v3413_v22 = vpop.f32.mrf.mxu3  ;;  %v880_v39 = vld [vmem:[#allocation3 + $0x15a0] sm:$0xff] }
 0x500   :  { %v3150_v14 = vadd.f32 %v3149_v35, %v6412_v4  ;;  %v854_v4 = vld [vmem:[#allocation3 + $0x14d0] sm:$0xff]  ;;  %v1330_v30 = vpack.c.bf16 %v880_v39, %v855_v48 }
 0x501   :  { %v3238_v57 = vpop.f32.mrf.mxu1  ;;  %v6505_v51 = vadd.f32 %v3413_v22, %v3325_v9  ;;  %v1329_v23 = vpack.c.bf16 %v879_v27, %v854_v4  ;;  %v1332_v9 = vpack.c.bf16 %v882_v29, %v857_v26  ;;  %v5289_v22 = vld [vmem:[#allocation6 + $0x120] sm:$0xf]  ;;  %v5181_v48 = vld [vmem:[#allocation6 + $0x50] sm:$0xf]  ;;  %v5395_v39 = vld [vmem:[#allocation6 + $0xb0] sm:$0xf0] }
 0x502   :  { %v3239_v58 = vadd.f32 %v3238_v57, %v3150_v14  ;;  %3188 = vmatmul.bf16.gmra.mxu0 %v1304_v62  ;;  %v5408_v57 = vld [vmem:[#allocation6 + $0x11c] sm:$0xf]  ;;  %v5189_v26 = vld [vmem:[#allocation6 + $0x58] sm:$0xf] }
 0x503   :  { %3366 = vmatmul.bf16.gmra.mxu2 %v1306_v63  ;;  %v5421_v63 = vld [vmem:[#allocation6 + $0x180] sm:$0xf0] }
 0x504   :  { %3277 = vmatmul.bf16.gmra.mxu1 %v1305_v36  ;;  %3455 = vmatmul.bf16.gmra.mxu3 %v1307_v17  ;;  %v5290_v14 = vor.u32 %v5421_v63, %v5289_v22  ;;  %v5283_v17 = vld [vmem:[#allocation6 + $0x17c] sm:$0xf0]  ;;  %v907_v63 = vld [vmem:[#allocation3 + $0x1678] sm:$0xff] }
 0x505   :  { %v5191_v22 = vld [vmem:[#allocation6 + $0xbc] sm:$0xf0] }
 0x506   :  { %v3327_v10 = vpop.f32.mrf.mxu2  ;;  %3660 = vmatpush.bf16.xpose.msrb.mxu2 %v5290_v14 }
 0x507   :  { %v3328_v18 = vadd.f32 %v3327_v10, %v3239_v58  ;;  %v3151_v37 = vpop.f32.mrf.mxu0  ;;  %v3416_v19 = vpop.f32.mrf.mxu3  ;;  %v5286_v58 = vor.u32 %v5408_v57, %v5283_v17  ;;  %v5409_v10 = vld [vmem:[#allocation6 + $0x124] sm:$0xf]  ;;  %v1354_v17 = vpack.c.bf16 %v929_v13, %v904_v49 }
 0x508   :  { %v3152_v20 = vadd.f32 %v3151_v37, %v6415_v59 }
 0x509   :  { %v3240_v28 = vpop.f32.mrf.mxu1  ;;  %v6508_v7 = vadd.f32 %v3416_v19, %v3328_v18  ;;  %v5291_v18 = vld [vmem:[#allocation6 + $0x184] sm:$0xf0]  ;;  %3571 = vmatpush.bf16.xpose.msrb.mxu1 %v5286_v58 }
 0x50a   :  { %v3241_v24 = vadd.f32 %v3240_v28, %v3152_v20  ;;  %v5294_v37 = vor.u32 %v5409_v10, %v5291_v18 }
 0x50c   :  { %3749 = vmatpush.bf16.xpose.msrb.mxu3 %v5294_v37 }
 0x50e   :  { %v3329_v2 = vpop.f32.mrf.mxu2 }
 0x50f   :  { %v3330_v54 = vadd.f32 %v3329_v2, %v3241_v24  ;;  %v3154_v21 = vpop.f32.mrf.mxu0  ;;  %v3418_v55 = vpop.f32.mrf.mxu3  ;;  %v906_v2 = vld [vmem:[#allocation3 + $0x1670] sm:$0xff] }
 0x510   :  { %v3155_v59 = vadd.f32 %v3154_v21, %v6418_v61  ;;  %v5396_v21 = vld [vmem:[#allocation6 + $0xb8] sm:$0xf0] }
 0x511   :  { %v3243_v62 = vpop.f32.mrf.mxu1  ;;  %v6511_v35 = vadd.f32 %v3418_v55, %v3330_v54  ;;  %v5182_v54 = vor.u32 %v5395_v39, %v5181_v48  ;;  %v5190_v55 = vor.u32 %v5396_v21, %v5189_v26  ;;  %v956_v21 = vld [vmem:[#allocation3 + $0x1800] sm:$0xff] }
 0x512   :  { %v3244_v36 = vadd.f32 %v3243_v62, %v3155_v59  ;;  %3193 = vmatmul.bf16.gmra.mxu0 %v1329_v23  ;;  %v931_v23 = vld [vmem:[#allocation3 + $0x1738] sm:$0xff]  ;;  %v905_v62 = vld [vmem:[#allocation3 + $0x1668] sm:$0xff] }
 0x513   :  { %3371 = vmatmul.bf16.gmra.mxu2 %v1331_v25  ;;  %v5383_v25 = vld [vmem:[#allocation6 + $0x54] sm:$0xf]  ;;  %v5384_v59 = vld [vmem:[#allocation6 + $0x5c] sm:$0xf]  ;;  %3483 = vmatpush.bf16.xpose.msrb.mxu0 %v5182_v54  ;;  %v1356_v37 = vpack.c.bf16 %v931_v23, %v906_v2 }
 0x514   :  { %3282 = vmatmul.bf16.gmra.mxu1 %v1330_v30  ;;  %3460 = vmatmul.bf16.gmra.mxu3 %v1332_v9  ;;  %v5183_v30 = vld [vmem:[#allocation6 + $0xb4] sm:$0xf0]  ;;  %v930_v9 = vld [vmem:[#allocation3 + $0x1730] sm:$0xff]  ;;  %v5194_v14 = vor.u32 %v5384_v59, %v5191_v22  ;;  %v957_v59 = vld [vmem:[#allocation3 + $0x1808] sm:$0xff] }
 0x515   :  { %3661 = vmatpush.bf16.xpose.msrb.mxu2 %v5190_v55  ;;  %v979_v54 = vld [vmem:[#allocation3 + $0x18b8] sm:$0xff]  ;;  %v981_v55 = vld [vmem:[#allocation3 + $0x18c8] sm:$0xff] }
 0x516   :  { %v3332_v61 = vpop.f32.mrf.mxu2  ;;  %3750 = vmatpush.bf16.xpose.msrb.mxu3 %v5194_v14  ;;  %v1381_v14 = vpack.c.bf16 %v981_v55, %v956_v21 }
 0x517   :  { %v3333_v19 = vadd.f32 %v3332_v61, %v3244_v36  ;;  %v3156_v20 = vpop.f32.mrf.mxu0  ;;  %v3421_v28 = vpop.f32.mrf.mxu3  ;;  %v932_v36 = vld [vmem:[#allocation3 + $0x1740] sm:$0xff]  ;;  %v1355_v61 = vpack.c.bf16 %v930_v9, %v905_v62  ;;  %v982_v62 = vld [vmem:[#allocation3 + $0x18d0] sm:$0xff] }
 0x518   :  { %v3157_v24 = vadd.f32 %v3156_v20, %v6421_v0  ;;  %v5186_v0 = vor.u32 %v5383_v25, %v5183_v30  ;;  %v955_v25 = vld [vmem:[#allocation3 + $0x17f8] sm:$0xff]  ;;  %v980_v30 = vld [vmem:[#allocation3 + $0x18c0] sm:$0xff] }
 0x519   :  { %v3245_v4 = vpop.f32.mrf.mxu1  ;;  %v6514_v27 = vadd.f32 %v3421_v28, %v3333_v19  ;;  %v1357_v28 = vpack.c.bf16 %v932_v36, %v907_v63 }
 0x51a   :  { %v3246_v29 = vadd.f32 %v3245_v4, %v3157_v24  ;;  %3572 = vmatpush.bf16.xpose.msrb.mxu1 %v5186_v0 }
 0x51e   :  { %v3334_v57 = vpop.f32.mrf.mxu2 }
 0x51f   :  { %v3335_v58 = vadd.f32 %v3334_v57, %v3246_v29  ;;  %v3159_v10 = vpop.f32.mrf.mxu0  ;;  %v3423_v18 = vpop.f32.mrf.mxu3  ;;  %v1380_v57 = vpack.c.bf16 %v980_v30, %v955_v25 }
 0x520   :  { %v3160_v19 = vadd.f32 %v3159_v10, %v6424_v50  ;;  %v954_v50 = vld [vmem:[#allocation3 + $0x17f0] sm:$0xff] }
 0x521   :  { %v3248_v20 = vpop.f32.mrf.mxu1  ;;  %v6517_v24 = vadd.f32 %v3423_v18, %v3335_v58  ;;  %v1379_v0 = vpack.c.bf16 %v979_v54, %v954_v50  ;;  %v1382_v58 = vpack.c.bf16 %v982_v62, %v957_v59  ;;  %v211_v50 = vld [vmem:[#allocation3 + $0xb8] sm:$0xff]  ;;  %v236_v54 = vld [vmem:[#allocation3 + $0x180] sm:$0xff] }
 0x522   :  { %v3249_v4 = vadd.f32 %v3248_v20, %v3160_v19  ;;  %3198 = vmatmul.bf16.gmra.mxu0 %v1354_v17 }
 0x523   :  { %3376 = vmatmul.bf16.gmra.mxu2 %v1356_v37 }
 0x524   :  { %3287 = vmatmul.bf16.gmra.mxu1 %v1355_v61  ;;  %3465 = vmatmul.bf16.gmra.mxu3 %v1357_v28 }
 0x526   :  { %v3337_v48 = vpop.f32.mrf.mxu2 }
 0x527   :  { %v3338_v49 = vadd.f32 %v3337_v48, %v3249_v4  ;;  %v3161_v13 = vpop.f32.mrf.mxu0  ;;  %v3426_v39 = vpop.f32.mrf.mxu3 }
 0x528   :  { %v3162_v26 = vadd.f32 %v3161_v13, %v6427_v44  ;;  %v233_v13 = vld [vmem:[#allocation3 + $0x168] sm:$0xff] }
 0x529   :  { %v3250_v29 = vpop.f32.mrf.mxu1  ;;  %v6520_v2 = vadd.f32 %v3426_v39, %v3338_v49  ;;  %v210_v39 = vld [vmem:[#allocation3 + $0xb0] sm:$0xff] }
 0x52a   :  { %v3251_v23 = vadd.f32 %v3250_v29, %v3162_v26  ;;  %v235_v26 = vld [vmem:[#allocation3 + $0x178] sm:$0xff]  ;;  %v209_v29 = vld [vmem:[#allocation3 + $0xa8] sm:$0xff] }
 0x52b   :  { %v1010_v62 = vpack.c.bf16 %v235_v26, %v210_v39 }
 0x52e   :  { %v3339_v9 = vpop.f32.mrf.mxu2 }
 0x52f   :  { %v3340_v22 = vadd.f32 %v3339_v9, %v3251_v23  ;;  %v3164_v63 = vpop.f32.mrf.mxu0  ;;  %v3428_v36 = vpop.f32.mrf.mxu3  ;;  %v234_v23 = vld [vmem:[#allocation3 + $0x170] sm:$0xff] }
 0x530   :  { %v3165_v44 = vadd.f32 %v3164_v63, %v6430_v38  ;;  %v208_v38 = vld [vmem:[#allocation3 + $0xa0] sm:$0xff]  ;;  %v1009_v9 = vpack.c.bf16 %v234_v23, %v209_v29 }
 0x531   :  { %v3253_v17 = vpop.f32.mrf.mxu1  ;;  %v6523_v10 = vadd.f32 %v3428_v36, %v3340_v22  ;;  %v1008_v55 = vpack.c.bf16 %v233_v13, %v208_v38  ;;  %v1011_v22 = vpack.c.bf16 %v236_v54, %v211_v50  ;;  %v261_v38 = vld [vmem:[#allocation3 + $0x248] sm:$0xff]  ;;  %v286_v13 = vld [vmem:[#allocation3 + $0x310] sm:$0xff] }
 0x532   :  { %v3254_v18 = vadd.f32 %v3253_v17, %v3165_v44  ;;  %3203 = vmatmul.bf16.gmra.mxu0 %v1379_v0 }
 0x533   :  { %3381 = vmatmul.bf16.gmra.mxu2 %v1381_v14 }
 0x534   :  { %3292 = vmatmul.bf16.gmra.mxu1 %v1380_v57  ;;  %3470 = vmatmul.bf16.gmra.mxu3 %v1382_v58 }
 0x536   :  { %v3342_v37 = vpop.f32.mrf.mxu2 }
 0x537   :  { %v3343_v61 = vadd.f32 %v3342_v37, %v3254_v18  ;;  %v3166_v19 = vpop.f32.mrf.mxu0  ;;  %v3431_v20 = vpop.f32.mrf.mxu3 }
 0x538   :  { %v3167_v28 = vadd.f32 %v3166_v19, %v6433_v12  ;;  %v283_v19 = vld [vmem:[#allocation3 + $0x2f8] sm:$0xff] }
 0x539   :  { %v3255_v4 = vpop.f32.mrf.mxu1  ;;  %v6526_v48 = vadd.f32 %v3431_v20, %v3343_v61  ;;  %v260_v20 = vld [vmem:[#allocation3 + $0x240] sm:$0xff] }
 0x53a   :  { %v3256_v49 = vadd.f32 %v3255_v4, %v3167_v28  ;;  %v285_v28 = vld [vmem:[#allocation3 + $0x308] sm:$0xff]  ;;  %v259_v4 = vld [vmem:[#allocation3 + $0x238] sm:$0xff] }
 0x53b   :  { %v1035_v54 = vpack.c.bf16 %v285_v28, %v260_v20 }
 0x53e   :  { %v3344_v21 = vpop.f32.mrf.mxu2 }
 0x53f   :  { %v3345_v25 = vadd.f32 %v3344_v21, %v3256_v49  ;;  %v3169_v30 = vpop.f32.mrf.mxu0  ;;  %v3433_v59 = vpop.f32.mrf.mxu3  ;;  %v284_v49 = vld [vmem:[#allocation3 + $0x300] sm:$0xff] }
 0x540   :  { %v3170_v12 = vadd.f32 %v3169_v30, %v6436_v15  ;;  %v258_v15 = vld [vmem:[#allocation3 + $0x230] sm:$0xff]  ;;  %v1034_v21 = vpack.c.bf16 %v284_v49, %v259_v4 }
 0x541   :  { %v3258_v0 = vpop.f32.mrf.mxu1  ;;  %v6529_v63 = vadd.f32 %v3433_v59, %v3345_v25  ;;  %v1033_v26 = vpack.c.bf16 %v283_v19, %v258_v15  ;;  %v1036_v25 = vpack.c.bf16 %v286_v13, %v261_v38  ;;  %v311_v15 = vld [vmem:[#allocation3 + $0x3d8] sm:$0xff]  ;;  %v336_v19 = vld [vmem:[#allocation3 + $0x4a0] sm:$0xff] }
 0x542   :  { %v3259_v36 = vadd.f32 %v3258_v0, %v3170_v12  ;;  %3484 = vmatmul.bf16.vlgmr.msrb.gmra.mxu0 %v1008_v55 }
 0x543   :  { %3662 = vmatmul.bf16.vlgmr.msrb.gmra.mxu2 %v1010_v62 }
 0x544   :  { %3573 = vmatmul.bf16.vlgmr.msrb.gmra.mxu1 %v1009_v9  ;;  %3751 = vmatmul.bf16.vlgmr.msrb.gmra.mxu3 %v1011_v22 }
 0x546   :  { %v3347_v14 = vpop.f32.mrf.mxu2 }
 0x547   :  { %v3348_v57 = vadd.f32 %v3347_v14, %v3259_v36  ;;  %v3171_v44 = vpop.f32.mrf.mxu0  ;;  %v3436_v17 = vpop.f32.mrf.mxu3 }
 0x548   :  { %v3172_v58 = vadd.f32 %v3171_v44, %v6439_v53  ;;  %v333_v44 = vld [vmem:[#allocation3 + $0x488] sm:$0xff] }
 0x549   :  { %v3260_v18 = vpop.f32.mrf.mxu1  ;;  %v6532_v37 = vadd.f32 %v3436_v17, %v3348_v57  ;;  %v310_v17 = vld [vmem:[#allocation3 + $0x3d0] sm:$0xff] }
 0x54a   :  { %v3261_v61 = vadd.f32 %v3260_v18, %v3172_v58  ;;  %v335_v58 = vld [vmem:[#allocation3 + $0x498] sm:$0xff]  ;;  %v309_v18 = vld [vmem:[#allocation3 + $0x3c8] sm:$0xff] }
 0x54b   :  { %v1060_v13 = vpack.c.bf16 %v335_v58, %v310_v17 }
 0x54e   :  { %v3349_v39 = vpop.f32.mrf.mxu2 }
 0x54f   :  { %v3350_v29 = vadd.f32 %v3349_v39, %v3261_v61  ;;  %v3174_v23 = vpop.f32.mrf.mxu0  ;;  %v3438_v50 = vpop.f32.mrf.mxu3  ;;  %v334_v61 = vld [vmem:[#allocation3 + $0x490] sm:$0xff] }
 0x550   :  { %v3175_v53 = vadd.f32 %v3174_v23, %v6442_v8  ;;  %v308_v8 = vld [vmem:[#allocation3 + $0x3c0] sm:$0xff]  ;;  %v1059_v39 = vpack.c.bf16 %v334_v61, %v309_v18 }
 0x551   :  { %v3263_v55 = vpop.f32.mrf.mxu1  ;;  %v6535_v30 = vadd.f32 %v3438_v50, %v3350_v29  ;;  %v1058_v28 = vpack.c.bf16 %v333_v44, %v308_v8  ;;  %v1061_v29 = vpack.c.bf16 %v336_v19, %v311_v15  ;;  %v361_v8 = vld [vmem:[#allocation3 + $0x568] sm:$0xff]  ;;  %v386_v44 = vld [vmem:[#allocation3 + $0x630] sm:$0xff] }
 0x552   :  { %v3264_v59 = vadd.f32 %v3263_v55, %v3175_v53  ;;  %3489 = vmatmul.bf16.gmra.mxu0 %v1033_v26 }
 0x553   :  { %3667 = vmatmul.bf16.gmra.mxu2 %v1035_v54 }
 0x554   :  { %3578 = vmatmul.bf16.gmra.mxu1 %v1034_v21  ;;  %3756 = vmatmul.bf16.gmra.mxu3 %v1036_v25 }
 0x556   :  { %v3352_v62 = vpop.f32.mrf.mxu2 }
 0x557   :  { %v3353_v9 = vadd.f32 %v3352_v62, %v3264_v59  ;;  %v3176_v12 = vpop.f32.mrf.mxu0  ;;  %v3441_v0 = vpop.f32.mrf.mxu3 }
 0x558   :  { %v3177_v22 = vadd.f32 %v3176_v12, %v6445_v46  ;;  %v383_v12 = vld [vmem:[#allocation3 + $0x618] sm:$0xff] }
 0x559   :  { %v3265_v36 = vpop.f32.mrf.mxu1  ;;  %v6538_v14 = vadd.f32 %v3441_v0, %v3353_v9  ;;  %v360_v0 = vld [vmem:[#allocation3 + $0x560] sm:$0xff] }
 0x55a   :  { %v3266_v57 = vadd.f32 %v3265_v36, %v3177_v22  ;;  %v385_v22 = vld [vmem:[#allocation3 + $0x628] sm:$0xff]  ;;  %v359_v36 = vld [vmem:[#allocation3 + $0x558] sm:$0xff] }
 0x55b   :  { %v1085_v19 = vpack.c.bf16 %v385_v22, %v360_v0 }
 0x55e   :  { %v3354_v20 = vpop.f32.mrf.mxu2 }
 0x55f   :  { %v3355_v4 = vadd.f32 %v3354_v20, %v3266_v57  ;;  %v3179_v49 = vpop.f32.mrf.mxu0  ;;  %v3443_v38 = vpop.f32.mrf.mxu3  ;;  %v384_v57 = vld [vmem:[#allocation3 + $0x620] sm:$0xff] }
 0x560   :  { %v3180_v46 = vadd.f32 %v3179_v49, %v6448_v47  ;;  %v358_v47 = vld [vmem:[#allocation3 + $0x550] sm:$0xff]  ;;  %v1084_v20 = vpack.c.bf16 %v384_v57, %v359_v36 }
 0x561   :  { %v3268_v26 = vpop.f32.mrf.mxu1  ;;  %v6541_v23 = vadd.f32 %v3443_v38, %v3355_v4  ;;  %v1083_v58 = vpack.c.bf16 %v383_v12, %v358_v47  ;;  %v1086_v4 = vpack.c.bf16 %v386_v44, %v361_v8  ;;  %v411_v47 = vld [vmem:[#allocation3 + $0x6f8] sm:$0xff]  ;;  %v436_v12 = vld [vmem:[#allocation3 + $0x7c0] sm:$0xff] }
 0x562   :  { %v3269_v50 = vadd.f32 %v3268_v26, %v3180_v46  ;;  %3494 = vmatmul.bf16.gmra.mxu0 %v1058_v28 }
 0x563   :  { %3672 = vmatmul.bf16.gmra.mxu2 %v1060_v13 }
 0x564   :  { %3583 = vmatmul.bf16.gmra.mxu1 %v1059_v39  ;;  %3761 = vmatmul.bf16.gmra.mxu3 %v1061_v29 }
 0x566   :  { %v3357_v54 = vpop.f32.mrf.mxu2 }
 0x567   :  { %v3358_v21 = vadd.f32 %v3357_v54, %v3269_v50  ;;  %v3181_v53 = vpop.f32.mrf.mxu0  ;;  %v3446_v55 = vpop.f32.mrf.mxu3 }
 0x568   :  { %v3182_v25 = vadd.f32 %v3181_v53, %v6451_v52  ;;  %v433_v53 = vld [vmem:[#allocation3 + $0x7a8] sm:$0xff] }
 0x569   :  { %v3270_v59 = vpop.f32.mrf.mxu1  ;;  %v6544_v62 = vadd.f32 %v3446_v55, %v3358_v21  ;;  %v410_v55 = vld [vmem:[#allocation3 + $0x6f0] sm:$0xff] }
 0x56a   :  { %v3271_v9 = vadd.f32 %v3270_v59, %v3182_v25  ;;  %v435_v25 = vld [vmem:[#allocation3 + $0x7b8] sm:$0xff]  ;;  %v409_v59 = vld [vmem:[#allocation3 + $0x6e8] sm:$0xff] }
 0x56b   :  { %v1110_v44 = vpack.c.bf16 %v435_v25, %v410_v55 }
 0x56e   :  { %v3359_v17 = vpop.f32.mrf.mxu2 }
 0x56f   :  { %v3360_v18 = vadd.f32 %v3359_v17, %v3271_v9  ;;  %v3184_v61 = vpop.f32.mrf.mxu0  ;;  %v3448_v15 = vpop.f32.mrf.mxu3  ;;  %v434_v9 = vld [vmem:[#allocation3 + $0x7b0] sm:$0xff] }
 0x570   :  { %v3185_v52 = vadd.f32 %v3184_v61, %v6454_v5  ;;  %v408_v5 = vld [vmem:[#allocation3 + $0x6e0] sm:$0xff]  ;;  %v1109_v17 = vpack.c.bf16 %v434_v9, %v409_v59 }
 0x571   :  { %v3273_v28 = vpop.f32.mrf.mxu1  ;;  %v6547_v49 = vadd.f32 %v3448_v15, %v3360_v18  ;;  %v1108_v22 = vpack.c.bf16 %v433_v53, %v408_v5  ;;  %v1111_v18 = vpack.c.bf16 %v436_v12, %v411_v47  ;;  %v461_v5 = vld [vmem:[#allocation3 + $0x888] sm:$0xff]  ;;  %v486_v53 = vld [vmem:[#allocation3 + $0x950] sm:$0xff] }
 0x572   :  { %v3274_v38 = vadd.f32 %v3273_v28, %v3185_v52  ;;  %3499 = vmatmul.bf16.gmra.mxu0 %v1083_v58 }
 0x573   :  { %3677 = vmatmul.bf16.gmra.mxu2 %v1085_v19 }
 0x574   :  { %3588 = vmatmul.bf16.gmra.mxu1 %v1084_v20  ;;  %3766 = vmatmul.bf16.gmra.mxu3 %v1086_v4 }
 0x576   :  { %v3362_v13 = vpop.f32.mrf.mxu2 }
 0x577   :  { %v3363_v39 = vadd.f32 %v3362_v13, %v3274_v38  ;;  %v3186_v46 = vpop.f32.mrf.mxu0  ;;  %v3451_v26 = vpop.f32.mrf.mxu3 }
 0x578   :  { %v3187_v29 = vadd.f32 %v3186_v46, %v6457_v43  ;;  %v483_v46 = vld [vmem:[#allocation3 + $0x938] sm:$0xff] }
 0x579   :  { %v3275_v50 = vpop.f32.mrf.mxu1  ;;  %v6550_v54 = vadd.f32 %v3451_v26, %v3363_v39  ;;  %v460_v26 = vld [vmem:[#allocation3 + $0x880] sm:$0xff] }
 0x57a   :  { %v3276_v21 = vadd.f32 %v3275_v50, %v3187_v29  ;;  %v485_v29 = vld [vmem:[#allocation3 + $0x948] sm:$0xff]  ;;  %v459_v50 = vld [vmem:[#allocation3 + $0x878] sm:$0xff] }
 0x57b   :  { %v1135_v12 = vpack.c.bf16 %v485_v29, %v460_v26 }
 0x57e   :  { %v3364_v0 = vpop.f32.mrf.mxu2 }
 0x57f   :  { %v3365_v36 = vadd.f32 %v3364_v0, %v3276_v21  ;;  %v3189_v57 = vpop.f32.mrf.mxu0  ;;  %v3453_v8 = vpop.f32.mrf.mxu3  ;;  %v484_v21 = vld [vmem:[#allocation3 + $0x940] sm:$0xff] }
 0x580   :  { %v3190_v43 = vadd.f32 %v3189_v57, %v6460_v31  ;;  %v458_v31 = vld [vmem:[#allocation3 + $0x870] sm:$0xff]  ;;  %v1134_v0 = vpack.c.bf16 %v484_v21, %v459_v50 }
 0x581   :  { %v3278_v58 = vpop.f32.mrf.mxu1  ;;  %v6553_v61 = vadd.f32 %v3453_v8, %v3365_v36  ;;  %v1133_v25 = vpack.c.bf16 %v483_v46, %v458_v31  ;;  %v1136_v36 = vpack.c.bf16 %v486_v53, %v461_v5  ;;  %v511_v31 = vld [vmem:[#allocation3 + $0xa18] sm:$0xff]  ;;  %v536_v46 = vld [vmem:[#allocation3 + $0xae0] sm:$0xff] }
 0x582   :  { %v3279_v15 = vadd.f32 %v3278_v58, %v3190_v43  ;;  %3504 = vmatmul.bf16.gmra.mxu0 %v1108_v22 }
 0x583   :  { %3682 = vmatmul.bf16.gmra.mxu2 %v1110_v44 }
 0x584   :  { %3593 = vmatmul.bf16.gmra.mxu1 %v1109_v17  ;;  %3771 = vmatmul.bf16.gmra.mxu3 %v1111_v18 }
 0x586   :  { %v3367_v19 = vpop.f32.mrf.mxu2 }
 0x587   :  { %v3368_v20 = vadd.f32 %v3367_v19, %v3279_v15  ;;  %v3191_v52 = vpop.f32.mrf.mxu0  ;;  %v3456_v28 = vpop.f32.mrf.mxu3 }
 0x588   :  { %v3192_v4 = vadd.f32 %v3191_v52, %v6463_v6  ;;  %v533_v52 = vld [vmem:[#allocation3 + $0xac8] sm:$0xff] }
 0x589   :  { %v3280_v38 = vpop.f32.mrf.mxu1  ;;  %v6556_v13 = vadd.f32 %v3456_v28, %v3368_v20  ;;  %v510_v28 = vld [vmem:[#allocation3 + $0xa10] sm:$0xff] }
 0x58a   :  { %v3281_v39 = vadd.f32 %v3280_v38, %v3192_v4  ;;  %v535_v4 = vld [vmem:[#allocation3 + $0xad8] sm:$0xff]  ;;  %v509_v38 = vld [vmem:[#allocation3 + $0xa08] sm:$0xff] }
 0x58b   :  { %v1160_v53 = vpack.c.bf16 %v535_v4, %v510_v28 }
 0x58e   :  { %v3369_v55 = vpop.f32.mrf.mxu2 }
 0x58f   :  { %v3370_v59 = vadd.f32 %v3369_v55, %v3281_v39  ;;  %v3194_v9 = vpop.f32.mrf.mxu0  ;;  %v3458_v47 = vpop.f32.mrf.mxu3  ;;  %v534_v39 = vld [vmem:[#allocation3 + $0xad0] sm:$0xff] }
 0x590   :  { %v3195_v6 = vadd.f32 %v3194_v9, %v6466_v32  ;;  %v508_v32 = vld [vmem:[#allocation3 + $0xa00] sm:$0xff]  ;;  %v1159_v55 = vpack.c.bf16 %v534_v39, %v509_v38 }
 0x591   :  { %v3283_v22 = vpop.f32.mrf.mxu1  ;;  %v6559_v57 = vadd.f32 %v3458_v47, %v3370_v59  ;;  %v1158_v29 = vpack.c.bf16 %v533_v52, %v508_v32  ;;  %v1161_v59 = vpack.c.bf16 %v536_v46, %v511_v31  ;;  %v561_v32 = vld [vmem:[#allocation3 + $0xba8] sm:$0xff]  ;;  %v586_v52 = vld [vmem:[#allocation3 + $0xc70] sm:$0xff] }
 0x592   :  { %v3284_v8 = vadd.f32 %v3283_v22, %v3195_v6  ;;  %3509 = vmatmul.bf16.gmra.mxu0 %v1133_v25 }
 0x593   :  { %3687 = vmatmul.bf16.gmra.mxu2 %v1135_v12 }
 0x594   :  { %3598 = vmatmul.bf16.gmra.mxu1 %v1134_v0  ;;  %3776 = vmatmul.bf16.gmra.mxu3 %v1136_v36 }
 0x596   :  { %v3372_v44 = vpop.f32.mrf.mxu2 }
 0x597   :  { %v3373_v17 = vadd.f32 %v3372_v44, %v3284_v8  ;;  %v3196_v43 = vpop.f32.mrf.mxu0  ;;  %v3461_v58 = vpop.f32.mrf.mxu3 }
 0x598   :  { %v3197_v18 = vadd.f32 %v3196_v43, %v6469_v3  ;;  %v583_v43 = vld [vmem:[#allocation3 + $0xc58] sm:$0xff] }
 0x599   :  { %v3285_v15 = vpop.f32.mrf.mxu1  ;;  %v6562_v19 = vadd.f32 %v3461_v58, %v3373_v17  ;;  %v560_v58 = vld [vmem:[#allocation3 + $0xba0] sm:$0xff] }
 0x59a   :  { %v3286_v20 = vadd.f32 %v3285_v15, %v3197_v18  ;;  %v585_v18 = vld [vmem:[#allocation3 + $0xc68] sm:$0xff]  ;;  %v559_v15 = vld [vmem:[#allocation3 + $0xb98] sm:$0xff] }
 0x59b   :  { %v1185_v46 = vpack.c.bf16 %v585_v18, %v560_v58 }
 0x59e   :  { %v3374_v26 = vpop.f32.mrf.mxu2 }
 0x59f   :  { %v3375_v50 = vadd.f32 %v3374_v26, %v3286_v20  ;;  %v3199_v21 = vpop.f32.mrf.mxu0  ;;  %v3463_v5 = vpop.f32.mrf.mxu3  ;;  %v584_v20 = vld [vmem:[#allocation3 + $0xc60] sm:$0xff] }
 0x5a0   :  { %v3200_v3 = vadd.f32 %v3199_v21, %v6472_v56  ;;  %v558_v56 = vld [vmem:[#allocation3 + $0xb90] sm:$0xff]  ;;  %v1184_v26 = vpack.c.bf16 %v584_v20, %v559_v15 }
 0x5a1   :  { %v3288_v25 = vpop.f32.mrf.mxu1  ;;  %v6565_v9 = vadd.f32 %v3463_v5, %v3375_v50  ;;  %v1183_v4 = vpack.c.bf16 %v583_v43, %v558_v56  ;;  %v1186_v50 = vpack.c.bf16 %v586_v52, %v561_v32  ;;  %v611_v56 = vld [vmem:[#allocation3 + $0xd38] sm:$0xff]  ;;  %v636_v43 = vld [vmem:[#allocation3 + $0xe00] sm:$0xff] }
 0x5a2   :  { %v3289_v47 = vadd.f32 %v3288_v25, %v3200_v3  ;;  %3514 = vmatmul.bf16.gmra.mxu0 %v1158_v29 }
 0x5a3   :  { %3692 = vmatmul.bf16.gmra.mxu2 %v1160_v53 }
 0x5a4   :  { %3603 = vmatmul.bf16.gmra.mxu1 %v1159_v55  ;;  %3781 = vmatmul.bf16.gmra.mxu3 %v1161_v59 }
 0x5a6   :  { %v3377_v12 = vpop.f32.mrf.mxu2 }
 0x5a7   :  { %v3378_v0 = vadd.f32 %v3377_v12, %v3289_v47  ;;  %v3201_v6 = vpop.f32.mrf.mxu0  ;;  %v3466_v22 = vpop.f32.mrf.mxu3 }
 0x5a8   :  { %v3202_v36 = vadd.f32 %v3201_v6, %v6475_v40  ;;  %v633_v6 = vld [vmem:[#allocation3 + $0xde8] sm:$0xff] }
 0x5a9   :  { %v3290_v8 = vpop.f32.mrf.mxu1  ;;  %v6568_v44 = vadd.f32 %v3466_v22, %v3378_v0  ;;  %v610_v22 = vld [vmem:[#allocation3 + $0xd30] sm:$0xff] }
 0x5aa   :  { %v3291_v17 = vadd.f32 %v3290_v8, %v3202_v36  ;;  %v635_v36 = vld [vmem:[#allocation3 + $0xdf8] sm:$0xff]  ;;  %v609_v8 = vld [vmem:[#allocation3 + $0xd28] sm:$0xff] }
 0x5ab   :  { %v1210_v52 = vpack.c.bf16 %v635_v36, %v610_v22 }
 0x5ae   :  { %v3379_v28 = vpop.f32.mrf.mxu2 }
 0x5af   :  { %v3380_v38 = vadd.f32 %v3379_v28, %v3291_v17  ;;  %v3204_v39 = vpop.f32.mrf.mxu0  ;;  %v3468_v31 = vpop.f32.mrf.mxu3  ;;  %v634_v17 = vld [vmem:[#allocation3 + $0xdf0] sm:$0xff] }
 0x5b0   :  { %v3205_v40 = vadd.f32 %v3204_v39, %v6478_v34  ;;  %v608_v34 = vld [vmem:[#allocation3 + $0xd20] sm:$0xff]  ;;  %v1209_v28 = vpack.c.bf16 %v634_v17, %v609_v8 }
 0x5b1   :  { %v3293_v29 = vpop.f32.mrf.mxu1  ;;  %v6571_v21 = vadd.f32 %v3468_v31, %v3380_v38  ;;  %v1208_v18 = vpack.c.bf16 %v633_v6, %v608_v34  ;;  %v1211_v38 = vpack.c.bf16 %v636_v43, %v611_v56  ;;  %v661_v34 = vld [vmem:[#allocation3 + $0xec8] sm:$0xff]  ;;  %v686_v6 = vld [vmem:[#allocation3 + $0xf90] sm:$0xff] }
 0x5b2   :  { %v3294_v5 = vadd.f32 %v3293_v29, %v3205_v40  ;;  %3519 = vmatmul.bf16.gmra.mxu0 %v1183_v4 }
 0x5b3   :  { %3697 = vmatmul.bf16.gmra.mxu2 %v1185_v46 }
 0x5b4   :  { %3608 = vmatmul.bf16.gmra.mxu1 %v1184_v26  ;;  %3786 = vmatmul.bf16.gmra.mxu3 %v1186_v50 }
 0x5b6   :  { %v3382_v53 = vpop.f32.mrf.mxu2 }
 0x5b7   :  { %v3383_v55 = vadd.f32 %v3382_v53, %v3294_v5  ;;  %v3206_v3 = vpop.f32.mrf.mxu0  ;;  %v3471_v25 = vpop.f32.mrf.mxu3 }
 0x5b8   :  { %v3207_v59 = vadd.f32 %v3206_v3, %v6481_v33  ;;  %v683_v3 = vld [vmem:[#allocation3 + $0xf78] sm:$0xff] }
 0x5b9   :  { %v3295_v47 = vpop.f32.mrf.mxu1  ;;  %v6574_v12 = vadd.f32 %v3471_v25, %v3383_v55  ;;  %v660_v25 = vld [vmem:[#allocation3 + $0xec0] sm:$0xff] }
 0x5ba   :  { %v3296_v0 = vadd.f32 %v3295_v47, %v3207_v59  ;;  %v685_v59 = vld [vmem:[#allocation3 + $0xf88] sm:$0xff]  ;;  %v659_v47 = vld [vmem:[#allocation3 + $0xeb8] sm:$0xff] }
 0x5bb   :  { %v1235_v43 = vpack.c.bf16 %v685_v59, %v660_v25 }
 0x5be   :  { %v3384_v58 = vpop.f32.mrf.mxu2 }
 0x5bf   :  { %v3385_v15 = vadd.f32 %v3384_v58, %v3296_v0  ;;  %v3473_v20 = vpop.f32.mrf.mxu3  ;;  %v3485_v32 = vpop.f32.mrf.mxu0  ;;  %v684_v0 = vld [vmem:[#allocation3 + $0xf80] sm:$0xff] }
 0x5c0   :  { %v3486_v33 = vadd.f32 %v3485_v32, %v6484_v42  ;;  %v658_v42 = vld [vmem:[#allocation3 + $0xeb0] sm:$0xff]  ;;  %v1234_v58 = vpack.c.bf16 %v684_v0, %v659_v47 }
 0x5c1   :  { %v3574_v4 = vpop.f32.mrf.mxu1  ;;  %v6577_v39 = vadd.f32 %v3473_v20, %v3385_v15  ;;  %v1233_v36 = vpack.c.bf16 %v683_v3, %v658_v42  ;;  %v1236_v15 = vpack.c.bf16 %v686_v6, %v661_v34  ;;  %v711_v42 = vld [vmem:[#allocation3 + $0x1058] sm:$0xff]  ;;  %v736_v3 = vld [vmem:[#allocation3 + $0x1120] sm:$0xff] }
 0x5c2   :  { %v3575_v31 = vadd.f32 %v3574_v4, %v3486_v33  ;;  %3524 = vmatmul.bf16.gmra.mxu0 %v1208_v18 }
 0x5c3   :  { %3702 = vmatmul.bf16.gmra.mxu2 %v1210_v52 }
 0x5c4   :  { %3613 = vmatmul.bf16.gmra.mxu1 %v1209_v28  ;;  %3791 = vmatmul.bf16.gmra.mxu3 %v1211_v38 }
 0x5c6   :  { %v3663_v46 = vpop.f32.mrf.mxu2 }
 0x5c7   :  { %v3664_v26 = vadd.f32 %v3663_v46, %v3575_v31  ;;  %v3487_v40 = vpop.f32.mrf.mxu0  ;;  %v3752_v29 = vpop.f32.mrf.mxu3 }
 0x5c8   :  { %v3488_v50 = vadd.f32 %v3487_v40, %v6487_v16  ;;  %v733_v40 = vld [vmem:[#allocation3 + $0x1108] sm:$0xff] }
 0x5c9   :  { %v3576_v5 = vpop.f32.mrf.mxu1  ;;  %v6580_v53 = vadd.f32 %v3752_v29, %v3664_v26  ;;  %v710_v29 = vld [vmem:[#allocation3 + $0x1050] sm:$0xff] }
 0x5ca   :  { %v3577_v55 = vadd.f32 %v3576_v5, %v3488_v50  ;;  %v735_v50 = vld [vmem:[#allocation3 + $0x1118] sm:$0xff]  ;;  %v709_v5 = vld [vmem:[#allocation3 + $0x1048] sm:$0xff] }
 0x5cb   :  { %v1260_v6 = vpack.c.bf16 %v735_v50, %v710_v29  ;;  %v784_v29 = vld [vmem:[#allocation3 + $0x12a0] sm:$0xff]  ;;  %v761_v50 = vld [vmem:[#allocation3 + $0x11e8] sm:$0xff] }
 0x5ce   :  { %v3665_v22 = vpop.f32.mrf.mxu2 }
 0x5cf   :  { %v3666_v8 = vadd.f32 %v3665_v22, %v3577_v55  ;;  %v3490_v17 = vpop.f32.mrf.mxu0  ;;  %v3754_v56 = vpop.f32.mrf.mxu3  ;;  %v734_v55 = vld [vmem:[#allocation3 + $0x1110] sm:$0xff] }
 0x5d0   :  { %v3491_v16 = vadd.f32 %v3490_v17, %v6490_v1  ;;  %v708_v1 = vld [vmem:[#allocation3 + $0x1040] sm:$0xff]  ;;  %v1259_v22 = vpack.c.bf16 %v734_v55, %v709_v5  ;;  %v786_v5 = vld [vmem:[#allocation3 + $0x12b0] sm:$0xff] }
 0x5d1   :  { %v3579_v18 = vpop.f32.mrf.mxu1  ;;  %v6583_v20 = vadd.f32 %v3754_v56, %v3666_v8  ;;  %v1258_v59 = vpack.c.bf16 %v733_v40, %v708_v1  ;;  %v1261_v8 = vpack.c.bf16 %v736_v3, %v711_v42  ;;  %v785_v1 = vld [vmem:[#allocation3 + $0x12a8] sm:$0xff]  ;;  %v759_v40 = vld [vmem:[#allocation3 + $0x11d8] sm:$0xff] }
 0x5d2   :  { %v3580_v32 = vadd.f32 %v3579_v18, %v3491_v16  ;;  %3529 = vmatmul.bf16.gmra.mxu0 %v1233_v36 }
 0x5d3   :  { %3707 = vmatmul.bf16.gmra.mxu2 %v1235_v43  ;;  %v5297_v43 = vld [vmem:[#allocation6 + $0x128] sm:$0xf] }
 0x5d4   :  { %3618 = vmatmul.bf16.gmra.mxu1 %v1234_v58  ;;  %3796 = vmatmul.bf16.gmra.mxu3 %v1236_v15  ;;  %v5422_v58 = vld [vmem:[#allocation6 + $0x188] sm:$0xf0] }
 0x5d5   :  { %v5298_v16 = vor.u32 %v5422_v58, %v5297_v43 }
 0x5d6   :  { %v3668_v52 = vpop.f32.mrf.mxu2 }
 0x5d7   :  { %v3669_v28 = vadd.f32 %v3668_v52, %v3580_v32  ;;  %v3492_v33 = vpop.f32.mrf.mxu0  ;;  %v3757_v4 = vpop.f32.mrf.mxu3  ;;  %3838 = vmatpush.bf16.xpose.msra.mxu0 %v5298_v16 }
 0x5d8   :  { %v3493_v38 = vadd.f32 %v3492_v33, %v6493_v11 }
 0x5d9   :  { %v3581_v31 = vpop.f32.mrf.mxu1  ;;  %v6586_v46 = vadd.f32 %v3757_v4, %v3669_v28 }
 0x5da   :  { %v3582_v26 = vadd.f32 %v3581_v31, %v3493_v38  ;;  %v758_v38 = vld [vmem:[#allocation3 + $0x11d0] sm:$0xff]  ;;  %v783_v31 = vld [vmem:[#allocation3 + $0x1298] sm:$0xff] }
 0x5db   :  { %v1283_v42 = vpack.c.bf16 %v783_v31, %v758_v38  ;;  %v811_v38 = vld [vmem:[#allocation3 + $0x1378] sm:$0xff]  ;;  %v836_v31 = vld [vmem:[#allocation3 + $0x1440] sm:$0xff] }
 0x5de   :  { %v3670_v25 = vpop.f32.mrf.mxu2 }
 0x5df   :  { %v3671_v47 = vadd.f32 %v3670_v25, %v3582_v26  ;;  %v3495_v0 = vpop.f32.mrf.mxu0  ;;  %v3759_v34 = vpop.f32.mrf.mxu3  ;;  %v760_v26 = vld [vmem:[#allocation3 + $0x11e0] sm:$0xff] }
 0x5e0   :  { %v3496_v11 = vadd.f32 %v3495_v0, %v6496_v45  ;;  %v1284_v0 = vpack.c.bf16 %v784_v29, %v759_v40 }
 0x5e1   :  { %v3584_v36 = vpop.f32.mrf.mxu1  ;;  %v6589_v17 = vadd.f32 %v3759_v34, %v3671_v47  ;;  %v1285_v47 = vpack.c.bf16 %v785_v1, %v760_v26 }
 0x5e2   :  { %v3585_v56 = vadd.f32 %v3584_v36, %v3496_v11  ;;  %3534 = vmatmul.bf16.gmra.mxu0 %v1258_v59 }
 0x5e3   :  { %3712 = vmatmul.bf16.gmra.mxu2 %v1260_v6  ;;  %v1286_v6 = vpack.c.bf16 %v786_v5, %v761_v50 }
 0x5e4   :  { %3623 = vmatmul.bf16.gmra.mxu1 %v1259_v22  ;;  %3801 = vmatmul.bf16.gmra.mxu3 %v1261_v8 }
 0x5e6   :  { %v3673_v18 = vpop.f32.mrf.mxu2 }
 0x5e7   :  { %v3674_v15 = vadd.f32 %v3673_v18, %v3585_v56  ;;  %v3497_v32 = vpop.f32.mrf.mxu0  ;;  %v3762_v52 = vpop.f32.mrf.mxu3 }
 0x5e8   :  { %v3498_v28 = vadd.f32 %v3497_v32, %v6499_v60  ;;  %v833_v32 = vld [vmem:[#allocation3 + $0x1428] sm:$0xff] }
 0x5e9   :  { %v3586_v45 = vpop.f32.mrf.mxu1  ;;  %v6592_v33 = vadd.f32 %v3762_v52, %v3674_v15  ;;  %v810_v52 = vld [vmem:[#allocation3 + $0x1370] sm:$0xff] }
 0x5ea   :  { %v3587_v4 = vadd.f32 %v3586_v45, %v3498_v28  ;;  %v835_v28 = vld [vmem:[#allocation3 + $0x1438] sm:$0xff]  ;;  %v809_v45 = vld [vmem:[#allocation3 + $0x1368] sm:$0xff] }
 0x5eb   :  { %v1310_v5 = vpack.c.bf16 %v835_v28, %v810_v52 }
 0x5ee   :  { %v3675_v55 = vpop.f32.mrf.mxu2 }
 0x5ef   :  { %v3676_v3 = vadd.f32 %v3675_v55, %v3587_v4  ;;  %v3500_v25 = vpop.f32.mrf.mxu0  ;;  %v3764_v59 = vpop.f32.mrf.mxu3  ;;  %v834_v4 = vld [vmem:[#allocation3 + $0x1430] sm:$0xff] }
 0x5f0   :  { %v3501_v60 = vadd.f32 %v3500_v25, %v6502_v41  ;;  %v808_v41 = vld [vmem:[#allocation3 + $0x1360] sm:$0xff]  ;;  %v1309_v55 = vpack.c.bf16 %v834_v4, %v809_v45 }
 0x5f1   :  { %v3589_v34 = vpop.f32.mrf.mxu1  ;;  %v6595_v22 = vadd.f32 %v3764_v59, %v3676_v3  ;;  %v1308_v1 = vpack.c.bf16 %v833_v32, %v808_v41  ;;  %v1311_v3 = vpack.c.bf16 %v836_v31, %v811_v38  ;;  %v5197_v31 = vld [vmem:[#allocation6 + $0x60] sm:$0xf] }
 0x5f2   :  { %v3590_v11 = vadd.f32 %v3589_v34, %v3501_v60  ;;  %3539 = vmatmul.bf16.gmra.mxu0 %v1283_v42  ;;  %v858_v34 = vld [vmem:[#allocation3 + $0x14f0] sm:$0xff] }
 0x5f3   :  { %3717 = vmatmul.bf16.gmra.mxu2 %v1285_v47 }
 0x5f4   :  { %3628 = vmatmul.bf16.gmra.mxu1 %v1284_v0  ;;  %3806 = vmatmul.bf16.gmra.mxu3 %v1286_v6  ;;  %v883_v6 = vld [vmem:[#allocation3 + $0x15b8] sm:$0xff] }
 0x5f6   :  { %v3678_v36 = vpop.f32.mrf.mxu2 }
 0x5f7   :  { %v3679_v8 = vadd.f32 %v3678_v36, %v3590_v11  ;;  %v3502_v56 = vpop.f32.mrf.mxu0  ;;  %v3767_v43 = vpop.f32.mrf.mxu3  ;;  %v860_v11 = vld [vmem:[#allocation3 + $0x1500] sm:$0xff]  ;;  %v859_v36 = vld [vmem:[#allocation3 + $0x14f8] sm:$0xff] }
 0x5f8   :  { %v3503_v58 = vadd.f32 %v3502_v56, %v6505_v51  ;;  %v861_v56 = vld [vmem:[#allocation3 + $0x1508] sm:$0xff] }
 0x5f9   :  { %v3591_v16 = vpop.f32.mrf.mxu1  ;;  %v6598_v18 = vadd.f32 %v3767_v43, %v3679_v8  ;;  %v884_v8 = vld [vmem:[#allocation3 + $0x15c0] sm:$0xff]  ;;  %v886_v43 = vld [vmem:[#allocation3 + $0x15d0] sm:$0xff] }
 0x5fa   :  { %v3592_v15 = vadd.f32 %v3591_v16, %v3503_v58  ;;  %v1333_v58 = vpack.c.bf16 %v883_v6, %v858_v34  ;;  %v1334_v41 = vpack.c.bf16 %v884_v8, %v859_v36  ;;  %v1336_v28 = vpack.c.bf16 %v886_v43, %v861_v56 }
 0x5fe   :  { %v3680_v26 = vpop.f32.mrf.mxu2 }
 0x5ff   :  { %v3681_v40 = vadd.f32 %v3680_v26, %v3592_v15  ;;  %v3505_v29 = vpop.f32.mrf.mxu0  ;;  %v3769_v50 = vpop.f32.mrf.mxu3  ;;  %v5397_v26 = vld [vmem:[#allocation6 + $0xc0] sm:$0xf0] }
 0x600   :  { %v3506_v51 = vadd.f32 %v3505_v29, %v6508_v7  ;;  %v885_v7 = vld [vmem:[#allocation3 + $0x15c8] sm:$0xff] }
 0x601   :  { %v3594_v42 = vpop.f32.mrf.mxu1  ;;  %v6601_v25 = vadd.f32 %v3769_v50, %v3681_v40  ;;  %v1335_v15 = vpack.c.bf16 %v885_v7, %v860_v11  ;;  %v908_v40 = vld [vmem:[#allocation3 + $0x1680] sm:$0xff]  ;;  %v933_v29 = vld [vmem:[#allocation3 + $0x1748] sm:$0xff]  ;;  %v935_v50 = vld [vmem:[#allocation3 + $0x1758] sm:$0xff] }
 0x602   :  { %v6603_v59 = vadd.f32 %v3594_v42, %v3506_v51  ;;  %3544 = vmatmul.bf16.gmra.mxu0 %v1308_v1  ;;  %v5198_v1 = vor.u32 %v5397_v26, %v5197_v31  ;;  %v911_v51 = vld [vmem:[#allocation3 + $0x1698] sm:$0xff]  ;;  %v936_v42 = vld [vmem:[#allocation3 + $0x1760] sm:$0xff] }
 0x603   :  { %3722 = vmatmul.bf16.gmra.mxu2 %v1310_v5  ;;  %v909_v5 = vld [vmem:[#allocation3 + $0x1688] sm:$0xff]  ;;  %v1361_v7 = vpack.c.bf16 %v936_v42, %v911_v51  ;;  %v212_v51 = vld [vmem:[#allocation3 + $0xc0] sm:$0xff] }
 0x604   :  { %3633 = vmatmul.bf16.gmra.mxu1 %v1309_v55  ;;  %3811 = vmatmul.bf16.gmra.mxu3 %v1311_v3  ;;  %v934_v55 = vld [vmem:[#allocation3 + $0x1750] sm:$0xff]  ;;  %v1358_v3 = vpack.c.bf16 %v933_v29, %v908_v40  ;;  %v237_v42 = vld [vmem:[#allocation3 + $0x188] sm:$0xff] }
 0x605   :  { %3839 = vmatpush.bf16.xpose.msra.mxu0 %v5198_v1  ;;  %v1359_v6 = vpack.c.bf16 %v934_v55, %v909_v5 }
 0x607   :  { %v3507_v47 = vpop.f32.mrf.mxu0 }
 0x608   :  { %v6606_v0 = vadd.f32 %v3507_v47, %v6511_v35 }
 0x609   :  { %v6608_v60 = vpop.f32.mrf.mxu1 }
 0x60f   :  { %v3510_v16 = vpop.f32.mrf.mxu0 }
 0x610   :  { %v3511_v32 = vadd.f32 %v3510_v16, %v6514_v27  ;;  %v910_v27 = vld [vmem:[#allocation3 + $0x1690] sm:$0xff]  ;;  %v983_v16 = vld [vmem:[#allocation3 + $0x18d8] sm:$0xff] }
 0x611   :  { %v3599_v52 = vpop.f32.mrf.mxu1  ;;  %v1360_v34 = vpack.c.bf16 %v935_v50, %v910_v27 }
 0x612   :  { %v6611_v35 = vadd.f32 %v3599_v52, %v3511_v32  ;;  %3549 = vmatmul.bf16.gmra.mxu0 %v1333_v58  ;;  %v958_v58 = vld [vmem:[#allocation3 + $0x1810] sm:$0xff]  ;;  %v959_v32 = vld [vmem:[#allocation3 + $0x1818] sm:$0xff]  ;;  %v961_v52 = vld [vmem:[#allocation3 + $0x1828] sm:$0xff] }
 0x613   :  { %3727 = vmatmul.bf16.gmra.mxu2 %v1335_v15  ;;  %v960_v15 = vld [vmem:[#allocation3 + $0x1820] sm:$0xff] }
 0x614   :  { %3638 = vmatmul.bf16.gmra.mxu1 %v1334_v41  ;;  %3816 = vmatmul.bf16.gmra.mxu3 %v1336_v28  ;;  %v985_v41 = vld [vmem:[#allocation3 + $0x18e8] sm:$0xff]  ;;  %v986_v28 = vld [vmem:[#allocation3 + $0x18f0] sm:$0xff] }
 0x615   :  { %v1385_v26 = vpack.c.bf16 %v985_v41, %v960_v15  ;;  %v1386_v27 = vpack.c.bf16 %v986_v28, %v961_v52  ;;  %v337_v28 = vld [vmem:[#allocation3 + $0x4a8] sm:$0xff] }
 0x617   :  { %v3512_v45 = vpop.f32.mrf.mxu0 }
 0x618   :  { %v6614_v4 = vadd.f32 %v3512_v45, %v6517_v24  ;;  %v1383_v45 = vpack.c.bf16 %v983_v16, %v958_v58 }
 0x619   :  { %v6616_v38 = vpop.f32.mrf.mxu1 }
 0x61f   :  { %v3515_v47 = vpop.f32.mrf.mxu0 }
 0x620   :  { %v3516_v24 = vadd.f32 %v3515_v47, %v6520_v2  ;;  %v984_v2 = vld [vmem:[#allocation3 + $0x18e0] sm:$0xff] }
 0x621   :  { %v3604_v11 = vpop.f32.mrf.mxu1  ;;  %v1384_v1 = vpack.c.bf16 %v984_v2, %v959_v32 }
 0x622   :  { %v6619_v36 = vadd.f32 %v3604_v11, %v3516_v24  ;;  %3554 = vmatmul.bf16.gmra.mxu0 %v1358_v3  ;;  %v1012_v3 = vpack.c.bf16 %v237_v42, %v212_v51 }
 0x623   :  { %3732 = vmatmul.bf16.gmra.mxu2 %v1360_v34 }
 0x624   :  { %3643 = vmatmul.bf16.gmra.mxu1 %v1359_v6  ;;  %3821 = vmatmul.bf16.gmra.mxu3 %v1361_v7 }
 0x627   :  { %v3517_v8 = vpop.f32.mrf.mxu0 }
 0x628   :  { %v6622_v56 = vadd.f32 %v3517_v8, %v6523_v10  ;;  %v287_v8 = vld [vmem:[#allocation3 + $0x318] sm:$0xff] }
 0x629   :  { %v6624_v43 = vpop.f32.mrf.mxu1 }
 0x62f   :  { %v3520_v31 = vpop.f32.mrf.mxu0 }
 0x630   :  { %v3521_v40 = vadd.f32 %v3520_v31, %v6526_v48 }
 0x631   :  { %v3609_v29 = vpop.f32.mrf.mxu1 }
 0x632   :  { %v6627_v10 = vadd.f32 %v3609_v29, %v3521_v40  ;;  %3559 = vmatmul.bf16.gmra.mxu0 %v1383_v45 }
 0x633   :  { %3737 = vmatmul.bf16.gmra.mxu2 %v1385_v26 }
 0x634   :  { %3648 = vmatmul.bf16.gmra.mxu1 %v1384_v1  ;;  %3826 = vmatmul.bf16.gmra.mxu3 %v1386_v27 }
 0x637   :  { %v3522_v50 = vpop.f32.mrf.mxu0 }
 0x638   :  { %v6630_v5 = vadd.f32 %v3522_v50, %v6529_v63  ;;  %v262_v63 = vld [vmem:[#allocation3 + $0x250] sm:$0xff]  ;;  %v387_v50 = vld [vmem:[#allocation3 + $0x638] sm:$0xff] }
 0x639   :  { %v6632_v55 = vpop.f32.mrf.mxu1  ;;  %v1037_v58 = vpack.c.bf16 %v287_v8, %v262_v63  ;;  %v412_v63 = vld [vmem:[#allocation3 + $0x700] sm:$0xff]  ;;  %v437_v8 = vld [vmem:[#allocation3 + $0x7c8] sm:$0xff] }
 0x63f   :  { %v3525_v47 = vpop.f32.mrf.mxu0 }
 0x640   :  { %v3526_v48 = vadd.f32 %v3525_v47, %v6532_v37 }
 0x641   :  { %v3614_v34 = vpop.f32.mrf.mxu1 }
 0x642   :  { %v6635_v6 = vadd.f32 %v3614_v34, %v3526_v48  ;;  %3840 = vmatmul.bf16.vlgmr.msra.gmra.mxu0 %v1012_v3 }
 0x647   :  { %v3527_v24 = vpop.f32.mrf.mxu0 }
 0x648   :  { %v6638_v11 = vadd.f32 %v3527_v24, %v6535_v30  ;;  %v312_v30 = vld [vmem:[#allocation3 + $0x3e0] sm:$0xff] }
 0x649   :  { %v6640_v7 = vpop.f32.mrf.mxu1  ;;  %v1062_v45 = vpack.c.bf16 %v337_v28, %v312_v30 }
 0x64f   :  { %v3530_v16 = vpop.f32.mrf.mxu0 }
 0x650   :  { %v3531_v15 = vadd.f32 %v3530_v16, %v6538_v14  ;;  %v1112_v16 = vpack.c.bf16 %v437_v8, %v412_v63 }
 0x651   :  { %v3619_v41 = vpop.f32.mrf.mxu1 }
 0x652   :  { %v6643_v32 = vadd.f32 %v3619_v41, %v3531_v15  ;;  %3845 = vmatmul.bf16.gmra.mxu0 %v1037_v58 }
 0x657   :  { %v3532_v37 = vpop.f32.mrf.mxu0 }
 0x658   :  { %v6646_v2 = vadd.f32 %v3532_v37, %v6541_v23  ;;  %v362_v23 = vld [vmem:[#allocation3 + $0x570] sm:$0xff] }
 0x659   :  { %v6648_v52 = vpop.f32.mrf.mxu1  ;;  %v1087_v51 = vpack.c.bf16 %v387_v50, %v362_v23 }
 0x65f   :  { %v3535_v31 = vpop.f32.mrf.mxu0 }
 0x660   :  { %v3536_v26 = vadd.f32 %v3535_v31, %v6544_v62  ;;  %v487_v31 = vld [vmem:[#allocation3 + $0x958] sm:$0xff] }
 0x661   :  { %v3624_v1 = vpop.f32.mrf.mxu1 }
 0x662   :  { %v6651_v40 = vadd.f32 %v3624_v1, %v3536_v26  ;;  %3850 = vmatmul.bf16.gmra.mxu0 %v1062_v45  ;;  %v462_v45 = vld [vmem:[#allocation3 + $0x890] sm:$0xff] }
 0x663   :  { %v1137_v26 = vpack.c.bf16 %v487_v31, %v462_v45  ;;  %v5423_v31 = vld [vmem:[#allocation9] sm:$0xff] }
 0x667   :  { %v3537_v14 = vpop.f32.mrf.mxu0 }
 0x668   :  { %v6654_v29 = vadd.f32 %v3537_v14, %v6547_v49  ;;  %v5424_v49 = vld [vmem:[#allocation9 + $0x8] sm:$0xff] }
 0x669   :  { %v6656_v27 = vpop.f32.mrf.mxu1  ;;  %v4136_v58 = vsel %vm4083_vm0, %v5424_v49, 0 }
 0x66a   :  { %4144 = vmatpush.bf16.xpose.msra.mxu1 %v4136_v58 }
 0x66f   :  { %v3540_v42 = vpop.f32.mrf.mxu0 }
 0x670   :  { %v3541_v3 = vadd.f32 %v3540_v42, %v6550_v54 }
 0x671   :  { %v3629_v47 = vpop.f32.mrf.mxu1 }
 0x672   :  { %v6659_v48 = vadd.f32 %v3629_v47, %v3541_v3  ;;  %3855 = vmatmul.bf16.gmra.mxu0 %v1087_v51  ;;  %v537_v3 = vld [vmem:[#allocation3 + $0xae8] sm:$0xff] }
 0x677   :  { %v3542_v62 = vpop.f32.mrf.mxu0 }
 0x678   :  { %v6662_v34 = vadd.f32 %v3542_v62, %v6553_v61 }
 0x679   :  { %v6664_v24 = vpop.f32.mrf.mxu1 }
 0x67f   :  { %v3545_v15 = vpop.f32.mrf.mxu0 }
 0x680   :  { %v3546_v54 = vadd.f32 %v3545_v15, %v6556_v13  ;;  %v587_v15 = vld [vmem:[#allocation3 + $0xc78] sm:$0xff] }
 0x681   :  { %v3634_v41 = vpop.f32.mrf.mxu1 }
 0x682   :  { %v6668_v37 = vadd.f32 %v3634_v41, %v3546_v54  ;;  %3860 = vmatmul.bf16.gmra.mxu0 %v1112_v16 }
 0x687   :  { %v3547_v30 = vpop.f32.mrf.mxu0 }
 0x688   :  { %v6671_v61 = vadd.f32 %v3547_v30, %v6559_v57  ;;  %v512_v57 = vld [vmem:[#allocation3 + $0xa20] sm:$0xff] }
 0x689   :  { %v6673_v28 = vpop.f32.mrf.mxu1  ;;  %v1162_v47 = vpack.c.bf16 %v537_v3, %v512_v57 }
 0x68f   :  { %v3550_v1 = vpop.f32.mrf.mxu0 }
 0x690   :  { %v3551_v14 = vadd.f32 %v3550_v1, %v6562_v19 }
 0x691   :  { %v3639_v23 = vpop.f32.mrf.mxu1 }
 0x692   :  { %v6676_v50 = vadd.f32 %v3639_v23, %v3551_v14  ;;  %3865 = vmatmul.bf16.gmra.mxu0 %v1137_v26  ;;  %v612_v14 = vld [vmem:[#allocation3 + $0xd40] sm:$0xff]  ;;  %v637_v23 = vld [vmem:[#allocation3 + $0xe08] sm:$0xff] }
 0x697   :  { %v3552_v13 = vpop.f32.mrf.mxu0 }
 0x698   :  { %v6679_v51 = vadd.f32 %v3552_v13, %v6565_v9  ;;  %v562_v9 = vld [vmem:[#allocation3 + $0xbb0] sm:$0xff]  ;;  %v1212_v13 = vpack.c.bf16 %v637_v23, %v612_v14 }
 0x699   :  { %v6681_v42 = vpop.f32.mrf.mxu1  ;;  %v1187_v54 = vpack.c.bf16 %v587_v15, %v562_v9  ;;  %v687_v9 = vld [vmem:[#allocation3 + $0xf98] sm:$0xff] }
 0x69f   :  { %v3555_v62 = vpop.f32.mrf.mxu0 }
 0x6a0   :  { %v3556_v49 = vadd.f32 %v3555_v62, %v6568_v44  ;;  %v4133_v44 = vsel %vm4083_vm0, %v5423_v31, 0 }
 0x6a1   :  { %v3644_v63 = vpop.f32.mrf.mxu1  ;;  %4145 = vmatpush.bf16.xpose.msra.mxu1 %v4133_v44 }
 0x6a2   :  { %v6684_v8 = vadd.f32 %v3644_v63, %v3556_v49  ;;  %3870 = vmatmul.bf16.gmra.mxu0 %v1162_v47  ;;  %v6700_v49 = vpop.f32.mrf.mxu2 }
 0x6a7   :  { %v3557_v19 = vpop.f32.mrf.mxu0 }
 0x6a8   :  { %v6687_v58 = vadd.f32 %v3557_v19, %v6571_v21  ;;  %v662_v19 = vld [vmem:[#allocation3 + $0xed0] sm:$0xff] }
 0x6a9   :  { %v6689_v16 = vpop.f32.mrf.mxu1 }
 0x6aa   :  { %v6705_v31 = vpop.f32.mrf.mxu2 }
 0x6af   :  { %v3560_v41 = vpop.f32.mrf.mxu0 }
 0x6b0   :  { %v3561_v30 = vadd.f32 %v3560_v41, %v6574_v12 }
 0x6b1   :  { %v3649_v45 = vpop.f32.mrf.mxu1 }
 0x6b2   :  { %v6692_v26 = vadd.f32 %v3649_v45, %v3561_v30  ;;  %3875 = vmatmul.bf16.gmra.mxu0 %v1187_v54  ;;  %v1237_v54 = vpack.c.bf16 %v687_v9, %v662_v19 }
 0x6b7   :  { %v3562_v1 = vpop.f32.mrf.mxu0 }
 0x6b8   :  { %v6696_v21 = vadd.f32 %v3562_v1, %v6577_v39  ;;  %v6702_v39 = vpop.f32.mrf.mxu3 }
 0x6bf   :  { %v3841_v57 = vpop.f32.mrf.mxu0 }
 0x6c0   :  { %v3842_v3 = vadd.f32 %v3841_v57, %v6580_v53  ;;  %v6707_v23 = vpop.f32.mrf.mxu3 }
 0x6c2   :  { %3880 = vmatmul.bf16.gmra.mxu0 %v1212_v13  ;;  %v3921_v12 = vmul.f32 0.5, %v3842_v3 }
 0x6c4   :  { %5452 = vtanh.f32 %v3921_v12 }
 0x6c7   :  { %v3843_v47 = vpop.f32.mrf.mxu0 }
 0x6c8   :  { %v3844_v62 = vadd.f32 %v3843_v47, %v6583_v20  ;;  %v737_v47 = vld [vmem:[#allocation3 + $0x1128] sm:$0xff] }
 0x6ca   :  { %v3922_v63 = vmul.f32 0.5, %v3844_v62  ;;  %v5453_v15 = vpop.eup %5452  ;;  %v6711_v62 = vpop.f32.mrf.mxu2 }
 0x6cb   :  { %v3985_v53 = vmul.f32 0.5, %v5453_v15 }
 0x6cc   :  { %5454 = vtanh.f32 %v3922_v63 }
 0x6cd   :  { %v4017_v1 = vadd.f32 0.5, %v3985_v53 }
 0x6cf   :  { %v3846_v41 = vpop.f32.mrf.mxu0 }
 0x6d0   :  { %v3847_v30 = vadd.f32 %v3846_v41, %v6586_v46  ;;  %v712_v46 = vld [vmem:[#allocation3 + $0x1060] sm:$0xff] }
 0x6d1   :  { %v1262_v19 = vpack.c.bf16 %v737_v47, %v712_v46 }
 0x6d2   :  { %v5455_v45 = vpop.eup %5454  ;;  %3885 = vmatmul.bf16.gmra.mxu0 %v1237_v54  ;;  %v3923_v20 = vmul.f32 0.5, %v3847_v30  ;;  %v6714_v54 = vpop.f32.mrf.mxu3 }
 0x6d3   :  { %v3986_v44 = vmul.f32 0.5, %v5455_v45 }
 0x6d4   :  { %5456 = vtanh.f32 %v3923_v20  ;;  %v6716_v20 = vpop.f32.mrf.mxu2 }
 0x6d5   :  { %v4018_v14 = vadd.f32 0.5, %v3986_v44 }
 0x6d7   :  { %v4049_v13 = vpack.c.bf16 %v4018_v14, %v4017_v1  ;;  %v3848_v57 = vpop.f32.mrf.mxu0 }
 0x6d8   :  { %v3849_v3 = vadd.f32 %v3848_v57, %v6589_v17 }
 0x6d9   :  { %5307 = vmatmul.msk.bf16.vlgmr.msra.gmra.mxu1 %vm4083_vm0, %v4049_v13 }
 0x6da   :  { %v3924_v12 = vmul.f32 0.5, %v3849_v3  ;;  %v5457_v63 = vpop.eup %5456  ;;  %v762_v3 = vld [vmem:[#allocation3 + $0x11f0] sm:$0xff] }
 0x6db   :  { %v3987_v41 = vmul.f32 0.5, %v5457_v63 }
 0x6dc   :  { %5458 = vtanh.f32 %v3924_v12  ;;  %v787_v12 = vld [vmem:[#allocation3 + $0x12b8] sm:$0xff] }
 0x6dd   :  { %v4019_v45 = vadd.f32 0.5, %v3987_v41  ;;  %v1287_v47 = vpack.c.bf16 %v787_v12, %v762_v3  ;;  %v812_v3 = vld [vmem:[#allocation3 + $0x1380] sm:$0xff]  ;;  %v837_v12 = vld [vmem:[#allocation3 + $0x1448] sm:$0xff] }
 0x6df   :  { %v3851_v9 = vpop.f32.mrf.mxu0 }
 0x6e0   :  { %v3852_v15 = vadd.f32 %v3851_v9, %v6592_v33  ;;  %v6720_v33 = vpop.f32.mrf.mxu3  ;;  %v6723_v9 = vpop.f32.mrf.mxu2 }
 0x6e2   :  { %v5459_v30 = vpop.eup %5458  ;;  %3890 = vmatmul.bf16.gmra.mxu0 %v1262_v19  ;;  %v3925_v17 = vmul.f32 0.5, %v3852_v15 }
 0x6e3   :  { %v3988_v53 = vmul.f32 0.5, %v5459_v30 }
 0x6e4   :  { %5460 = vtanh.f32 %v3925_v17 }
 0x6e5   :  { %v4020_v44 = vadd.f32 0.5, %v3988_v53 }
 0x6e7   :  { %v4050_v1 = vpack.c.bf16 %v4020_v44, %v4019_v45  ;;  %v3853_v14 = vpop.f32.mrf.mxu0 }
 0x6e8   :  { %v3854_v13 = vadd.f32 %v3853_v14, %v6595_v22  ;;  %v6725_v53 = vpop.f32.mrf.mxu3 }
 0x6e9   :  { %5308 = vmatmul.msk.bf16.gmra.mxu1 %vm4083_vm0, %v4050_v1 }
 0x6ea   :  { %v3926_v57 = vmul.f32 0.5, %v3854_v13  ;;  %v5461_v46 = vpop.eup %5460 }
 0x6eb   :  { %v3989_v15 = vmul.f32 0.5, %v5461_v46 }
 0x6ec   :  { %5462 = vtanh.f32 %v3926_v57  ;;  %v6731_v57 = vpop.f32.mrf.mxu2 }
 0x6ed   :  { %v4021_v17 = vadd.f32 0.5, %v3989_v15 }
 0x6ef   :  { %v3856_v63 = vpop.f32.mrf.mxu0 }
 0x6f0   :  { %v3857_v19 = vadd.f32 %v3856_v63, %v6598_v18  ;;  %v3684_v18 = vadd.f32 %v6700_v49, %v6603_v59  ;;  %v1312_v63 = vpack.c.bf16 %v837_v12, %v812_v3  ;;  %v887_v12 = vld [vmem:[#allocation3 + $0x15d8] sm:$0xff] }
 0x6f2   :  { %v5463_v41 = vpop.eup %5462  ;;  %3895 = vmatmul.bf16.gmra.mxu0 %v1287_v47  ;;  %v3927_v22 = vmul.f32 0.5, %v3857_v19  ;;  %v3773_v47 = vadd.f32 %v6702_v39, %v3684_v18  ;;  %v6734_v19 = vpop.f32.mrf.mxu3 }
 0x6f3   :  { %v3990_v30 = vmul.f32 0.5, %v5463_v41 }
 0x6f4   :  { %5464 = vtanh.f32 %v3927_v22 }
 0x6f5   :  { %v4022_v45 = vadd.f32 0.5, %v3990_v30 }
 0x6f7   :  { %v4051_v44 = vpack.c.bf16 %v4022_v45, %v4021_v17  ;;  %v3858_v1 = vpop.f32.mrf.mxu0  ;;  %v6739_v45 = vpop.f32.mrf.mxu2 }
 0x6f8   :  { %v3859_v14 = vadd.f32 %v3858_v1, %v6601_v25  ;;  %v3597_v25 = vadd.f32 %v6608_v60, %v6606_v0  ;;  %v3689_v0 = vadd.f32 %v6711_v62, %v6611_v35 }
 0x6f9   :  { %5309 = vmatmul.msk.bf16.gmra.mxu1 %vm4083_vm0, %v4051_v44 }
 0x6fa   :  { %v3928_v13 = vmul.f32 0.5, %v3859_v14  ;;  %v5465_v46 = vpop.eup %5464  ;;  %v3686_v59 = vadd.f32 %v6705_v31, %v3597_v25  ;;  %v6742_v3 = vpop.f32.mrf.mxu3  ;;  %v862_v31 = vld [vmem:[#allocation3 + $0x1510] sm:$0xff]  ;;  %v3602_v25 = vadd.f32 %v6616_v38, %v6614_v4  ;;  %v3694_v4 = vadd.f32 %v6723_v9, %v6619_v36 }
 0x6fb   :  { %v3991_v30 = vmul.f32 0.5, %v5465_v46 }
 0x6fc   :  { %5466 = vtanh.f32 %v3928_v13  ;;  %v3775_v39 = vadd.f32 %v6707_v23, %v3686_v59  ;;  %v3691_v59 = vadd.f32 %v6716_v20, %v3602_v25  ;;  %v912_v20 = vld [vmem:[#allocation3 + $0x16a0] sm:$0xff] }
 0x6fd   :  { %v4023_v44 = vadd.f32 0.5, %v3991_v30 }
 0x6ff   :  { %v3861_v15 = vpop.f32.mrf.mxu0  ;;  %v6748_v23 = vpop.f32.mrf.mxu2 }
 0x700   :  { %v3862_v41 = vadd.f32 %v3861_v15, %v3773_v47  ;;  %v3778_v47 = vadd.f32 %v6714_v54, %v3689_v0  ;;  %v3780_v54 = vadd.f32 %v6720_v33, %v3691_v59 }
 0x702   :  { %v5467_v22 = vpop.eup %5466  ;;  %3900 = vmatmul.bf16.gmra.mxu0 %v1312_v63  ;;  %v3929_v17 = vmul.f32 0.5, %v3862_v41  ;;  %v1337_v63 = vpack.c.bf16 %v887_v12, %v862_v31  ;;  %v6753_v35 = vpop.f32.mrf.mxu3  ;;  %v3783_v12 = vadd.f32 %v6725_v53, %v3694_v4 }
 0x703   :  { %v3992_v49 = vmul.f32 0.5, %v5467_v22 }
 0x704   :  { %5468 = vtanh.f32 %v3929_v17 }
 0x705   :  { %v4024_v1 = vadd.f32 0.5, %v3992_v49 }
 0x707   :  { %v4052_v14 = vpack.c.bf16 %v4024_v1, %v4023_v44  ;;  %v3863_v18 = vpop.f32.mrf.mxu0 }
 0x708   :  { %v3864_v13 = vadd.f32 %v3863_v18, %v3775_v39  ;;  %v3703_v18 = vpop.f32.mrf.mxu2 }
 0x709   :  { %5310 = vmatmul.msk.bf16.gmra.mxu1 %vm4083_vm0, %v4052_v14 }
 0x70a   :  { %v3930_v60 = vmul.f32 0.5, %v3864_v13  ;;  %v5469_v46 = vpop.eup %5468  ;;  %v937_v13 = vld [vmem:[#allocation3 + $0x1768] sm:$0xff]  ;;  %v3792_v0 = vpop.f32.mrf.mxu3 }
 0x70b   :  { %v3993_v30 = vmul.f32 0.5, %v5469_v46  ;;  %v1362_v33 = vpack.c.bf16 %v937_v13, %v912_v20  ;;  %v3612_v20 = vadd.f32 %v6632_v55, %v6630_v5  ;;  %v3704_v5 = vadd.f32 %v3703_v18, %v6635_v6 }
 0x70c   :  { %5470 = vtanh.f32 %v3930_v60  ;;  %v5426_v60 = vld [vmem:[#allocation12 + $0x8] sm:$0xff] }
 0x70d   :  { %v4025_v17 = vadd.f32 0.5, %v3993_v30 }
 0x70f   :  { %v3866_v15 = vpop.f32.mrf.mxu0 }
 0x710   :  { %v3867_v41 = vadd.f32 %v3866_v15, %v3778_v47  ;;  %v4441_v47 = vsel %vm4083_vm0, %v5426_v60, 0 }
 0x711   :  { %4449 = vmatpush.bf16.xpose.msra.mxu2 %v4441_v47 }
 0x712   :  { %v5471_v22 = vpop.eup %5470  ;;  %3905 = vmatmul.bf16.gmra.mxu0 %v1337_v63  ;;  %v3931_v49 = vmul.f32 0.5, %v3867_v41  ;;  %v3607_v63 = vadd.f32 %v6624_v43, %v6622_v56  ;;  %v3705_v41 = vpop.f32.mrf.mxu2  ;;  %v3699_v56 = vadd.f32 %v6739_v45, %v6627_v10 }
 0x713   :  { %v3994_v62 = vmul.f32 0.5, %v5471_v22 }
 0x714   :  { %5472 = vtanh.f32 %v3931_v49  ;;  %v3696_v9 = vadd.f32 %v6731_v57, %v3607_v63  ;;  %v3794_v49 = vpop.f32.mrf.mxu3  ;;  %v962_v57 = vld [vmem:[#allocation3 + $0x1830] sm:$0xff]  ;;  %v3788_v4 = vadd.f32 %v6742_v3, %v3699_v56 }
 0x715   :  { %v4026_v44 = vadd.f32 0.5, %v3994_v62 }
 0x716   :  { %v3785_v53 = vadd.f32 %v6734_v19, %v3696_v9 }
 0x717   :  { %v4053_v1 = vpack.c.bf16 %v4026_v44, %v4025_v17  ;;  %v3868_v39 = vpop.f32.mrf.mxu0 }
 0x718   :  { %v3869_v14 = vadd.f32 %v3868_v39, %v3780_v54 }
 0x719   :  { %5311 = vmatmul.msk.bf16.gmra.mxu1 %vm4083_vm0, %v4053_v1  ;;  %v987_v1 = vld [vmem:[#allocation3 + $0x18f8] sm:$0xff] }
 0x71a   :  { %v3932_v38 = vmul.f32 0.5, %v3869_v14  ;;  %v5473_v31 = vpop.eup %5472  ;;  %v3708_v39 = vpop.f32.mrf.mxu2 }
 0x71b   :  { %v3995_v25 = vmul.f32 0.5, %v5473_v31 }
 0x71c   :  { %5474 = vtanh.f32 %v3932_v38  ;;  %v1387_v38 = vpack.c.bf16 %v987_v1, %v962_v57  ;;  %v3797_v60 = vpop.f32.mrf.mxu3 }
 0x71d   :  { %v4027_v59 = vadd.f32 0.5, %v3995_v25 }
 0x71f   :  { %v3871_v46 = vpop.f32.mrf.mxu0 }
 0x720   :  { %v3872_v15 = vadd.f32 %v3871_v46, %v3783_v12 }
 0x722   :  { %v5475_v36 = vpop.eup %5474  ;;  %3910 = vmatmul.bf16.gmra.mxu0 %v1362_v33  ;;  %v3933_v22 = vmul.f32 0.5, %v3872_v15  ;;  %v3701_v33 = vadd.f32 %v6748_v23, %v3612_v20  ;;  %v3710_v15 = vpop.f32.mrf.mxu2 }
 0x723   :  { %v3996_v30 = vmul.f32 0.5, %v5475_v36 }
 0x724   :  { %5476 = vtanh.f32 %v3933_v22  ;;  %v3790_v63 = vadd.f32 %v6753_v35, %v3701_v33  ;;  %v3799_v9 = vpop.f32.mrf.mxu3 }
 0x725   :  { %v4028_v62 = vadd.f32 0.5, %v3996_v30  ;;  %v3793_v30 = vadd.f32 %v3792_v0, %v3704_v5 }
 0x727   :  { %v4054_v17 = vpack.c.bf16 %v4028_v62, %v4027_v59  ;;  %v3873_v44 = vpop.f32.mrf.mxu0  ;;  %v3617_v59 = vadd.f32 %v6640_v7, %v6638_v11  ;;  %v3709_v7 = vadd.f32 %v3708_v39, %v6643_v32 }
 0x728   :  { %v3874_v54 = vadd.f32 %v3873_v44, %v3785_v53 }
 0x729   :  { %5312 = vmatmul.msk.bf16.gmra.mxu1 %vm4083_vm0, %v4054_v17  ;;  %v3706_v44 = vadd.f32 %v3705_v41, %v3617_v59  ;;  %v3798_v20 = vadd.f32 %v3797_v60, %v3709_v7 }
 0x72a   :  { %v3934_v43 = vmul.f32 0.5, %v3874_v54  ;;  %v5477_v14 = vpop.eup %5476  ;;  %v3713_v35 = vpop.f32.mrf.mxu2 }
 0x72b   :  { %v3997_v31 = vmul.f32 0.5, %v5477_v14  ;;  %v3795_v6 = vadd.f32 %v3794_v49, %v3706_v44 }
 0x72c   :  { %5478 = vtanh.f32 %v3934_v43  ;;  %v3802_v43 = vpop.f32.mrf.mxu3 }
 0x72d   :  { %v4029_v46 = vadd.f32 0.5, %v3997_v31 }
 0x72f   :  { %v3876_v19 = vpop.f32.mrf.mxu0 }
 0x730   :  { %v3877_v13 = vadd.f32 %v3876_v19, %v3788_v4  ;;  %v5425_v4 = vld [vmem:[#allocation12] sm:$0xff] }
 0x731   :  { %v4438_v11 = vsel %vm4083_vm0, %v5425_v4, 0 }
 0x732   :  { %v5479_v12 = vpop.eup %5478  ;;  %3915 = vmatmul.bf16.gmra.mxu0 %v1387_v38  ;;  %v3935_v45 = vmul.f32 0.5, %v3877_v13  ;;  %4450 = vmatpush.bf16.xpose.msra.mxu2 %v4438_v11  ;;  %v3715_v41 = vpop.f32.mrf.mxu2 }
 0x733   :  { %v3998_v10 = vmul.f32 0.5, %v5479_v12  ;;  %v6780_v13 = vpop.f32.mrf.mxu1  ;;  %v3622_v12 = vadd.f32 %v6648_v52, %v6646_v2  ;;  %v3714_v52 = vadd.f32 %v3713_v35, %v6651_v40 }
 0x734   :  { %5480 = vtanh.f32 %v3935_v45  ;;  %v3804_v49 = vpop.f32.mrf.mxu3 }
 0x735   :  { %v4030_v47 = vadd.f32 0.5, %v3998_v10 }
 0x737   :  { %v4055_v3 = vpack.c.bf16 %v4030_v47, %v4029_v46  ;;  %v3878_v25 = vpop.f32.mrf.mxu0  ;;  %v3711_v46 = vadd.f32 %v3710_v15, %v3622_v12 }
 0x738   :  { %v3879_v36 = vadd.f32 %v3878_v25, %v3790_v63  ;;  %v6784_v63 = vld [vmem:[#allocation11] ss:$0 sm:$0xff] }
 0x739   :  { %5313 = vmatmul.msk.bf16.gmra.mxu1 %vm4083_vm0, %v4055_v3 }
 0x73a   :  { %v3936_v55 = vmul.f32 0.5, %v3879_v36  ;;  %v5481_v23 = vpop.eup %5480  ;;  %v3718_v39 = vpop.f32.mrf.mxu2  ;;  %v3800_v36 = vadd.f32 %v3799_v9, %v3711_v46 }
 0x73b   :  { %v3999_v53 = vmul.f32 0.5, %v5481_v23 }
 0x73c   :  { %5482 = vtanh.f32 %v3936_v55  ;;  %v3807_v2 = vpop.f32.mrf.mxu3 }
 0x73d   :  { %v4031_v57 = vadd.f32 0.5, %v3999_v53 }
 0x73f   :  { %v3881_v22 = vpop.f32.mrf.mxu0 }
 0x740   :  { %v3882_v62 = vadd.f32 %v3881_v22, %v3793_v30 }
 0x742   :  { %v5483_v17 = vpop.eup %5482  ;;  %v3937_v56 = vmul.f32 0.5, %v3882_v62  ;;  %v3803_v62 = vadd.f32 %v3802_v43, %v3714_v52 }
 0x743   :  { %v4000_v54 = vmul.f32 0.5, %v5483_v17  ;;  %v3720_v17 = vpop.f32.mrf.mxu2 }
 0x744   :  { %5484 = vtanh.f32 %v3937_v56  ;;  %v3809_v40 = vpop.f32.mrf.mxu3 }
 0x745   :  { %v4032_v1 = vadd.f32 0.5, %v4000_v54  ;;  %v3627_v54 = vadd.f32 %v6656_v27, %v6654_v29 }
 0x747   :  { %v4056_v18 = vpack.c.bf16 %v4032_v1, %v4031_v57  ;;  %v3883_v14 = vpop.f32.mrf.mxu0 }
 0x748   :  { %v3884_v0 = vadd.f32 %v3883_v14, %v3795_v6 }
 0x749   :  { %5314 = vmatmul.msk.bf16.gmra.mxu1 %vm4083_vm0, %v4056_v18  ;;  %v3716_v18 = vadd.f32 %v3715_v41, %v3627_v54  ;;  %v3719_v41 = vadd.f32 %v3718_v39, %v6659_v48 }
 0x74a   :  { %v3938_v38 = vmul.f32 0.5, %v3884_v0  ;;  %v5485_v19 = vpop.eup %5484 }
 0x74b   :  { %v4001_v10 = vmul.f32 0.5, %v5485_v19  ;;  %v3805_v11 = vadd.f32 %v3804_v49, %v3716_v18  ;;  %v3723_v12 = vpop.f32.mrf.mxu2 }
 0x74c   :  { %5486 = vtanh.f32 %v3938_v38  ;;  %v3812_v49 = vpop.f32.mrf.mxu3 }
 0x74d   :  { %v4033_v3 = vadd.f32 0.5, %v4001_v10 }
 0x74f   :  { %v3886_v31 = vpop.f32.mrf.mxu0 }
 0x750   :  { %v3887_v33 = vadd.f32 %v3886_v31, %v3798_v20 }
 0x752   :  { %v5487_v45 = vpop.eup %5486  ;;  %v3939_v32 = vmul.f32 0.5, %v3887_v33 }
 0x753   :  { %v4002_v47 = vmul.f32 0.5, %v5487_v45 }
 0x754   :  { %5488 = vtanh.f32 %v3939_v32  ;;  %v3814_v54 = vpop.f32.mrf.mxu3 }
 0x755   :  { %v4034_v25 = vadd.f32 0.5, %v4002_v47 }
 0x756   :  { %v4147_v60 = vpop.f32.mrf.mxu1 }
 0x757   :  { %v4057_v5 = vpack.c.bf16 %v4034_v25, %v4033_v3  ;;  %v4148_v55 = vadd.f32 %v6784_v63, %v4147_v60  ;;  %v3888_v23 = vpop.f32.mrf.mxu0  ;;  %v3808_v3 = vadd.f32 %v3807_v2, %v3719_v41 }
 0x758   :  { %v3889_v30 = vadd.f32 %v3888_v23, %v3800_v36 }
 0x759   :  { %5315 = vmatmul.msk.bf16.gmra.mxu1 %vm4083_vm0, %v4057_v5  ;;  %v4227_v22 = vmul.f32 0.5, %v4148_v55  ;;  %v3632_v55 = vadd.f32 %v6664_v24, %v6662_v34 }
 0x75a   :  { %v3940_v15 = vmul.f32 0.5, %v3889_v30  ;;  %v5489_v59 = vpop.eup %5488 }
 0x75b   :  { %v4003_v57 = vmul.f32 0.5, %v5489_v59  ;;  %v3721_v52 = vadd.f32 %v3720_v17, %v3632_v55  ;;  %v3724_v17 = vadd.f32 %v3723_v12, %v6668_v37 }
 0x75c   :  { %5490 = vtanh.f32 %v3940_v15  ;;  %v3725_v15 = vpop.f32.mrf.mxu2  ;;  %v3817_v37 = vpop.f32.mrf.mxu3 }
 0x75d   :  { %5492 = vtanh.f32 %v4227_v22  ;;  %v4035_v43 = vadd.f32 0.5, %v4003_v57 }
 0x75e   :  { %v4149_v53 = vpop.f32.mrf.mxu1 }
 0x75f   :  { %v4150_v9 = vadd.f32 %v6784_v63, %v4149_v53  ;;  %v3891_v44 = vpop.f32.mrf.mxu0 }
 0x760   :  { %v3892_v56 = vadd.f32 %v3891_v44, %v3803_v62 }
 0x761   :  { %v4228_v1 = vmul.f32 0.5, %v4150_v9  ;;  %v3810_v9 = vadd.f32 %v3809_v40, %v3721_v52 }
 0x762   :  { %v5491_v6 = vpop.eup %5490  ;;  %v3941_v14 = vmul.f32 0.5, %v3892_v56 }
 0x763   :  { %v4004_v35 = vmul.f32 0.5, %v5491_v6  ;;  %5494 = vtanh.f32 %v4228_v1  ;;  %v5493_v4 = vpop.eup %5492 }
 0x764   :  { %v4291_v31 = vmul.f32 0.5, %v5493_v4  ;;  %5496 = vtanh.f32 %v3941_v14  ;;  %v3728_v40 = vpop.f32.mrf.mxu2 }
 0x765   :  { %v4036_v0 = vadd.f32 0.5, %v4004_v35 }
 0x766   :  { %v4152_v7 = vpop.f32.mrf.mxu1  ;;  %v4323_v46 = vadd.f32 0.5, %v4291_v31  ;;  %v3637_v31 = vadd.f32 %v6673_v28, %v6671_v61 }
 0x767   :  { %v4058_v38 = vpack.c.bf16 %v4036_v0, %v4035_v43  ;;  %v4153_v19 = vadd.f32 %v6784_v63, %v4152_v7  ;;  %v3893_v20 = vpop.f32.mrf.mxu0 }
 0x768   :  { %v3894_v29 = vadd.f32 %v3893_v20, %v3805_v11  ;;  %v3813_v11 = vadd.f32 %v3812_v49, %v3724_v17 }
 0x769   :  { %v5495_v27 = vpop.eup %5494  ;;  %5316 = vmatmul.msk.bf16.gmra.mxu1 %vm4083_vm0, %v4058_v38  ;;  %v4229_v45 = vmul.f32 0.5, %v4153_v19 }
 0x76a   :  { %v4292_v33 = vmul.f32 0.5, %v5495_v27  ;;  %v3942_v10 = vmul.f32 0.5, %v3894_v29  ;;  %v5497_v32 = vpop.eup %5496 }
 0x76b   :  { %v4005_v48 = vmul.f32 0.5, %v5497_v32 }
 0x76c   :  { %v4324_v47 = vadd.f32 0.5, %v4292_v33  ;;  %5498 = vtanh.f32 %v3942_v10  ;;  %v3726_v33 = vadd.f32 %v3725_v15, %v3637_v31 }
 0x76d   :  { %5500 = vtanh.f32 %v4229_v45  ;;  %v4037_v62 = vadd.f32 0.5, %v4005_v48 }
 0x76e   :  { %v4355_v25 = vpack.c.bf16 %v4324_v47, %v4323_v46  ;;  %v4154_v36 = vpop.f32.mrf.mxu1  ;;  %v3815_v32 = vadd.f32 %v3814_v54, %v3726_v33  ;;  %v3642_v54 = vadd.f32 %v6681_v42, %v6679_v51 }
 0x76f   :  { %v4155_v60 = vadd.f32 %v6784_v63, %v4154_v36  ;;  %v3896_v5 = vpop.f32.mrf.mxu0 }
 0x770   :  { %v3897_v23 = vadd.f32 %v3896_v5, %v3808_v3  ;;  %5331 = vmatmul.msk.bf16.vlgmr.msra.gmra.mxu2 %vm4083_vm0, %v4355_v25  ;;  %v3730_v25 = vpop.f32.mrf.mxu2 }
 0x771   :  { %v4230_v39 = vmul.f32 0.5, %v4155_v60 }
 0x772   :  { %v5499_v30 = vpop.eup %5498  ;;  %v3943_v2 = vmul.f32 0.5, %v3897_v23  ;;  %v3729_v23 = vadd.f32 %v3728_v40, %v6676_v50 }
 0x773   :  { %v4006_v22 = vmul.f32 0.5, %v5499_v30  ;;  %5502 = vtanh.f32 %v4230_v39  ;;  %v5501_v59 = vpop.eup %5500  ;;  %v3819_v30 = vpop.f32.mrf.mxu3 }
 0x774   :  { %v4293_v57 = vmul.f32 0.5, %v5501_v59  ;;  %5504 = vtanh.f32 %v3943_v2  ;;  %v3818_v59 = vadd.f32 %v3817_v37, %v3729_v23 }
 0x775   :  { %v4038_v53 = vadd.f32 0.5, %v4006_v22 }
 0x776   :  { %v4157_v44 = vpop.f32.mrf.mxu1  ;;  %v4325_v4 = vadd.f32 0.5, %v4293_v57 }
 0x777   :  { %v4059_v56 = vpack.c.bf16 %v4038_v53, %v4037_v62  ;;  %v4158_v34 = vadd.f32 %v6784_v63, %v4157_v44  ;;  %v3898_v24 = vpop.f32.mrf.mxu0 }
 0x778   :  { %v3899_v1 = vadd.f32 %v3898_v24, %v3810_v9  ;;  %v3733_v50 = vpop.f32.mrf.mxu2 }
 0x779   :  { %v5503_v6 = vpop.eup %5502  ;;  %5317 = vmatmul.msk.bf16.gmra.mxu1 %vm4083_vm0, %v4059_v56  ;;  %v4231_v14 = vmul.f32 0.5, %v4158_v34 }
 0x77a   :  { %v4294_v18 = vmul.f32 0.5, %v5503_v6  ;;  %v3944_v35 = vmul.f32 0.5, %v3899_v1  ;;  %v5505_v0 = vpop.eup %5504  ;;  %v3731_v1 = vadd.f32 %v3730_v25, %v3642_v54 }
 0x77b   :  { %v4007_v27 = vmul.f32 0.5, %v5505_v0 }
 0x77c   :  { %v4326_v43 = vadd.f32 0.5, %v4294_v18  ;;  %5506 = vtanh.f32 %v3944_v35  ;;  %v3822_v35 = vpop.f32.mrf.mxu3 }
 0x77d   :  { %5508 = vtanh.f32 %v4231_v14  ;;  %v4039_v47 = vadd.f32 0.5, %v4007_v27 }
 0x77e   :  { %v4356_v7 = vpack.c.bf16 %v4326_v43, %v4325_v4  ;;  %v4159_v38 = vpop.f32.mrf.mxu1  ;;  %v3820_v43 = vadd.f32 %v3819_v30, %v3731_v1 }
 0x77f   :  { %v4160_v19 = vadd.f32 %v6784_v63, %v4159_v38  ;;  %v3901_v20 = vpop.f32.mrf.mxu0 }
 0x780   :  { %v3902_v29 = vadd.f32 %v3901_v20, %v3813_v11  ;;  %5332 = vmatmul.msk.bf16.gmra.mxu2 %vm4083_vm0, %v4356_v7 }
 0x781   :  { %v4232_v12 = vmul.f32 0.5, %v4160_v19  ;;  %v3734_v19 = vadd.f32 %v3733_v50, %v6684_v8 }
 0x782   :  { %v5507_v41 = vpop.eup %5506  ;;  %v3945_v45 = vmul.f32 0.5, %v3902_v29  ;;  %v3735_v29 = vpop.f32.mrf.mxu2 }
 0x783   :  { %v4008_v10 = vmul.f32 0.5, %v5507_v41  ;;  %5510 = vtanh.f32 %v4232_v12  ;;  %v5509_v46 = vpop.eup %5508  ;;  %v3823_v33 = vadd.f32 %v3822_v35, %v3734_v19 }
 0x784   :  { %v4295_v60 = vmul.f32 0.5, %v5509_v46  ;;  %5512 = vtanh.f32 %v3945_v45  ;;  %v3824_v46 = vpop.f32.mrf.mxu3 }
 0x785   :  { %v4040_v49 = vadd.f32 0.5, %v4008_v10 }
 0x786   :  { %v4162_v3 = vpop.f32.mrf.mxu1  ;;  %v4327_v15 = vadd.f32 0.5, %v4295_v60 }
 0x787   :  { %v4060_v36 = vpack.c.bf16 %v4040_v49, %v4039_v47  ;;  %v4163_v61 = vadd.f32 %v6784_v63, %v4162_v3  ;;  %v3903_v28 = vpop.f32.mrf.mxu0 }
 0x788   :  { %v3904_v5 = vadd.f32 %v3903_v28, %v3815_v32  ;;  %v3647_v32 = vadd.f32 %v6689_v16, %v6687_v58 }
 0x789   :  { %v5511_v55 = vpop.eup %5510  ;;  %5318 = vmatmul.msk.bf16.gmra.mxu1 %vm4083_vm0, %v4060_v36  ;;  %v4233_v52 = vmul.f32 0.5, %v4163_v61 }
 0x78a   :  { %v4296_v48 = vmul.f32 0.5, %v5511_v55  ;;  %v3946_v39 = vmul.f32 0.5, %v3904_v5  ;;  %v5513_v2 = vpop.eup %5512  ;;  %v3736_v61 = vadd.f32 %v3735_v29, %v3647_v32  ;;  %v3738_v55 = vpop.f32.mrf.mxu2 }
 0x78b   :  { %v4009_v34 = vmul.f32 0.5, %v5513_v2 }
 0x78c   :  { %v4328_v22 = vadd.f32 0.5, %v4296_v48  ;;  %5514 = vtanh.f32 %v3946_v39  ;;  %v3825_v39 = vadd.f32 %v3824_v46, %v3736_v61 }
 0x78d   :  { %5516 = vtanh.f32 %v4233_v52  ;;  %v4041_v14 = vadd.f32 0.5, %v4009_v34 }
 0x78e   :  { %v4357_v62 = vpack.c.bf16 %v4328_v22, %v4327_v15  ;;  %v4164_v53 = vpop.f32.mrf.mxu1 }
 0x78f   :  { %v4165_v9 = vadd.f32 %v6784_v63, %v4164_v53  ;;  %v3906_v44 = vpop.f32.mrf.mxu0 }
 0x790   :  { %v3907_v56 = vadd.f32 %v3906_v44, %v3818_v59  ;;  %5333 = vmatmul.msk.bf16.gmra.mxu2 %vm4083_vm0, %v4357_v62  ;;  %v3827_v59 = vpop.f32.mrf.mxu3  ;;  %v3739_v62 = vadd.f32 %v3738_v55, %v6692_v26 }
 0x791   :  { %v4234_v24 = vmul.f32 0.5, %v4165_v9 }
 0x792   :  { %v5515_v57 = vpop.eup %5514  ;;  %v3947_v17 = vmul.f32 0.5, %v3907_v56  ;;  %v3828_v34 = vadd.f32 %v3827_v59, %v3739_v62  ;;  %v3740_v1 = vpop.f32.mrf.mxu2 }
 0x793   :  { %v4010_v6 = vmul.f32 0.5, %v5515_v57  ;;  %5518 = vtanh.f32 %v4234_v24  ;;  %v5517_v18 = vpop.eup %5516 }
 0x794   :  { %v4297_v11 = vmul.f32 0.5, %v5517_v18  ;;  %5520 = vtanh.f32 %v3947_v17  ;;  %v3652_v18 = vadd.f32 %v6780_v13, %v6696_v21 }
 0x795   :  { %v4042_v4 = vadd.f32 0.5, %v4010_v6 }
 0x796   :  { %v4167_v40 = vpop.f32.mrf.mxu1  ;;  %v4329_v27 = vadd.f32 0.5, %v4297_v11 }
 0x797   :  { %v4061_v0 = vpack.c.bf16 %v4042_v4, %v4041_v14  ;;  %v4168_v51 = vadd.f32 %v6784_v63, %v4167_v40  ;;  %v3908_v42 = vpop.f32.mrf.mxu0 }
 0x798   :  { %v3909_v7 = vadd.f32 %v3908_v42, %v3820_v43  ;;  %v3741_v43 = vadd.f32 %v3740_v1, %v3652_v18  ;;  %v3829_v40 = vpop.f32.mrf.mxu3 }
 0x799   :  { %v5519_v38 = vpop.eup %5518  ;;  %5319 = vmatmul.msk.bf16.gmra.mxu1 %vm4083_vm0, %v4061_v0  ;;  %v4235_v37 = vmul.f32 0.5, %v4168_v51 }
 0x79a   :  { %v4298_v20 = vmul.f32 0.5, %v5519_v38  ;;  %v3948_v31 = vmul.f32 0.5, %v3909_v7  ;;  %v5521_v41 = vpop.eup %5520  ;;  %v3830_v38 = vadd.f32 %v3829_v40, %v3741_v43 }
 0x79b   :  { %v4011_v3 = vmul.f32 0.5, %v5521_v41 }
 0x79c   :  { %v4330_v12 = vadd.f32 0.5, %v4298_v20  ;;  %5522 = vtanh.f32 %v3948_v31 }
 0x79d   :  { %5524 = vtanh.f32 %v4235_v37  ;;  %v4043_v23 = vadd.f32 0.5, %v4011_v3 }
 0x79e   :  { %v4358_v10 = vpack.c.bf16 %v4330_v12, %v4329_v27  ;;  %v4169_v45 = vpop.f32.mrf.mxu1 }
 0x79f   :  { %v4170_v47 = vadd.f32 %v6784_v63, %v4169_v45  ;;  %v3911_v49 = vpop.f32.mrf.mxu0 }
 0x7a0   :  { %v3912_v8 = vadd.f32 %v3911_v49, %v3823_v33  ;;  %5334 = vmatmul.msk.bf16.gmra.mxu2 %vm4083_vm0, %v4358_v10  ;;  %v5428_v49 = vld [vmem:[#allocation15 + $0x8] sm:$0xff] }
 0x7a1   :  { %v4236_v25 = vmul.f32 0.5, %v4170_v47 }
 0x7a2   :  { %v5523_v36 = vpop.eup %5522  ;;  %v3949_v60 = vmul.f32 0.5, %v3912_v8  ;;  %v4746_v8 = vsel %vm4083_vm0, %v5428_v49, 0 }
 0x7a3   :  { %v4012_v28 = vmul.f32 0.5, %v5523_v36  ;;  %5526 = vtanh.f32 %v4236_v25  ;;  %v5525_v5 = vpop.eup %5524  ;;  %4754 = vmatpush.bf16.xpose.msra.mxu3 %v4746_v8 }
 0x7a4   :  { %v4299_v16 = vmul.f32 0.5, %v5525_v5  ;;  %5528 = vtanh.f32 %v3949_v60 }
 0x7a5   :  { %v4044_v48 = vadd.f32 0.5, %v4012_v28 }
 0x7a6   :  { %v4172_v30 = vpop.f32.mrf.mxu1  ;;  %v4331_v54 = vadd.f32 0.5, %v4299_v16 }
 0x7a7   :  { %v4062_v52 = vpack.c.bf16 %v4044_v48, %v4043_v23  ;;  %v4173_v15 = vadd.f32 %v6784_v63, %v4172_v30  ;;  %v3913_v58 = vpop.f32.mrf.mxu0 }
 0x7a8   :  { %v3914_v22 = vadd.f32 %v3913_v58, %v3825_v39 }
 0x7a9   :  { %v5527_v2 = vpop.eup %5526  ;;  %5320 = vmatmul.msk.bf16.gmra.mxu1 %vm4083_vm0, %v4062_v52  ;;  %v4237_v44 = vmul.f32 0.5, %v4173_v15 }
 0x7aa   :  { %v4300_v53 = vmul.f32 0.5, %v5527_v2  ;;  %v3950_v9 = vmul.f32 0.5, %v3914_v22  ;;  %v5529_v50 = vpop.eup %5528 }
 0x7ab   :  { %v4013_v26 = vmul.f32 0.5, %v5529_v50 }
 0x7ac   :  { %v4332_v56 = vadd.f32 0.5, %v4300_v53  ;;  %5530 = vtanh.f32 %v3950_v9 }
 0x7ad   :  { %5532 = vtanh.f32 %v4237_v44  ;;  %v4045_v11 = vadd.f32 0.5, %v4013_v26 }
 0x7ae   :  { %v4359_v24 = vpack.c.bf16 %v4332_v56, %v4331_v54  ;;  %v4174_v57 = vpop.f32.mrf.mxu1 }
 0x7af   :  { %v4175_v6 = vadd.f32 %v6784_v63, %v4174_v57  ;;  %v3916_v17 = vpop.f32.mrf.mxu0 }
 0x7b0   :  { %v3917_v35 = vadd.f32 %v3916_v17, %v3828_v34  ;;  %5335 = vmatmul.msk.bf16.gmra.mxu2 %vm4083_vm0, %v4359_v24 }
 0x7b1   :  { %v4238_v14 = vmul.f32 0.5, %v4175_v6 }
 0x7b2   :  { %v5531_v4 = vpop.eup %5530  ;;  %v3951_v51 = vmul.f32 0.5, %v3917_v35  ;;  %v5427_v35 = vld [vmem:[#allocation15] sm:$0xff] }
 0x7b3   :  { %v4014_v0 = vmul.f32 0.5, %v5531_v4  ;;  %5534 = vtanh.f32 %v4238_v14  ;;  %v5533_v42 = vpop.eup %5532  ;;  %v4743_v4 = vsel %vm4083_vm0, %v5427_v35, 0 }
 0x7b4   :  { %v4301_v13 = vmul.f32 0.5, %v5533_v42  ;;  %5536 = vtanh.f32 %v3951_v51  ;;  %4755 = vmatpush.bf16.xpose.msra.mxu3 %v4743_v4 }
 0x7b5   :  { %v4046_v7 = vadd.f32 0.5, %v4014_v0 }
 0x7b6   :  { %v4177_v19 = vpop.f32.mrf.mxu1  ;;  %v4333_v33 = vadd.f32 0.5, %v4301_v13 }
 0x7b7   :  { %v4063_v20 = vpack.c.bf16 %v4046_v7, %v4045_v11  ;;  %v4178_v31 = vadd.f32 %v6784_v63, %v4177_v19  ;;  %v3918_v21 = vpop.f32.mrf.mxu0 }
 0x7b8   :  { %v3919_v29 = vadd.f32 %v3918_v21, %v3830_v38 }
 0x7b9   :  { %v5535_v37 = vpop.eup %5534  ;;  %5321 = vmatmul.msk.bf16.gmra.mxu1 %vm4083_vm0, %v4063_v20  ;;  %v4239_v41 = vmul.f32 0.5, %v4178_v31  ;;  %v6843_v31 = vld [vmem:[#allocation14] ss:$0 sm:$0xff] }
 0x7ba   :  { %v4302_v27 = vmul.f32 0.5, %v5535_v37  ;;  %v3952_v12 = vmul.f32 0.5, %v3919_v29  ;;  %v5537_v45 = vpop.eup %5536 }
 0x7bb   :  { %v4015_v3 = vmul.f32 0.5, %v5537_v45 }
 0x7bc   :  { %v4334_v10 = vadd.f32 0.5, %v4302_v27  ;;  %5538 = vtanh.f32 %v3952_v12 }
 0x7bd   :  { %5540 = vtanh.f32 %v4239_v41  ;;  %v4047_v60 = vadd.f32 0.5, %v4015_v3 }
 0x7be   :  { %v4360_v46 = vpack.c.bf16 %v4334_v10, %v4333_v33  ;;  %v4179_v47 = vpop.f32.mrf.mxu1 }
 0x7bf   :  { %v4180_v32 = vadd.f32 %v6784_v63, %v4179_v47 }
 0x7c0   :  { %5336 = vmatmul.msk.bf16.gmra.mxu2 %vm4083_vm0, %v4360_v46 }
 0x7c1   :  { %v4240_v25 = vmul.f32 0.5, %v4180_v32 }
 0x7c2   :  { %v5539_v36 = vpop.eup %5538 }
 0x7c3   :  { %v4016_v61 = vmul.f32 0.5, %v5539_v36  ;;  %5542 = vtanh.f32 %v4240_v25  ;;  %v5541_v28 = vpop.eup %5540 }
 0x7c4   :  { %v4303_v39 = vmul.f32 0.5, %v5541_v28 }
 0x7c5   :  { %v4048_v5 = vadd.f32 0.5, %v4016_v61 }
 0x7c6   :  { %v4182_v55 = vpop.f32.mrf.mxu1  ;;  %v4335_v58 = vadd.f32 0.5, %v4303_v39 }
 0x7c7   :  { %v4064_v23 = vpack.c.bf16 %v4048_v5, %v4047_v60  ;;  %v4183_v48 = vadd.f32 %v6784_v63, %v4182_v55 }
 0x7c9   :  { %v5543_v30 = vpop.eup %5542  ;;  %5322 = vmatmul.msk.bf16.gmra.mxu1 %vm4083_vm0, %v4064_v23  ;;  %v4241_v15 = vmul.f32 0.5, %v4183_v48 }
 0x7ca   :  { %v4304_v52 = vmul.f32 0.5, %v5543_v30 }
 0x7cb   :  { %5544 = vtanh.f32 %v4241_v15 }
 0x7cc   :  { %v4336_v16 = vadd.f32 0.5, %v4304_v52 }
 0x7ce   :  { %v4361_v22 = vpack.c.bf16 %v4336_v16, %v4335_v58  ;;  %v4184_v2 = vpop.f32.mrf.mxu1 }
 0x7cf   :  { %v4185_v59 = vadd.f32 %v6784_v63, %v4184_v2 }
 0x7d0   :  { %5337 = vmatmul.msk.bf16.gmra.mxu2 %vm4083_vm0, %v4361_v22 }
 0x7d1   :  { %v4242_v62 = vmul.f32 0.5, %v4185_v59  ;;  %v5545_v53 = vpop.eup %5544 }
 0x7d2   :  { %v4305_v54 = vmul.f32 0.5, %v5545_v53 }
 0x7d3   :  { %5546 = vtanh.f32 %v4242_v62 }
 0x7d4   :  { %v4337_v24 = vadd.f32 0.5, %v4305_v54 }
 0x7d6   :  { %v4187_v9 = vpop.f32.mrf.mxu1 }
 0x7d7   :  { %v4188_v44 = vadd.f32 %v6784_v63, %v4187_v9 }
 0x7d9   :  { %v5547_v56 = vpop.eup %5546  ;;  %v4243_v34 = vmul.f32 0.5, %v4188_v44 }
 0x7da   :  { %v4306_v50 = vmul.f32 0.5, %v5547_v56 }
 0x7db   :  { %5548 = vtanh.f32 %v4243_v34 }
 0x7dc   :  { %v4338_v57 = vadd.f32 0.5, %v4306_v50 }
 0x7de   :  { %v4362_v1 = vpack.c.bf16 %v4338_v57, %v4337_v24  ;;  %v4189_v6 = vpop.f32.mrf.mxu1 }
 0x7df   :  { %v4190_v17 = vadd.f32 %v6784_v63, %v4189_v6 }
 0x7e0   :  { %5338 = vmatmul.msk.bf16.gmra.mxu2 %vm4083_vm0, %v4362_v1 }
 0x7e1   :  { %v4244_v18 = vmul.f32 0.5, %v4190_v17  ;;  %v5549_v26 = vpop.eup %5548 }
 0x7e2   :  { %v4307_v40 = vmul.f32 0.5, %v5549_v26 }
 0x7e3   :  { %5550 = vtanh.f32 %v4244_v18 }
 0x7e4   :  { %v4339_v11 = vadd.f32 0.5, %v4307_v40 }
 0x7e6   :  { %v4192_v14 = vpop.f32.mrf.mxu1 }
 0x7e7   :  { %v4193_v43 = vadd.f32 %v6784_v63, %v4192_v14 }
 0x7e9   :  { %v5551_v0 = vpop.eup %5550  ;;  %v4245_v42 = vmul.f32 0.5, %v4193_v43 }
 0x7ea   :  { %v4308_v51 = vmul.f32 0.5, %v5551_v0 }
 0x7eb   :  { %5552 = vtanh.f32 %v4245_v42 }
 0x7ec   :  { %v4340_v7 = vadd.f32 0.5, %v4308_v51 }
 0x7ee   :  { %v4363_v38 = vpack.c.bf16 %v4340_v7, %v4339_v11  ;;  %v4194_v19 = vpop.f32.mrf.mxu1 }
 0x7ef   :  { %v4195_v20 = vadd.f32 %v6784_v63, %v4194_v19 }
 0x7f0   :  { %5339 = vmatmul.msk.bf16.gmra.mxu2 %vm4083_vm0, %v4363_v38 }
 0x7f1   :  { %v4246_v21 = vmul.f32 0.5, %v4195_v20  ;;  %v5553_v37 = vpop.eup %5552 }
 0x7f2   :  { %v4309_v41 = vmul.f32 0.5, %v5553_v37 }
 0x7f3   :  { %5554 = vtanh.f32 %v4246_v21  ;;  %v4452_v13 = vpop.f32.mrf.mxu2 }
 0x7f4   :  { %v4453_v29 = vadd.f32 %v6843_v31, %v4452_v13  ;;  %v4341_v49 = vadd.f32 0.5, %v4309_v41 }
 0x7f6   :  { %v4197_v27 = vpop.f32.mrf.mxu1  ;;  %v4532_v33 = vmul.f32 0.5, %v4453_v29 }
 0x7f7   :  { %v4198_v12 = vadd.f32 %v6784_v63, %v4197_v27 }
 0x7f8   :  { %5556 = vtanh.f32 %v4532_v33 }
 0x7f9   :  { %v5555_v10 = vpop.eup %5554  ;;  %v4247_v46 = vmul.f32 0.5, %v4198_v12 }
 0x7fa   :  { %v4310_v45 = vmul.f32 0.5, %v5555_v10 }
 0x7fb   :  { %v4454_v47 = vpop.f32.mrf.mxu2  ;;  %5558 = vtanh.f32 %v4247_v46 }
 0x7fc   :  { %v4342_v32 = vadd.f32 0.5, %v4310_v45  ;;  %v4455_v8 = vadd.f32 %v6843_v31, %v4454_v47 }
 0x7fe   :  { %v4364_v3 = vpack.c.bf16 %v4342_v32, %v4341_v49  ;;  %v4533_v25 = vmul.f32 0.5, %v4455_v8  ;;  %v4199_v36 = vpop.f32.mrf.mxu1  ;;  %v5557_v60 = vpop.eup %5556 }
 0x7ff   :  { %v4200_v61 = vadd.f32 %v6784_v63, %v4199_v36  ;;  %v4596_v48 = vmul.f32 0.5, %v5557_v60 }
 0x800   :  { %5560 = vtanh.f32 %v4533_v25  ;;  %5340 = vmatmul.msk.bf16.gmra.mxu2 %vm4083_vm0, %v4364_v3 }
 0x801   :  { %v4248_v28 = vmul.f32 0.5, %v4200_v61  ;;  %v5559_v23 = vpop.eup %5558  ;;  %v4628_v2 = vadd.f32 0.5, %v4596_v48 }
 0x802   :  { %v4311_v58 = vmul.f32 0.5, %v5559_v23 }
 0x803   :  { %5562 = vtanh.f32 %v4248_v28  ;;  %v4457_v5 = vpop.f32.mrf.mxu2 }
 0x804   :  { %v4458_v55 = vadd.f32 %v6843_v31, %v4457_v5  ;;  %v4343_v54 = vadd.f32 0.5, %v4311_v58 }
 0x806   :  { %v5561_v39 = vpop.eup %5560  ;;  %v4202_v30 = vpop.f32.mrf.mxu1  ;;  %v4534_v16 = vmul.f32 0.5, %v4458_v55 }
 0x807   :  { %v4597_v52 = vmul.f32 0.5, %v5561_v39  ;;  %v4203_v15 = vadd.f32 %v6784_v63, %v4202_v30 }
 0x808   :  { %5564 = vtanh.f32 %v4534_v16 }
 0x809   :  { %v5563_v22 = vpop.eup %5562  ;;  %v4629_v59 = vadd.f32 0.5, %v4597_v52  ;;  %v4249_v9 = vmul.f32 0.5, %v4203_v15 }
 0x80a   :  { %v4312_v62 = vmul.f32 0.5, %v5563_v22 }
 0x80b   :  { %v4660_v53 = vpack.c.bf16 %v4629_v59, %v4628_v2  ;;  %v4459_v44 = vpop.f32.mrf.mxu2  ;;  %5566 = vtanh.f32 %v4249_v9 }
 0x80c   :  { %v4344_v56 = vadd.f32 0.5, %v4312_v62  ;;  %v4460_v50 = vadd.f32 %v6843_v31, %v4459_v44 }
 0x80d   :  { %5355 = vmatmul.msk.bf16.vlgmr.msra.gmra.mxu3 %vm4083_vm0, %v4660_v53 }
 0x80e   :  { %v4365_v34 = vpack.c.bf16 %v4344_v56, %v4343_v54  ;;  %v4535_v24 = vmul.f32 0.5, %v4460_v50  ;;  %v4204_v57 = vpop.f32.mrf.mxu1  ;;  %v5565_v17 = vpop.eup %5564 }
 0x80f   :  { %v4205_v1 = vadd.f32 %v6784_v63, %v4204_v57  ;;  %v4598_v14 = vmul.f32 0.5, %v5565_v17 }
 0x810   :  { %5568 = vtanh.f32 %v4535_v24  ;;  %5341 = vmatmul.msk.bf16.gmra.mxu2 %vm4083_vm0, %v4365_v34 }
 0x811   :  { %v4250_v6 = vmul.f32 0.5, %v4205_v1  ;;  %v5567_v26 = vpop.eup %5566  ;;  %v4630_v7 = vadd.f32 0.5, %v4598_v14 }
 0x812   :  { %v4313_v51 = vmul.f32 0.5, %v5567_v26 }
 0x813   :  { %5570 = vtanh.f32 %v4250_v6  ;;  %v4462_v18 = vpop.f32.mrf.mxu2 }
 0x814   :  { %v4463_v35 = vadd.f32 %v6843_v31, %v4462_v18  ;;  %v4345_v29 = vadd.f32 0.5, %v4313_v51 }
 0x816   :  { %v5569_v4 = vpop.eup %5568  ;;  %v4207_v43 = vpop.f32.mrf.mxu1  ;;  %v4536_v42 = vmul.f32 0.5, %v4463_v35 }
 0x817   :  { %v4599_v40 = vmul.f32 0.5, %v5569_v4  ;;  %v4208_v0 = vadd.f32 %v6784_v63, %v4207_v43 }
 0x818   :  { %5572 = vtanh.f32 %v4536_v42 }
 0x819   :  { %v5571_v11 = vpop.eup %5570  ;;  %v4631_v38 = vadd.f32 0.5, %v4599_v40  ;;  %v4251_v21 = vmul.f32 0.5, %v4208_v0 }
 0x81a   :  { %v4314_v19 = vmul.f32 0.5, %v5571_v11 }
 0x81b   :  { %v4661_v20 = vpack.c.bf16 %v4631_v38, %v4630_v7  ;;  %v4464_v13 = vpop.f32.mrf.mxu2  ;;  %5574 = vtanh.f32 %v4251_v21 }
 0x81c   :  { %v4346_v37 = vadd.f32 0.5, %v4314_v19  ;;  %v4465_v27 = vadd.f32 %v6843_v31, %v4464_v13 }
 0x81d   :  { %5356 = vmatmul.msk.bf16.gmra.mxu3 %vm4083_vm0, %v4661_v20 }
 0x81e   :  { %v4366_v12 = vpack.c.bf16 %v4346_v37, %v4345_v29  ;;  %v4537_v41 = vmul.f32 0.5, %v4465_v27  ;;  %v4209_v33 = vpop.f32.mrf.mxu1  ;;  %v5573_v46 = vpop.eup %5572 }
 0x81f   :  { %v4210_v10 = vadd.f32 %v6784_v63, %v4209_v33  ;;  %v4600_v8 = vmul.f32 0.5, %v5573_v46 }
 0x820   :  { %5576 = vtanh.f32 %v4537_v41  ;;  %5342 = vmatmul.msk.bf16.gmra.mxu2 %vm4083_vm0, %v4366_v12 }
 0x821   :  { %v4252_v45 = vmul.f32 0.5, %v4210_v10  ;;  %v5575_v32 = vpop.eup %5574  ;;  %v4632_v55 = vadd.f32 0.5, %v4600_v8 }
 0x822   :  { %v4315_v28 = vmul.f32 0.5, %v5575_v32 }
 0x823   :  { %5578 = vtanh.f32 %v4252_v45  ;;  %v4467_v47 = vpop.f32.mrf.mxu2 }
 0x824   :  { %v4468_v49 = vadd.f32 %v6843_v31, %v4467_v47  ;;  %v4347_v15 = vadd.f32 0.5, %v4315_v28 }
 0x826   :  { %v5577_v3 = vpop.eup %5576  ;;  %v4212_v25 = vpop.f32.mrf.mxu1  ;;  %v4538_v60 = vmul.f32 0.5, %v4468_v49 }
 0x827   :  { %v4601_v36 = vmul.f32 0.5, %v5577_v3  ;;  %v4213_v61 = vadd.f32 %v6784_v63, %v4212_v25 }
 0x828   :  { %5580 = vtanh.f32 %v4538_v60 }
 0x829   :  { %v5579_v5 = vpop.eup %5578  ;;  %v4633_v23 = vadd.f32 0.5, %v4601_v36  ;;  %v4253_v30 = vmul.f32 0.5, %v4213_v61 }
 0x82a   :  { %v4316_v48 = vmul.f32 0.5, %v5579_v5 }
 0x82b   :  { %v4662_v39 = vpack.c.bf16 %v4633_v23, %v4632_v55  ;;  %v4469_v52 = vpop.f32.mrf.mxu2  ;;  %5582 = vtanh.f32 %v4253_v30 }
 0x82c   :  { %v4348_v58 = vadd.f32 0.5, %v4316_v48  ;;  %v4470_v16 = vadd.f32 %v6843_v31, %v4469_v52 }
 0x82d   :  { %5357 = vmatmul.msk.bf16.gmra.mxu3 %vm4083_vm0, %v4662_v39 }
 0x82e   :  { %v4367_v22 = vpack.c.bf16 %v4348_v58, %v4347_v15  ;;  %v4539_v2 = vmul.f32 0.5, %v4470_v16  ;;  %v4214_v59 = vpop.f32.mrf.mxu1  ;;  %v5581_v9 = vpop.eup %5580 }
 0x82f   :  { %v4215_v62 = vadd.f32 %v6784_v63, %v4214_v59  ;;  %v4602_v50 = vmul.f32 0.5, %v5581_v9 }
 0x830   :  { %5584 = vtanh.f32 %v4539_v2  ;;  %5343 = vmatmul.msk.bf16.gmra.mxu2 %vm4083_vm0, %v4367_v22 }
 0x831   :  { %v4254_v53 = vmul.f32 0.5, %v4215_v62  ;;  %v5583_v56 = vpop.eup %5582  ;;  %v4634_v35 = vadd.f32 0.5, %v4602_v50 }
 0x832   :  { %v4317_v6 = vmul.f32 0.5, %v5583_v56 }
 0x833   :  { %5586 = vtanh.f32 %v4254_v53  ;;  %v4472_v44 = vpop.f32.mrf.mxu2 }
 0x834   :  { %v4473_v54 = vadd.f32 %v6843_v31, %v4472_v44  ;;  %v4349_v0 = vadd.f32 0.5, %v4317_v6 }
 0x836   :  { %v5585_v34 = vpop.eup %5584  ;;  %v4217_v24 = vpop.f32.mrf.mxu1  ;;  %v4540_v17 = vmul.f32 0.5, %v4473_v54 }
 0x837   :  { %v4603_v57 = vmul.f32 0.5, %v5585_v34  ;;  %v4218_v1 = vadd.f32 %v6784_v63, %v4217_v24 }
 0x838   :  { %5588 = vtanh.f32 %v4540_v17 }
 0x839   :  { %v5587_v18 = vpop.eup %5586  ;;  %v4635_v26 = vadd.f32 0.5, %v4603_v57  ;;  %v4255_v43 = vmul.f32 0.5, %v4218_v1 }
 0x83a   :  { %v4318_v14 = vmul.f32 0.5, %v5587_v18 }
 0x83b   :  { %v4663_v4 = vpack.c.bf16 %v4635_v26, %v4634_v35  ;;  %v4474_v40 = vpop.f32.mrf.mxu2  ;;  %5590 = vtanh.f32 %v4255_v43 }
 0x83c   :  { %v4350_v51 = vadd.f32 0.5, %v4318_v14  ;;  %v4475_v42 = vadd.f32 %v6843_v31, %v4474_v40 }
 0x83d   :  { %5358 = vmatmul.msk.bf16.gmra.mxu3 %vm4083_vm0, %v4663_v4 }
 0x83e   :  { %v4368_v11 = vpack.c.bf16 %v4350_v51, %v4349_v0  ;;  %v4541_v7 = vmul.f32 0.5, %v4475_v42  ;;  %v4219_v38 = vpop.f32.mrf.mxu1  ;;  %v5589_v21 = vpop.eup %5588 }
 0x83f   :  { %v4220_v19 = vadd.f32 %v6784_v63, %v4219_v38  ;;  %v4604_v27 = vmul.f32 0.5, %v5589_v21 }
 0x840   :  { %5592 = vtanh.f32 %v4541_v7  ;;  %5344 = vmatmul.msk.bf16.gmra.mxu2 %vm4083_vm0, %v4368_v11 }
 0x841   :  { %v4256_v20 = vmul.f32 0.5, %v4220_v19  ;;  %v5591_v37 = vpop.eup %5590  ;;  %v4636_v49 = vadd.f32 0.5, %v4604_v27 }
 0x842   :  { %v4319_v45 = vmul.f32 0.5, %v5591_v37 }
 0x843   :  { %5594 = vtanh.f32 %v4256_v20  ;;  %v4477_v13 = vpop.f32.mrf.mxu2 }
 0x844   :  { %v4478_v29 = vadd.f32 %v6843_v31, %v4477_v13  ;;  %v4351_v61 = vadd.f32 0.5, %v4319_v45 }
 0x846   :  { %v5593_v12 = vpop.eup %5592  ;;  %v4222_v41 = vpop.f32.mrf.mxu1  ;;  %v4542_v46 = vmul.f32 0.5, %v4478_v29 }
 0x847   :  { %v4605_v33 = vmul.f32 0.5, %v5593_v12  ;;  %v4223_v10 = vadd.f32 %v6784_v63, %v4222_v41 }
 0x848   :  { %5596 = vtanh.f32 %v4542_v46 }
 0x849   :  { %v5595_v47 = vpop.eup %5594  ;;  %v4637_v32 = vadd.f32 0.5, %v4605_v33  ;;  %v4257_v25 = vmul.f32 0.5, %v4223_v10 }
 0x84a   :  { %v4320_v8 = vmul.f32 0.5, %v5595_v47 }
 0x84b   :  { %v4664_v3 = vpack.c.bf16 %v4637_v32, %v4636_v49  ;;  %v4479_v36 = vpop.f32.mrf.mxu2  ;;  %5598 = vtanh.f32 %v4257_v25 }
 0x84c   :  { %v4352_v28 = vadd.f32 0.5, %v4320_v8  ;;  %v4480_v60 = vadd.f32 %v6843_v31, %v4479_v36 }
 0x84d   :  { %5359 = vmatmul.msk.bf16.gmra.mxu3 %vm4083_vm0, %v4664_v3 }
 0x84e   :  { %v4369_v5 = vpack.c.bf16 %v4352_v28, %v4351_v61  ;;  %v4543_v55 = vmul.f32 0.5, %v4480_v60  ;;  %v4224_v23 = vpop.f32.mrf.mxu1  ;;  %v5597_v30 = vpop.eup %5596 }
 0x84f   :  { %v4225_v48 = vadd.f32 %v6784_v63, %v4224_v23  ;;  %v4606_v16 = vmul.f32 0.5, %v5597_v30 }
 0x850   :  { %5600 = vtanh.f32 %v4543_v55  ;;  %5345 = vmatmul.msk.bf16.gmra.mxu2 %vm4083_vm0, %v4369_v5  ;;  %v6893_v5 = vld [vmem:[#allocation17] ss:$0 sm:$0xff] }
 0x851   :  { %v4258_v39 = vmul.f32 0.5, %v4225_v48  ;;  %v5599_v58 = vpop.eup %5598  ;;  %v4638_v9 = vadd.f32 0.5, %v4606_v16 }
 0x852   :  { %v4321_v59 = vmul.f32 0.5, %v5599_v58 }
 0x853   :  { %5602 = vtanh.f32 %v4258_v39  ;;  %v4482_v52 = vpop.f32.mrf.mxu2 }
 0x854   :  { %v4483_v15 = vadd.f32 %v6843_v31, %v4482_v52  ;;  %v4353_v50 = vadd.f32 0.5, %v4321_v59 }
 0x856   :  { %v5601_v22 = vpop.eup %5600  ;;  %v4544_v62 = vmul.f32 0.5, %v4483_v15 }
 0x857   :  { %v4607_v2 = vmul.f32 0.5, %v5601_v22 }
 0x858   :  { %5604 = vtanh.f32 %v4544_v62 }
 0x859   :  { %v5603_v53 = vpop.eup %5602  ;;  %v4639_v44 = vadd.f32 0.5, %v4607_v2 }
 0x85a   :  { %v4322_v54 = vmul.f32 0.5, %v5603_v53 }
 0x85b   :  { %v4665_v63 = vpack.c.bf16 %v4639_v44, %v4638_v9  ;;  %v4484_v56 = vpop.f32.mrf.mxu2 }
 0x85c   :  { %v4354_v34 = vadd.f32 0.5, %v4322_v54  ;;  %v4485_v24 = vadd.f32 %v6843_v31, %v4484_v56 }
 0x85d   :  { %5360 = vmatmul.msk.bf16.gmra.mxu3 %vm4083_vm0, %v4665_v63 }
 0x85e   :  { %v4370_v57 = vpack.c.bf16 %v4354_v34, %v4353_v50  ;;  %v4545_v1 = vmul.f32 0.5, %v4485_v24  ;;  %v5605_v6 = vpop.eup %5604 }
 0x85f   :  { %v4608_v35 = vmul.f32 0.5, %v5605_v6 }
 0x860   :  { %5606 = vtanh.f32 %v4545_v1  ;;  %5346 = vmatmul.msk.bf16.gmra.mxu2 %vm4083_vm0, %v4370_v57 }
 0x861   :  { %v4640_v43 = vadd.f32 0.5, %v4608_v35 }
 0x863   :  { %v4487_v17 = vpop.f32.mrf.mxu2 }
 0x864   :  { %v4488_v18 = vadd.f32 %v6843_v31, %v4487_v17 }
 0x866   :  { %v5607_v26 = vpop.eup %5606  ;;  %v4546_v4 = vmul.f32 0.5, %v4488_v18 }
 0x867   :  { %v4609_v14 = vmul.f32 0.5, %v5607_v26 }
 0x868   :  { %5608 = vtanh.f32 %v4546_v4 }
 0x869   :  { %v4641_v40 = vadd.f32 0.5, %v4609_v14 }
 0x86b   :  { %v4666_v0 = vpack.c.bf16 %v4641_v40, %v4640_v43  ;;  %v4489_v51 = vpop.f32.mrf.mxu2 }
 0x86c   :  { %v4490_v42 = vadd.f32 %v6843_v31, %v4489_v51 }
 0x86d   :  { %5361 = vmatmul.msk.bf16.gmra.mxu3 %vm4083_vm0, %v4666_v0 }
 0x86e   :  { %v4547_v11 = vmul.f32 0.5, %v4490_v42  ;;  %v5609_v7 = vpop.eup %5608 }
 0x86f   :  { %v4610_v20 = vmul.f32 0.5, %v5609_v7 }
 0x870   :  { %5610 = vtanh.f32 %v4547_v11 }
 0x871   :  { %v4642_v37 = vadd.f32 0.5, %v4610_v20 }
 0x873   :  { %v4492_v38 = vpop.f32.mrf.mxu2 }
 0x874   :  { %v4493_v19 = vadd.f32 %v6843_v31, %v4492_v38 }
 0x876   :  { %v5611_v21 = vpop.eup %5610  ;;  %v4548_v29 = vmul.f32 0.5, %v4493_v19 }
 0x877   :  { %v4611_v13 = vmul.f32 0.5, %v5611_v21 }
 0x878   :  { %5612 = vtanh.f32 %v4548_v29 }
 0x879   :  { %v4643_v27 = vadd.f32 0.5, %v4611_v13 }
 0x87b   :  { %v4667_v12 = vpack.c.bf16 %v4643_v27, %v4642_v37  ;;  %v4494_v41 = vpop.f32.mrf.mxu2 }
 0x87c   :  { %v4495_v33 = vadd.f32 %v6843_v31, %v4494_v41 }
 0x87d   :  { %5362 = vmatmul.msk.bf16.gmra.mxu3 %vm4083_vm0, %v4667_v12 }
 0x87e   :  { %v4549_v10 = vmul.f32 0.5, %v4495_v33  ;;  %v5613_v45 = vpop.eup %5612 }
 0x87f   :  { %v4612_v49 = vmul.f32 0.5, %v5613_v45 }
 0x880   :  { %5614 = vtanh.f32 %v4549_v10 }
 0x881   :  { %v4644_v25 = vadd.f32 0.5, %v4612_v49 }
 0x883   :  { %v4497_v46 = vpop.f32.mrf.mxu2 }
 0x884   :  { %v4498_v47 = vadd.f32 %v6843_v31, %v4497_v46 }
 0x886   :  { %v5615_v32 = vpop.eup %5614  ;;  %v4550_v3 = vmul.f32 0.5, %v4498_v47 }
 0x887   :  { %v4613_v8 = vmul.f32 0.5, %v5615_v32 }
 0x888   :  { %5616 = vtanh.f32 %v4550_v3 }
 0x889   :  { %v4645_v36 = vadd.f32 0.5, %v4613_v8 }
 0x88b   :  { %v4668_v61 = vpack.c.bf16 %v4645_v36, %v4644_v25  ;;  %v4499_v28 = vpop.f32.mrf.mxu2 }
 0x88c   :  { %v4500_v60 = vadd.f32 %v6843_v31, %v4499_v28 }
 0x88d   :  { %5363 = vmatmul.msk.bf16.gmra.mxu3 %vm4083_vm0, %v4668_v61 }
 0x88e   :  { %v4551_v55 = vmul.f32 0.5, %v4500_v60  ;;  %v5617_v39 = vpop.eup %5616 }
 0x88f   :  { %v4614_v15 = vmul.f32 0.5, %v5617_v39 }
 0x890   :  { %5618 = vtanh.f32 %v4551_v55  ;;  %v4757_v23 = vpop.f32.mrf.mxu3 }
 0x891   :  { %v4758_v48 = vadd.f32 %v6893_v5, %v4757_v23  ;;  %v4646_v62 = vadd.f32 0.5, %v4614_v15 }
 0x893   :  { %v4502_v30 = vpop.f32.mrf.mxu2  ;;  %v4837_v58 = vmul.f32 0.5, %v4758_v48 }
 0x894   :  { %v4503_v52 = vadd.f32 %v6843_v31, %v4502_v30 }
 0x895   :  { %5620 = vtanh.f32 %v4837_v58 }
 0x896   :  { %v5619_v16 = vpop.eup %5618  ;;  %v4552_v2 = vmul.f32 0.5, %v4503_v52 }
 0x897   :  { %v4615_v22 = vmul.f32 0.5, %v5619_v16 }
 0x898   :  { %v4759_v59 = vpop.f32.mrf.mxu3  ;;  %5622 = vtanh.f32 %v4552_v2 }
 0x899   :  { %v4647_v53 = vadd.f32 0.5, %v4615_v22  ;;  %v4760_v9 = vadd.f32 %v6893_v5, %v4759_v59 }
 0x89b   :  { %v4669_v44 = vpack.c.bf16 %v4647_v53, %v4646_v62  ;;  %v4838_v54 = vmul.f32 0.5, %v4760_v9  ;;  %v4504_v63 = vpop.f32.mrf.mxu2  ;;  %v5621_v34 = vpop.eup %5620 }
 0x89c   :  { %v4505_v56 = vadd.f32 %v6843_v31, %v4504_v63  ;;  %v4901_v6 = vmul.f32 0.5, %v5621_v34 }
 0x89d   :  { %5624 = vtanh.f32 %v4838_v54  ;;  %5364 = vmatmul.msk.bf16.gmra.mxu3 %vm4083_vm0, %v4669_v44 }
 0x89e   :  { %v4553_v50 = vmul.f32 0.5, %v4505_v56  ;;  %v5623_v1 = vpop.eup %5622  ;;  %v6902_v40 = vadd.f32 0.5, %v4901_v6 }
 0x89f   :  { %v4616_v14 = vmul.f32 0.5, %v5623_v1 }
 0x8a0   :  { %5626 = vtanh.f32 %v4553_v50  ;;  %v4762_v24 = vpop.f32.mrf.mxu3 }
 0x8a1   :  { %v4763_v57 = vadd.f32 %v6893_v5, %v4762_v24  ;;  %v4648_v38 = vadd.f32 0.5, %v4616_v14 }
 0x8a3   :  { %v5625_v17 = vpop.eup %5624  ;;  %v4507_v18 = vpop.f32.mrf.mxu2  ;;  %v4839_v4 = vmul.f32 0.5, %v4763_v57 }
 0x8a4   :  { %v4902_v35 = vmul.f32 0.5, %v5625_v17  ;;  %v4508_v26 = vadd.f32 %v6843_v31, %v4507_v18 }
 0x8a5   :  { %5628 = vtanh.f32 %v4839_v4 }
 0x8a6   :  { %v5627_v43 = vpop.eup %5626  ;;  %v6904_v0 = vadd.f32 0.5, %v4902_v35  ;;  %v4554_v42 = vmul.f32 0.5, %v4508_v26 }
 0x8a7   :  { %v4617_v51 = vmul.f32 0.5, %v5627_v43 }
 0x8a8   :  { %v4764_v11 = vpop.f32.mrf.mxu3  ;;  %v4966_v7 = vpack.c.bf16 %v6904_v0, %v6902_v40  ;;  %5630 = vtanh.f32 %v4554_v42 }
 0x8a9   :  { %v4649_v19 = vadd.f32 0.5, %v4617_v51  ;;  %v4765_v20 = vadd.f32 %v6893_v5, %v4764_v11 }
 0x8ab   :  { %v4670_v21 = vpack.c.bf16 %v4649_v19, %v4648_v38  ;;  %v4840_v13 = vmul.f32 0.5, %v4765_v20  ;;  %v4509_v29 = vpop.f32.mrf.mxu2  ;;  %v5629_v12 = vpop.eup %5628 }
 0x8ac   :  { %v4510_v37 = vadd.f32 %v6843_v31, %v4509_v29  ;;  %v4903_v45 = vmul.f32 0.5, %v5629_v12 }
 0x8ad   :  { %5632 = vtanh.f32 %v4840_v13  ;;  %5365 = vmatmul.msk.bf16.gmra.mxu3 %vm4083_vm0, %v4670_v21 }
 0x8ae   :  { %v4555_v27 = vmul.f32 0.5, %v4510_v37  ;;  %v5631_v10 = vpop.eup %5630  ;;  %v6913_v36 = vadd.f32 0.5, %v4903_v45 }
 0x8af   :  { %v4618_v8 = vmul.f32 0.5, %v5631_v10 }
 0x8b0   :  { %5634 = vtanh.f32 %v4555_v27  ;;  %v4767_v41 = vpop.f32.mrf.mxu3 }
 0x8b1   :  { %v4768_v33 = vadd.f32 %v6893_v5, %v4767_v41  ;;  %v4650_v48 = vadd.f32 0.5, %v4618_v8 }
 0x8b3   :  { %v5633_v46 = vpop.eup %5632  ;;  %v4512_v47 = vpop.f32.mrf.mxu2  ;;  %v4841_v3 = vmul.f32 0.5, %v4768_v33 }
 0x8b4   :  { %v4904_v49 = vmul.f32 0.5, %v5633_v46  ;;  %v4513_v32 = vadd.f32 %v6843_v31, %v4512_v47 }
 0x8b5   :  { %5636 = vtanh.f32 %v4841_v3 }
 0x8b6   :  { %v5635_v25 = vpop.eup %5634  ;;  %v6915_v61 = vadd.f32 0.5, %v4904_v49  ;;  %v4556_v60 = vmul.f32 0.5, %v4513_v32 }
 0x8b7   :  { %v4619_v28 = vmul.f32 0.5, %v5635_v25 }
 0x8b8   :  { %v4769_v55 = vpop.f32.mrf.mxu3  ;;  %v4967_v23 = vpack.c.bf16 %v6915_v61, %v6913_v36  ;;  %5638 = vtanh.f32 %v4556_v60 }
 0x8b9   :  { %v4651_v39 = vadd.f32 0.5, %v4619_v28  ;;  %v4770_v30 = vadd.f32 %v6893_v5, %v4769_v55 }
 0x8bb   :  { %v4671_v52 = vpack.c.bf16 %v4651_v39, %v4650_v48  ;;  %v4842_v15 = vmul.f32 0.5, %v4770_v30  ;;  %v4514_v58 = vpop.f32.mrf.mxu2  ;;  %v5637_v2 = vpop.eup %5636 }
 0x8bc   :  { %v4515_v16 = vadd.f32 %v6843_v31, %v4514_v58  ;;  %v4905_v9 = vmul.f32 0.5, %v5637_v2 }
 0x8bd   :  { %5640 = vtanh.f32 %v4842_v15  ;;  %5366 = vmatmul.msk.bf16.gmra.mxu3 %vm4083_vm0, %v4671_v52 }
 0x8be   :  { %v4557_v22 = vmul.f32 0.5, %v4515_v16  ;;  %v5639_v53 = vpop.eup %5638  ;;  %v6924_v57 = vadd.f32 0.5, %v4905_v9 }
 0x8bf   :  { %v4620_v50 = vmul.f32 0.5, %v5639_v53 }
 0x8c0   :  { %5642 = vtanh.f32 %v4557_v22  ;;  %v4772_v59 = vpop.f32.mrf.mxu3 }
 0x8c1   :  { %v4773_v62 = vadd.f32 %v6893_v5, %v4772_v59  ;;  %v4652_v26 = vadd.f32 0.5, %v4620_v50 }
 0x8c3   :  { %v5641_v44 = vpop.eup %5640  ;;  %v4517_v54 = vpop.f32.mrf.mxu2  ;;  %v4843_v34 = vmul.f32 0.5, %v4773_v62 }
 0x8c4   :  { %v4906_v63 = vmul.f32 0.5, %v5641_v44  ;;  %v4518_v56 = vadd.f32 %v6843_v31, %v4517_v54 }
 0x8c5   :  { %5644 = vtanh.f32 %v4843_v34 }
 0x8c6   :  { %v5643_v24 = vpop.eup %5642  ;;  %v6926_v1 = vadd.f32 0.5, %v4906_v63  ;;  %v4558_v17 = vmul.f32 0.5, %v4518_v56 }
 0x8c7   :  { %v4621_v6 = vmul.f32 0.5, %v5643_v24 }
 0x8c8   :  { %v4774_v18 = vpop.f32.mrf.mxu3  ;;  %v4968_v35 = vpack.c.bf16 %v6926_v1, %v6924_v57  ;;  %5646 = vtanh.f32 %v4558_v17  ;;  %v4996_v57 = vsel %vm4083_vm0, %v4967_v23, 0 }
 0x8c9   :  { %v4653_v14 = vadd.f32 0.5, %v4621_v6  ;;  %v4775_v4 = vadd.f32 %v6893_v5, %v4774_v18 }
 0x8cb   :  { %v4672_v43 = vpack.c.bf16 %v4653_v14, %v4652_v26  ;;  %v4844_v51 = vmul.f32 0.5, %v4775_v4  ;;  %v4519_v42 = vpop.f32.mrf.mxu2  ;;  %v5645_v19 = vpop.eup %5644 }
 0x8cc   :  { %v4520_v11 = vadd.f32 %v6843_v31, %v4519_v42  ;;  %v4907_v29 = vmul.f32 0.5, %v5645_v19 }
 0x8cd   :  { %5648 = vtanh.f32 %v4844_v51  ;;  %5367 = vmatmul.msk.bf16.gmra.mxu3 %vm4083_vm0, %v4672_v43 }
 0x8ce   :  { %v4559_v38 = vmul.f32 0.5, %v4520_v11  ;;  %v5647_v13 = vpop.eup %5646  ;;  %v6935_v46 = vadd.f32 0.5, %v4907_v29 }
 0x8cf   :  { %v4622_v33 = vmul.f32 0.5, %v5647_v13 }
 0x8d0   :  { %5650 = vtanh.f32 %v4559_v38  ;;  %v4777_v20 = vpop.f32.mrf.mxu3 }
 0x8d1   :  { %v4778_v21 = vadd.f32 %v6893_v5, %v4777_v20  ;;  %v4654_v25 = vadd.f32 0.5, %v4622_v33 }
 0x8d3   :  { %v5649_v37 = vpop.eup %5648  ;;  %v4522_v27 = vpop.f32.mrf.mxu2  ;;  %v4845_v10 = vmul.f32 0.5, %v4778_v21 }
 0x8d4   :  { %v4908_v12 = vmul.f32 0.5, %v5649_v37  ;;  %v4523_v41 = vadd.f32 %v6843_v31, %v4522_v27 }
 0x8d5   :  { %5652 = vtanh.f32 %v4845_v10 }
 0x8d6   :  { %v5651_v45 = vpop.eup %5650  ;;  %v6937_v47 = vadd.f32 0.5, %v4908_v12  ;;  %v4560_v32 = vmul.f32 0.5, %v4523_v41 }
 0x8d7   :  { %v4623_v49 = vmul.f32 0.5, %v5651_v45 }
 0x8d8   :  { %v4779_v8 = vpop.f32.mrf.mxu3  ;;  %v4969_v3 = vpack.c.bf16 %v6937_v47, %v6935_v46  ;;  %5654 = vtanh.f32 %v4560_v32 }
 0x8d9   :  { %v4655_v28 = vadd.f32 0.5, %v4623_v49  ;;  %v4780_v60 = vadd.f32 %v6893_v5, %v4779_v8 }
 0x8db   :  { %v4673_v55 = vpack.c.bf16 %v4655_v28, %v4654_v25  ;;  %v4846_v48 = vmul.f32 0.5, %v4780_v60  ;;  %v4524_v39 = vpop.f32.mrf.mxu2  ;;  %v5653_v15 = vpop.eup %5652 }
 0x8dc   :  { %v4525_v30 = vadd.f32 %v6843_v31, %v4524_v39  ;;  %v4909_v22 = vmul.f32 0.5, %v5653_v15 }
 0x8dd   :  { %5656 = vtanh.f32 %v4846_v48  ;;  %5368 = vmatmul.msk.bf16.gmra.mxu3 %vm4083_vm0, %v4673_v55 }
 0x8de   :  { %v4561_v52 = vmul.f32 0.5, %v4525_v30  ;;  %v5655_v16 = vpop.eup %5654  ;;  %v6945_v54 = vadd.f32 0.5, %v4909_v22 }
 0x8df   :  { %v4624_v9 = vmul.f32 0.5, %v5655_v16 }
 0x8e0   :  { %5658 = vtanh.f32 %v4561_v52  ;;  %v4782_v58 = vpop.f32.mrf.mxu3 }
 0x8e1   :  { %v4656_v6 = vadd.f32 0.5, %v4624_v9  ;;  %v4783_v25 = vadd.f32 %v6893_v5, %v4782_v58 }
 0x8e3   :  { %v5657_v2 = vpop.eup %5656  ;;  %v4527_v59 = vpop.f32.mrf.mxu2  ;;  %v4847_v52 = vmul.f32 0.5, %v4783_v25 }
 0x8e4   :  { %v4910_v62 = vmul.f32 0.5, %v5657_v2  ;;  %v4528_v53 = vadd.f32 %v6843_v31, %v4527_v59 }
 0x8e6   :  { %v5659_v44 = vpop.eup %5658  ;;  %v6947_v63 = vadd.f32 0.5, %v4910_v62  ;;  %v4562_v50 = vmul.f32 0.5, %v4528_v53 }
 0x8e7   :  { %v4625_v56 = vmul.f32 0.5, %v5659_v44 }
 0x8e8   :  { %v4784_v34 = vpop.f32.mrf.mxu3  ;;  %v4970_v24 = vpack.c.bf16 %v6947_v63, %v6945_v54  ;;  %5660 = vtanh.f32 %v4562_v50  ;;  %v5002_v54 = vsel %vm4083_vm0, %v4969_v3, 0 }
 0x8e9   :  { %v4657_v17 = vadd.f32 0.5, %v4625_v56  ;;  %v4785_v32 = vadd.f32 %v6893_v5, %v4784_v34 }
 0x8eb   :  { %v4674_v18 = vpack.c.bf16 %v4657_v17, %v4656_v6  ;;  %v4529_v26 = vpop.f32.mrf.mxu2  ;;  %v4848_v60 = vmul.f32 0.5, %v4785_v32 }
 0x8ec   :  { %v4530_v14 = vadd.f32 %v6843_v31, %v4529_v26 }
 0x8ed   :  { %5369 = vmatmul.msk.bf16.gmra.mxu3 %vm4083_vm0, %v4674_v18 }
 0x8ee   :  { %v4563_v4 = vmul.f32 0.5, %v4530_v14  ;;  %v5661_v51 = vpop.eup %5660 }
 0x8ef   :  { %v4626_v42 = vmul.f32 0.5, %v5661_v51 }
 0x8f0   :  { %5662 = vtanh.f32 %v4563_v4  ;;  %v4787_v43 = vpop.f32.mrf.mxu3 }
 0x8f1   :  { %v4658_v20 = vadd.f32 0.5, %v4626_v42  ;;  %v4788_v12 = vadd.f32 %v6893_v5, %v4787_v43 }
 0x8f3   :  { %v4849_v45 = vmul.f32 0.5, %v4788_v12 }
 0x8f6   :  { %v5663_v11 = vpop.eup %5662 }
 0x8f7   :  { %v4627_v38 = vmul.f32 0.5, %v5663_v11 }
 0x8f8   :  { %v4789_v19 = vpop.f32.mrf.mxu3 }
 0x8f9   :  { %v4659_v21 = vadd.f32 0.5, %v4627_v38  ;;  %v4790_v31 = vadd.f32 %v6893_v5, %v4789_v19 }
 0x8fb   :  { %v4675_v13 = vpack.c.bf16 %v4659_v21, %v4658_v20  ;;  %v4850_v41 = vmul.f32 0.5, %v4790_v31 }
 0x8fd   :  { %5370 = vmatmul.msk.bf16.gmra.mxu3 %vm4083_vm0, %v4675_v13 }
 0x900   :  { %v4792_v29 = vpop.f32.mrf.mxu3 }
 0x901   :  { %v4793_v37 = vadd.f32 %v6893_v5, %v4792_v29 }
 0x903   :  { %v4851_v27 = vmul.f32 0.5, %v4793_v37 }
 0x905   :  { %5664 = vtanh.f32 %v4851_v27 }
 0x906   :  { %5666 = vtanh.f32 %v4850_v41 }
 0x908   :  { %v4794_v33 = vpop.f32.mrf.mxu3 }
 0x909   :  { %v4795_v10 = vadd.f32 %v6893_v5, %v4794_v33 }
 0x90b   :  { %v4852_v49 = vmul.f32 0.5, %v4795_v10  ;;  %v5665_v8 = vpop.eup %5664 }
 0x90c   :  { %v5667_v48 = vpop.eup %5666  ;;  %v4915_v39 = vmul.f32 0.5, %v5665_v8 }
 0x90d   :  { %5668 = vtanh.f32 %v4852_v49  ;;  %v4914_v2 = vmul.f32 0.5, %v5667_v48 }
 0x90e   :  { %5670 = vtanh.f32 %v4849_v45  ;;  %v4947_v59 = vadd.f32 0.5, %v4915_v39 }
 0x90f   :  { %5672 = vtanh.f32 %v4848_v60  ;;  %v4946_v56 = vadd.f32 0.5, %v4914_v2 }
 0x910   :  { %v4797_v28 = vpop.f32.mrf.mxu3  ;;  %5674 = vtanh.f32 %v4847_v52 }
 0x911   :  { %v4798_v55 = vadd.f32 %v6893_v5, %v4797_v28  ;;  %v5005_v28 = vsel %vm4083_vm0, %v4970_v24, 0 }
 0x913   :  { %v5669_v30 = vpop.eup %5668  ;;  %v4853_v22 = vmul.f32 0.5, %v4798_v55 }
 0x914   :  { %v4916_v15 = vmul.f32 0.5, %v5669_v30  ;;  %v5671_v16 = vpop.eup %5670 }
 0x915   :  { %v4913_v53 = vmul.f32 0.5, %v5671_v16  ;;  %5676 = vtanh.f32 %v4853_v22  ;;  %v5673_v34 = vpop.eup %5672 }
 0x916   :  { %v4948_v62 = vadd.f32 0.5, %v4916_v15  ;;  %v5675_v18 = vpop.eup %5674  ;;  %v4912_v26 = vmul.f32 0.5, %v5673_v34 }
 0x917   :  { %v4945_v17 = vadd.f32 0.5, %v4913_v53  ;;  %v4911_v43 = vmul.f32 0.5, %v5675_v18 }
 0x918   :  { %v4799_v9 = vpop.f32.mrf.mxu3  ;;  %v4973_v58 = vpack.c.bf16 %v4948_v62, %v4947_v59  ;;  %v4944_v11 = vadd.f32 0.5, %v4912_v26  ;;  %v4999_v62 = vsel %vm4083_vm0, %v4968_v35, 0 }
 0x919   :  { %v4800_v44 = vadd.f32 %v6893_v5, %v4799_v9  ;;  %v4972_v14 = vpack.c.bf16 %v4946_v56, %v4945_v17  ;;  %v4943_v21 = vadd.f32 0.5, %v4911_v43  ;;  %v4993_v17 = vsel %vm4083_vm0, %v4966_v7, 0 }
 0x91a   :  { %v5014_v50 = vsel %vm4083_vm0, %v4973_v58, 0 }
 0x91b   :  { %v4854_v6 = vmul.f32 0.5, %v4800_v44  ;;  %5040 = vmatpush.bf16.xpose.msrb.mxu0 %v5014_v50  ;;  %v5677_v4 = vpop.eup %5676  ;;  %v5011_v19 = vsel %vm4083_vm0, %v4972_v14, 0  ;;  %v4971_v27 = vpack.c.bf16 %v4944_v11, %v4943_v21 }
 0x91c   :  { %v4917_v38 = vmul.f32 0.5, %v5677_v4 }
 0x91d   :  { %5678 = vtanh.f32 %v4854_v6  ;;  %v5008_v10 = vsel %vm4083_vm0, %v4971_v27, 0 }
 0x91e   :  { %v6965_v37 = vadd.f32 0.5, %v4917_v38 }
 0x920   :  { %v4802_v51 = vpop.f32.mrf.mxu3 }
 0x921   :  { %v4803_v42 = vadd.f32 %v6893_v5, %v4802_v51 }
 0x923   :  { %v5679_v20 = vpop.eup %5678  ;;  %5041 = vmatpush.bf16.xpose.msrb.mxu0 %v5011_v19  ;;  %v4855_v29 = vmul.f32 0.5, %v4803_v42 }
 0x924   :  { %v4918_v13 = vmul.f32 0.5, %v5679_v20 }
 0x925   :  { %5680 = vtanh.f32 %v4855_v29 }
 0x926   :  { %v6967_v31 = vadd.f32 0.5, %v4918_v13 }
 0x928   :  { %v4804_v12 = vpop.f32.mrf.mxu3  ;;  %v4974_v41 = vpack.c.bf16 %v6967_v31, %v6965_v37 }
 0x929   :  { %v4805_v33 = vadd.f32 %v6893_v5, %v4804_v12 }
 0x92b   :  { %v4856_v45 = vmul.f32 0.5, %v4805_v33  ;;  %5042 = vmatpush.bf16.xpose.msrb.mxu0 %v5008_v10  ;;  %v5681_v49 = vpop.eup %5680 }
 0x92c   :  { %v4919_v25 = vmul.f32 0.5, %v5681_v49 }
 0x92d   :  { %5682 = vtanh.f32 %v4856_v45 }
 0x92e   :  { %v6978_v39 = vadd.f32 0.5, %v4919_v25 }
 0x930   :  { %v4807_v32 = vpop.f32.mrf.mxu3 }
 0x931   :  { %v4808_v8 = vadd.f32 %v6893_v5, %v4807_v32 }
 0x933   :  { %v5683_v60 = vpop.eup %5682  ;;  %5043 = vmatpush.bf16.xpose.msrb.mxu0 %v5005_v28  ;;  %v4857_v48 = vmul.f32 0.5, %v4808_v8 }
 0x934   :  { %v4920_v55 = vmul.f32 0.5, %v5683_v60 }
 0x935   :  { %5684 = vtanh.f32 %v4857_v48 }
 0x936   :  { %v6980_v30 = vadd.f32 0.5, %v4920_v55 }
 0x938   :  { %v4809_v52 = vpop.f32.mrf.mxu3  ;;  %v4975_v15 = vpack.c.bf16 %v6980_v30, %v6978_v39 }
 0x939   :  { %v4810_v16 = vadd.f32 %v6893_v5, %v4809_v52 }
 0x93b   :  { %v4858_v63 = vmul.f32 0.5, %v4810_v16  ;;  %5044 = vmatpush.bf16.xpose.msrb.mxu0 %v5002_v54  ;;  %v5685_v24 = vpop.eup %5684 }
 0x93c   :  { %v4921_v59 = vmul.f32 0.5, %v5685_v24 }
 0x93d   :  { %5686 = vtanh.f32 %v4858_v63 }
 0x93e   :  { %v6994_v46 = vadd.f32 0.5, %v4921_v59 }
 0x940   :  { %v4812_v22 = vpop.f32.mrf.mxu3 }
 0x941   :  { %v4813_v2 = vadd.f32 %v6893_v5, %v4812_v22 }
 0x943   :  { %v5687_v53 = vpop.eup %5686  ;;  %5045 = vmatpush.bf16.xpose.msrb.mxu0 %v4999_v62  ;;  %v4859_v58 = vmul.f32 0.5, %v4813_v2 }
 0x944   :  { %v4922_v9 = vmul.f32 0.5, %v5687_v53 }
 0x945   :  { %5688 = vtanh.f32 %v4859_v58 }
 0x946   :  { %v6996_v47 = vadd.f32 0.5, %v4922_v9 }
 0x948   :  { %v4814_v3 = vpop.f32.mrf.mxu3  ;;  %v4976_v44 = vpack.c.bf16 %v6996_v47, %v6994_v46 }
 0x949   :  { %v4815_v56 = vadd.f32 %v6893_v5, %v4814_v3 }
 0x94b   :  { %v4860_v1 = vmul.f32 0.5, %v4815_v56  ;;  %5046 = vmatpush.bf16.xpose.msrb.mxu0 %v4996_v57  ;;  %v5689_v35 = vpop.eup %5688 }
 0x94c   :  { %v4923_v6 = vmul.f32 0.5, %v5689_v35 }
 0x94d   :  { %5690 = vtanh.f32 %v4860_v1 }
 0x94e   :  { %v7010_v36 = vadd.f32 0.5, %v4923_v6 }
 0x950   :  { %v4817_v50 = vpop.f32.mrf.mxu3 }
 0x951   :  { %v4818_v34 = vadd.f32 %v6893_v5, %v4817_v50 }
 0x953   :  { %v5691_v18 = vpop.eup %5690  ;;  %5047 = vmatpush.bf16.xpose.msrb.mxu0 %v4993_v17  ;;  %v4861_v14 = vmul.f32 0.5, %v4818_v34 }
 0x954   :  { %v4924_v26 = vmul.f32 0.5, %v5691_v18 }
 0x955   :  { %5692 = vtanh.f32 %v4861_v14 }
 0x956   :  { %v7012_v61 = vadd.f32 0.5, %v4924_v26 }
 0x958   :  { %v4819_v23 = vpop.f32.mrf.mxu3  ;;  %v4977_v4 = vpack.c.bf16 %v7012_v61, %v7010_v36  ;;  %v5017_v36 = vsel %vm4083_vm0, %v4974_v41, 0 }
 0x959   :  { %v4820_v43 = vadd.f32 %v6893_v5, %v4819_v23 }
 0x95b   :  { %v4862_v51 = vmul.f32 0.5, %v4820_v43  ;;  %v5693_v40 = vpop.eup %5692  ;;  %v4965_v43 = vld [vmem:[#allocation18] sm:$0x1] }
 0x95c   :  { %v4925_v7 = vmul.f32 0.5, %v5693_v40  ;;  %5371 = vmatmul.msk.bf16.vlgmr.msrb.gmra.mxu0 %vm4083_vm0, %v4965_v43  ;;  %v4982_v40 = vld [vmem:[#allocation2] sm:$0x1] }
 0x95d   :  { %5694 = vtanh.f32 %v4862_v51  ;;  %v5026_v51 = vsel %vm4083_vm0, %v4977_v4, 0 }
 0x95e   :  { %v4957_v38 = vadd.f32 0.5, %v4925_v7  ;;  %v5023_v7 = vsel %vm4083_vm0, %v4976_v44, 0  ;;  %v5072_v44 = vlaneseq }
 0x960   :  { %v4822_v0 = vpop.f32.mrf.mxu3  ;;  %vm5074_vm2 = vcmp.lt.s32.totalorder %v5072_v44, 256 }
 0x961   :  { %v4823_v48 = vadd.f32 %v6893_v5, %v4822_v0  ;;  %v6003_v0 = vmov 0  }
 0x962   :  { %5447 = vset.pattern.permute.xlu0 %v6003_v0 }
 0x963   :  { %v5695_v42 = vpop.eup %5694  ;;  %v4863_v24 = vmul.f32 0.5, %v4823_v48  ;;  %4985 = vperm.xlu0 %5447, %v4982_v40  }
 0x964   :  { %v4926_v11 = vmul.f32 0.5, %v5695_v42  ;;  %v5020_v42 = vsel %vm4083_vm0, %v4975_v15, 0 }
 0x966   :  { %v4958_v19 = vadd.f32 0.5, %v4926_v11 }
 0x968   :  { %v4824_v20 = vpop.f32.mrf.mxu3  ;;  %v4978_v21 = vpack.c.bf16 %v4958_v19, %v4957_v38 }
 0x969   :  { %v4825_v60 = vadd.f32 %v6893_v5, %v4824_v20 }
 0x96a   :  { %v5029_v23 = vsel %vm4083_vm0, %v4978_v21, 0 }
 0x96b   :  { %v4864_v52 = vmul.f32 0.5, %v4825_v60 }
 0x970   :  { %v4827_v13 = vpop.f32.mrf.mxu3 }
 0x971   :  { %v4828_v45 = vadd.f32 %v6893_v5, %v4827_v13 }
 0x973   :  { %v4865_v25 = vmul.f32 0.5, %v4828_v45 }
 0x978   :  { %v4829_v29 = vpop.f32.mrf.mxu3 }
 0x979   :  { %v4830_v33 = vadd.f32 %v6893_v5, %v4829_v29 }
 0x97b   :  { %v4866_v49 = vmul.f32 0.5, %v4830_v33 }
 0x980   :  { %v4832_v27 = vpop.f32.mrf.mxu3 }
 0x981   :  { %v4833_v12 = vadd.f32 %v6893_v5, %v4832_v27 }
 0x983   :  { %v4867_v10 = vmul.f32 0.5, %v4833_v12 }
 0x985   :  { %5696 = vtanh.f32 %v4867_v10 }
 0x986   :  { %5698 = vtanh.f32 %v4866_v49 }
 0x988   :  { %v4834_v32 = vpop.f32.mrf.mxu3 }
 0x989   :  { %v4835_v8 = vadd.f32 %v6893_v5, %v4834_v32 }
 0x98b   :  { %v4868_v28 = vmul.f32 0.5, %v4835_v8  ;;  %v5697_v55 = vpop.eup %5696 }
 0x98c   :  { %v5699_v16 = vpop.eup %5698  ;;  %v4931_v54 = vmul.f32 0.5, %v5697_v55 }
 0x98d   :  { %5700 = vtanh.f32 %v4868_v28  ;;  %v4930_v59 = vmul.f32 0.5, %v5699_v16 }
 0x98e   :  { %5702 = vtanh.f32 %v4865_v25  ;;  %v4963_v62 = vadd.f32 0.5, %v4931_v54 }
 0x98f   :  { %5704 = vtanh.f32 %v4864_v52  ;;  %v4962_v3 = vadd.f32 0.5, %v4930_v59 }
 0x990   :  { %5706 = vtanh.f32 %v4863_v24 }
 0x993   :  { %v5701_v63 = vpop.eup %5700 }
 0x994   :  { %v4932_v22 = vmul.f32 0.5, %v5701_v63  ;;  %v5703_v2 = vpop.eup %5702 }
 0x995   :  { %v4929_v9 = vmul.f32 0.5, %v5703_v2  ;;  %v5705_v57 = vpop.eup %5704 }
 0x996   :  { %v4964_v53 = vadd.f32 0.5, %v4932_v22  ;;  %v5707_v1 = vpop.eup %5706  ;;  %v4928_v35 = vmul.f32 0.5, %v5705_v57 }
 0x997   :  { %v4961_v5 = vadd.f32 0.5, %v4929_v9  ;;  %v4927_v34 = vmul.f32 0.5, %v5707_v1 }
 0x998   :  { %v4981_v58 = vpack.c.bf16 %v4964_v53, %v4963_v62  ;;  %v4960_v6 = vadd.f32 0.5, %v4928_v35 }
 0x999   :  { %v4980_v50 = vpack.c.bf16 %v4962_v3, %v4961_v5  ;;  %v4959_v18 = vadd.f32 0.5, %v4927_v34 }
 0x99a   :  { %v5038_v56 = vsel %vm4083_vm0, %v4981_v58, 0 }
 0x99b   :  { %5053 = vmatpush.bf16.xpose.msrb.mxu1 %v5038_v56  ;;  %v5035_v17 = vsel %vm4083_vm0, %v4980_v50, 0  ;;  %v4979_v26 = vpack.c.bf16 %v4960_v6, %v4959_v18 }
 0x99d   :  { %v5032_v14 = vsel %vm4083_vm0, %v4979_v26, 0 }
 0x9a3   :  { %5054 = vmatpush.bf16.xpose.msrb.mxu1 %v5035_v17 }
 0x9ab   :  { %5055 = vmatpush.bf16.xpose.msrb.mxu1 %v5032_v14 }
 0x9b3   :  { %5056 = vmatpush.bf16.xpose.msrb.mxu1 %v5029_v23 }
 0x9bb   :  { %5057 = vmatpush.bf16.xpose.msrb.mxu1 %v5026_v51 }
 0x9c3   :  { %5058 = vmatpush.bf16.xpose.msrb.mxu1 %v5023_v7 }
 0x9cb   :  { %5059 = vmatpush.bf16.xpose.msrb.mxu1 %v5020_v42 }
 0x9d3   :  { %5060 = vmatpush.bf16.xpose.msrb.mxu1 %v5017_v36 }
 0x9d5   :  { %v4986_v46 = vpop.permute.xlu0 %4985 }
 0x9d6   :  { %v4988_v47 = vperm.slane %v4986_v46, 0 }
 0x9d9   :  { %v5049_v61 = vpop.f32.mrf.mxu0 }
 0x9da   :  { %5372 = vmatmul.msk.bf16.vlgmr.msrb.gmra.mxu1 %vm4083_vm0, %v4965_v43  ;;  %v5050_v37 = vadd.f32 %v5049_v61, %v4988_v47 }
 0x9e1   :  { %v5051_v4 = vpop.f32.mrf.mxu0 }
 0xa57   :  { %v5062_v11 = vpop.f32.mrf.mxu1 }
 0xa58   :  { %v5063_v38 = vadd.f32 %v5062_v11, %v4988_v47 }
 0xa5a   :  { %v5068_v31 = vrot.slane %v5063_v38, 7 }
 0xa5c   :  { %v5070_v41 = vsel %vm5069_vm1, %v5050_v37, %v5068_v31 }
 0xa5d   :  { %5076 = vst.msk [vmem:[#allocation20] sm:$0x3] %vm5074_vm2, %v5070_v41 }
 0xa5e   :  { %5087 = dma.vmem_to_hbm [thread:$0]  %s5083_s9, 32, %s5085_s10, [#allocation5]  }
 0xa5f   :  { %v5064_v39 = vpop.f32.mrf.mxu1 }
 0xa60   :  { %5985 = dma.done.wait [#allocation5], 32  }
 0xa61   :  { %5986 = vsyncadd [#allocation5], 4294967264 }
 0xa62   :  { %5092 = vsyncpa [#allocation4], 1 }
 0xa63   :  { %5093 = vsyncpa [#allocation7], 1 }
 0xa64   :  { %5094 = vsyncpa [#allocation10], 1 }
 0xa65   :  { %5095 = vsyncpa [#allocation13], 1 }
 0xa66   :  { %5096 = vsyncpa [#allocation16], 1 }
 0xa67   :  { %5097 = vsyncpa [#allocation19], 1 }
 0xa68   :  { %5098 = vsyncpa [#allocation5], 1 }

</bundles_post_ra>
